<compile_context>
chip_gen: v7x
topology: tpu7x:2x2x1
jax: 0.10.0
libtpu: 0.0.40
codegen_flags: <defaults>
</compile_context>

<pallas_src>
import math

import jax
import jax.numpy as jnp
from jax import lax
from jax.experimental import pallas as pl
from jax.experimental.pallas import tpu as pltpu

EPS = 1e-5
GROUPS = 32


def _round_up(x, m):
    return ((x + m - 1) // m) * m


def _pick_vmem_limit(footprint_bytes):
    """Per-generation VMEM limit: real footprint + headroom, capped at 3/4 of
    physical per-core VMEM (conservative default = v7x's 64 MiB)."""
    cap = 64 * 1024 * 1024
    try:
        cap = int(pltpu.get_tpu_info().vmem_capacity_bytes)
    except Exception:
        pass
    want = max(2 * int(footprint_bytes), 16 * 1024 * 1024)
    return int(min(want, (cap * 3) // 4))


def _interp_matrix(n_in, n_out):
    # align_corners=True bilinear interpolation matrix (n_out, n_in)
    if n_in == 1:
        return jnp.ones((n_out, 1), jnp.float32)
    src = jnp.arange(n_out, dtype=jnp.float32) * (n_in - 1) / (n_out - 1)
    i0 = jnp.clip(jnp.floor(src).astype(jnp.int32), 0, n_in - 2)
    frac = src - i0.astype(jnp.float32)
    rows = jnp.arange(n_out)
    m = jnp.zeros((n_out, n_in), jnp.float32)
    m = m.at[rows, i0].add(1.0 - frac)
    m = m.at[rows, i0 + 1].add(frac)
    return m


def _height_taps(H, Ho):
    """Trace-time (i0, frac) pairs for the align_corners=True height pass."""
    taps = []
    for ho in range(Ho):
        if H == 1:
            taps.append((0, 0.0))
            continue
        src = ho * (H - 1) / (Ho - 1)
        i0 = min(int(math.floor(src)), H - 2)
        taps.append((i0, src - i0))
    return taps


# ----------------------------------------------------------------------------
# Fused kernel: all Conv3x3GNReLU(+x2 upsample) layers, one sample / grid step.
# Flat per-sample pixel layout (H*W, C): channels on lanes, pixels on sublanes.
# ----------------------------------------------------------------------------
def make_fused_kernel(layers, eps):
    n_layers = len(layers)
    n_param_refs = sum(5 if l["upsample"] else 4 for l in layers)
    htaps = [_height_taps(l["H"], l["Ho"]) if l["upsample"] else None
             for l in layers]

    def kernel(*refs):
        x_ref = refs[0]
        param_refs = refs[1:1 + n_param_refs]
        o_ref = refs[1 + n_param_refs]
        pad_refs = refs[2 + n_param_refs:]

        # Zero pad bands (every step — see header comment re: megacore).
        for lyr, pr in zip(layers, pad_refs):
            L, P, Cin = lyr["L"], lyr["H"] * lyr["W"], lyr["Cin"]
            zband = jnp.zeros((L, Cin), jnp.float32)
            pr[0:L, :] = zband
            pr[L + P:L + P + L, :] = zband

        # First layer input (bf16 from HBM) into the first padded buffer.
        L0 = layers[0]["L"]
        P0 = layers[0]["H"] * layers[0]["W"]
        pad_refs[0][L0:L0 + P0, :] = x_ref[...].astype(jnp.float32)

        pi = 0
        for li, lyr in enumerate(layers):
            H, W, Cin, Cout = lyr["H"], lyr["W"], lyr["Cin"], lyr["Cout"]
            Ho, Wo, up, L = lyr["Ho"], lyr["Wo"], lyr["upsample"], lyr["L"]
            P = H * W
            wk_ref, mg_ref, gamma_ref, beta_ref = param_refs[pi:pi + 4]
            pi += 4
            uw_ref = None
            if up:
                uw_ref = param_refs[pi]
                pi += 1
            pad = pad_refs[li]

            # Horizontal-validity masks: (P, 1), broadcast by jnp.where.
            col = lax.broadcasted_iota(jnp.int32, (P, 1), 0) % W
            m_left = col >= 1            # kx == 0 taps valid
            m_right = col <= W - 2       # kx == 2 taps valid

            # 3x3 conv: 3 matmuls with contraction depth 3*Cin (im2col over kx).
            acc = jnp.zeros((P, Cout), jnp.float32)
            for ky in range(3):
                base = L + (ky - 1) * W
                t0 = jnp.where(m_left, pad[base - 1:base - 1 + P, :], 0.0)
                t1 = pad[base:base + P, :]
                t2 = jnp.where(m_right, pad[base + 1:base + 1 + P, :], 0.0)
                op = jnp.concatenate([t0, t1, t2], axis=1).astype(jnp.bfloat16)
                acc = acc + jnp.dot(op, wk_ref[ky],
                                    preferred_element_type=jnp.float32)

            # GroupNorm(32, Cout): two-pass (centered) f32 statistics; group
            # averaging is a tiny (1, Cout) x (Cout, Cout) matmul.
            s = jnp.sum(acc, axis=0, keepdims=True)                  # (1, Cout)
            mean = jnp.dot(s, mg_ref[...],
                           preferred_element_type=jnp.float32,
                           precision=lax.Precision.HIGHEST)
            d = acc - mean
            ssd = jnp.sum(d * d, axis=0, keepdims=True)              # (1, Cout)
            var = jnp.dot(ssd, mg_ref[...],
                          preferred_element_type=jnp.float32,
                          precision=lax.Precision.HIGHEST)
            inv = lax.rsqrt(var + eps)
            y = jnp.maximum(d * (inv * gamma_ref[...]) + beta_ref[...], 0.0)

            # Destination: final output ref, or the next layer's padded buffer.
            last = (li == n_layers - 1)
            if last:
                dst, off, dt = o_ref, 0, o_ref.dtype
            else:
                dst, off, dt = pad_refs[li + 1], layers[li + 1]["L"], jnp.float32

            if not up:
                dst[off:off + P, :] = y.astype(dt)
                continue

            # Bilinear x2, align_corners=True.
            # Width pass: per-source-row (Wo, W) x (W, Cout) bf16 matmul,
            # memoised in output-row order so only a rolling pair of rows is
            # live (i0 is non-decreasing in ho).
            uw = uw_ref[...]                                         # (Wo, W)
            zcache = {}

            def zrow(h, _uw=uw, _y=y, _zc=zcache, _W=W):
                if h not in _zc:
                    row = _y[h * _W:(h + 1) * _W, :].astype(jnp.bfloat16)
                    _zc[h] = jnp.dot(_uw, row,
                                     preferred_element_type=jnp.float32)
                return _zc[h]

            # Height pass: VPU blend with trace-time coefficients, contiguous
            # (Wo, Cout) stores.
            for ho in range(Ho):
                i0, f = htaps[li][ho]
                if f == 0.0:
                    blk = zrow(i0)
                else:
                    blk = (1.0 - f) * zrow(i0) + f * zrow(i0 + 1)
                dst[off + ho * Wo:off + (ho + 1) * Wo, :] = blk.astype(dt)

    return kernel


# ----------------------------------------------------------------------------
# Parameter init, one-time packing, forward wrapper
# ----------------------------------------------------------------------------
def init_segmentation_block(key, in_channels, out_channels, n_upsamples):
    specs = [(in_channels, out_channels, bool(n_upsamples))]
    if n_upsamples > 1:
        for _ in range(1, n_upsamples):
            specs.append((out_channels, out_channels, True))
    params = []
    for i, (ci, co, up) in enumerate(specs):
        kw, kg, kb = jax.random.split(jax.random.fold_in(key, i), 3)
        w = jax.random.normal(kw, (co, ci, 3, 3), jnp.float32) / (3.0 * (ci ** 0.5))
        gamma = 1.0 + 0.1 * jax.random.normal(kg, (co,), jnp.float32)
        beta = 0.1 * jax.random.normal(kb, (co,), jnp.float32)
        params.append({"w": w, "gamma": gamma, "beta": beta, "upsample": up})
    return params


def prepare_segmentation_block(params, H, W):
    """One-time packing of per-layer constants (all KB-sized) + static info."""
    packed = []
    h, w = H, W
    for p in params:
        Cout, Cin = p["w"].shape[0], p["w"].shape[1]
        assert Cout % GROUPS == 0
        cpg = Cout // GROUPS
        up = p["upsample"]
        ho, wo = (2 * h, 2 * w) if up else (h, w)
        L = _round_up(w + 1, 8)            # zero-pad band length (pixels)
        # Per-ky (3*Cin, Cout) bf16 weight slabs, rows ordered kx-major then
        # cin, matching the in-kernel concat([t_kx0, t_kx1, t_kx2], axis=1).
        wk = jnp.transpose(p["w"], (2, 3, 1, 0)).reshape(3, 3 * Cin, Cout)
        ch = jnp.arange(Cout)
        mg = (((ch[:, None] // cpg) == (ch[None, :] // cpg)).astype(jnp.float32)
              / float(h * w * cpg))                                  # (Cout, Cout)
        packed.append({
            "H": h, "W": w, "Ho": ho, "Wo": wo, "L": L, "Ppad": h * w + 2 * L,
            "Cin": Cin, "Cout": Cout, "upsample": up,
            "wk": wk.astype(jnp.bfloat16),
            "mg": mg,
            "gamma": p["gamma"].astype(jnp.float32).reshape(1, Cout),
            "beta": p["beta"].astype(jnp.float32).reshape(1, Cout),
            # TODO(synk): keep uw in f32 if tolerances ever need tightening.
            "uw": _interp_matrix(w, wo).astype(jnp.bfloat16) if up else None,
        })
        h, w = ho, wo
    return packed


def segmentation_block_forward(x_nchw, packed):
    """Run the whole SegmentationBlock in one fused pallas_call per batch."""
    N, C, H, W = x_nchw.shape
    first, last = packed[0], packed[-1]
    assert (C, H, W) == (first["Cin"], first["H"], first["W"])
    P0 = H * W
    Pout = last["Ho"] * last["Wo"]
    Cout = last["Cout"]

    # Flat per-sample pixel layout (H*W, C); feed bf16 (conv operands are bf16
    # anyway) to halve the HBM read of the input.
    x = jnp.transpose(x_nchw, (0, 2, 3, 1)).reshape(N, P0, C).astype(jnp.bfloat16)

    args = [x]
    in_specs = [pl.BlockSpec((None, P0, C), lambda n: (n, 0, 0))]
    const_bytes = 0
    for lp in packed:
        args += [lp["wk"], lp["mg"], lp["gamma"], lp["beta"]]
        in_specs += [
            pl.BlockSpec(lp["wk"].shape, lambda n: (0, 0, 0)),
            pl.BlockSpec(lp["mg"].shape, lambda n: (0, 0)),
            pl.BlockSpec(lp["gamma"].shape, lambda n: (0, 0)),
            pl.BlockSpec(lp["beta"].shape, lambda n: (0, 0)),
        ]
        const_bytes += (lp["wk"].size * 2 + lp["mg"].size * 4 +
                        lp["gamma"].size * 4 + lp["beta"].size * 4)
        if lp["upsample"]:
            args.append(lp["uw"])
            in_specs.append(pl.BlockSpec(lp["uw"].shape, lambda n: (0, 0)))
            const_bytes += lp["uw"].size * 2

    scratch = [pltpu.VMEM((lp["Ppad"], lp["Cin"]), jnp.float32) for lp in packed]
    scratch_bytes = sum(lp["Ppad"] * lp["Cin"] * 4 for lp in packed)
    live_bytes = max(
        lp["H"] * lp["W"] * (3 * lp["Cin"] * 2 + 4 * lp["Cout"] * 4)
        + 2 * lp["Wo"] * lp["Cout"] * 4
        for lp in packed)
    footprint = (2 * P0 * C * 2 + 2 * Pout * Cout * 4
                 + 2 * const_bytes + scratch_bytes + live_bytes)

    out = pl.pallas_call(
        make_fused_kernel(packed, EPS),
        out_shape=jax.ShapeDtypeStruct((N, Pout, Cout), jnp.float32),
        grid=(N,),
        in_specs=in_specs,
        out_specs=pl.BlockSpec((None, Pout, Cout), lambda n: (n, 0, 0)),
        scratch_shapes=scratch,
        compiler_params=pltpu.CompilerParams(
            dimension_semantics=("parallel",),      # N>=2 keeps both v7x TCs busy
            vmem_limit_bytes=_pick_vmem_limit(footprint)),
    )(*args)

    out = out.reshape(N, last["Ho"], last["Wo"], Cout)
    return jnp.transpose(out, (0, 3, 1, 2))          # back to NCHW


# ----------------------------------------------------------------------------
# Pure-JAX reference (mirrors PyTorch semantics) for validation
# ----------------------------------------------------------------------------
def _bilinear_up2_align_corners(x):  # NHWC
    N, H, W, C = x.shape
    Ho, Wo = 2 * H, 2 * W
    ys = jnp.arange(Ho, dtype=jnp.float32) * (H - 1) / (Ho - 1)
    xs = jnp.arange(Wo, dtype=jnp.float32) * (W - 1) / (Wo - 1)
    y0 = jnp.clip(jnp.floor(ys).astype(jnp.int32), 0, H - 2)
    x0 = jnp.clip(jnp.floor(xs).astype(jnp.int32), 0, W - 2)
    fy = (ys - y0)[None, :, None, None]
    fx = (xs - x0)[None, None, :, None]
    v00 = x[:, y0][:, :, x0]
    v01 = x[:, y0][:, :, x0 + 1]
    v10 = x[:, y0 + 1][:, :, x0]
    v11 = x[:, y0 + 1][:, :, x0 + 1]
    return (v00 * (1 - fy) * (1 - fx) + v01 * (1 - fy) * fx +
            v10 * fy * (1 - fx) + v11 * fy * fx)


def reference_forward(x_nchw, params):
    x = jnp.transpose(x_nchw, (0, 2, 3, 1)).astype(jnp.float32)
    for p in params:
        w = jnp.transpose(p["w"], (2, 3, 1, 0))  # HWIO
        x = lax.conv_general_dilated(
            x, w, window_strides=(1, 1), padding=((1, 1), (1, 1)),
            dimension_numbers=("NHWC", "HWIO", "NHWC"),
            precision=lax.Precision.HIGHEST)
        N, H, W, C = x.shape
        cpg = C // GROUPS
        xg = x.reshape(N, H, W, GROUPS, cpg)
        mean = xg.mean(axis=(1, 2, 4), keepdims=True)
        var = ((xg - mean) ** 2).mean(axis=(1, 2, 4), keepdims=True)
        xg = (xg - mean) / jnp.sqrt(var + EPS)
        x = xg.reshape(N, H, W, C) * p["gamma"] + p["beta"]
        x = jnp.maximum(x, 0.0)
        if p["upsample"]:
            x = _bilinear_up2_align_corners(x)
    return jnp.transpose(x, (0, 3, 1, 2))


# ----------------------------------------------------------------------------
if __name__ == "__main__":
    key = jax.random.PRNGKey(0)
    kx, kp = jax.random.split(key)

    # small shapes consistent with the module (GroupNorm(32, C) needs C % 32 == 0)
    N, Cin, H, W = 2, 16, 8, 8
    Cout = 32
    n_upsamples = 2   # two Conv3x3GNReLU blocks, both upsampling x2

    x = jax.random.normal(kx, (N, Cin, H, W), jnp.float32)
    params = init_segmentation_block(kp, Cin, Cout, n_upsamples)
    packed = prepare_segmentation_block(params, H, W)   # one-time packing

    out = segmentation_block_forward(x, packed)
    out = jax.block_until_ready(out)

    expected_shape = (N, Cout, H * (2 ** n_upsamples), W * (2 ** n_upsamples))
    assert out.shape == expected_shape, (out.shape, expected_shape)

    ref = jax.block_until_ready(reference_forward(x, params))
    # Conv / upsample matmuls use bf16 operands with f32 accumulation (GN stats
    # stay f32), so allow a bf16-level tolerance vs the f32-HIGHEST reference.
    max_diff = float(jnp.max(jnp.abs(out - ref)))
    mean_diff = float(jnp.mean(jnp.abs(out - ref)))
    assert max_diff < 5e-2, f"max diff too large: {max_diff}"
    assert mean_diff < 8e-3, f"mean diff too large: {mean_diff}"

    print("KERNEL_OK")
</pallas_src>

<mosaic_0001>
module attributes {stable_mosaic.version = 11 : i64} {
  func.func @kernel(%arg0: i32, %arg1: memref<1x64x16xbf16, #tpu.memory_space<vmem>>, %arg2: memref<3x48x32xbf16, #tpu.memory_space<vmem>>, %arg3: memref<32x32xf32, #tpu.memory_space<vmem>>, %arg4: memref<1x32xf32, #tpu.memory_space<vmem>>, %arg5: memref<1x32xf32, #tpu.memory_space<vmem>>, %arg6: memref<16x8xbf16, #tpu.memory_space<vmem>>, %arg7: memref<3x96x32xbf16, #tpu.memory_space<vmem>>, %arg8: memref<32x32xf32, #tpu.memory_space<vmem>>, %arg9: memref<1x32xf32, #tpu.memory_space<vmem>>, %arg10: memref<1x32xf32, #tpu.memory_space<vmem>>, %arg11: memref<32x16xbf16, #tpu.memory_space<vmem>>, %arg12: memref<1x1024x32xf32, #tpu.memory_space<vmem>>, %arg13: memref<96x16xf32, #tpu.memory_space<vmem>>, %arg14: memref<304x32xf32, #tpu.memory_space<vmem>>) attributes {dimension_semantics = [#tpu.dimension_semantics<parallel>], iteration_bounds = array<i64: 2>, scalar_prefetch = 0 : i64, scratch_operands = 2 : i64, tpu.core_type = #tpu.core_type<tc>, window_params = [{transform_indices = @transform_0, window_bounds = array<i64: 1, 64, 16>}, {pipeline_mode = #tpu.pipeline_mode<synchronous>, transform_indices = @transform_1, window_bounds = array<i64: 3, 48, 32>}, {pipeline_mode = #tpu.pipeline_mode<synchronous>, transform_indices = @transform_2, window_bounds = array<i64: 32, 32>}, {pipeline_mode = #tpu.pipeline_mode<synchronous>, transform_indices = @transform_3, window_bounds = array<i64: 1, 32>}, {pipeline_mode = #tpu.pipeline_mode<synchronous>, transform_indices = @transform_4, window_bounds = array<i64: 1, 32>}, {pipeline_mode = #tpu.pipeline_mode<synchronous>, transform_indices = @transform_5, window_bounds = array<i64: 16, 8>}, {pipeline_mode = #tpu.pipeline_mode<synchronous>, transform_indices = @transform_6, window_bounds = array<i64: 3, 96, 32>}, {pipeline_mode = #tpu.pipeline_mode<synchronous>, transform_indices = @transform_7, window_bounds = array<i64: 32, 32>}, {pipeline_mode = #tpu.pipeline_mode<synchronous>, transform_indices = @transform_8, window_bounds = array<i64: 1, 32>}, {pipeline_mode = #tpu.pipeline_mode<synchronous>, transform_indices = @transform_9, window_bounds = array<i64: 1, 32>}, {pipeline_mode = #tpu.pipeline_mode<synchronous>, transform_indices = @transform_10, window_bounds = array<i64: 32, 16>}, {transform_indices = @transform_11, window_bounds = array<i64: 1, 1024, 32>}]} {
    %cst = arith.constant 0.000000e+00 : f32
    %0 = vector.broadcast %cst : f32 to vector<16x16xf32>
    %c0 = arith.constant 0 : index
    %c0_0 = arith.constant 0 : index
    %1 = vector.load %arg13[%c0, %c0_0] : memref<96x16xf32, #tpu.memory_space<vmem>>, vector<16x16xf32>
    tpu.vector_store %arg13[%c0, %c0_0], %0 {strides = array<i32>} : memref<96x16xf32, #tpu.memory_space<vmem>>, vector<16x16xf32>,
    %c80 = arith.constant 80 : index
    %c0_1 = arith.constant 0 : index
    %2 = vector.load %arg13[%c80, %c0_1] : memref<96x16xf32, #tpu.memory_space<vmem>>, vector<16x16xf32>
    tpu.vector_store %arg13[%c80, %c0_1], %0 {strides = array<i32>} : memref<96x16xf32, #tpu.memory_space<vmem>>, vector<16x16xf32>,
    %cst_2 = arith.constant 0.000000e+00 : f32
    %3 = vector.broadcast %cst_2 : f32 to vector<24x32xf32>
    %c0_3 = arith.constant 0 : index
    %c0_4 = arith.constant 0 : index
    %4 = vector.load %arg14[%c0_3, %c0_4] : memref<304x32xf32, #tpu.memory_space<vmem>>, vector<24x32xf32>
    tpu.vector_store %arg14[%c0_3, %c0_4], %3 {strides = array<i32>} : memref<304x32xf32, #tpu.memory_space<vmem>>, vector<24x32xf32>,
    %c280 = arith.constant 280 : index
    %c0_5 = arith.constant 0 : index
    %5 = vector.load %arg14[%c280, %c0_5] : memref<304x32xf32, #tpu.memory_space<vmem>>, vector<24x32xf32>
    tpu.vector_store %arg14[%c280, %c0_5], %3 {strides = array<i32>} : memref<304x32xf32, #tpu.memory_space<vmem>>, vector<24x32xf32>,
    %c0_6 = arith.constant 0 : index
    %c0_7 = arith.constant 0 : index
    %c0_8 = arith.constant 0 : index
    %6 = vector.load %arg1[%c0_6, %c0_7, %c0_8] : memref<1x64x16xbf16, #tpu.memory_space<vmem>>, vector<1x64x16xbf16>
    %7 = vector.shape_cast %6 : vector<1x64x16xbf16> to vector<64x16xbf16>
    %8 = arith.extf %7 : vector<64x16xbf16> to vector<64x16xf32>
    %c16 = arith.constant 16 : index
    %c0_9 = arith.constant 0 : index
    %9 = vector.load %arg13[%c16, %c0_9] : memref<96x16xf32, #tpu.memory_space<vmem>>, vector<64x16xf32>
    tpu.vector_store %arg13[%c16, %c0_9], %8 {strides = array<i32>} : memref<96x16xf32, #tpu.memory_space<vmem>>, vector<64x16xf32>,
    %10 = tpu.iota {dimensions = array<i32: 0>} : vector<64x1xi32>
    %c8_i32 = arith.constant 8 : i32
    %c0_i32 = arith.constant 0 : i32
    %11 = arith.cmpi eq, %c8_i32, %c0_i32 : i32
    %c1_i32 = arith.constant 1 : i32
    %12 = arith.select %11, %c1_i32, %c8_i32 : i32
    %13 = vector.broadcast %12 : i32 to vector<64x1xi32>
    %14 = arith.remsi %10, %13 : vector<64x1xi32>
    %c0_i32_10 = arith.constant 0 : i32
    %15 = vector.broadcast %c0_i32_10 : i32 to vector<64x1xi32>
    %16 = arith.cmpi ne, %14, %15 : vector<64x1xi32>
    %c0_i32_11 = arith.constant 0 : i32
    %17 = vector.broadcast %c0_i32_11 : i32 to vector<64x1xi32>
    %18 = arith.cmpi slt, %14, %17 : vector<64x1xi32>
    %c0_i32_12 = arith.constant 0 : i32
    %19 = arith.cmpi slt, %12, %c0_i32_12 : i32
    %20 = vector.broadcast %19 : i1 to vector<64x1xi1>
    %21 = vector.broadcast %20 : vector<64x1xi1> to vector<64x1xi1>
    %22 = arith.xori %18, %21 : vector<64x1xi1>
    %23 = arith.andi %22, %16 : vector<64x1xi1>
    %24 = vector.broadcast %12 : i32 to vector<64x1xi32>
    %25 = arith.addi %14, %24 : vector<64x1xi32>
    %26 = arith.select %23, %25, %14 : vector<64x1xi1>, vector<64x1xi32>
    %c1_i32_13 = arith.constant 1 : i32
    %27 = vector.broadcast %c1_i32_13 : i32 to vector<64x1xi32>
    %28 = arith.cmpi sge, %26, %27 : vector<64x1xi32>
    %c6_i32 = arith.constant 6 : i32
    %29 = vector.broadcast %c6_i32 : i32 to vector<64x1xi32>
    %30 = arith.cmpi sle, %26, %29 : vector<64x1xi32>
    %cst_14 = arith.constant 0.000000e+00 : f32
    %31 = vector.broadcast %cst_14 : f32 to vector<64x32xf32>
    %c7 = arith.constant 7 : index
    %c0_15 = arith.constant 0 : index
    %32 = vector.load %arg13[%c7, %c0_15] : memref<96x16xf32, #tpu.memory_space<vmem>>, vector<64x16xf32>
    %cst_16 = arith.constant 0.000000e+00 : f32
    %33 = vector.shape_cast %28 : vector<64x1xi1> to vector<64x1xi1>
    %34 = vector.broadcast %33 : vector<64x1xi1> to vector<64x16xi1>
    %35 = vector.broadcast %cst_16 : f32 to vector<64x16xf32>
    %36 = arith.select %34, %32, %35 : vector<64x16xi1>, vector<64x16xf32>
    %c8 = arith.constant 8 : index
    %c0_17 = arith.constant 0 : index
    %37 = vector.load %arg13[%c8, %c0_17] : memref<96x16xf32, #tpu.memory_space<vmem>>, vector<64x16xf32>
    %c9 = arith.constant 9 : index
    %c0_18 = arith.constant 0 : index
    %38 = vector.load %arg13[%c9, %c0_18] : memref<96x16xf32, #tpu.memory_space<vmem>>, vector<64x16xf32>
    %cst_19 = arith.constant 0.000000e+00 : f32
    %39 = vector.shape_cast %30 : vector<64x1xi1> to vector<64x1xi1>
    %40 = vector.broadcast %39 : vector<64x1xi1> to vector<64x16xi1>
    %41 = vector.broadcast %cst_19 : f32 to vector<64x16xf32>
    %42 = arith.select %40, %38, %41 : vector<64x16xi1>, vector<64x16xf32>
    %43 = tpu.concatenate %36, %37, %42 in 1 : vector<64x16xf32>, vector<64x16xf32>, vector<64x16xf32> -> vector<64x48xf32>
    %44 = arith.truncf %43 : vector<64x48xf32> to vector<64x48xbf16>
    %c0_20 = arith.constant 0 : index
    %c0_21 = arith.constant 0 : index
    %c0_22 = arith.constant 0 : index
    %45 = vector.load %arg2[%c0_20, %c0_21, %c0_22] : memref<3x48x32xbf16, #tpu.memory_space<vmem>>, vector<1x48x32xbf16>
    %46 = vector.shape_cast %45 : vector<1x48x32xbf16> to vector<48x32xbf16>
    %cst_23 = arith.constant dense<0.000000e+00> : vector<64x32xf32>
    %47 = tpu.matmul %44, %46, %cst_23 {dimension_numbers = #tpu.dot_dimension_numbers<[1], [0], [0], [1], [0, 0, 1, 1], [], []>} : vector<64x48xbf16>, vector<48x32xbf16>, vector<64x32xf32> -> vector<64x32xf32>
    %48 = arith.addf %31, %47 : vector<64x32xf32>
    %c15 = arith.constant 15 : index
    %c0_24 = arith.constant 0 : index
    %49 = vector.load %arg13[%c15, %c0_24] : memref<96x16xf32, #tpu.memory_space<vmem>>, vector<64x16xf32>
    %cst_25 = arith.constant 0.000000e+00 : f32
    %50 = vector.shape_cast %28 : vector<64x1xi1> to vector<64x1xi1>
    %51 = vector.broadcast %50 : vector<64x1xi1> to vector<64x16xi1>
    %52 = vector.broadcast %cst_25 : f32 to vector<64x16xf32>
    %53 = arith.select %51, %49, %52 : vector<64x16xi1>, vector<64x16xf32>
    %c16_26 = arith.constant 16 : index
    %c0_27 = arith.constant 0 : index
    %54 = vector.load %arg13[%c16_26, %c0_27] : memref<96x16xf32, #tpu.memory_space<vmem>>, vector<64x16xf32>
    %c17 = arith.constant 17 : index
    %c0_28 = arith.constant 0 : index
    %55 = vector.load %arg13[%c17, %c0_28] : memref<96x16xf32, #tpu.memory_space<vmem>>, vector<64x16xf32>
    %cst_29 = arith.constant 0.000000e+00 : f32
    %56 = vector.shape_cast %30 : vector<64x1xi1> to vector<64x1xi1>
    %57 = vector.broadcast %56 : vector<64x1xi1> to vector<64x16xi1>
    %58 = vector.broadcast %cst_29 : f32 to vector<64x16xf32>
    %59 = arith.select %57, %55, %58 : vector<64x16xi1>, vector<64x16xf32>
    %60 = tpu.concatenate %53, %54, %59 in 1 : vector<64x16xf32>, vector<64x16xf32>, vector<64x16xf32> -> vector<64x48xf32>
    %61 = arith.truncf %60 : vector<64x48xf32> to vector<64x48xbf16>
    %c1 = arith.constant 1 : index
    %c0_30 = arith.constant 0 : index
    %c0_31 = arith.constant 0 : index
    %62 = vector.load %arg2[%c1, %c0_30, %c0_31] : memref<3x48x32xbf16, #tpu.memory_space<vmem>>, vector<1x48x32xbf16>
    %63 = vector.shape_cast %62 : vector<1x48x32xbf16> to vector<48x32xbf16>
    %cst_32 = arith.constant dense<0.000000e+00> : vector<64x32xf32>
    %64 = tpu.matmul %61, %63, %cst_32 {dimension_numbers = #tpu.dot_dimension_numbers<[1], [0], [0], [1], [0, 0, 1, 1], [], []>} : vector<64x48xbf16>, vector<48x32xbf16>, vector<64x32xf32> -> vector<64x32xf32>
    %65 = arith.addf %48, %64 : vector<64x32xf32>
    %c23 = arith.constant 23 : index
    %c0_33 = arith.constant 0 : index
    %66 = vector.load %arg13[%c23, %c0_33] : memref<96x16xf32, #tpu.memory_space<vmem>>, vector<64x16xf32>
    %cst_34 = arith.constant 0.000000e+00 : f32
    %67 = vector.shape_cast %28 : vector<64x1xi1> to vector<64x1xi1>
    %68 = vector.broadcast %67 : vector<64x1xi1> to vector<64x16xi1>
    %69 = vector.broadcast %cst_34 : f32 to vector<64x16xf32>
    %70 = arith.select %68, %66, %69 : vector<64x16xi1>, vector<64x16xf32>
    %c24 = arith.constant 24 : index
    %c0_35 = arith.constant 0 : index
    %71 = vector.load %arg13[%c24, %c0_35] : memref<96x16xf32, #tpu.memory_space<vmem>>, vector<64x16xf32>
    %c25 = arith.constant 25 : index
    %c0_36 = arith.constant 0 : index
    %72 = vector.load %arg13[%c25, %c0_36] : memref<96x16xf32, #tpu.memory_space<vmem>>, vector<64x16xf32>
    %cst_37 = arith.constant 0.000000e+00 : f32
    %73 = vector.shape_cast %30 : vector<64x1xi1> to vector<64x1xi1>
    %74 = vector.broadcast %73 : vector<64x1xi1> to vector<64x16xi1>
    %75 = vector.broadcast %cst_37 : f32 to vector<64x16xf32>
    %76 = arith.select %74, %72, %75 : vector<64x16xi1>, vector<64x16xf32>
    %77 = tpu.concatenate %70, %71, %76 in 1 : vector<64x16xf32>, vector<64x16xf32>, vector<64x16xf32> -> vector<64x48xf32>
    %78 = arith.truncf %77 : vector<64x48xf32> to vector<64x48xbf16>
    %c2 = arith.constant 2 : index
    %c0_38 = arith.constant 0 : index
    %c0_39 = arith.constant 0 : index
    %79 = vector.load %arg2[%c2, %c0_38, %c0_39] : memref<3x48x32xbf16, #tpu.memory_space<vmem>>, vector<1x48x32xbf16>
    %80 = vector.shape_cast %79 : vector<1x48x32xbf16> to vector<48x32xbf16>
    %cst_40 = arith.constant dense<0.000000e+00> : vector<64x32xf32>
    %81 = tpu.matmul %78, %80, %cst_40 {dimension_numbers = #tpu.dot_dimension_numbers<[1], [0], [0], [1], [0, 0, 1, 1], [], []>} : vector<64x48xbf16>, vector<48x32xbf16>, vector<64x32xf32> -> vector<64x32xf32>
    %82 = arith.addf %65, %81 : vector<64x32xf32>
    %cst_41 = arith.constant dense<0.000000e+00> : vector<32xf32>
    %83 = vector.multi_reduction <add>, %82, %cst_41 [0] : vector<64x32xf32> to vector<32xf32>
    %84 = vector.shape_cast %83 : vector<32xf32> to vector<1x32xf32>
    %c0_42 = arith.constant 0 : index
    %c0_43 = arith.constant 0 : index
    %85 = vector.load %arg3[%c0_42, %c0_43] : memref<32x32xf32, #tpu.memory_space<vmem>>, vector<32x32xf32>
    %cst_44 = arith.constant dense<0.000000e+00> : vector<1x32xf32>
    %86 = tpu.matmul %84, %85, %cst_44 {dimension_numbers = #tpu.dot_dimension_numbers<[1], [0], [0], [1], [0, 0, 1, 1], [], []>, precision = #tpu.contract_precision<fp32>} : vector<1x32xf32>, vector<32x32xf32>, vector<1x32xf32> -> vector<1x32xf32>
    %87 = vector.broadcast %86 : vector<1x32xf32> to vector<64x32xf32>
    %88 = arith.subf %82, %87 : vector<64x32xf32>
    %89 = arith.mulf %88, %88 : vector<64x32xf32>
    %cst_45 = arith.constant dense<0.000000e+00> : vector<32xf32>
    %90 = vector.multi_reduction <add>, %89, %cst_45 [0] : vector<64x32xf32> to vector<32xf32>
    %91 = vector.shape_cast %90 : vector<32xf32> to vector<1x32xf32>
    %c0_46 = arith.constant 0 : index
    %c0_47 = arith.constant 0 : index
    %92 = vector.load %arg3[%c0_46, %c0_47] : memref<32x32xf32, #tpu.memory_space<vmem>>, vector<32x32xf32>
    %cst_48 = arith.constant dense<0.000000e+00> : vector<1x32xf32>
    %93 = tpu.matmul %91, %92, %cst_48 {dimension_numbers = #tpu.dot_dimension_numbers<[1], [0], [0], [1], [0, 0, 1, 1], [], []>, precision = #tpu.contract_precision<fp32>} : vector<1x32xf32>, vector<32x32xf32>, vector<1x32xf32> -> vector<1x32xf32>
    %cst_49 = arith.constant 9.99999974E-6 : f32
    %94 = vector.broadcast %cst_49 : f32 to vector<1x32xf32>
    %95 = arith.addf %93, %94 : vector<1x32xf32>
    %96 = math.rsqrt %95 : vector<1x32xf32>
    %c0_50 = arith.constant 0 : index
    %c0_51 = arith.constant 0 : index
    %97 = vector.load %arg4[%c0_50, %c0_51] : memref<1x32xf32, #tpu.memory_space<vmem>>, vector<1x32xf32>
    %98 = arith.mulf %96, %97 : vector<1x32xf32>
    %99 = vector.broadcast %98 : vector<1x32xf32> to vector<64x32xf32>
    %100 = arith.mulf %88, %99 : vector<64x32xf32>
    %c0_52 = arith.constant 0 : index
    %c0_53 = arith.constant 0 : index
    %101 = vector.load %arg5[%c0_52, %c0_53] : memref<1x32xf32, #tpu.memory_space<vmem>>, vector<1x32xf32>
    %102 = vector.broadcast %101 : vector<1x32xf32> to vector<64x32xf32>
    %103 = arith.addf %100, %102 : vector<64x32xf32>
    %cst_54 = arith.constant 0.000000e+00 : f32
    %104 = vector.broadcast %cst_54 : f32 to vector<64x32xf32>
    %105 = arith.maximumf %103, %104 : vector<64x32xf32>
    %c0_55 = arith.constant 0 : index
    %c0_56 = arith.constant 0 : index
    %106 = vector.load %arg6[%c0_55, %c0_56] : memref<16x8xbf16, #tpu.memory_space<vmem>>, vector<16x8xbf16>
    %107 = vector.extract_strided_slice %105 {offsets = [0, 0], sizes = [8, 32], strides = [1, 1]} : vector<64x32xf32> to vector<8x32xf32>
    %108 = arith.truncf %107 : vector<8x32xf32> to vector<8x32xbf16>
    %cst_57 = arith.constant dense<0.000000e+00> : vector<16x32xf32>
    %109 = tpu.matmul %106, %108, %cst_57 {dimension_numbers = #tpu.dot_dimension_numbers<[1], [0], [0], [1], [0, 0, 1, 1], [], []>} : vector<16x8xbf16>, vector<8x32xbf16>, vector<16x32xf32> -> vector<16x32xf32>
    %c24_58 = arith.constant 24 : index
    %c0_59 = arith.constant 0 : index
    %110 = vector.load %arg14[%c24_58, %c0_59] : memref<304x32xf32, #tpu.memory_space<vmem>>, vector<16x32xf32>
    tpu.vector_store %arg14[%c24_58, %c0_59], %109 {strides = array<i32>} : memref<304x32xf32, #tpu.memory_space<vmem>>, vector<16x32xf32>,
    %cst_60 = arith.constant 0.533333361 : f32
    %111 = vector.broadcast %cst_60 : f32 to vector<16x32xf32>
    %112 = arith.mulf %111, %109 : vector<16x32xf32>
    %113 = vector.extract_strided_slice %105 {offsets = [8, 0], sizes = [8, 32], strides = [1, 1]} : vector<64x32xf32> to vector<8x32xf32>
    %114 = arith.truncf %113 : vector<8x32xf32> to vector<8x32xbf16>
    %cst_61 = arith.constant dense<0.000000e+00> : vector<16x32xf32>
    %115 = tpu.matmul %106, %114, %cst_61 {dimension_numbers = #tpu.dot_dimension_numbers<[1], [0], [0], [1], [0, 0, 1, 1], [], []>} : vector<16x8xbf16>, vector<8x32xbf16>, vector<16x32xf32> -> vector<16x32xf32>
    %cst_62 = arith.constant 0.466666669 : f32
    %116 = vector.broadcast %cst_62 : f32 to vector<16x32xf32>
    %117 = arith.mulf %116, %115 : vector<16x32xf32>
    %118 = arith.addf %112, %117 : vector<16x32xf32>
    %c40 = arith.constant 40 : index
    %c0_63 = arith.constant 0 : index
    %119 = vector.load %arg14[%c40, %c0_63] : memref<304x32xf32, #tpu.memory_space<vmem>>, vector<16x32xf32>
    tpu.vector_store %arg14[%c40, %c0_63], %118 {strides = array<i32>} : memref<304x32xf32, #tpu.memory_space<vmem>>, vector<16x32xf32>,
    %cst_64 = arith.constant 0.0666666701 : f32
    %120 = vector.broadcast %cst_64 : f32 to vector<16x32xf32>
    %121 = arith.mulf %120, %109 : vector<16x32xf32>
    %cst_65 = arith.constant 0.933333337 : f32
    %122 = vector.broadcast %cst_65 : f32 to vector<16x32xf32>
    %123 = arith.mulf %122, %115 : vector<16x32xf32>
    %124 = arith.addf %121, %123 : vector<16x32xf32>
    %c56 = arith.constant 56 : index
    %c0_66 = arith.constant 0 : index
    %125 = vector.load %arg14[%c56, %c0_66] : memref<304x32xf32, #tpu.memory_space<vmem>>, vector<16x32xf32>
    tpu.vector_store %arg14[%c56, %c0_66], %124 {strides = array<i32>} : memref<304x32xf32, #tpu.memory_space<vmem>>, vector<16x32xf32>,
    %cst_67 = arith.constant 6.000000e-01 : f32
    %126 = vector.broadcast %cst_67 : f32 to vector<16x32xf32>
    %127 = arith.mulf %126, %115 : vector<16x32xf32>
    %128 = vector.extract_strided_slice %105 {offsets = [16, 0], sizes = [8, 32], strides = [1, 1]} : vector<64x32xf32> to vector<8x32xf32>
    %129 = arith.truncf %128 : vector<8x32xf32> to vector<8x32xbf16>
    %cst_68 = arith.constant dense<0.000000e+00> : vector<16x32xf32>
    %130 = tpu.matmul %106, %129, %cst_68 {dimension_numbers = #tpu.dot_dimension_numbers<[1], [0], [0], [1], [0, 0, 1, 1], [], []>} : vector<16x8xbf16>, vector<8x32xbf16>, vector<16x32xf32> -> vector<16x32xf32>
    %cst_69 = arith.constant 4.000000e-01 : f32
    %131 = vector.broadcast %cst_69 : f32 to vector<16x32xf32>
    %132 = arith.mulf %131, %130 : vector<16x32xf32>
    %133 = arith.addf %127, %132 : vector<16x32xf32>
    %c72 = arith.constant 72 : index
    %c0_70 = arith.constant 0 : index
    %134 = vector.load %arg14[%c72, %c0_70] : memref<304x32xf32, #tpu.memory_space<vmem>>, vector<16x32xf32>
    tpu.vector_store %arg14[%c72, %c0_70], %133 {strides = array<i32>} : memref<304x32xf32, #tpu.memory_space<vmem>>, vector<16x32xf32>,
    %cst_71 = arith.constant 0.13333334 : f32
    %135 = vector.broadcast %cst_71 : f32 to vector<16x32xf32>
    %136 = arith.mulf %135, %115 : vector<16x32xf32>
    %cst_72 = arith.constant 0.866666674 : f32
    %137 = vector.broadcast %cst_72 : f32 to vector<16x32xf32>
    %138 = arith.mulf %137, %130 : vector<16x32xf32>
    %139 = arith.addf %136, %138 : vector<16x32xf32>
    %c88 = arith.constant 88 : index
    %c0_73 = arith.constant 0 : index
    %140 = vector.load %arg14[%c88, %c0_73] : memref<304x32xf32, #tpu.memory_space<vmem>>, vector<16x32xf32>
    tpu.vector_store %arg14[%c88, %c0_73], %139 {strides = array<i32>} : memref<304x32xf32, #tpu.memory_space<vmem>>, vector<16x32xf32>,
    %cst_74 = arith.constant 0.666666686 : f32
    %141 = vector.broadcast %cst_74 : f32 to vector<16x32xf32>
    %142 = arith.mulf %141, %130 : vector<16x32xf32>
    %143 = vector.extract_strided_slice %105 {offsets = [24, 0], sizes = [8, 32], strides = [1, 1]} : vector<64x32xf32> to vector<8x32xf32>
    %144 = arith.truncf %143 : vector<8x32xf32> to vector<8x32xbf16>
    %cst_75 = arith.constant dense<0.000000e+00> : vector<16x32xf32>
    %145 = tpu.matmul %106, %144, %cst_75 {dimension_numbers = #tpu.dot_dimension_numbers<[1], [0], [0], [1], [0, 0, 1, 1], [], []>} : vector<16x8xbf16>, vector<8x32xbf16>, vector<16x32xf32> -> vector<16x32xf32>
    %cst_76 = arith.constant 0.333333343 : f32
    %146 = vector.broadcast %cst_76 : f32 to vector<16x32xf32>
    %147 = arith.mulf %146, %145 : vector<16x32xf32>
    %148 = arith.addf %142, %147 : vector<16x32xf32>
    %c104 = arith.constant 104 : index
    %c0_77 = arith.constant 0 : index
    %149 = vector.load %arg14[%c104, %c0_77] : memref<304x32xf32, #tpu.memory_space<vmem>>, vector<16x32xf32>
    tpu.vector_store %arg14[%c104, %c0_77], %148 {strides = array<i32>} : memref<304x32xf32, #tpu.memory_space<vmem>>, vector<16x32xf32>,
    %cst_78 = arith.constant 2.000000e-01 : f32
    %150 = vector.broadcast %cst_78 : f32 to vector<16x32xf32>
    %151 = arith.mulf %150, %130 : vector<16x32xf32>
    %cst_79 = arith.constant 8.000000e-01 : f32
    %152 = vector.broadcast %cst_79 : f32 to vector<16x32xf32>
    %153 = arith.mulf %152, %145 : vector<16x32xf32>
    %154 = arith.addf %151, %153 : vector<16x32xf32>
    %c120 = arith.constant 120 : index
    %c0_80 = arith.constant 0 : index
    %155 = vector.load %arg14[%c120, %c0_80] : memref<304x32xf32, #tpu.memory_space<vmem>>, vector<16x32xf32>
    tpu.vector_store %arg14[%c120, %c0_80], %154 {strides = array<i32>} : memref<304x32xf32, #tpu.memory_space<vmem>>, vector<16x32xf32>,
    %cst_81 = arith.constant 0.733333349 : f32
    %156 = vector.broadcast %cst_81 : f32 to vector<16x32xf32>
    %157 = arith.mulf %156, %145 : vector<16x32xf32>
    %158 = vector.extract_strided_slice %105 {offsets = [32, 0], sizes = [8, 32], strides = [1, 1]} : vector<64x32xf32> to vector<8x32xf32>
    %159 = arith.truncf %158 : vector<8x32xf32> to vector<8x32xbf16>
    %cst_82 = arith.constant dense<0.000000e+00> : vector<16x32xf32>
    %160 = tpu.matmul %106, %159, %cst_82 {dimension_numbers = #tpu.dot_dimension_numbers<[1], [0], [0], [1], [0, 0, 1, 1], [], []>} : vector<16x8xbf16>, vector<8x32xbf16>, vector<16x32xf32> -> vector<16x32xf32>
    %cst_83 = arith.constant 0.266666681 : f32
    %161 = vector.broadcast %cst_83 : f32 to vector<16x32xf32>
    %162 = arith.mulf %161, %160 : vector<16x32xf32>
    %163 = arith.addf %157, %162 : vector<16x32xf32>
    %c136 = arith.constant 136 : index
    %c0_84 = arith.constant 0 : index
    %164 = vector.load %arg14[%c136, %c0_84] : memref<304x32xf32, #tpu.memory_space<vmem>>, vector<16x32xf32>
    tpu.vector_store %arg14[%c136, %c0_84], %163 {strides = array<i32>} : memref<304x32xf32, #tpu.memory_space<vmem>>, vector<16x32xf32>,
    %cst_85 = arith.constant 0.266666681 : f32
    %165 = vector.broadcast %cst_85 : f32 to vector<16x32xf32>
    %166 = arith.mulf %165, %145 : vector<16x32xf32>
    %cst_86 = arith.constant 0.733333349 : f32
    %167 = vector.broadcast %cst_86 : f32 to vector<16x32xf32>
    %168 = arith.mulf %167, %160 : vector<16x32xf32>
    %169 = arith.addf %166, %168 : vector<16x32xf32>
    %c152 = arith.constant 152 : index
    %c0_87 = arith.constant 0 : index
    %170 = vector.load %arg14[%c152, %c0_87] : memref<304x32xf32, #tpu.memory_space<vmem>>, vector<16x32xf32>
    tpu.vector_store %arg14[%c152, %c0_87], %169 {strides = array<i32>} : memref<304x32xf32, #tpu.memory_space<vmem>>, vector<16x32xf32>,
    %cst_88 = arith.constant 8.000000e-01 : f32
    %171 = vector.broadcast %cst_88 : f32 to vector<16x32xf32>
    %172 = arith.mulf %171, %160 : vector<16x32xf32>
    %173 = vector.extract_strided_slice %105 {offsets = [40, 0], sizes = [8, 32], strides = [1, 1]} : vector<64x32xf32> to vector<8x32xf32>
    %174 = arith.truncf %173 : vector<8x32xf32> to vector<8x32xbf16>
    %cst_89 = arith.constant dense<0.000000e+00> : vector<16x32xf32>
    %175 = tpu.matmul %106, %174, %cst_89 {dimension_numbers = #tpu.dot_dimension_numbers<[1], [0], [0], [1], [0, 0, 1, 1], [], []>} : vector<16x8xbf16>, vector<8x32xbf16>, vector<16x32xf32> -> vector<16x32xf32>
    %cst_90 = arith.constant 2.000000e-01 : f32
    %176 = vector.broadcast %cst_90 : f32 to vector<16x32xf32>
    %177 = arith.mulf %176, %175 : vector<16x32xf32>
    %178 = arith.addf %172, %177 : vector<16x32xf32>
    %c168 = arith.constant 168 : index
    %c0_91 = arith.constant 0 : index
    %179 = vector.load %arg14[%c168, %c0_91] : memref<304x32xf32, #tpu.memory_space<vmem>>, vector<16x32xf32>
    tpu.vector_store %arg14[%c168, %c0_91], %178 {strides = array<i32>} : memref<304x32xf32, #tpu.memory_space<vmem>>, vector<16x32xf32>,
    %cst_92 = arith.constant 0.333333343 : f32
    %180 = vector.broadcast %cst_92 : f32 to vector<16x32xf32>
    %181 = arith.mulf %180, %160 : vector<16x32xf32>
    %cst_93 = arith.constant 0.666666686 : f32
    %182 = vector.broadcast %cst_93 : f32 to vector<16x32xf32>
    %183 = arith.mulf %182, %175 : vector<16x32xf32>
    %184 = arith.addf %181, %183 : vector<16x32xf32>
    %c184 = arith.constant 184 : index
    %c0_94 = arith.constant 0 : index
    %185 = vector.load %arg14[%c184, %c0_94] : memref<304x32xf32, #tpu.memory_space<vmem>>, vector<16x32xf32>
    tpu.vector_store %arg14[%c184, %c0_94], %184 {strides = array<i32>} : memref<304x32xf32, #tpu.memory_space<vmem>>, vector<16x32xf32>,
    %cst_95 = arith.constant 0.866666674 : f32
    %186 = vector.broadcast %cst_95 : f32 to vector<16x32xf32>
    %187 = arith.mulf %186, %175 : vector<16x32xf32>
    %188 = vector.extract_strided_slice %105 {offsets = [48, 0], sizes = [8, 32], strides = [1, 1]} : vector<64x32xf32> to vector<8x32xf32>
    %189 = arith.truncf %188 : vector<8x32xf32> to vector<8x32xbf16>
    %cst_96 = arith.constant dense<0.000000e+00> : vector<16x32xf32>
    %190 = tpu.matmul %106, %189, %cst_96 {dimension_numbers = #tpu.dot_dimension_numbers<[1], [0], [0], [1], [0, 0, 1, 1], [], []>} : vector<16x8xbf16>, vector<8x32xbf16>, vector<16x32xf32> -> vector<16x32xf32>
    %cst_97 = arith.constant 0.13333334 : f32
    %191 = vector.broadcast %cst_97 : f32 to vector<16x32xf32>
    %192 = arith.mulf %191, %190 : vector<16x32xf32>
    %193 = arith.addf %187, %192 : vector<16x32xf32>
    %c200 = arith.constant 200 : index
    %c0_98 = arith.constant 0 : index
    %194 = vector.load %arg14[%c200, %c0_98] : memref<304x32xf32, #tpu.memory_space<vmem>>, vector<16x32xf32>
    tpu.vector_store %arg14[%c200, %c0_98], %193 {strides = array<i32>} : memref<304x32xf32, #tpu.memory_space<vmem>>, vector<16x32xf32>,
    %cst_99 = arith.constant 4.000000e-01 : f32
    %195 = vector.broadcast %cst_99 : f32 to vector<16x32xf32>
    %196 = arith.mulf %195, %175 : vector<16x32xf32>
    %cst_100 = arith.constant 6.000000e-01 : f32
    %197 = vector.broadcast %cst_100 : f32 to vector<16x32xf32>
    %198 = arith.mulf %197, %190 : vector<16x32xf32>
    %199 = arith.addf %196, %198 : vector<16x32xf32>
    %c216 = arith.constant 216 : index
    %c0_101 = arith.constant 0 : index
    %200 = vector.load %arg14[%c216, %c0_101] : memref<304x32xf32, #tpu.memory_space<vmem>>, vector<16x32xf32>
    tpu.vector_store %arg14[%c216, %c0_101], %199 {strides = array<i32>} : memref<304x32xf32, #tpu.memory_space<vmem>>, vector<16x32xf32>,
    %cst_102 = arith.constant 0.933333337 : f32
    %201 = vector.broadcast %cst_102 : f32 to vector<16x32xf32>
    %202 = arith.mulf %201, %190 : vector<16x32xf32>
    %203 = vector.extract_strided_slice %105 {offsets = [56, 0], sizes = [8, 32], strides = [1, 1]} : vector<64x32xf32> to vector<8x32xf32>
    %204 = arith.truncf %203 : vector<8x32xf32> to vector<8x32xbf16>
    %cst_103 = arith.constant dense<0.000000e+00> : vector<16x32xf32>
    %205 = tpu.matmul %106, %204, %cst_103 {dimension_numbers = #tpu.dot_dimension_numbers<[1], [0], [0], [1], [0, 0, 1, 1], [], []>} : vector<16x8xbf16>, vector<8x32xbf16>, vector<16x32xf32> -> vector<16x32xf32>
    %cst_104 = arith.constant 0.0666666701 : f32
    %206 = vector.broadcast %cst_104 : f32 to vector<16x32xf32>
    %207 = arith.mulf %206, %205 : vector<16x32xf32>
    %208 = arith.addf %202, %207 : vector<16x32xf32>
    %c232 = arith.constant 232 : index
    %c0_105 = arith.constant 0 : index
    %209 = vector.load %arg14[%c232, %c0_105] : memref<304x32xf32, #tpu.memory_space<vmem>>, vector<16x32xf32>
    tpu.vector_store %arg14[%c232, %c0_105], %208 {strides = array<i32>} : memref<304x32xf32, #tpu.memory_space<vmem>>, vector<16x32xf32>,
    %cst_106 = arith.constant 0.466666669 : f32
    %210 = vector.broadcast %cst_106 : f32 to vector<16x32xf32>
    %211 = arith.mulf %210, %190 : vector<16x32xf32>
    %cst_107 = arith.constant 0.533333361 : f32
    %212 = vector.broadcast %cst_107 : f32 to vector<16x32xf32>
    %213 = arith.mulf %212, %205 : vector<16x32xf32>
    %214 = arith.addf %211, %213 : vector<16x32xf32>
    %c248 = arith.constant 248 : index
    %c0_108 = arith.constant 0 : index
    %215 = vector.load %arg14[%c248, %c0_108] : memref<304x32xf32, #tpu.memory_space<vmem>>, vector<16x32xf32>
    tpu.vector_store %arg14[%c248, %c0_108], %214 {strides = array<i32>} : memref<304x32xf32, #tpu.memory_space<vmem>>, vector<16x32xf32>,
    %cst_109 = arith.constant 0.000000e+00 : f32
    %216 = vector.broadcast %cst_109 : f32 to vector<16x32xf32>
    %217 = arith.mulf %216, %190 : vector<16x32xf32>
    %cst_110 = arith.constant 1.000000e+00 : f32
    %218 = vector.broadcast %cst_110 : f32 to vector<16x32xf32>
    %219 = arith.mulf %218, %205 : vector<16x32xf32>
    %220 = arith.addf %217, %219 : vector<16x32xf32>
    %c264 = arith.constant 264 : index
    %c0_111 = arith.constant 0 : index
    %221 = vector.load %arg14[%c264, %c0_111] : memref<304x32xf32, #tpu.memory_space<vmem>>, vector<16x32xf32>
    tpu.vector_store %arg14[%c264, %c0_111], %220 {strides = array<i32>} : memref<304x32xf32, #tpu.memory_space<vmem>>, vector<16x32xf32>,
    %222 = tpu.iota {dimensions = array<i32: 0>} : vector<256x1xi32>
    %c16_i32 = arith.constant 16 : i32
    %c0_i32_112 = arith.constant 0 : i32
    %223 = arith.cmpi eq, %c16_i32, %c0_i32_112 : i32
    %c1_i32_113 = arith.constant 1 : i32
    %224 = arith.select %223, %c1_i32_113, %c16_i32 : i32
    %225 = vector.broadcast %224 : i32 to vector<256x1xi32>
    %226 = arith.remsi %222, %225 : vector<256x1xi32>
    %c0_i32_114 = arith.constant 0 : i32
    %227 = vector.broadcast %c0_i32_114 : i32 to vector<256x1xi32>
    %228 = arith.cmpi ne, %226, %227 : vector<256x1xi32>
    %c0_i32_115 = arith.constant 0 : i32
    %229 = vector.broadcast %c0_i32_115 : i32 to vector<256x1xi32>
    %230 = arith.cmpi slt, %226, %229 : vector<256x1xi32>
    %c0_i32_116 = arith.constant 0 : i32
    %231 = arith.cmpi slt, %224, %c0_i32_116 : i32
    %232 = vector.broadcast %231 : i1 to vector<256x1xi1>
    %233 = vector.broadcast %232 : vector<256x1xi1> to vector<256x1xi1>
    %234 = arith.xori %230, %233 : vector<256x1xi1>
    %235 = arith.andi %234, %228 : vector<256x1xi1>
    %236 = vector.broadcast %224 : i32 to vector<256x1xi32>
    %237 = arith.addi %226, %236 : vector<256x1xi32>
    %238 = arith.select %235, %237, %226 : vector<256x1xi1>, vector<256x1xi32>
    %c1_i32_117 = arith.constant 1 : i32
    %239 = vector.broadcast %c1_i32_117 : i32 to vector<256x1xi32>
    %240 = arith.cmpi sge, %238, %239 : vector<256x1xi32>
    %c14_i32 = arith.constant 14 : i32
    %241 = vector.broadcast %c14_i32 : i32 to vector<256x1xi32>
    %242 = arith.cmpi sle, %238, %241 : vector<256x1xi32>
    %cst_118 = arith.constant 0.000000e+00 : f32
    %243 = vector.broadcast %cst_118 : f32 to vector<256x32xf32>
    %c7_119 = arith.constant 7 : index
    %c0_120 = arith.constant 0 : index
    %244 = vector.load %arg14[%c7_119, %c0_120] : memref<304x32xf32, #tpu.memory_space<vmem>>, vector<256x32xf32>
    %cst_121 = arith.constant 0.000000e+00 : f32
    %245 = vector.shape_cast %240 : vector<256x1xi1> to vector<256x1xi1>
    %246 = vector.broadcast %245 : vector<256x1xi1> to vector<256x32xi1>
    %247 = vector.broadcast %cst_121 : f32 to vector<256x32xf32>
    %248 = arith.select %246, %244, %247 : vector<256x32xi1>, vector<256x32xf32>
    %c8_122 = arith.constant 8 : index
    %c0_123 = arith.constant 0 : index
    %249 = vector.load %arg14[%c8_122, %c0_123] : memref<304x32xf32, #tpu.memory_space<vmem>>, vector<256x32xf32>
    %c9_124 = arith.constant 9 : index
    %c0_125 = arith.constant 0 : index
    %250 = vector.load %arg14[%c9_124, %c0_125] : memref<304x32xf32, #tpu.memory_space<vmem>>, vector<256x32xf32>
    %cst_126 = arith.constant 0.000000e+00 : f32
    %251 = vector.shape_cast %242 : vector<256x1xi1> to vector<256x1xi1>
    %252 = vector.broadcast %251 : vector<256x1xi1> to vector<256x32xi1>
    %253 = vector.broadcast %cst_126 : f32 to vector<256x32xf32>
    %254 = arith.select %252, %250, %253 : vector<256x32xi1>, vector<256x32xf32>
    %255 = tpu.concatenate %248, %249, %254 in 1 : vector<256x32xf32>, vector<256x32xf32>, vector<256x32xf32> -> vector<256x96xf32>
    %256 = arith.truncf %255 : vector<256x96xf32> to vector<256x96xbf16>
    %c0_127 = arith.constant 0 : index
    %c0_128 = arith.constant 0 : index
    %c0_129 = arith.constant 0 : index
    %257 = vector.load %arg7[%c0_127, %c0_128, %c0_129] : memref<3x96x32xbf16, #tpu.memory_space<vmem>>, vector<1x96x32xbf16>
    %258 = vector.shape_cast %257 : vector<1x96x32xbf16> to vector<96x32xbf16>
    %cst_130 = arith.constant dense<0.000000e+00> : vector<256x32xf32>
    %259 = tpu.matmul %256, %258, %cst_130 {dimension_numbers = #tpu.dot_dimension_numbers<[1], [0], [0], [1], [0, 0, 1, 1], [], []>} : vector<256x96xbf16>, vector<96x32xbf16>, vector<256x32xf32> -> vector<256x32xf32>
    %260 = arith.addf %243, %259 : vector<256x32xf32>
    %c23_131 = arith.constant 23 : index
    %c0_132 = arith.constant 0 : index
    %261 = vector.load %arg14[%c23_131, %c0_132] : memref<304x32xf32, #tpu.memory_space<vmem>>, vector<256x32xf32>
    %cst_133 = arith.constant 0.000000e+00 : f32
    %262 = vector.shape_cast %240 : vector<256x1xi1> to vector<256x1xi1>
    %263 = vector.broadcast %262 : vector<256x1xi1> to vector<256x32xi1>
    %264 = vector.broadcast %cst_133 : f32 to vector<256x32xf32>
    %265 = arith.select %263, %261, %264 : vector<256x32xi1>, vector<256x32xf32>
    %c24_134 = arith.constant 24 : index
    %c0_135 = arith.constant 0 : index
    %266 = vector.load %arg14[%c24_134, %c0_135] : memref<304x32xf32, #tpu.memory_space<vmem>>, vector<256x32xf32>
    %c25_136 = arith.constant 25 : index
    %c0_137 = arith.constant 0 : index
    %267 = vector.load %arg14[%c25_136, %c0_137] : memref<304x32xf32, #tpu.memory_space<vmem>>, vector<256x32xf32>
    %cst_138 = arith.constant 0.000000e+00 : f32
    %268 = vector.shape_cast %242 : vector<256x1xi1> to vector<256x1xi1>
    %269 = vector.broadcast %268 : vector<256x1xi1> to vector<256x32xi1>
    %270 = vector.broadcast %cst_138 : f32 to vector<256x32xf32>
    %271 = arith.select %269, %267, %270 : vector<256x32xi1>, vector<256x32xf32>
    %272 = tpu.concatenate %265, %266, %271 in 1 : vector<256x32xf32>, vector<256x32xf32>, vector<256x32xf32> -> vector<256x96xf32>
    %273 = arith.truncf %272 : vector<256x96xf32> to vector<256x96xbf16>
    %c1_139 = arith.constant 1 : index
    %c0_140 = arith.constant 0 : index
    %c0_141 = arith.constant 0 : index
    %274 = vector.load %arg7[%c1_139, %c0_140, %c0_141] : memref<3x96x32xbf16, #tpu.memory_space<vmem>>, vector<1x96x32xbf16>
    %275 = vector.shape_cast %274 : vector<1x96x32xbf16> to vector<96x32xbf16>
    %cst_142 = arith.constant dense<0.000000e+00> : vector<256x32xf32>
    %276 = tpu.matmul %273, %275, %cst_142 {dimension_numbers = #tpu.dot_dimension_numbers<[1], [0], [0], [1], [0, 0, 1, 1], [], []>} : vector<256x96xbf16>, vector<96x32xbf16>, vector<256x32xf32> -> vector<256x32xf32>
    %277 = arith.addf %260, %276 : vector<256x32xf32>
    %c39 = arith.constant 39 : index
    %c0_143 = arith.constant 0 : index
    %278 = vector.load %arg14[%c39, %c0_143] : memref<304x32xf32, #tpu.memory_space<vmem>>, vector<256x32xf32>
    %cst_144 = arith.constant 0.000000e+00 : f32
    %279 = vector.shape_cast %240 : vector<256x1xi1> to vector<256x1xi1>
    %280 = vector.broadcast %279 : vector<256x1xi1> to vector<256x32xi1>
    %281 = vector.broadcast %cst_144 : f32 to vector<256x32xf32>
    %282 = arith.select %280, %278, %281 : vector<256x32xi1>, vector<256x32xf32>
    %c40_145 = arith.constant 40 : index
    %c0_146 = arith.constant 0 : index
    %283 = vector.load %arg14[%c40_145, %c0_146] : memref<304x32xf32, #tpu.memory_space<vmem>>, vector<256x32xf32>
    %c41 = arith.constant 41 : index
    %c0_147 = arith.constant 0 : index
    %284 = vector.load %arg14[%c41, %c0_147] : memref<304x32xf32, #tpu.memory_space<vmem>>, vector<256x32xf32>
    %cst_148 = arith.constant 0.000000e+00 : f32
    %285 = vector.shape_cast %242 : vector<256x1xi1> to vector<256x1xi1>
    %286 = vector.broadcast %285 : vector<256x1xi1> to vector<256x32xi1>
    %287 = vector.broadcast %cst_148 : f32 to vector<256x32xf32>
    %288 = arith.select %286, %284, %287 : vector<256x32xi1>, vector<256x32xf32>
    %289 = tpu.concatenate %282, %283, %288 in 1 : vector<256x32xf32>, vector<256x32xf32>, vector<256x32xf32> -> vector<256x96xf32>
    %290 = arith.truncf %289 : vector<256x96xf32> to vector<256x96xbf16>
    %c2_149 = arith.constant 2 : index
    %c0_150 = arith.constant 0 : index
    %c0_151 = arith.constant 0 : index
    %291 = vector.load %arg7[%c2_149, %c0_150, %c0_151] : memref<3x96x32xbf16, #tpu.memory_space<vmem>>, vector<1x96x32xbf16>
    %292 = vector.shape_cast %291 : vector<1x96x32xbf16> to vector<96x32xbf16>
    %cst_152 = arith.constant dense<0.000000e+00> : vector<256x32xf32>
    %293 = tpu.matmul %290, %292, %cst_152 {dimension_numbers = #tpu.dot_dimension_numbers<[1], [0], [0], [1], [0, 0, 1, 1], [], []>} : vector<256x96xbf16>, vector<96x32xbf16>, vector<256x32xf32> -> vector<256x32xf32>
    %294 = arith.addf %277, %293 : vector<256x32xf32>
    %cst_153 = arith.constant dense<0.000000e+00> : vector<32xf32>
    %295 = vector.multi_reduction <add>, %294, %cst_153 [0] : vector<256x32xf32> to vector<32xf32>
    %296 = vector.shape_cast %295 : vector<32xf32> to vector<1x32xf32>
    %c0_154 = arith.constant 0 : index
    %c0_155 = arith.constant 0 : index
    %297 = vector.load %arg8[%c0_154, %c0_155] : memref<32x32xf32, #tpu.memory_space<vmem>>, vector<32x32xf32>
    %cst_156 = arith.constant dense<0.000000e+00> : vector<1x32xf32>
    %298 = tpu.matmul %296, %297, %cst_156 {dimension_numbers = #tpu.dot_dimension_numbers<[1], [0], [0], [1], [0, 0, 1, 1], [], []>, precision = #tpu.contract_precision<fp32>} : vector<1x32xf32>, vector<32x32xf32>, vector<1x32xf32> -> vector<1x32xf32>
    %299 = vector.broadcast %298 : vector<1x32xf32> to vector<256x32xf32>
    %300 = arith.subf %294, %299 : vector<256x32xf32>
    %301 = arith.mulf %300, %300 : vector<256x32xf32>
    %cst_157 = arith.constant dense<0.000000e+00> : vector<32xf32>
    %302 = vector.multi_reduction <add>, %301, %cst_157 [0] : vector<256x32xf32> to vector<32xf32>
    %303 = vector.shape_cast %302 : vector<32xf32> to vector<1x32xf32>
    %c0_158 = arith.constant 0 : index
    %c0_159 = arith.constant 0 : index
    %304 = vector.load %arg8[%c0_158, %c0_159] : memref<32x32xf32, #tpu.memory_space<vmem>>, vector<32x32xf32>
    %cst_160 = arith.constant dense<0.000000e+00> : vector<1x32xf32>
    %305 = tpu.matmul %303, %304, %cst_160 {dimension_numbers = #tpu.dot_dimension_numbers<[1], [0], [0], [1], [0, 0, 1, 1], [], []>, precision = #tpu.contract_precision<fp32>} : vector<1x32xf32>, vector<32x32xf32>, vector<1x32xf32> -> vector<1x32xf32>
    %cst_161 = arith.constant 9.99999974E-6 : f32
    %306 = vector.broadcast %cst_161 : f32 to vector<1x32xf32>
    %307 = arith.addf %305, %306 : vector<1x32xf32>
    %308 = math.rsqrt %307 : vector<1x32xf32>
    %c0_162 = arith.constant 0 : index
    %c0_163 = arith.constant 0 : index
    %309 = vector.load %arg9[%c0_162, %c0_163] : memref<1x32xf32, #tpu.memory_space<vmem>>, vector<1x32xf32>
    %310 = arith.mulf %308, %309 : vector<1x32xf32>
    %311 = vector.broadcast %310 : vector<1x32xf32> to vector<256x32xf32>
    %312 = arith.mulf %300, %311 : vector<256x32xf32>
    %c0_164 = arith.constant 0 : index
    %c0_165 = arith.constant 0 : index
    %313 = vector.load %arg10[%c0_164, %c0_165] : memref<1x32xf32, #tpu.memory_space<vmem>>, vector<1x32xf32>
    %314 = vector.broadcast %313 : vector<1x32xf32> to vector<256x32xf32>
    %315 = arith.addf %312, %314 : vector<256x32xf32>
    %cst_166 = arith.constant 0.000000e+00 : f32
    %316 = vector.broadcast %cst_166 : f32 to vector<256x32xf32>
    %317 = arith.maximumf %315, %316 : vector<256x32xf32>
    %c0_167 = arith.constant 0 : index
    %c0_168 = arith.constant 0 : index
    %318 = vector.load %arg11[%c0_167, %c0_168] : memref<32x16xbf16, #tpu.memory_space<vmem>>, vector<32x16xbf16>
    %319 = vector.extract_strided_slice %317 {offsets = [0, 0], sizes = [16, 32], strides = [1, 1]} : vector<256x32xf32> to vector<16x32xf32>
    %320 = arith.truncf %319 : vector<16x32xf32> to vector<16x32xbf16>
    %cst_169 = arith.constant dense<0.000000e+00> : vector<32x32xf32>
    %321 = tpu.matmul %318, %320, %cst_169 {dimension_numbers = #tpu.dot_dimension_numbers<[1], [0], [0], [1], [0, 0, 1, 1], [], []>} : vector<32x16xbf16>, vector<16x32xbf16>, vector<32x32xf32> -> vector<32x32xf32>
    %c0_170 = arith.constant 0 : index
    %c0_171 = arith.constant 0 : index
    %c0_172 = arith.constant 0 : index
    %322 = vector.load %arg12[%c0_170, %c0_171, %c0_172] : memref<1x1024x32xf32, #tpu.memory_space<vmem>>, vector<1x32x32xf32>
    %323 = vector.shape_cast %322 : vector<1x32x32xf32> to vector<32x32xf32>
    %324 = vector.shape_cast %321 : vector<32x32xf32> to vector<1x32x32xf32>
    tpu.vector_store %arg12[%c0_170, %c0_171, %c0_172], %324 {strides = array<i32>} : memref<1x1024x32xf32, #tpu.memory_space<vmem>>, vector<1x32x32xf32>,
    %cst_173 = arith.constant 5.161290e-01 : f32
    %325 = vector.broadcast %cst_173 : f32 to vector<32x32xf32>
    %326 = arith.mulf %325, %321 : vector<32x32xf32>
    %327 = vector.extract_strided_slice %317 {offsets = [16, 0], sizes = [16, 32], strides = [1, 1]} : vector<256x32xf32> to vector<16x32xf32>
    %328 = arith.truncf %327 : vector<16x32xf32> to vector<16x32xbf16>
    %cst_174 = arith.constant dense<0.000000e+00> : vector<32x32xf32>
    %329 = tpu.matmul %318, %328, %cst_174 {dimension_numbers = #tpu.dot_dimension_numbers<[1], [0], [0], [1], [0, 0, 1, 1], [], []>} : vector<32x16xbf16>, vector<16x32xbf16>, vector<32x32xf32> -> vector<32x32xf32>
    %cst_175 = arith.constant 0.483870953 : f32
    %330 = vector.broadcast %cst_175 : f32 to vector<32x32xf32>
    %331 = arith.mulf %330, %329 : vector<32x32xf32>
    %332 = arith.addf %326, %331 : vector<32x32xf32>
    %c0_176 = arith.constant 0 : index
    %c32 = arith.constant 32 : index
    %c0_177 = arith.constant 0 : index
    %333 = vector.load %arg12[%c0_176, %c32, %c0_177] : memref<1x1024x32xf32, #tpu.memory_space<vmem>>, vector<1x32x32xf32>
    %334 = vector.shape_cast %333 : vector<1x32x32xf32> to vector<32x32xf32>
    %335 = vector.shape_cast %332 : vector<32x32xf32> to vector<1x32x32xf32>
    tpu.vector_store %arg12[%c0_176, %c32, %c0_177], %335 {strides = array<i32>} : memref<1x1024x32xf32, #tpu.memory_space<vmem>>, vector<1x32x32xf32>,
    %cst_178 = arith.constant 0.0322580636 : f32
    %336 = vector.broadcast %cst_178 : f32 to vector<32x32xf32>
    %337 = arith.mulf %336, %321 : vector<32x32xf32>
    %cst_179 = arith.constant 0.967741906 : f32
    %338 = vector.broadcast %cst_179 : f32 to vector<32x32xf32>
    %339 = arith.mulf %338, %329 : vector<32x32xf32>
    %340 = arith.addf %337, %339 : vector<32x32xf32>
    %c0_180 = arith.constant 0 : index
    %c64 = arith.constant 64 : index
    %c0_181 = arith.constant 0 : index
    %341 = vector.load %arg12[%c0_180, %c64, %c0_181] : memref<1x1024x32xf32, #tpu.memory_space<vmem>>, vector<1x32x32xf32>
    %342 = vector.shape_cast %341 : vector<1x32x32xf32> to vector<32x32xf32>
    %343 = vector.shape_cast %340 : vector<32x32xf32> to vector<1x32x32xf32>
    tpu.vector_store %arg12[%c0_180, %c64, %c0_181], %343 {strides = array<i32>} : memref<1x1024x32xf32, #tpu.memory_space<vmem>>, vector<1x32x32xf32>,
    %cst_182 = arith.constant 0.54838711 : f32
    %344 = vector.broadcast %cst_182 : f32 to vector<32x32xf32>
    %345 = arith.mulf %344, %329 : vector<32x32xf32>
    %346 = vector.extract_strided_slice %317 {offsets = [32, 0], sizes = [16, 32], strides = [1, 1]} : vector<256x32xf32> to vector<16x32xf32>
    %347 = arith.truncf %346 : vector<16x32xf32> to vector<16x32xbf16>
    %cst_183 = arith.constant dense<0.000000e+00> : vector<32x32xf32>
    %348 = tpu.matmul %318, %347, %cst_183 {dimension_numbers = #tpu.dot_dimension_numbers<[1], [0], [0], [1], [0, 0, 1, 1], [], []>} : vector<32x16xbf16>, vector<16x32xbf16>, vector<32x32xf32> -> vector<32x32xf32>
    %cst_184 = arith.constant 0.45161289 : f32
    %349 = vector.broadcast %cst_184 : f32 to vector<32x32xf32>
    %350 = arith.mulf %349, %348 : vector<32x32xf32>
    %351 = arith.addf %345, %350 : vector<32x32xf32>
    %c0_185 = arith.constant 0 : index
    %c96 = arith.constant 96 : index
    %c0_186 = arith.constant 0 : index
    %352 = vector.load %arg12[%c0_185, %c96, %c0_186] : memref<1x1024x32xf32, #tpu.memory_space<vmem>>, vector<1x32x32xf32>
    %353 = vector.shape_cast %352 : vector<1x32x32xf32> to vector<32x32xf32>
    %354 = vector.shape_cast %351 : vector<32x32xf32> to vector<1x32x32xf32>
    tpu.vector_store %arg12[%c0_185, %c96, %c0_186], %354 {strides = array<i32>} : memref<1x1024x32xf32, #tpu.memory_space<vmem>>, vector<1x32x32xf32>,
    %cst_187 = arith.constant 0.0645161271 : f32
    %355 = vector.broadcast %cst_187 : f32 to vector<32x32xf32>
    %356 = arith.mulf %355, %329 : vector<32x32xf32>
    %cst_188 = arith.constant 0.935483872 : f32
    %357 = vector.broadcast %cst_188 : f32 to vector<32x32xf32>
    %358 = arith.mulf %357, %348 : vector<32x32xf32>
    %359 = arith.addf %356, %358 : vector<32x32xf32>
    %c0_189 = arith.constant 0 : index
    %c128 = arith.constant 128 : index
    %c0_190 = arith.constant 0 : index
    %360 = vector.load %arg12[%c0_189, %c128, %c0_190] : memref<1x1024x32xf32, #tpu.memory_space<vmem>>, vector<1x32x32xf32>
    %361 = vector.shape_cast %360 : vector<1x32x32xf32> to vector<32x32xf32>
    %362 = vector.shape_cast %359 : vector<32x32xf32> to vector<1x32x32xf32>
    tpu.vector_store %arg12[%c0_189, %c128, %c0_190], %362 {strides = array<i32>} : memref<1x1024x32xf32, #tpu.memory_space<vmem>>, vector<1x32x32xf32>,
    %cst_191 = arith.constant 0.580645144 : f32
    %363 = vector.broadcast %cst_191 : f32 to vector<32x32xf32>
    %364 = arith.mulf %363, %348 : vector<32x32xf32>
    %365 = vector.extract_strided_slice %317 {offsets = [48, 0], sizes = [16, 32], strides = [1, 1]} : vector<256x32xf32> to vector<16x32xf32>
    %366 = arith.truncf %365 : vector<16x32xf32> to vector<16x32xbf16>
    %cst_192 = arith.constant dense<0.000000e+00> : vector<32x32xf32>
    %367 = tpu.matmul %318, %366, %cst_192 {dimension_numbers = #tpu.dot_dimension_numbers<[1], [0], [0], [1], [0, 0, 1, 1], [], []>} : vector<32x16xbf16>, vector<16x32xbf16>, vector<32x32xf32> -> vector<32x32xf32>
    %cst_193 = arith.constant 0.419354826 : f32
    %368 = vector.broadcast %cst_193 : f32 to vector<32x32xf32>
    %369 = arith.mulf %368, %367 : vector<32x32xf32>
    %370 = arith.addf %364, %369 : vector<32x32xf32>
    %c0_194 = arith.constant 0 : index
    %c160 = arith.constant 160 : index
    %c0_195 = arith.constant 0 : index
    %371 = vector.load %arg12[%c0_194, %c160, %c0_195] : memref<1x1024x32xf32, #tpu.memory_space<vmem>>, vector<1x32x32xf32>
    %372 = vector.shape_cast %371 : vector<1x32x32xf32> to vector<32x32xf32>
    %373 = vector.shape_cast %370 : vector<32x32xf32> to vector<1x32x32xf32>
    tpu.vector_store %arg12[%c0_194, %c160, %c0_195], %373 {strides = array<i32>} : memref<1x1024x32xf32, #tpu.memory_space<vmem>>, vector<1x32x32xf32>,
    %cst_196 = arith.constant 0.0967741906 : f32
    %374 = vector.broadcast %cst_196 : f32 to vector<32x32xf32>
    %375 = arith.mulf %374, %348 : vector<32x32xf32>
    %cst_197 = arith.constant 0.903225779 : f32
    %376 = vector.broadcast %cst_197 : f32 to vector<32x32xf32>
    %377 = arith.mulf %376, %367 : vector<32x32xf32>
    %378 = arith.addf %375, %377 : vector<32x32xf32>
    %c0_198 = arith.constant 0 : index
    %c192 = arith.constant 192 : index
    %c0_199 = arith.constant 0 : index
    %379 = vector.load %arg12[%c0_198, %c192, %c0_199] : memref<1x1024x32xf32, #tpu.memory_space<vmem>>, vector<1x32x32xf32>
    %380 = vector.shape_cast %379 : vector<1x32x32xf32> to vector<32x32xf32>
    %381 = vector.shape_cast %378 : vector<32x32xf32> to vector<1x32x32xf32>
    tpu.vector_store %arg12[%c0_198, %c192, %c0_199], %381 {strides = array<i32>} : memref<1x1024x32xf32, #tpu.memory_space<vmem>>, vector<1x32x32xf32>,
    %cst_200 = arith.constant 0.612903237 : f32
    %382 = vector.broadcast %cst_200 : f32 to vector<32x32xf32>
    %383 = arith.mulf %382, %367 : vector<32x32xf32>
    %384 = vector.extract_strided_slice %317 {offsets = [64, 0], sizes = [16, 32], strides = [1, 1]} : vector<256x32xf32> to vector<16x32xf32>
    %385 = arith.truncf %384 : vector<16x32xf32> to vector<16x32xbf16>
    %cst_201 = arith.constant dense<0.000000e+00> : vector<32x32xf32>
    %386 = tpu.matmul %318, %385, %cst_201 {dimension_numbers = #tpu.dot_dimension_numbers<[1], [0], [0], [1], [0, 0, 1, 1], [], []>} : vector<32x16xbf16>, vector<16x32xbf16>, vector<32x32xf32> -> vector<32x32xf32>
    %cst_202 = arith.constant 0.387096763 : f32
    %387 = vector.broadcast %cst_202 : f32 to vector<32x32xf32>
    %388 = arith.mulf %387, %386 : vector<32x32xf32>
    %389 = arith.addf %383, %388 : vector<32x32xf32>
    %c0_203 = arith.constant 0 : index
    %c224 = arith.constant 224 : index
    %c0_204 = arith.constant 0 : index
    %390 = vector.load %arg12[%c0_203, %c224, %c0_204] : memref<1x1024x32xf32, #tpu.memory_space<vmem>>, vector<1x32x32xf32>
    %391 = vector.shape_cast %390 : vector<1x32x32xf32> to vector<32x32xf32>
    %392 = vector.shape_cast %389 : vector<32x32xf32> to vector<1x32x32xf32>
    tpu.vector_store %arg12[%c0_203, %c224, %c0_204], %392 {strides = array<i32>} : memref<1x1024x32xf32, #tpu.memory_space<vmem>>, vector<1x32x32xf32>,
    %cst_205 = arith.constant 0.129032254 : f32
    %393 = vector.broadcast %cst_205 : f32 to vector<32x32xf32>
    %394 = arith.mulf %393, %367 : vector<32x32xf32>
    %cst_206 = arith.constant 0.870967745 : f32
    %395 = vector.broadcast %cst_206 : f32 to vector<32x32xf32>
    %396 = arith.mulf %395, %386 : vector<32x32xf32>
    %397 = arith.addf %394, %396 : vector<32x32xf32>
    %c0_207 = arith.constant 0 : index
    %c256 = arith.constant 256 : index
    %c0_208 = arith.constant 0 : index
    %398 = vector.load %arg12[%c0_207, %c256, %c0_208] : memref<1x1024x32xf32, #tpu.memory_space<vmem>>, vector<1x32x32xf32>
    %399 = vector.shape_cast %398 : vector<1x32x32xf32> to vector<32x32xf32>
    %400 = vector.shape_cast %397 : vector<32x32xf32> to vector<1x32x32xf32>
    tpu.vector_store %arg12[%c0_207, %c256, %c0_208], %400 {strides = array<i32>} : memref<1x1024x32xf32, #tpu.memory_space<vmem>>, vector<1x32x32xf32>,
    %cst_209 = arith.constant 0.645161271 : f32
    %401 = vector.broadcast %cst_209 : f32 to vector<32x32xf32>
    %402 = arith.mulf %401, %386 : vector<32x32xf32>
    %403 = vector.extract_strided_slice %317 {offsets = [80, 0], sizes = [16, 32], strides = [1, 1]} : vector<256x32xf32> to vector<16x32xf32>
    %404 = arith.truncf %403 : vector<16x32xf32> to vector<16x32xbf16>
    %cst_210 = arith.constant dense<0.000000e+00> : vector<32x32xf32>
    %405 = tpu.matmul %318, %404, %cst_210 {dimension_numbers = #tpu.dot_dimension_numbers<[1], [0], [0], [1], [0, 0, 1, 1], [], []>} : vector<32x16xbf16>, vector<16x32xbf16>, vector<32x32xf32> -> vector<32x32xf32>
    %cst_211 = arith.constant 0.354838699 : f32
    %406 = vector.broadcast %cst_211 : f32 to vector<32x32xf32>
    %407 = arith.mulf %406, %405 : vector<32x32xf32>
    %408 = arith.addf %402, %407 : vector<32x32xf32>
    %c0_212 = arith.constant 0 : index
    %c288 = arith.constant 288 : index
    %c0_213 = arith.constant 0 : index
    %409 = vector.load %arg12[%c0_212, %c288, %c0_213] : memref<1x1024x32xf32, #tpu.memory_space<vmem>>, vector<1x32x32xf32>
    %410 = vector.shape_cast %409 : vector<1x32x32xf32> to vector<32x32xf32>
    %411 = vector.shape_cast %408 : vector<32x32xf32> to vector<1x32x32xf32>
    tpu.vector_store %arg12[%c0_212, %c288, %c0_213], %411 {strides = array<i32>} : memref<1x1024x32xf32, #tpu.memory_space<vmem>>, vector<1x32x32xf32>,
    %cst_214 = arith.constant 0.161290318 : f32
    %412 = vector.broadcast %cst_214 : f32 to vector<32x32xf32>
    %413 = arith.mulf %412, %386 : vector<32x32xf32>
    %cst_215 = arith.constant 0.838709652 : f32
    %414 = vector.broadcast %cst_215 : f32 to vector<32x32xf32>
    %415 = arith.mulf %414, %405 : vector<32x32xf32>
    %416 = arith.addf %413, %415 : vector<32x32xf32>
    %c0_216 = arith.constant 0 : index
    %c320 = arith.constant 320 : index
    %c0_217 = arith.constant 0 : index
    %417 = vector.load %arg12[%c0_216, %c320, %c0_217] : memref<1x1024x32xf32, #tpu.memory_space<vmem>>, vector<1x32x32xf32>
    %418 = vector.shape_cast %417 : vector<1x32x32xf32> to vector<32x32xf32>
    %419 = vector.shape_cast %416 : vector<32x32xf32> to vector<1x32x32xf32>
    tpu.vector_store %arg12[%c0_216, %c320, %c0_217], %419 {strides = array<i32>} : memref<1x1024x32xf32, #tpu.memory_space<vmem>>, vector<1x32x32xf32>,
    %cst_218 = arith.constant 0.677419364 : f32
    %420 = vector.broadcast %cst_218 : f32 to vector<32x32xf32>
    %421 = arith.mulf %420, %405 : vector<32x32xf32>
    %422 = vector.extract_strided_slice %317 {offsets = [96, 0], sizes = [16, 32], strides = [1, 1]} : vector<256x32xf32> to vector<16x32xf32>
    %423 = arith.truncf %422 : vector<16x32xf32> to vector<16x32xbf16>
    %cst_219 = arith.constant dense<0.000000e+00> : vector<32x32xf32>
    %424 = tpu.matmul %318, %423, %cst_219 {dimension_numbers = #tpu.dot_dimension_numbers<[1], [0], [0], [1], [0, 0, 1, 1], [], []>} : vector<32x16xbf16>, vector<16x32xbf16>, vector<32x32xf32> -> vector<32x32xf32>
    %cst_220 = arith.constant 0.322580636 : f32
    %425 = vector.broadcast %cst_220 : f32 to vector<32x32xf32>
    %426 = arith.mulf %425, %424 : vector<32x32xf32>
    %427 = arith.addf %421, %426 : vector<32x32xf32>
    %c0_221 = arith.constant 0 : index
    %c352 = arith.constant 352 : index
    %c0_222 = arith.constant 0 : index
    %428 = vector.load %arg12[%c0_221, %c352, %c0_222] : memref<1x1024x32xf32, #tpu.memory_space<vmem>>, vector<1x32x32xf32>
    %429 = vector.shape_cast %428 : vector<1x32x32xf32> to vector<32x32xf32>
    %430 = vector.shape_cast %427 : vector<32x32xf32> to vector<1x32x32xf32>
    tpu.vector_store %arg12[%c0_221, %c352, %c0_222], %430 {strides = array<i32>} : memref<1x1024x32xf32, #tpu.memory_space<vmem>>, vector<1x32x32xf32>,
    %cst_223 = arith.constant 0.193548381 : f32
    %431 = vector.broadcast %cst_223 : f32 to vector<32x32xf32>
    %432 = arith.mulf %431, %405 : vector<32x32xf32>
    %cst_224 = arith.constant 0.806451618 : f32
    %433 = vector.broadcast %cst_224 : f32 to vector<32x32xf32>
    %434 = arith.mulf %433, %424 : vector<32x32xf32>
    %435 = arith.addf %432, %434 : vector<32x32xf32>
    %c0_225 = arith.constant 0 : index
    %c384 = arith.constant 384 : index
    %c0_226 = arith.constant 0 : index
    %436 = vector.load %arg12[%c0_225, %c384, %c0_226] : memref<1x1024x32xf32, #tpu.memory_space<vmem>>, vector<1x32x32xf32>
    %437 = vector.shape_cast %436 : vector<1x32x32xf32> to vector<32x32xf32>
    %438 = vector.shape_cast %435 : vector<32x32xf32> to vector<1x32x32xf32>
    tpu.vector_store %arg12[%c0_225, %c384, %c0_226], %438 {strides = array<i32>} : memref<1x1024x32xf32, #tpu.memory_space<vmem>>, vector<1x32x32xf32>,
    %cst_227 = arith.constant 0.709677398 : f32
    %439 = vector.broadcast %cst_227 : f32 to vector<32x32xf32>
    %440 = arith.mulf %439, %424 : vector<32x32xf32>
    %441 = vector.extract_strided_slice %317 {offsets = [112, 0], sizes = [16, 32], strides = [1, 1]} : vector<256x32xf32> to vector<16x32xf32>
    %442 = arith.truncf %441 : vector<16x32xf32> to vector<16x32xbf16>
    %cst_228 = arith.constant dense<0.000000e+00> : vector<32x32xf32>
    %443 = tpu.matmul %318, %442, %cst_228 {dimension_numbers = #tpu.dot_dimension_numbers<[1], [0], [0], [1], [0, 0, 1, 1], [], []>} : vector<32x16xbf16>, vector<16x32xbf16>, vector<32x32xf32> -> vector<32x32xf32>
    %cst_229 = arith.constant 0.290322572 : f32
    %444 = vector.broadcast %cst_229 : f32 to vector<32x32xf32>
    %445 = arith.mulf %444, %443 : vector<32x32xf32>
    %446 = arith.addf %440, %445 : vector<32x32xf32>
    %c0_230 = arith.constant 0 : index
    %c416 = arith.constant 416 : index
    %c0_231 = arith.constant 0 : index
    %447 = vector.load %arg12[%c0_230, %c416, %c0_231] : memref<1x1024x32xf32, #tpu.memory_space<vmem>>, vector<1x32x32xf32>
    %448 = vector.shape_cast %447 : vector<1x32x32xf32> to vector<32x32xf32>
    %449 = vector.shape_cast %446 : vector<32x32xf32> to vector<1x32x32xf32>
    tpu.vector_store %arg12[%c0_230, %c416, %c0_231], %449 {strides = array<i32>} : memref<1x1024x32xf32, #tpu.memory_space<vmem>>, vector<1x32x32xf32>,
    %cst_232 = arith.constant 0.225806445 : f32
    %450 = vector.broadcast %cst_232 : f32 to vector<32x32xf32>
    %451 = arith.mulf %450, %424 : vector<32x32xf32>
    %cst_233 = arith.constant 0.774193525 : f32
    %452 = vector.broadcast %cst_233 : f32 to vector<32x32xf32>
    %453 = arith.mulf %452, %443 : vector<32x32xf32>
    %454 = arith.addf %451, %453 : vector<32x32xf32>
    %c0_234 = arith.constant 0 : index
    %c448 = arith.constant 448 : index
    %c0_235 = arith.constant 0 : index
    %455 = vector.load %arg12[%c0_234, %c448, %c0_235] : memref<1x1024x32xf32, #tpu.memory_space<vmem>>, vector<1x32x32xf32>
    %456 = vector.shape_cast %455 : vector<1x32x32xf32> to vector<32x32xf32>
    %457 = vector.shape_cast %454 : vector<32x32xf32> to vector<1x32x32xf32>
    tpu.vector_store %arg12[%c0_234, %c448, %c0_235], %457 {strides = array<i32>} : memref<1x1024x32xf32, #tpu.memory_space<vmem>>, vector<1x32x32xf32>,
    %cst_236 = arith.constant 0.741935492 : f32
    %458 = vector.broadcast %cst_236 : f32 to vector<32x32xf32>
    %459 = arith.mulf %458, %443 : vector<32x32xf32>
    %460 = vector.extract_strided_slice %317 {offsets = [128, 0], sizes = [16, 32], strides = [1, 1]} : vector<256x32xf32> to vector<16x32xf32>
    %461 = arith.truncf %460 : vector<16x32xf32> to vector<16x32xbf16>
    %cst_237 = arith.constant dense<0.000000e+00> : vector<32x32xf32>
    %462 = tpu.matmul %318, %461, %cst_237 {dimension_numbers = #tpu.dot_dimension_numbers<[1], [0], [0], [1], [0, 0, 1, 1], [], []>} : vector<32x16xbf16>, vector<16x32xbf16>, vector<32x32xf32> -> vector<32x32xf32>
    %cst_238 = arith.constant 0.258064508 : f32
    %463 = vector.broadcast %cst_238 : f32 to vector<32x32xf32>
    %464 = arith.mulf %463, %462 : vector<32x32xf32>
    %465 = arith.addf %459, %464 : vector<32x32xf32>
    %c0_239 = arith.constant 0 : index
    %c480 = arith.constant 480 : index
    %c0_240 = arith.constant 0 : index
    %466 = vector.load %arg12[%c0_239, %c480, %c0_240] : memref<1x1024x32xf32, #tpu.memory_space<vmem>>, vector<1x32x32xf32>
    %467 = vector.shape_cast %466 : vector<1x32x32xf32> to vector<32x32xf32>
    %468 = vector.shape_cast %465 : vector<32x32xf32> to vector<1x32x32xf32>
    tpu.vector_store %arg12[%c0_239, %c480, %c0_240], %468 {strides = array<i32>} : memref<1x1024x32xf32, #tpu.memory_space<vmem>>, vector<1x32x32xf32>,
    %cst_241 = arith.constant 0.258064508 : f32
    %469 = vector.broadcast %cst_241 : f32 to vector<32x32xf32>
    %470 = arith.mulf %469, %443 : vector<32x32xf32>
    %cst_242 = arith.constant 0.741935492 : f32
    %471 = vector.broadcast %cst_242 : f32 to vector<32x32xf32>
    %472 = arith.mulf %471, %462 : vector<32x32xf32>
    %473 = arith.addf %470, %472 : vector<32x32xf32>
    %c0_243 = arith.constant 0 : index
    %c512 = arith.constant 512 : index
    %c0_244 = arith.constant 0 : index
    %474 = vector.load %arg12[%c0_243, %c512, %c0_244] : memref<1x1024x32xf32, #tpu.memory_space<vmem>>, vector<1x32x32xf32>
    %475 = vector.shape_cast %474 : vector<1x32x32xf32> to vector<32x32xf32>
    %476 = vector.shape_cast %473 : vector<32x32xf32> to vector<1x32x32xf32>
    tpu.vector_store %arg12[%c0_243, %c512, %c0_244], %476 {strides = array<i32>} : memref<1x1024x32xf32, #tpu.memory_space<vmem>>, vector<1x32x32xf32>,
    %cst_245 = arith.constant 0.774193525 : f32
    %477 = vector.broadcast %cst_245 : f32 to vector<32x32xf32>
    %478 = arith.mulf %477, %462 : vector<32x32xf32>
    %479 = vector.extract_strided_slice %317 {offsets = [144, 0], sizes = [16, 32], strides = [1, 1]} : vector<256x32xf32> to vector<16x32xf32>
    %480 = arith.truncf %479 : vector<16x32xf32> to vector<16x32xbf16>
    %cst_246 = arith.constant dense<0.000000e+00> : vector<32x32xf32>
    %481 = tpu.matmul %318, %480, %cst_246 {dimension_numbers = #tpu.dot_dimension_numbers<[1], [0], [0], [1], [0, 0, 1, 1], [], []>} : vector<32x16xbf16>, vector<16x32xbf16>, vector<32x32xf32> -> vector<32x32xf32>
    %cst_247 = arith.constant 0.225806445 : f32
    %482 = vector.broadcast %cst_247 : f32 to vector<32x32xf32>
    %483 = arith.mulf %482, %481 : vector<32x32xf32>
    %484 = arith.addf %478, %483 : vector<32x32xf32>
    %c0_248 = arith.constant 0 : index
    %c544 = arith.constant 544 : index
    %c0_249 = arith.constant 0 : index
    %485 = vector.load %arg12[%c0_248, %c544, %c0_249] : memref<1x1024x32xf32, #tpu.memory_space<vmem>>, vector<1x32x32xf32>
    %486 = vector.shape_cast %485 : vector<1x32x32xf32> to vector<32x32xf32>
    %487 = vector.shape_cast %484 : vector<32x32xf32> to vector<1x32x32xf32>
    tpu.vector_store %arg12[%c0_248, %c544, %c0_249], %487 {strides = array<i32>} : memref<1x1024x32xf32, #tpu.memory_space<vmem>>, vector<1x32x32xf32>,
    %cst_250 = arith.constant 0.290322572 : f32
    %488 = vector.broadcast %cst_250 : f32 to vector<32x32xf32>
    %489 = arith.mulf %488, %462 : vector<32x32xf32>
    %cst_251 = arith.constant 0.709677398 : f32
    %490 = vector.broadcast %cst_251 : f32 to vector<32x32xf32>
    %491 = arith.mulf %490, %481 : vector<32x32xf32>
    %492 = arith.addf %489, %491 : vector<32x32xf32>
    %c0_252 = arith.constant 0 : index
    %c576 = arith.constant 576 : index
    %c0_253 = arith.constant 0 : index
    %493 = vector.load %arg12[%c0_252, %c576, %c0_253] : memref<1x1024x32xf32, #tpu.memory_space<vmem>>, vector<1x32x32xf32>
    %494 = vector.shape_cast %493 : vector<1x32x32xf32> to vector<32x32xf32>
    %495 = vector.shape_cast %492 : vector<32x32xf32> to vector<1x32x32xf32>
    tpu.vector_store %arg12[%c0_252, %c576, %c0_253], %495 {strides = array<i32>} : memref<1x1024x32xf32, #tpu.memory_space<vmem>>, vector<1x32x32xf32>,
    %cst_254 = arith.constant 0.806451618 : f32
    %496 = vector.broadcast %cst_254 : f32 to vector<32x32xf32>
    %497 = arith.mulf %496, %481 : vector<32x32xf32>
    %498 = vector.extract_strided_slice %317 {offsets = [160, 0], sizes = [16, 32], strides = [1, 1]} : vector<256x32xf32> to vector<16x32xf32>
    %499 = arith.truncf %498 : vector<16x32xf32> to vector<16x32xbf16>
    %cst_255 = arith.constant dense<0.000000e+00> : vector<32x32xf32>
    %500 = tpu.matmul %318, %499, %cst_255 {dimension_numbers = #tpu.dot_dimension_numbers<[1], [0], [0], [1], [0, 0, 1, 1], [], []>} : vector<32x16xbf16>, vector<16x32xbf16>, vector<32x32xf32> -> vector<32x32xf32>
    %cst_256 = arith.constant 0.193548381 : f32
    %501 = vector.broadcast %cst_256 : f32 to vector<32x32xf32>
    %502 = arith.mulf %501, %500 : vector<32x32xf32>
    %503 = arith.addf %497, %502 : vector<32x32xf32>
    %c0_257 = arith.constant 0 : index
    %c608 = arith.constant 608 : index
    %c0_258 = arith.constant 0 : index
    %504 = vector.load %arg12[%c0_257, %c608, %c0_258] : memref<1x1024x32xf32, #tpu.memory_space<vmem>>, vector<1x32x32xf32>
    %505 = vector.shape_cast %504 : vector<1x32x32xf32> to vector<32x32xf32>
    %506 = vector.shape_cast %503 : vector<32x32xf32> to vector<1x32x32xf32>
    tpu.vector_store %arg12[%c0_257, %c608, %c0_258], %506 {strides = array<i32>} : memref<1x1024x32xf32, #tpu.memory_space<vmem>>, vector<1x32x32xf32>,
    %cst_259 = arith.constant 0.322580636 : f32
    %507 = vector.broadcast %cst_259 : f32 to vector<32x32xf32>
    %508 = arith.mulf %507, %481 : vector<32x32xf32>
    %cst_260 = arith.constant 0.677419364 : f32
    %509 = vector.broadcast %cst_260 : f32 to vector<32x32xf32>
    %510 = arith.mulf %509, %500 : vector<32x32xf32>
    %511 = arith.addf %508, %510 : vector<32x32xf32>
    %c0_261 = arith.constant 0 : index
    %c640 = arith.constant 640 : index
    %c0_262 = arith.constant 0 : index
    %512 = vector.load %arg12[%c0_261, %c640, %c0_262] : memref<1x1024x32xf32, #tpu.memory_space<vmem>>, vector<1x32x32xf32>
    %513 = vector.shape_cast %512 : vector<1x32x32xf32> to vector<32x32xf32>
    %514 = vector.shape_cast %511 : vector<32x32xf32> to vector<1x32x32xf32>
    tpu.vector_store %arg12[%c0_261, %c640, %c0_262], %514 {strides = array<i32>} : memref<1x1024x32xf32, #tpu.memory_space<vmem>>, vector<1x32x32xf32>,
    %cst_263 = arith.constant 0.838709652 : f32
    %515 = vector.broadcast %cst_263 : f32 to vector<32x32xf32>
    %516 = arith.mulf %515, %500 : vector<32x32xf32>
    %517 = vector.extract_strided_slice %317 {offsets = [176, 0], sizes = [16, 32], strides = [1, 1]} : vector<256x32xf32> to vector<16x32xf32>
    %518 = arith.truncf %517 : vector<16x32xf32> to vector<16x32xbf16>
    %cst_264 = arith.constant dense<0.000000e+00> : vector<32x32xf32>
    %519 = tpu.matmul %318, %518, %cst_264 {dimension_numbers = #tpu.dot_dimension_numbers<[1], [0], [0], [1], [0, 0, 1, 1], [], []>} : vector<32x16xbf16>, vector<16x32xbf16>, vector<32x32xf32> -> vector<32x32xf32>
    %cst_265 = arith.constant 0.161290318 : f32
    %520 = vector.broadcast %cst_265 : f32 to vector<32x32xf32>
    %521 = arith.mulf %520, %519 : vector<32x32xf32>
    %522 = arith.addf %516, %521 : vector<32x32xf32>
    %c0_266 = arith.constant 0 : index
    %c672 = arith.constant 672 : index
    %c0_267 = arith.constant 0 : index
    %523 = vector.load %arg12[%c0_266, %c672, %c0_267] : memref<1x1024x32xf32, #tpu.memory_space<vmem>>, vector<1x32x32xf32>
    %524 = vector.shape_cast %523 : vector<1x32x32xf32> to vector<32x32xf32>
    %525 = vector.shape_cast %522 : vector<32x32xf32> to vector<1x32x32xf32>
    tpu.vector_store %arg12[%c0_266, %c672, %c0_267], %525 {strides = array<i32>} : memref<1x1024x32xf32, #tpu.memory_space<vmem>>, vector<1x32x32xf32>,
    %cst_268 = arith.constant 0.354838699 : f32
    %526 = vector.broadcast %cst_268 : f32 to vector<32x32xf32>
    %527 = arith.mulf %526, %500 : vector<32x32xf32>
    %cst_269 = arith.constant 0.645161271 : f32
    %528 = vector.broadcast %cst_269 : f32 to vector<32x32xf32>
    %529 = arith.mulf %528, %519 : vector<32x32xf32>
    %530 = arith.addf %527, %529 : vector<32x32xf32>
    %c0_270 = arith.constant 0 : index
    %c704 = arith.constant 704 : index
    %c0_271 = arith.constant 0 : index
    %531 = vector.load %arg12[%c0_270, %c704, %c0_271] : memref<1x1024x32xf32, #tpu.memory_space<vmem>>, vector<1x32x32xf32>
    %532 = vector.shape_cast %531 : vector<1x32x32xf32> to vector<32x32xf32>
    %533 = vector.shape_cast %530 : vector<32x32xf32> to vector<1x32x32xf32>
    tpu.vector_store %arg12[%c0_270, %c704, %c0_271], %533 {strides = array<i32>} : memref<1x1024x32xf32, #tpu.memory_space<vmem>>, vector<1x32x32xf32>,
    %cst_272 = arith.constant 0.870967745 : f32
    %534 = vector.broadcast %cst_272 : f32 to vector<32x32xf32>
    %535 = arith.mulf %534, %519 : vector<32x32xf32>
    %536 = vector.extract_strided_slice %317 {offsets = [192, 0], sizes = [16, 32], strides = [1, 1]} : vector<256x32xf32> to vector<16x32xf32>
    %537 = arith.truncf %536 : vector<16x32xf32> to vector<16x32xbf16>
    %cst_273 = arith.constant dense<0.000000e+00> : vector<32x32xf32>
    %538 = tpu.matmul %318, %537, %cst_273 {dimension_numbers = #tpu.dot_dimension_numbers<[1], [0], [0], [1], [0, 0, 1, 1], [], []>} : vector<32x16xbf16>, vector<16x32xbf16>, vector<32x32xf32> -> vector<32x32xf32>
    %cst_274 = arith.constant 0.129032254 : f32
    %539 = vector.broadcast %cst_274 : f32 to vector<32x32xf32>
    %540 = arith.mulf %539, %538 : vector<32x32xf32>
    %541 = arith.addf %535, %540 : vector<32x32xf32>
    %c0_275 = arith.constant 0 : index
    %c736 = arith.constant 736 : index
    %c0_276 = arith.constant 0 : index
    %542 = vector.load %arg12[%c0_275, %c736, %c0_276] : memref<1x1024x32xf32, #tpu.memory_space<vmem>>, vector<1x32x32xf32>
    %543 = vector.shape_cast %542 : vector<1x32x32xf32> to vector<32x32xf32>
    %544 = vector.shape_cast %541 : vector<32x32xf32> to vector<1x32x32xf32>
    tpu.vector_store %arg12[%c0_275, %c736, %c0_276], %544 {strides = array<i32>} : memref<1x1024x32xf32, #tpu.memory_space<vmem>>, vector<1x32x32xf32>,
    %cst_277 = arith.constant 0.387096763 : f32
    %545 = vector.broadcast %cst_277 : f32 to vector<32x32xf32>
    %546 = arith.mulf %545, %519 : vector<32x32xf32>
    %cst_278 = arith.constant 0.612903237 : f32
    %547 = vector.broadcast %cst_278 : f32 to vector<32x32xf32>
    %548 = arith.mulf %547, %538 : vector<32x32xf32>
    %549 = arith.addf %546, %548 : vector<32x32xf32>
    %c0_279 = arith.constant 0 : index
    %c768 = arith.constant 768 : index
    %c0_280 = arith.constant 0 : index
    %550 = vector.load %arg12[%c0_279, %c768, %c0_280] : memref<1x1024x32xf32, #tpu.memory_space<vmem>>, vector<1x32x32xf32>
    %551 = vector.shape_cast %550 : vector<1x32x32xf32> to vector<32x32xf32>
    %552 = vector.shape_cast %549 : vector<32x32xf32> to vector<1x32x32xf32>
    tpu.vector_store %arg12[%c0_279, %c768, %c0_280], %552 {strides = array<i32>} : memref<1x1024x32xf32, #tpu.memory_space<vmem>>, vector<1x32x32xf32>,
    %cst_281 = arith.constant 0.903225779 : f32
    %553 = vector.broadcast %cst_281 : f32 to vector<32x32xf32>
    %554 = arith.mulf %553, %538 : vector<32x32xf32>
    %555 = vector.extract_strided_slice %317 {offsets = [208, 0], sizes = [16, 32], strides = [1, 1]} : vector<256x32xf32> to vector<16x32xf32>
    %556 = arith.truncf %555 : vector<16x32xf32> to vector<16x32xbf16>
    %cst_282 = arith.constant dense<0.000000e+00> : vector<32x32xf32>
    %557 = tpu.matmul %318, %556, %cst_282 {dimension_numbers = #tpu.dot_dimension_numbers<[1], [0], [0], [1], [0, 0, 1, 1], [], []>} : vector<32x16xbf16>, vector<16x32xbf16>, vector<32x32xf32> -> vector<32x32xf32>
    %cst_283 = arith.constant 0.0967741906 : f32
    %558 = vector.broadcast %cst_283 : f32 to vector<32x32xf32>
    %559 = arith.mulf %558, %557 : vector<32x32xf32>
    %560 = arith.addf %554, %559 : vector<32x32xf32>
    %c0_284 = arith.constant 0 : index
    %c800 = arith.constant 800 : index
    %c0_285 = arith.constant 0 : index
    %561 = vector.load %arg12[%c0_284, %c800, %c0_285] : memref<1x1024x32xf32, #tpu.memory_space<vmem>>, vector<1x32x32xf32>
    %562 = vector.shape_cast %561 : vector<1x32x32xf32> to vector<32x32xf32>
    %563 = vector.shape_cast %560 : vector<32x32xf32> to vector<1x32x32xf32>
    tpu.vector_store %arg12[%c0_284, %c800, %c0_285], %563 {strides = array<i32>} : memref<1x1024x32xf32, #tpu.memory_space<vmem>>, vector<1x32x32xf32>,
    %cst_286 = arith.constant 0.419354826 : f32
    %564 = vector.broadcast %cst_286 : f32 to vector<32x32xf32>
    %565 = arith.mulf %564, %538 : vector<32x32xf32>
    %cst_287 = arith.constant 0.580645144 : f32
    %566 = vector.broadcast %cst_287 : f32 to vector<32x32xf32>
    %567 = arith.mulf %566, %557 : vector<32x32xf32>
    %568 = arith.addf %565, %567 : vector<32x32xf32>
    %c0_288 = arith.constant 0 : index
    %c832 = arith.constant 832 : index
    %c0_289 = arith.constant 0 : index
    %569 = vector.load %arg12[%c0_288, %c832, %c0_289] : memref<1x1024x32xf32, #tpu.memory_space<vmem>>, vector<1x32x32xf32>
    %570 = vector.shape_cast %569 : vector<1x32x32xf32> to vector<32x32xf32>
    %571 = vector.shape_cast %568 : vector<32x32xf32> to vector<1x32x32xf32>
    tpu.vector_store %arg12[%c0_288, %c832, %c0_289], %571 {strides = array<i32>} : memref<1x1024x32xf32, #tpu.memory_space<vmem>>, vector<1x32x32xf32>,
    %cst_290 = arith.constant 0.935483872 : f32
    %572 = vector.broadcast %cst_290 : f32 to vector<32x32xf32>
    %573 = arith.mulf %572, %557 : vector<32x32xf32>
    %574 = vector.extract_strided_slice %317 {offsets = [224, 0], sizes = [16, 32], strides = [1, 1]} : vector<256x32xf32> to vector<16x32xf32>
    %575 = arith.truncf %574 : vector<16x32xf32> to vector<16x32xbf16>
    %cst_291 = arith.constant dense<0.000000e+00> : vector<32x32xf32>
    %576 = tpu.matmul %318, %575, %cst_291 {dimension_numbers = #tpu.dot_dimension_numbers<[1], [0], [0], [1], [0, 0, 1, 1], [], []>} : vector<32x16xbf16>, vector<16x32xbf16>, vector<32x32xf32> -> vector<32x32xf32>
    %cst_292 = arith.constant 0.0645161271 : f32
    %577 = vector.broadcast %cst_292 : f32 to vector<32x32xf32>
    %578 = arith.mulf %577, %576 : vector<32x32xf32>
    %579 = arith.addf %573, %578 : vector<32x32xf32>
    %c0_293 = arith.constant 0 : index
    %c864 = arith.constant 864 : index
    %c0_294 = arith.constant 0 : index
    %580 = vector.load %arg12[%c0_293, %c864, %c0_294] : memref<1x1024x32xf32, #tpu.memory_space<vmem>>, vector<1x32x32xf32>
    %581 = vector.shape_cast %580 : vector<1x32x32xf32> to vector<32x32xf32>
    %582 = vector.shape_cast %579 : vector<32x32xf32> to vector<1x32x32xf32>
    tpu.vector_store %arg12[%c0_293, %c864, %c0_294], %582 {strides = array<i32>} : memref<1x1024x32xf32, #tpu.memory_space<vmem>>, vector<1x32x32xf32>,
    %cst_295 = arith.constant 0.45161289 : f32
    %583 = vector.broadcast %cst_295 : f32 to vector<32x32xf32>
    %584 = arith.mulf %583, %557 : vector<32x32xf32>
    %cst_296 = arith.constant 0.54838711 : f32
    %585 = vector.broadcast %cst_296 : f32 to vector<32x32xf32>
    %586 = arith.mulf %585, %576 : vector<32x32xf32>
    %587 = arith.addf %584, %586 : vector<32x32xf32>
    %c0_297 = arith.constant 0 : index
    %c896 = arith.constant 896 : index
    %c0_298 = arith.constant 0 : index
    %588 = vector.load %arg12[%c0_297, %c896, %c0_298] : memref<1x1024x32xf32, #tpu.memory_space<vmem>>, vector<1x32x32xf32>
    %589 = vector.shape_cast %588 : vector<1x32x32xf32> to vector<32x32xf32>
    %590 = vector.shape_cast %587 : vector<32x32xf32> to vector<1x32x32xf32>
    tpu.vector_store %arg12[%c0_297, %c896, %c0_298], %590 {strides = array<i32>} : memref<1x1024x32xf32, #tpu.memory_space<vmem>>, vector<1x32x32xf32>,
    %cst_299 = arith.constant 0.967741906 : f32
    %591 = vector.broadcast %cst_299 : f32 to vector<32x32xf32>
    %592 = arith.mulf %591, %576 : vector<32x32xf32>
    %593 = vector.extract_strided_slice %317 {offsets = [240, 0], sizes = [16, 32], strides = [1, 1]} : vector<256x32xf32> to vector<16x32xf32>
    %594 = arith.truncf %593 : vector<16x32xf32> to vector<16x32xbf16>
    %cst_300 = arith.constant dense<0.000000e+00> : vector<32x32xf32>
    %595 = tpu.matmul %318, %594, %cst_300 {dimension_numbers = #tpu.dot_dimension_numbers<[1], [0], [0], [1], [0, 0, 1, 1], [], []>} : vector<32x16xbf16>, vector<16x32xbf16>, vector<32x32xf32> -> vector<32x32xf32>
    %cst_301 = arith.constant 0.0322580636 : f32
    %596 = vector.broadcast %cst_301 : f32 to vector<32x32xf32>
    %597 = arith.mulf %596, %595 : vector<32x32xf32>
    %598 = arith.addf %592, %597 : vector<32x32xf32>
    %c0_302 = arith.constant 0 : index
    %c928 = arith.constant 928 : index
    %c0_303 = arith.constant 0 : index
    %599 = vector.load %arg12[%c0_302, %c928, %c0_303] : memref<1x1024x32xf32, #tpu.memory_space<vmem>>, vector<1x32x32xf32>
    %600 = vector.shape_cast %599 : vector<1x32x32xf32> to vector<32x32xf32>
    %601 = vector.shape_cast %598 : vector<32x32xf32> to vector<1x32x32xf32>
    tpu.vector_store %arg12[%c0_302, %c928, %c0_303], %601 {strides = array<i32>} : memref<1x1024x32xf32, #tpu.memory_space<vmem>>, vector<1x32x32xf32>,
    %cst_304 = arith.constant 0.483870953 : f32
    %602 = vector.broadcast %cst_304 : f32 to vector<32x32xf32>
    %603 = arith.mulf %602, %576 : vector<32x32xf32>
    %cst_305 = arith.constant 5.161290e-01 : f32
    %604 = vector.broadcast %cst_305 : f32 to vector<32x32xf32>
    %605 = arith.mulf %604, %595 : vector<32x32xf32>
    %606 = arith.addf %603, %605 : vector<32x32xf32>
    %c0_306 = arith.constant 0 : index
    %c960 = arith.constant 960 : index
    %c0_307 = arith.constant 0 : index
    %607 = vector.load %arg12[%c0_306, %c960, %c0_307] : memref<1x1024x32xf32, #tpu.memory_space<vmem>>, vector<1x32x32xf32>
    %608 = vector.shape_cast %607 : vector<1x32x32xf32> to vector<32x32xf32>
    %609 = vector.shape_cast %606 : vector<32x32xf32> to vector<1x32x32xf32>
    tpu.vector_store %arg12[%c0_306, %c960, %c0_307], %609 {strides = array<i32>} : memref<1x1024x32xf32, #tpu.memory_space<vmem>>, vector<1x32x32xf32>,
    %cst_308 = arith.constant 0.000000e+00 : f32
    %610 = vector.broadcast %cst_308 : f32 to vector<32x32xf32>
    %611 = arith.mulf %610, %576 : vector<32x32xf32>
    %cst_309 = arith.constant 1.000000e+00 : f32
    %612 = vector.broadcast %cst_309 : f32 to vector<32x32xf32>
    %613 = arith.mulf %612, %595 : vector<32x32xf32>
    %614 = arith.addf %611, %613 : vector<32x32xf32>
    %c0_310 = arith.constant 0 : index
    %c992 = arith.constant 992 : index
    %c0_311 = arith.constant 0 : index
    %615 = vector.load %arg12[%c0_310, %c992, %c0_311] : memref<1x1024x32xf32, #tpu.memory_space<vmem>>, vector<1x32x32xf32>
    %616 = vector.shape_cast %615 : vector<1x32x32xf32> to vector<32x32xf32>
    %617 = vector.shape_cast %614 : vector<32x32xf32> to vector<1x32x32xf32>
    tpu.vector_store %arg12[%c0_310, %c992, %c0_311], %617 {strides = array<i32>} : memref<1x1024x32xf32, #tpu.memory_space<vmem>>, vector<1x32x32xf32>,
    return
  }
  func.func @transform_0(%arg0: i32) -> (i32, i32, i32) {
    %c0_i32 = arith.constant 0 : i32
    %c0_i32_0 = arith.constant 0 : i32
    %c0_i32_1 = arith.constant 0 : i32
    return %arg0, %c0_i32, %c0_i32_0 : i32, i32, i32
  }
  func.func @transform_1(%arg0: i32) -> (i32, i32, i32) {
    %c0_i32 = arith.constant 0 : i32
    %c0_i32_0 = arith.constant 0 : i32
    %c0_i32_1 = arith.constant 0 : i32
    %c0_i32_2 = arith.constant 0 : i32
    return %c0_i32, %c0_i32_0, %c0_i32_1 : i32, i32, i32
  }
  func.func @transform_2(%arg0: i32) -> (i32, i32) {
    %c0_i32 = arith.constant 0 : i32
    %c0_i32_0 = arith.constant 0 : i32
    %c0_i32_1 = arith.constant 0 : i32
    return %c0_i32, %c0_i32_0 : i32, i32
  }
  func.func @transform_3(%arg0: i32) -> (i32, i32) {
    %c0_i32 = arith.constant 0 : i32
    %c0_i32_0 = arith.constant 0 : i32
    %c0_i32_1 = arith.constant 0 : i32
    return %c0_i32, %c0_i32_0 : i32, i32
  }
  func.func @transform_4(%arg0: i32) -> (i32, i32) {
    %c0_i32 = arith.constant 0 : i32
    %c0_i32_0 = arith.constant 0 : i32
    %c0_i32_1 = arith.constant 0 : i32
    return %c0_i32, %c0_i32_0 : i32, i32
  }
  func.func @transform_5(%arg0: i32) -> (i32, i32) {
    %c0_i32 = arith.constant 0 : i32
    %c0_i32_0 = arith.constant 0 : i32
    %c0_i32_1 = arith.constant 0 : i32
    return %c0_i32, %c0_i32_0 : i32, i32
  }
  func.func @transform_6(%arg0: i32) -> (i32, i32, i32) {
    %c0_i32 = arith.constant 0 : i32
    %c0_i32_0 = arith.constant 0 : i32
    %c0_i32_1 = arith.constant 0 : i32
    %c0_i32_2 = arith.constant 0 : i32
    return %c0_i32, %c0_i32_0, %c0_i32_1 : i32, i32, i32
  }
  func.func @transform_7(%arg0: i32) -> (i32, i32) {
    %c0_i32 = arith.constant 0 : i32
    %c0_i32_0 = arith.constant 0 : i32
    %c0_i32_1 = arith.constant 0 : i32
    return %c0_i32, %c0_i32_0 : i32, i32
  }
  func.func @transform_8(%arg0: i32) -> (i32, i32) {
    %c0_i32 = arith.constant 0 : i32
    %c0_i32_0 = arith.constant 0 : i32
    %c0_i32_1 = arith.constant 0 : i32
    return %c0_i32, %c0_i32_0 : i32, i32
  }
  func.func @transform_9(%arg0: i32) -> (i32, i32) {
    %c0_i32 = arith.constant 0 : i32
    %c0_i32_0 = arith.constant 0 : i32
    %c0_i32_1 = arith.constant 0 : i32
    return %c0_i32, %c0_i32_0 : i32, i32
  }
  func.func @transform_10(%arg0: i32) -> (i32, i32) {
    %c0_i32 = arith.constant 0 : i32
    %c0_i32_0 = arith.constant 0 : i32
    %c0_i32_1 = arith.constant 0 : i32
    return %c0_i32, %c0_i32_0 : i32, i32
  }
  func.func @transform_11(%arg0: i32) -> (i32, i32, i32) {
    %c0_i32 = arith.constant 0 : i32
    %c0_i32_0 = arith.constant 0 : i32
    %c0_i32_1 = arith.constant 0 : i32
    return %arg0, %c0_i32, %c0_i32_0 : i32, i32, i32
  }
}

</mosaic_0001>

<bundles_post_ra>
// kernel: tpu_custom_call.1
= control target key start
LH: loop header
LB: loop body
LE: loop exit
PB: predicated region body
PF: predicated region fallthrough
CT: control target
= control target key end

     0   :  { %s10084_s17 = smov 0   ;;  %s13267_s0 = inlined_call_operand.vmem [shape: bf16[2,64,16], index: 0, kind: input, shape index: {}]   ;;  %s13268_s1 = inlined_call_operand.vmem [shape: bf16[3,48,32], index: 1, kind: input, shape index: {}]   ;;  %s13269_s2 = inlined_call_operand.vmem [shape: f32[32,32], index: 2, kind: input, shape index: {}]   ;;  %s13270_s3 = inlined_call_operand.vmem [shape: f32[1,32], index: 3, kind: input, shape index: {}]   ;;  %s13271_s4 = inlined_call_operand.vmem [shape: f32[1,32], index: 4, kind: input, shape index: {}]   ;;  %s13272_s5 = inlined_call_operand.vmem [shape: bf16[16,8], index: 5, kind: input, shape index: {}]   ;;  %s13273_s6 = inlined_call_operand.vmem [shape: bf16[3,96,32], index: 6, kind: input, shape index: {}]   ;;  %s13274_s7 = inlined_call_operand.vmem [shape: f32[32,32], index: 7, kind: input, shape index: {}]   ;;  %s13275_s8 = inlined_call_operand.vmem [shape: f32[1,32], index: 8, kind: input, shape index: {}]   ;;  %s13276_s9 = inlined_call_operand.vmem [shape: f32[1,32], index: 9, kind: input, shape index: {}]   ;;  %s13277_s10 = inlined_call_operand.vmem [shape: bf16[32,16], index: 10, kind: input, shape index: {}]   ;;  %s13278_s11 = inlined_call_operand.vmem [shape: f32[2,1024,32], index: 11, kind: output, shape index: {}]  }
   0x1 LB: > { %s8138_s18 = sadd.s32 4294967295, %s10016_s17   ;;  %p8142_p0 = scmp.ge.s32.totalorder %s10016_s17, 1  ;;  %s10016_s17 = sphi %s10084_s17, %s21_s17  }
   0x2   : > { %p337_p1 = scmp.lt.s32.totalorder %s10016_s17, 3 }
   0x4   : > { %p338_p2 = pnand %p8142_p0, %p337_p1 }
   0x6   : > { %341 = sbr.rel (%p338_p2) target bundleno = 2810 (0xafa), region = 64 }
   0xd   : > { %p377_p3 = scmp.lt.s32.totalorder %s8138_s18, 1  ;;  %vm13292_vm0 = vcmask 130048   ;;  %v424_v0 = vlaneseq  ;;  %v13279_v1 = vmov 0.0   ;;  %v9976_v2 = vld [vmem:[%s13268_s1 + $0x18] sm:$0xff]   ;;  %v9977_v13 = vld [vmem:[%s13268_s1 + $0x20] sm:$0xff]   ;;  %vm13300_vm1 = vcmask 261120  }
   0xe   : > { %391 = vst.msk [vmem:[#allocation2 + $0x50] sm:$0xff] %vm13292_vm0, %v13279_v1  ;;  %389 = vst.msk [vmem:[#allocation2] sm:$0xff] %vm13292_vm0, %v13279_v1  ;;  %8609 = vmatprep.subr.bf16.mxu0 %v9976_v2  ;;  %v9978_v25 = vld [vmem:[%s13268_s1 + $0x28] sm:$0xff]   ;;  %s10019_s29 = smov 16   ;;  %s10020_s30 = smov 32   ;;  %vm807_vm14 = vcmask 392192  }
   0xf   : > { %390 = vst.msk [vmem:[#allocation2 + $0x8] sm:$0xff] %vm13292_vm0, %v13279_v1  ;;  %392 = vst.msk [vmem:[#allocation2 + $0x58] sm:$0xff] %vm13292_vm0, %v13279_v1  ;;  %s14111_s18 = smov (!%p377_p3, %s8138_s18), 1  ;;  %v10105_v3 = vshrl.u32 %v424_v0, 7  ;;  %8610 = vmatpush3.bf16.msra.mxu0 %v9976_v2  ;;  %s10023_s20 = smov 64  }
  0x10   : > { %s8317_s21 = sshll.u32 %s14111_s18, 5  ;;  %8611 = vmatprep.subr.bf16.mxu0 %v9977_v13  ;;  %394 = vst.msk [vmem:[#allocation3] sm:$0xff] %vm13300_vm1, %v13279_v1  ;;  %395 = vst.msk [vmem:[#allocation3 + $0x8] sm:$0xff] %vm13300_vm1, %v13279_v1  ;;  %s8318_s27 = sshll.u32 %s14111_s18, 10 }
  0x11   : > { %13395 = vst [vmem:[#allocation4_spill] sm:$0xff] %v10105_v3  ;;  %s381_s24 = scalar_lea.vmem %s13267_s0, %s8317_s21  ;;  %v10112_v6 = vadd.s32 8, %v10105_v3  ;;  %v10118_v14 = vadd.s32 16, %v10105_v3  ;;  %v10121_v15 = vadd.s32 24, %v10105_v3  ;;  %v437_v19 = vand.u32 7, %v10105_v3  ;;  %396 = vst.msk [vmem:[#allocation3 + $0x10] sm:$0xff] %vm13300_vm1, %v13279_v1  ;;  %s12924_s12 = scalar_lea.vmem %s13278_s11, %s8318_s27 }
  0x12   : > { %v8320_v4 = vld [vmem:[%s381_s24] sm:$0xff]   ;;  %v8335_v5 = vld [vmem:[%s381_s24 + $0x8] sm:$0xff]   ;;  %v8336_v11 = vld [vmem:[%s381_s24 + $0x10] sm:$0xff]   ;;  %v10136_v24 = vadd.s32 32, %v10105_v3  ;;  %397 = vst.msk [vmem:[#allocation3 + $0x118] sm:$0xff] %vm13300_vm1, %v13279_v1  ;;  %v10154_v26 = vadd.s32 40, %v10105_v3 }
  0x13   : > { %v8321_v7 = vunpack.c.l.bf16 %v8320_v4  ;;  %v8322_v8 = vunpack.c.h.bf16 %v8320_v4  ;;  %v8325_v9 = vunpack.c.l.bf16 %v8335_v5  ;;  %v8326_v10 = vunpack.c.h.bf16 %v8335_v5  ;;  %v8337_v12 = vld [vmem:[%s381_s24 + $0x18] sm:$0xff]   ;;  %8612 = vmatpush3.bf16.msra.mxu0 %v9977_v13  ;;  %398 = vst.msk [vmem:[#allocation3 + $0x120] sm:$0xff] %vm13300_vm1, %v13279_v1  ;;  %399 = vst.msk [vmem:[#allocation3 + $0x128] sm:$0xff] %vm13300_vm1, %v13279_v1 }
  0x14   : > { %v8329_v16 = vunpack.c.l.bf16 %v8336_v11  ;;  %v8330_v17 = vunpack.c.h.bf16 %v8336_v11  ;;  %v8333_v18 = vunpack.c.l.bf16 %v8337_v12  ;;  %v8334_v20 = vunpack.c.h.bf16 %v8337_v12  ;;  %13396 = vst [vmem:[#allocation5_spill] sm:$0xff] %v10136_v24  ;;  %8613 = vmatprep.subr.bf16.mxu0 %v9978_v25 }
  0x15   : > { %416 = vst.msk [vmem:[#allocation2 + $0x10] sm:$0xff] %vm13292_vm0, %v8321_v7  ;;  %417 = vst.msk [vmem:[#allocation2 + $0x18] sm:$0xff] %vm13292_vm0, %v8322_v8  ;;  %v444_v21 = vand.u32 7, %v10112_v6  ;;  %v451_v22 = vand.u32 7, %v10118_v14  ;;  %v458_v23 = vand.u32 7, %v10121_v15  ;;  %v10157_v27 = vadd.s32 48, %v10105_v3 }
  0x16   : > { %418 = vst.msk [vmem:[#allocation2 + $0x20] sm:$0xff] %vm13292_vm0, %v8325_v9  ;;  %419 = vst.msk [vmem:[#allocation2 + $0x28] sm:$0xff] %vm13292_vm0, %v8326_v10  ;;  %vm10161_vm2 = vcmp.le.s32.totalorder %v437_v19, 6  ;;  %v10166_v29 = vadd.s32 56, %v10105_v3  ;;  %v465_v41 = vand.u32 7, %v10136_v24  ;;  %v472_v42 = vand.u32 7, %v10154_v26 }
  0x17   : > { %420 = vst.msk [vmem:[#allocation2 + $0x30] sm:$0xff] %vm13292_vm0, %v8329_v16  ;;  %421 = vst.msk [vmem:[#allocation2 + $0x38] sm:$0xff] %vm13292_vm0, %v8330_v17  ;;  %vm10170_vm3 = vcmp.le.s32.totalorder %v444_v21, 6  ;;  %8614 = vmatpush3.bf16.msra.mxu0 %v9978_v25  ;;  %vm10178_vm4 = vcmp.le.s32.totalorder %v451_v22, 6  ;;  %vm10184_vm5 = vcmp.le.s32.totalorder %v458_v23, 6  ;;  %v479_v46 = vand.u32 7, %v10157_v27 }
  0x18   : > { %422 = vst.msk [vmem:[#allocation2 + $0x40] sm:$0xff] %vm13292_vm0, %v8333_v18  ;;  %423 = vst.msk [vmem:[#allocation2 + $0x48] sm:$0xff] %vm13292_vm0, %v8334_v20  ;;  %v486_v47 = vand.u32 7, %v10166_v29  ;;  %vm10214_vm6 = vcmp.le.s32.totalorder %v465_v41, 6  ;;  %vm10220_vm7 = vcmp.le.s32.totalorder %v472_v42, 6  ;;  %v10245_v8 = vld [vmem:[%s13268_s1] sm:$0xff]  }
  0x19   : > { %vm10227_vm8 = vcmp.le.s32.totalorder %v479_v46, 6  ;;  %8623 = vmatprep.subr.bf16.mxu0 %v10245_v8  ;;  %v577_v13 = vld [vmem:[#allocation2 + $0x8] sm:$0xff]  ;;  %v1003_v33 = vld [vmem:[#allocation2 + $0x50] sm:$0xff]  ;;  %vm10310_vm10 = vcmp.ge.s32.totalorder %v437_v19, 1  ;;  %vm10316_vm11 = vcmp.ge.s32.totalorder %v444_v21, 1  ;;  %vm10326_vm12 = vcmp.ge.s32.totalorder %v458_v23, 1 }
  0x1a   : > { %vm10233_vm9 = vcmp.le.s32.totalorder %v486_v47, 6  ;;  %vm10346_vm13 = vcmp.ge.s32.totalorder %v451_v22, 1  ;;  %vm10377_vm15 = vcmp.ge.s32.totalorder %v472_v42, 1 }
  0x1c   : > { %v578_v31 = vld [vmem:[#allocation2 + $0x10] sm:$0xff]  ;;  %v10174_v32 = vld [vmem:[#allocation2 + $0x18] sm:$0xff] }
  0x1d   : > { %v586_v34 = vld [vmem:[#allocation2 + $0x11] sm:$0xff]  ;;  %v9471_v36 = vpack.i.bf16 %v10174_v32, %v578_v31  ;;  %v10189_v37 = vld [vmem:[#allocation2 + $0x19] sm:$0xff]  ;;  %v581_v40 = vld [vmem:[#allocation2 + $0x28] sm:$0xff]  ;;  %v9511_v25 = vpack.i.bf16 %v10174_v32, %v577_v13 }
  0x1e   : > { %v718_v38 = vsel %vm10161_vm2, %v586_v34, 0.0  ;;  %v580_v39 = vld [vmem:[#allocation2 + $0x20] sm:$0xff]  ;;  %v719_v43 = vsel %vm10170_vm3, %v10189_v37, 0.0  ;;  %v10200_v45 = vld [vmem:[#allocation2 + $0x29] sm:$0xff]  ;;  %v583_v53 = vld [vmem:[#allocation2 + $0x38] sm:$0xff]  ;;  %v610_v17 = vsel %vm10170_vm3, %v586_v34, 0.0 }
  0x1f   : > { %v10198_v44 = vld [vmem:[#allocation2 + $0x21] sm:$0xff]  ;;  %9472 = vrot.lane.b32.xlu0 %v9471_v36, %s10019_s29  ;;  %v9486_v48 = vpack.i.bf16 %v719_v43, %v718_v38  ;;  %v9476_v49 = vpack.i.bf16 %v581_v40, %v580_v39  ;;  %v721_v51 = vsel %vm10184_vm5, %v10200_v45, 0.0  ;;  %v582_v52 = vld [vmem:[#allocation2 + $0x30] sm:$0xff]  ;;  %v591_v58 = vld [vmem:[#allocation2 + $0x39] sm:$0xff]  ;;  %v611_v20 = vsel %vm10178_vm4, %v10189_v37, 0.0 }
  0x20   : > { %v720_v50 = vsel %vm10178_vm4, %v10198_v44, 0.0  ;;  %v590_v57 = vld [vmem:[#allocation2 + $0x31] sm:$0xff]  ;;  %v584_v59 = vld [vmem:[#allocation2 + $0x40] sm:$0xff]  ;;  %v716_v60 = vld [vmem:[#allocation2 + $0x48] sm:$0xff]  ;;  %v9481_v61 = vpack.i.bf16 %v583_v53, %v582_v52  ;;  %v723_v5 = vsel %vm10220_vm7, %v591_v58, 0.0  ;;  %v612_v31 = vsel %vm10184_vm5, %v10198_v44, 0.0 }
  0x21   : > { %9487 = vrot.lane.b32.xlu1 %v9486_v48, %s10020_s30  ;;  %v9491_v54 = vpack.i.bf16 %v721_v51, %v720_v50  ;;  %v592_v0 = vld [vmem:[#allocation2 + $0x41] sm:$0xff]  ;;  %v717_v2 = vld [vmem:[#allocation2 + $0x49] sm:$0xff]  ;;  %v722_v4 = vsel %vm10214_vm6, %v590_v57, 0.0  ;;  %v9496_v7 = vpack.i.bf16 %v716_v60, %v584_v59  ;;  %v613_v34 = vsel %vm10214_vm6, %v10200_v45, 0.0  ;;  %v10322_v59 = vld [vmem:[#allocation2 + $0x17] sm:$0xff] }
  0x22   : > { %v724_v9 = vsel %vm10227_vm8, %v592_v0, 0.0  ;;  %v725_v10 = vsel %vm10233_vm9, %v717_v2, 0.0  ;;  %v9501_v11 = vpack.i.bf16 %v723_v5, %v722_v4  ;;  %v585_v12 = vld [vmem:[#allocation2 + $0x9] sm:$0xff]  ;;  %v614_v38 = vsel %vm10220_vm7, %v590_v57, 0.0  ;;  %v10334_v21 = vld [vmem:[#allocation2 + $0x1f] sm:$0xff] }
  0x23   : > { %9477 = vrot.lane.b32.xlu0 %v9476_v49, %s10019_s29  ;;  %v9506_v16 = vpack.i.bf16 %v725_v10, %v724_v9  ;;  %v609_v18 = vsel %vm10161_vm2, %v585_v12, 0.0  ;;  %v9521_v39 = vpack.i.bf16 %v612_v31, %v611_v20  ;;  %v615_v32 = vsel %vm10227_vm8, %v591_v58, 0.0  ;;  %v10336_v63 = vld [vmem:[#allocation2 + $0x27] sm:$0xff] }
  0x24   : > { %v9516_v36 = vpack.i.bf16 %v610_v17, %v609_v18  ;;  %v616_v40 = vsel %vm10233_vm9, %v592_v0, 0.0  ;;  %v9526_v43 = vpack.i.bf16 %v614_v38, %v613_v34  ;;  %v1012_v50 = vsel %vm10161_vm2, %v10189_v37, 0.0  ;;  %v1011_v37 = vld [vmem:[#allocation2 + $0x51] sm:$0xff]  ;;  %v9984_v60 = vld [vmem:[%s13268_s1 + $0x40] sm:$0xff]  }
  0x25   : > { %9492 = vrot.lane.b32.xlu1 %v9491_v54, %s10020_s30  ;;  %v9531_v48 = vpack.i.bf16 %v616_v40, %v615_v32  ;;  %v1013_v51 = vsel %vm10170_vm3, %v10198_v44, 0.0  ;;  %v1014_v52 = vsel %vm10178_vm4, %v10200_v45, 0.0  ;;  %v1015_v53 = vsel %vm10184_vm5, %v590_v57, 0.0  ;;  %v10381_v32 = vld [vmem:[#allocation2 + $0x2f] sm:$0xff]  ;;  %v10383_v40 = vld [vmem:[#allocation2 + $0x37] sm:$0xff] }
  0x26   : > { %v9546_v54 = vpack.i.bf16 %v1013_v51, %v1012_v50  ;;  %v9551_v28 = vpack.i.bf16 %v1015_v53, %v1014_v52  ;;  %v1016_v30 = vsel %vm10214_vm6, %v591_v58, 0.0  ;;  %v1017_v44 = vsel %vm10220_vm7, %v592_v0, 0.0  ;;  %v10320_v58 = vld [vmem:[#allocation2 + $0xf] sm:$0xff] }
  0x27   : > { %9482 = vrot.lane.b32.xlu0 %v9481_v61, %s10019_s29  ;;  %v1018_v35 = vsel %vm10227_vm8, %v717_v2, 0.0  ;;  %v1019_v45 = vsel %vm10233_vm9, %v1011_v37, 0.0  ;;  %v708_v0 = vsel %vm10310_vm10, %v10320_v58, 0.0  ;;  %v709_v23 = vsel %vm10316_vm11, %v10322_v59, 0.0 }
  0x28   : > { %v9566_v57 = vpack.i.bf16 %v1019_v45, %v1018_v35  ;;  %v710_v9 = vsel %vm10346_vm13, %v10334_v21, 0.0  ;;  %v711_v10 = vsel %vm10326_vm12, %v10336_v63, 0.0  ;;  %vm10389_vm2 = vcmp.ge.s32.totalorder %v465_v41, 1  ;;  %v9980_v45 = vld [vmem:[%s13268_s1 + $0x8] sm:$0xff]  }
  0x29   : > { %9497 = vrot.lane.b32.xlu1 %v9496_v7, %s10019_s29  ;;  %vm10395_vm3 = vcmp.ge.s32.totalorder %v479_v46, 1  ;;  %vm10401_vm4 = vcmp.ge.s32.totalorder %v486_v47, 1  ;;  %v10411_v46 = vld [vmem:[#allocation2 + $0x47] sm:$0xff]  ;;  %v712_v47 = vsel %vm10389_vm2, %v10381_v32, 0.0  ;;  %v713_v37 = vsel %vm10377_vm15, %v10383_v40, 0.0 }
  0x2a   : > { %v991_v56 = vsel %vm10326_vm12, %v10381_v32, 0.0  ;;  %vm13294_vm5 = vmmov 0   ;;  %vm2306_vm6 = vcmask 1043456   ;;  %vm2302_vm7 = vcmask 64512  }
  0x2b   : > { %9502 = vrot.lane.b32.xlu0 %v9501_v11, %s10020_s30  ;;  %8659 = vmatprep.mubr.msk.f32.mxu1 %vm13294_vm5, %v13279_v1 }
  0x2d   : > { %9507 = vrot.lane.b32.xlu1 %v9506_v16, %s10020_s30 }
  0x2f   : > { %9512 = vrot.lane.b32.xlu0 %v9511_v25, %s10019_s29 }
  0x31   : > { %9517 = vrot.lane.b32.xlu1 %v9516_v36, %s10020_s30 }
  0x33   : > { %9522 = vrot.lane.b32.xlu0 %v9521_v39, %s10020_s30 }
  0x35   : > { %9527 = vrot.lane.b32.xlu1 %v9526_v43, %s10020_s30 }
  0x37   : > { %9532 = vrot.lane.b32.xlu0 %v9531_v48, %s10020_s30 }
  0x39   : > { %9537 = vrot.lane.b32.xlu1 %v9476_v49, %s10019_s29  ;;  %v9561_v49 = vpack.i.bf16 %v1017_v44, %v1016_v30 }
  0x3b   : > { %9542 = vrot.lane.b32.xlu0 %v9481_v61, %s10019_s29 }
  0x3d   : > { %9547 = vrot.lane.b32.xlu1 %v9546_v54, %s10020_s30  ;;  %v10409_v54 = vld [vmem:[#allocation2 + $0x3f] sm:$0xff] }
  0x3f   : > { %9552 = vrot.lane.b32.xlu0 %v9551_v28, %s10020_s30 }
  0x41   : > { %9557 = vrot.lane.b32.xlu1 %v9496_v7, %s10019_s29 }
  0x43   : > { %1042 = vrot.lane.b32.xlu0 %v1003_v33, %s10019_s29 }
  0x45   : > { %9562 = vrot.lane.b32.xlu1 %v9561_v49, %s10020_s30  ;;  %v714_v49 = vsel %vm10395_vm3, %v10409_v54, 0.0 }
  0x47   : > { %9567 = vrot.lane.b32.xlu0 %v9566_v57, %s10020_s30  ;;  %v715_v57 = vsel %vm10401_vm4, %v10411_v46, 0.0 }
  0x91   : > { %v10330_v19 = vpop.permute.xlu0 %9472 }
  0x92   : > { %v9475_v61 = vunpack.i.h.bf16 %v10330_v19  ;;  %v9474_v62 = vunpack.i.l.bf16 %v10330_v19 }
  0x93   : > { %v9488_v2 = vpop.permute.xlu1 %9487 }
  0x94   : > { %v9490_v5 = vunpack.i.h.bf16 %v9488_v2  ;;  %v9489_v7 = vunpack.i.l.bf16 %v9488_v2  ;;  %v762_v22 = vsel %vm13292_vm0, %v708_v0, %v9474_v62  ;;  %v763_v12 = vsel %vm13292_vm0, %v709_v23, %v9475_v61  ;;  %v545_v2 = vld [vmem:[#allocation2 + $0x7] sm:$0xff] }
  0x95   : > { %v10356_v11 = vpop.permute.xlu0 %9477 }
  0x96   : > { %v9480_v13 = vunpack.i.h.bf16 %v10356_v11  ;;  %v9479_v16 = vunpack.i.l.bf16 %v10356_v11  ;;  %v770_v17 = vsel %vm13300_vm1, %v762_v22, %v9489_v7  ;;  %v771_v18 = vsel %vm13300_vm1, %v763_v12, %v9490_v5 }
  0x97   : > { %v9493_v20 = vpop.permute.xlu1 %9492  ;;  %v778_v25 = vpack.c.bf16 %v771_v18, %v770_v17 }
  0x98   : > { %v765_v31 = vsel %vm13292_vm0, %v711_v10, %v9480_v13  ;;  %v764_v36 = vsel %vm13292_vm0, %v710_v9, %v9479_v16  ;;  %v9495_v34 = vunpack.i.h.bf16 %v9493_v20  ;;  %v9494_v38 = vunpack.i.l.bf16 %v9493_v20 }
  0x99   : > { %8615 = vmatprep.mubr.msk.bf16.mxu0 %vm807_vm14, %v778_v25  ;;  %v10385_v43 = vpop.permute.xlu0 %9482 }
  0x9a   : > { %v772_v51 = vsel %vm13300_vm1, %v764_v36, %v9494_v38  ;;  %v773_v52 = vsel %vm13300_vm1, %v765_v31, %v9495_v34  ;;  %v9485_v41 = vunpack.i.h.bf16 %v10385_v43  ;;  %v9484_v53 = vunpack.i.l.bf16 %v10385_v43  ;;  %v9981_v34 = vld [vmem:[%s13268_s1 + $0x10] sm:$0xff]  }
  0x9b   : > { %v10413_v28 = vpop.permute.xlu1 %9497  ;;  %v779_v33 = vpack.c.bf16 %v773_v52, %v772_v51  ;;  %v569_v31 = vsel %vm10310_vm10, %v545_v2, 0.0  ;;  %v575_v2 = vsel %vm10395_vm3, %v10383_v40, 0.0 }
  0x9c   : > { %v9500_v30 = vunpack.i.h.bf16 %v10413_v28  ;;  %v9499_v44 = vunpack.i.l.bf16 %v10413_v28  ;;  %v767_v5 = vsel %vm13292_vm0, %v713_v37, %v9485_v41  ;;  %v766_v7 = vsel %vm13292_vm0, %v712_v47, %v9484_v53  ;;  %v9983_v28 = vld [vmem:[%s13268_s1 + $0x38] sm:$0xff]  }
  0x9d   : > { %v9503_v35 = vpop.permute.xlu0 %9502  ;;  %8616 = vmatmul.mubr.msk.bf16.vlgmr.msra.gmra.mrb[0].mxu0 %vm807_vm14, %v779_v33  ;;  %v571_v47 = vsel %vm10346_vm13, %v10322_v59, 0.0  ;;  %v572_v33 = vsel %vm10326_vm12, %v10334_v21, 0.0  ;;  %v687_v11 = vsel %vm13292_vm0, %v575_v2, %v9485_v41 }
  0x9e   : > { %v9505_v0 = vunpack.i.h.bf16 %v9503_v35  ;;  %v9504_v23 = vunpack.i.l.bf16 %v9503_v35  ;;  %8624 = vmatpush3.bf16.msra.mxu0 %v10245_v8  ;;  %v769_v18 = vsel %vm13292_vm0, %v715_v57, %v9500_v30  ;;  %v768_v20 = vsel %vm13292_vm0, %v714_v49, %v9499_v44 }
  0x9f   : > { %v9508_v9 = vpop.permute.xlu1 %9507  ;;  %8625 = vmatprep.subr.bf16.mxu0 %v9980_v45  ;;  %v570_v8 = vsel %vm10316_vm11, %v10320_v58, 0.0 }
  0xa0   : > { %v774_v10 = vsel %vm13300_vm1, %v766_v7, %v9504_v23  ;;  %v775_v22 = vsel %vm13300_vm1, %v767_v5, %v9505_v0  ;;  %v9510_v12 = vunpack.i.h.bf16 %v9508_v9  ;;  %v9509_v17 = vunpack.i.l.bf16 %v9508_v9 }
  0xa1   : > { %v780_v25 = vpack.c.bf16 %v775_v22, %v774_v10  ;;  %v10448_v36 = vpop.permute.xlu0 %9512  ;;  %v682_v57 = vsel %vm13292_vm0, %v570_v8, %v9474_v62  ;;  %v573_v0 = vsel %vm10389_vm2, %v10336_v63, 0.0  ;;  %v574_v23 = vsel %vm10377_vm15, %v10381_v32, 0.0 }
  0xa2   : > { %v776_v38 = vsel %vm13300_vm1, %v768_v20, %v9509_v17  ;;  %v777_v51 = vsel %vm13300_vm1, %v769_v18, %v9510_v12  ;;  %v9514_v52 = vunpack.i.l.bf16 %v10448_v36  ;;  %8626 = vmatpush3.bf16.msra.mxu0 %v9980_v45  ;;  %v9982_v45 = vld [vmem:[%s13268_s1 + $0x30] sm:$0xff]   ;;  %v683_v22 = vsel %vm13292_vm0, %v571_v47, %v9475_v61 }
  0xa3   : > { %v781_v37 = vpack.c.bf16 %v777_v51, %v776_v38  ;;  %v9518_v30 = vpop.permute.xlu1 %9517  ;;  %8619 = vmatprep.mubr.msk.bf16.mxu0 %vm807_vm14, %v780_v25  ;;  %8627 = vmatprep.subr.bf16.mxu0 %v9981_v34  ;;  %v684_v12 = vsel %vm13292_vm0, %v572_v33, %v9479_v16  ;;  %v576_v17 = vsel %vm10401_vm4, %v10409_v54, 0.0  ;;  %v685_v61 = vsel %vm13292_vm0, %v573_v0, %v9480_v13 }
  0xa4   : > { %v681_v58 = vsel %vm13292_vm0, %v569_v31, %v9514_v52  ;;  %v9520_v35 = vunpack.i.h.bf16 %v9518_v30  ;;  %v9519_v49 = vunpack.i.l.bf16 %v9518_v30  ;;  %v686_v16 = vsel %vm13292_vm0, %v574_v23, %v9484_v53 }
  0xa5   : > { %v9523_v5 = vpop.permute.xlu0 %9522  ;;  %8620 = vmatmul.mubr.msk.bf16.gmra.mrb[4].mxu0 %vm807_vm14, %v781_v37  ;;  %v688_v13 = vsel %vm13292_vm0, %v576_v17, %v9499_v44  ;;  %v988_v44 = vsel %vm10310_vm10, %v10322_v59, 0.0  ;;  %v990_v23 = vsel %vm10346_vm13, %v10336_v63, 0.0 }
  0xa6   : > { %v689_v62 = vsel %vm13300_vm1, %v681_v58, %v9519_v49  ;;  %v690_v7 = vsel %vm13300_vm1, %v682_v57, %v9520_v35  ;;  %v9525_v9 = vunpack.i.h.bf16 %v9523_v5  ;;  %v9524_v10 = vunpack.i.l.bf16 %v9523_v5  ;;  %8628 = vmatpush3.bf16.msra.mxu0 %v9981_v34 }
  0xa7   : > { %v697_v18 = vpack.c.bf16 %v690_v7, %v689_v62  ;;  %v9528_v20 = vpop.permute.xlu1 %9527  ;;  %8637 = vmatprep.subr.bf16.mxu0 %v9982_v45  ;;  %v989_v35 = vsel %vm10316_vm11, %v10334_v21, 0.0  ;;  %v9515_v57 = vunpack.i.h.bf16 %v10448_v36 }
  0xa8   : > { %v691_v25 = vsel %vm13300_vm1, %v683_v22, %v9524_v10  ;;  %v692_v31 = vsel %vm13300_vm1, %v684_v12, %v9525_v9  ;;  %v9530_v8 = vunpack.i.h.bf16 %v9528_v20  ;;  %v9529_v19 = vunpack.i.l.bf16 %v9528_v20  ;;  %v987_v12 = vld [vmem:[#allocation2 + $0x4f] sm:$0xff] }
  0xa9   : > { %v698_v38 = vpack.c.bf16 %v692_v31, %v691_v25  ;;  %8629 = vmatprep.mubr.msk.bf16.mxu0 %vm807_vm14, %v697_v18  ;;  %v9533_v51 = vpop.permute.xlu0 %9532  ;;  %v1084_v55 = vsel %vm13292_vm0, %v988_v44, %v9515_v57  ;;  %v993_v20 = vsel %vm10377_vm15, %v10409_v54, 0.0  ;;  %v13281_v57 = vmov 0.0|0.0  }
  0xaa   : > { %v693_v52 = vsel %vm13300_vm1, %v685_v61, %v9529_v19  ;;  %v694_v47 = vsel %vm13300_vm1, %v686_v16, %v9530_v8  ;;  %v9535_v37 = vunpack.i.h.bf16 %v9533_v51  ;;  %v9534_v30 = vunpack.i.l.bf16 %v9533_v51  ;;  %9191 = vmatprep.subr.bf16.mxu1 %v13281_v57 }
  0xab   : > { %v699_v53 = vpack.c.bf16 %v694_v47, %v693_v52  ;;  %v9538_v34 = vpop.permute.xlu1 %9537  ;;  %v992_v16 = vsel %vm10389_vm2, %v10383_v40, 0.0  ;;  %v995_v51 = vsel %vm10401_vm4, %v987_v12, 0.0 }
  0xac   : > { %v696_v33 = vsel %vm13300_vm1, %v688_v13, %v9535_v37  ;;  %v695_v58 = vsel %vm13300_vm1, %v687_v11, %v9534_v30  ;;  %v9539_v49 = vunpack.i.l.bf16 %v9538_v34  ;;  %v9540_v0 = vunpack.i.h.bf16 %v9538_v34 }
  0xad   : > { %v700_v43 = vpack.c.bf16 %v696_v33, %v695_v58  ;;  %v9543_v41 = vpop.permute.xlu0 %9542  ;;  %8630 = vmatmul.mubr.msk.bf16.vlgmr.msra.gmra.mrb[0].mxu0 %vm807_vm14, %v698_v38  ;;  %v994_v38 = vsel %vm10395_vm3, %v10411_v46, 0.0  ;;  %v1235_v58 = vld [vmem:[%s13269_s2] sm:$0xff] }
  0xae   : > { %v9544_v21 = vunpack.i.l.bf16 %v9543_v41  ;;  %v1085_v36 = vsel %vm13292_vm0, %v989_v35, %v9539_v49  ;;  %8633 = vmatprep.mubr.msk.bf16.mxu0 %vm807_vm14, %v699_v53  ;;  %8638 = vmatpush3.bf16.msra.mxu0 %v9982_v45  ;;  %v1086_v59 = vsel %vm13292_vm0, %v990_v23, %v9540_v0  ;;  %v9545_v31 = vunpack.i.h.bf16 %v9543_v41  ;;  %v1236_v35 = vld [vmem:[%s13269_s2 + $0x8] sm:$0xff]  ;;  %v1237_v49 = vld [vmem:[%s13269_s2 + $0x10] sm:$0xff]  ;;  %v1238_v41 = vld [vmem:[%s13269_s2 + $0x18] sm:$0xff] }
  0xaf   : > { %v9548_v2 = vpop.permute.xlu1 %9547  ;;  %8639 = vmatprep.subr.bf16.mxu0 %v9983_v28  ;;  %v1246_v0 = vand.u32 4294901760, %v1236_v35  ;;  %v1252_v44 = vand.u32 4294901760, %v1238_v41 }
  0xb0   : > { %v9550_v5 = vunpack.i.h.bf16 %v9548_v2  ;;  %v9549_v62 = vunpack.i.l.bf16 %v9548_v2  ;;  %v1087_v63 = vsel %vm13292_vm0, %v991_v56, %v9544_v21  ;;  %v1088_v48 = vsel %vm13292_vm0, %v992_v16, %v9545_v31 }
  0xb1   : > { %v9553_v4 = vpop.permute.xlu0 %9552 }
  0xb2   : > { %v1092_v32 = vsel %vm13300_vm1, %v1084_v55, %v9549_v62  ;;  %v1093_v7 = vsel %vm13300_vm1, %v1085_v36, %v9550_v5  ;;  %v9555_v9 = vunpack.i.h.bf16 %v9553_v4  ;;  %v9554_v10 = vunpack.i.l.bf16 %v9553_v4  ;;  %8640 = vmatpush3.bf16.msra.mxu0 %v9983_v28 }
  0xb3   : > { %v1100_v22 = vpack.c.bf16 %v1093_v7, %v1092_v32  ;;  %v9558_v45 = vpop.permute.xlu1 %9557  ;;  %8641 = vmatprep.subr.bf16.mxu0 %v9984_v60  ;;  %v1249_v28 = vand.u32 4294901760, %v1237_v49  ;;  %v1330_v36 = vsub.f32 %v1236_v35, %v1246_v0 }
  0xb4   : > { %v1094_v17 = vsel %vm13300_vm1, %v1086_v59, %v9554_v10  ;;  %v1095_v18 = vsel %vm13300_vm1, %v1087_v63, %v9555_v9  ;;  %v9559_v25 = vunpack.i.l.bf16 %v9558_v45  ;;  %v9560_v19 = vunpack.i.h.bf16 %v9558_v45 }
  0xb5   : > { %v1101_v8 = vpack.c.bf16 %v1095_v18, %v1094_v17  ;;  %v1043_v61 = vpop.permute.xlu0 %1042  ;;  %8634 = vmatmul.mubr.msk.bf16.gmra.mrb[4].mxu0 %vm807_vm14, %v700_v43  ;;  %v1243_v43 = vand.u32 4294901760, %v1235_v58  ;;  %v10587_v56 = vpack.c.bf16 %v1252_v44, %v1249_v28  ;;  %v1331_v5 = vand.u32 4294901760, %v1330_v36 }
  0xb6   : > { %v1089_v39 = vsel %vm13292_vm0, %v993_v20, %v9559_v25  ;;  %8643 = vmatprep.mubr.msk.bf16.mxu0 %vm807_vm14, %v1100_v22  ;;  %8642 = vmatpush3.bf16.msra.mxu0 %v9984_v60  ;;  %v1090_v40 = vsel %vm13292_vm0, %v994_v38, %v9560_v19  ;;  %v1091_v50 = vsel %vm13292_vm0, %v995_v51, %v1043_v61 }
  0xb7   : > { %v9563_v54 = vpop.permute.xlu1 %9562  ;;  %8783 = vmatprep.subr.bf16.mxu0 %v13279_v1  ;;  %v10584_v23 = vpack.c.bf16 %v1246_v0, %v1243_v43  ;;  %v1323_v21 = vsub.f32 %v1235_v58, %v1243_v43  ;;  %v1332_v55 = vsub.f32 %v1330_v36, %v1331_v5  ;;  %v1337_v59 = vsub.f32 %v1237_v49, %v1249_v28 }
  0xb8   : > { %v9565_v52 = vunpack.i.h.bf16 %v9563_v54  ;;  %v9564_v47 = vunpack.i.l.bf16 %v9563_v54  ;;  %v1344_v63 = vsub.f32 %v1238_v41, %v1252_v44 }
  0xb9   : > { %v9568_v46 = vpop.permute.xlu0 %9567  ;;  %9193 = vmatpush3.bf16.msra.mxu1 %v10584_v23  ;;  %v1324_v2 = vand.u32 4294901760, %v1323_v21  ;;  %v1333_v60 = vand.u32 4294901760, %v1332_v55  ;;  %v1338_v32 = vand.u32 4294901760, %v1337_v59  ;;  %v10596_v18 = vpack.c.bf16 %v1330_v36, %v1323_v21 }
  0xba   : > { %v1096_v42 = vsel %vm13300_vm1, %v1088_v48, %v9564_v47  ;;  %v1097_v37 = vsel %vm13300_vm1, %v1089_v39, %v9565_v52  ;;  %v9570_v30 = vunpack.i.h.bf16 %v9568_v46  ;;  %v9569_v11 = vunpack.i.l.bf16 %v9568_v46  ;;  %9194 = vmatprep.subr.bf16.mxu1 %v13281_v57 }
  0xbb   : > { %v1102_v13 = vpack.c.bf16 %v1097_v37, %v1096_v42  ;;  %v1325_v62 = vsub.f32 %v1323_v21, %v1324_v2  ;;  %v1345_v7 = vand.u32 4294901760, %v1344_v63  ;;  %v1339_v10 = vsub.f32 %v1337_v59, %v1338_v32 }
  0xbc   : > { %v1099_v53 = vsel %vm13300_vm1, %v1091_v50, %v9570_v30  ;;  %v1098_v34 = vsel %vm13300_vm1, %v1090_v40, %v9569_v11  ;;  %v10598_v20 = vpack.c.bf16 %v1344_v63, %v1337_v59  ;;  %v10600_v25 = vpack.c.bf16 %v1331_v5, %v1324_v2 }
  0xbd   : > { %v1103_v33 = vpack.c.bf16 %v1099_v53, %v1098_v34  ;;  %8644 = vmatmul.mubr.msk.bf16.vlgmr.msra.gmra.mrb[0].mxu0 %vm807_vm14, %v1101_v8  ;;  %9196 = vmatpush3.bf16.msra.mxu1 %v10587_v56  ;;  %v1326_v4 = vand.u32 4294901760, %v1325_v62  ;;  %v1346_v22 = vsub.f32 %v1344_v63, %v1345_v7  ;;  %v1340_v45 = vand.u32 4294901760, %v1339_v10 }
  0xbe   : > { %8647 = vmatprep.mubr.msk.bf16.mxu0 %vm807_vm14, %v1102_v13  ;;  %9197 = vmatprep.subr.bf16.mxu1 %v13281_v57  ;;  %v10602_v31 = vpack.c.bf16 %v1345_v7, %v1338_v32  ;;  %v10674_v55 = vsub.s32 0, %v10105_v3 }
  0xbf   : > { %v10592_v9 = vpack.c.bf16 %v1333_v60, %v1326_v4  ;;  %v1347_v12 = vand.u32 4294901760, %v1346_v22 }
  0xc0   : > { %13429 = vst [vmem:[#allocation6_spill] sm:$0xff] %v10674_v55 }
  0xc1   : > { %v10594_v17 = vpack.c.bf16 %v1347_v12, %v1340_v45 }
  0xc5   : > { %8648 = vmatmul.mubr.msk.bf16.gmra.mrb[4].mxu0 %vm807_vm14, %v1103_v33 }
  0xc6   : > { %8785 = vmatprep.mubr.msk.bf16.mxu0 %vm13294_vm5, %v13279_v1 }
 0x190   : > { %v10604_v8 = vpop.f32.mrb[0].mxu0 }
 0x191   : > { %v10606_v19 = vpop.f32.mrb[1].mxu0  ;;  %v1217_v54 = vsel %vm13300_vm1, %v10604_v8, 0.0 }
 0x192   : > { %v10608_v61 = vpop.f32.mrb[2].mxu0  ;;  %v1214_v38 = vsel %vm13300_vm1, %v10606_v19, 0.0 }
 0x193   : > { %v10610_v16 = vpop.f32.mrb[3].mxu0  ;;  %v1219_v47 = vsel %vm13300_vm1, %v10608_v61, 0.0 }
 0x194   : > { %v1215_v51 = vsel %vm13300_vm1, %v10610_v16, 0.0 }
 0x195   : > { %v1216_v39 = vadd.f32 %v1215_v51, %v1214_v38 }
 0x197   : > { %v1218_v52 = vadd.f32 %v1217_v54, %v1216_v39 }
 0x198   : > { %v10620_v48 = vpop.f32.mrb[4].mxu0 }
 0x199   : > { %v10622_v40 = vpop.f32.mrb[5].mxu0  ;;  %v1220_v50 = vadd.f32 %v1219_v47, %v1218_v52  ;;  %v1225_v53 = vsel %vm13300_vm1, %v10620_v48, 0.0 }
 0x19a   : > { %v1221_v46 = vsel %vm13300_vm1, %v10622_v40, 0.0  ;;  %v10626_v42 = vpop.f32.mrb[6].mxu0 }
 0x19b   : > { %v1222_v37 = vadd.f32 %v1221_v46, %v1220_v50  ;;  %v10628_v30 = vpop.f32.mrb[7].mxu0  ;;  %v1227_v33 = vsel %vm13300_vm1, %v10626_v42, 0.0 }
 0x19c   : > { %v1223_v11 = vsel %vm13300_vm1, %v10628_v30, 0.0 }
 0x19d   : > { %v1224_v13 = vadd.f32 %v1223_v11, %v1222_v37 }
 0x19f   : > { %v1226_v34 = vadd.f32 %v1225_v53, %v1224_v13 }
 0x1a1   : > { %v1228_v58 = vadd.f32 %v1227_v33, %v1226_v34 }
 0x1a3   : > { %v1229_v35 = vrot.slane %v1228_v58, 4 }
 0x1a5   : > { %v1230_v49 = vadd.f32 %v1229_v35, %v1228_v58 }
 0x1a7   : > { %v1231_v43 = vrot.slane %v1230_v49, 2 }
 0x1a9   : > { %v1232_v0 = vadd.f32 %v1231_v43, %v1230_v49 }
 0x1ab   : > { %v1233_v41 = vrot.slane %v1232_v0, 1 }
 0x1ad   : > { %v1234_v28 = vadd.f32 %v1233_v41, %v1232_v0 }
 0x1af   : > { %v1240_v44 = vsel %vm13300_vm1, %v1234_v28, 0 }
 0x1b0   : > { %v1311_v21 = vand.u32 4294901760, %v1240_v44 }
 0x1b2   : > { %v1312_v36 = vsub.f32 %v1240_v44, %v1311_v21 }
 0x1b4   : > { %v1313_v2 = vand.u32 4294901760, %v1312_v36 }
 0x1b6   : > { %v1314_v5 = vsub.f32 %v1312_v36, %v1313_v2 }
 0x1b8   : > { %v1315_v62 = vand.u32 4294901760, %v1314_v5 }
 0x1ba   : > { %8660 = vmatmul.mubr.f32.vlgmr.msra.gmra.mrb[0].mxu1 %v1315_v62 }
 0x1bb   : > { %9199 = vmatpush3.bf16.msra.mxu1 %v10592_v9  ;;  %8670 = vmatprep.mubr.msk.f32.mxu1 %vm13294_vm5, %v13279_v1 }
 0x1bc   : > { %9200 = vmatprep.subr.bf16.mxu1 %v13281_v57 }
 0x1bf   : > { %9202 = vmatpush3.bf16.msra.mxu1 %v10594_v17 }
 0x1c0   : > { %9203 = vmatprep.subr.bf16.mxu1 %v13281_v57 }
 0x1c2   : > { %8671 = vmatmul.mubr.f32.vlgmr.msra.gmra.mrb[0].mxu1 %v1311_v21 }
 0x1c3   : > { %9205 = vmatpush3.bf16.msra.mxu1 %v10596_v18  ;;  %8681 = vmatprep.mubr.msk.f32.mxu1 %vm13294_vm5, %v13279_v1 }
 0x1c4   : > { %9206 = vmatprep.subr.bf16.mxu1 %v13281_v57 }
 0x1c7   : > { %9208 = vmatpush3.bf16.msra.mxu1 %v10598_v20 }
 0x1c8   : > { %9209 = vmatprep.subr.bf16.mxu1 %v13281_v57 }
 0x1ca   : > { %8682 = vmatmul.mubr.f32.vlgmr.msra.gmra.mrb[0].mxu1 %v1312_v36 }
 0x1cb   : > { %9211 = vmatpush3.bf16.msra.mxu1 %v10584_v23  ;;  %8692 = vmatprep.mubr.msk.f32.mxu1 %vm13294_vm5, %v13279_v1 }
 0x1cc   : > { %9212 = vmatprep.subr.bf16.mxu1 %v13281_v57 }
 0x1cf   : > { %9214 = vmatpush3.bf16.msra.mxu1 %v10587_v56 }
 0x1d0   : > { %9215 = vmatprep.subr.bf16.mxu1 %v13281_v57 }
 0x1d2   : > { %8693 = vmatmul.mubr.f32.vlgmr.msra.gmra.mrb[0].mxu1 %v1313_v2 }
 0x1d3   : > { %9217 = vmatpush3.bf16.msra.mxu1 %v10600_v25  ;;  %8703 = vmatprep.mubr.msk.f32.mxu1 %vm13294_vm5, %v13279_v1 }
 0x1d4   : > { %9218 = vmatprep.subr.bf16.mxu1 %v13281_v57 }
 0x1d7   : > { %9220 = vmatpush3.bf16.msra.mxu1 %v10602_v31 }
 0x1d8   : > { %9221 = vmatprep.subr.bf16.mxu1 %v13281_v57 }
 0x1da   : > { %8704 = vmatmul.mubr.f32.vlgmr.msra.gmra.mrb[0].mxu1 %v1311_v21 }
 0x1db   : > { %9223 = vmatpush3.bf16.msra.mxu1 %v10584_v23  ;;  %8714 = vmatprep.mubr.msk.f32.mxu1 %vm13294_vm5, %v13279_v1 }
 0x1dc   : > { %9224 = vmatprep.subr.bf16.mxu1 %v13281_v57 }
 0x1df   : > { %9226 = vmatpush3.bf16.msra.mxu1 %v10587_v56 }
 0x1e0   : > { %9227 = vmatprep.subr.bf16.mxu1 %v13281_v57 }
 0x1e2   : > { %8715 = vmatmul.mubr.f32.vlgmr.msra.gmra.mrb[0].mxu1 %v1311_v21 }
 0x1e3   : > { %9229 = vmatpush3.bf16.msra.mxu1 %v10584_v23  ;;  %8725 = vmatprep.mubr.msk.f32.mxu1 %vm13294_vm5, %v13279_v1 }
 0x1e4   : > { %9230 = vmatprep.subr.bf16.mxu1 %v13281_v57 }
 0x1e7   : > { %9232 = vmatpush3.bf16.msra.mxu1 %v10587_v56 }
 0x1e8   : > { %9233 = vmatprep.subr.bf16.mxu1 %v13281_v57 }
 0x2b5   : > { %v1723_v59 = vpop.f32.mrb[0].mxu1 }
 0x2b6   : > { %v1730_v63 = vrot.slane %v1723_v59, %v10674_v55  ;;  %v8716_v4 = vpop.f32.mrb[1].mxu1 }
 0x2b8   : > { %v10678_v60 = vsub.f32 %v10606_v19, %v1730_v63  ;;  %v10681_v32 = vsub.f32 %v10610_v16, %v1730_v63  ;;  %v10684_v7 = vsub.f32 %v10604_v8, %v1730_v63  ;;  %v10687_v10 = vsub.f32 %v10608_v61, %v1730_v63 }
 0x2b9   : > { %v10690_v22 = vsub.f32 %v10622_v40, %v1730_v63  ;;  %v10693_v45 = vsub.f32 %v10628_v30, %v1730_v63  ;;  %v10696_v12 = vsub.f32 %v10620_v48, %v1730_v63  ;;  %v10699_v19 = vsub.f32 %v10626_v42, %v1730_v63 }
 0x2ba   : > { %v1739_v16 = vmul.f32 %v10678_v60, %v10678_v60  ;;  %v1740_v8 = vmul.f32 %v10681_v32, %v10681_v32  ;;  %v1741_v61 = vmul.f32 %v10684_v7, %v10684_v7  ;;  %v1742_v38 = vmul.f32 %v10687_v10, %v10687_v10 }
 0x2bb   : > { %v1743_v52 = vmul.f32 %v10690_v22, %v10690_v22  ;;  %v1744_v40 = vmul.f32 %v10693_v45, %v10693_v45  ;;  %v1745_v42 = vmul.f32 %v10696_v12, %v10696_v12  ;;  %v1746_v11 = vmul.f32 %v10699_v19, %v10699_v19 }
 0x2bc   : > { %v1747_v51 = vsel %vm13300_vm1, %v1739_v16, 0.0  ;;  %v1748_v39 = vsel %vm13300_vm1, %v1740_v8, 0.0  ;;  %v1750_v47 = vsel %vm13300_vm1, %v1741_v61, 0.0  ;;  %v1752_v50 = vsel %vm13300_vm1, %v1742_v38, 0.0 }
 0x2bd   : > { %v1749_v54 = vadd.f32 %v1748_v39, %v1747_v51  ;;  %v1754_v37 = vsel %vm13300_vm1, %v1743_v52, 0.0  ;;  %v1756_v13 = vsel %vm13300_vm1, %v1744_v40, 0.0  ;;  %v1758_v34 = vsel %vm13300_vm1, %v1745_v42, 0.0 }
 0x2be   : > { %v1760_v58 = vsel %vm13300_vm1, %v1746_v11, 0.0 }
 0x2bf   : > { %v1751_v48 = vadd.f32 %v1750_v47, %v1749_v54 }
 0x2c1   : > { %v1753_v46 = vadd.f32 %v1752_v50, %v1751_v48 }
 0x2c3   : > { %v1755_v30 = vadd.f32 %v1754_v37, %v1753_v46 }
 0x2c5   : > { %v1757_v53 = vadd.f32 %v1756_v13, %v1755_v30 }
 0x2c7   : > { %v1759_v33 = vadd.f32 %v1758_v34, %v1757_v53 }
 0x2c9   : > { %v1761_v35 = vadd.f32 %v1760_v58, %v1759_v33 }
 0x2cb   : > { %v1762_v49 = vrot.slane %v1761_v35, 4 }
 0x2cd   : > { %v1763_v43 = vadd.f32 %v1762_v49, %v1761_v35 }
 0x2cf   : > { %v1764_v0 = vrot.slane %v1763_v43, 2 }
 0x2d1   : > { %v1765_v41 = vadd.f32 %v1764_v0, %v1763_v43 }
 0x2d3   : > { %v1766_v28 = vrot.slane %v1765_v41, 1 }
 0x2d5   : > { %v1767_v44 = vadd.f32 %v1766_v28, %v1765_v41 }
 0x2d7   : > { %v1769_v21 = vsel %vm13300_vm1, %v1767_v44, 0 }
 0x2d8   : > { %v1840_v36 = vand.u32 4294901760, %v1769_v21 }
 0x2da   : > { %v1841_v2 = vsub.f32 %v1769_v21, %v1840_v36 }
 0x2dc   : > { %v1842_v5 = vand.u32 4294901760, %v1841_v2 }
 0x2de   : > { %v1843_v62 = vsub.f32 %v1841_v2, %v1842_v5 }
 0x2e0   : > { %v1844_v59 = vand.u32 4294901760, %v1843_v62 }
 0x2e2   : > { %8726 = vmatmul.mubr.f32.vlgmr.msra.gmra.mrb[2].mxu1 %v1844_v59 }
 0x2e3   : > { %9235 = vmatpush3.bf16.msra.mxu1 %v10592_v9  ;;  %8736 = vmatprep.mubr.msk.f32.mxu1 %vm13294_vm5, %v13279_v1 }
 0x2e4   : > { %9236 = vmatprep.subr.bf16.mxu1 %v13281_v57 }
 0x2e7   : > { %9238 = vmatpush3.bf16.msra.mxu1 %v10594_v17 }
 0x2e8   : > { %9239 = vmatprep.subr.bf16.mxu1 %v13281_v57 }
 0x2ea   : > { %8737 = vmatmul.mubr.f32.vlgmr.msra.gmra.mrb[2].mxu1 %v1840_v36 }
 0x2eb   : > { %9241 = vmatpush3.bf16.msra.mxu1 %v10596_v18  ;;  %8747 = vmatprep.mubr.msk.f32.mxu1 %vm13294_vm5, %v13279_v1 }
 0x2ec   : > { %9242 = vmatprep.subr.bf16.mxu1 %v13281_v57 }
 0x2ef   : > { %9244 = vmatpush3.bf16.msra.mxu1 %v10598_v20 }
 0x2f0   : > { %9245 = vmatprep.subr.bf16.mxu1 %v13281_v57 }
 0x2f2   : > { %8748 = vmatmul.mubr.f32.vlgmr.msra.gmra.mrb[2].mxu1 %v1841_v2  ;;  %v9986_v2 = vld [vmem:[%s13273_s6 + $0x30] sm:$0xff]  }
 0x2f3   : > { %9247 = vmatpush3.bf16.msra.mxu1 %v10584_v23  ;;  %8758 = vmatprep.mubr.msk.f32.mxu1 %vm13294_vm5, %v13279_v1 }
 0x2f4   : > { %9248 = vmatprep.subr.bf16.mxu1 %v13281_v57 }
 0x2f7   : > { %9250 = vmatpush3.bf16.msra.mxu1 %v10587_v56 }
 0x2f8   : > { %9251 = vmatprep.subr.bf16.mxu1 %v13281_v57 }
 0x2fa   : > { %8759 = vmatmul.mubr.f32.vlgmr.msra.gmra.mrb[2].mxu1 %v1842_v5 }
 0x2fb   : > { %9253 = vmatpush3.bf16.msra.mxu1 %v10600_v25  ;;  %8769 = vmatprep.mubr.msk.f32.mxu1 %vm13294_vm5, %v13279_v1 }
 0x2fc   : > { %9254 = vmatprep.subr.bf16.mxu1 %v13281_v57 }
 0x2ff   : > { %9256 = vmatpush3.bf16.msra.mxu1 %v10602_v31 }
 0x300   : > { %9257 = vmatprep.subr.bf16.mxu1 %v13281_v57 }
 0x302   : > { %8770 = vmatmul.mubr.f32.vlgmr.msra.gmra.mrb[2].mxu1 %v1840_v36 }
 0x303   : > { %9259 = vmatpush3.bf16.msra.mxu1 %v10584_v23  ;;  %8780 = vmatprep.mubr.msk.f32.mxu1 %vm13294_vm5, %v13279_v1  ;;  %v2257_v23 = vld [vmem:[%s13270_s3] sm:$0x1] }
 0x304   : > { %9260 = vmatprep.subr.bf16.mxu1 %v13281_v57 }
 0x307   : > { %9262 = vmatpush3.bf16.msra.mxu1 %v10587_v56  ;;  %v8180_v56 = vld [vmem:[%s13271_s4] ss:$0 sm:$0xff] }
 0x308   : > { %8819 = vmatprep.subr.bf16.mxu1 %v13279_v1 }
 0x30a   : > { %8781 = vmatmul.mubr.f32.vlgmr.msra.gmra.mrb[2].mxu1 %v1840_v36 }
 0x30b   : > { %8821 = vmatprep.mubr.msk.bf16.mxu1 %vm13294_vm5, %v13279_v1 }
 0x3dd   : > { %v2252_v9 = vpop.f32.mrb[2].mxu1 }
 0x3de   : > { %v9335_v17 = vadd.f32 1e-05, %v2252_v9  ;;  %v8782_v18 = vpop.f32.mrb[3].mxu1 }
 0x3e0   : > { %10006 = vrsqrt.f32 %v9335_v17 }
 0x3ea   : > { %v10007_v20 = vpop.eup %10006 }
 0x3eb   : > { %v2258_v25 = vmul.f32 %v10007_v20, %v2257_v23  ;;  %v2828_v20 = vand.u32 15, %v10118_v14  ;;  %v2849_v14 = vand.u32 15, %v10154_v26  ;;  %v10848_v26 = vadd.s32 80, %v10105_v3 }
 0x3ed   : > { %v2262_v31 = vrot.slane %v2258_v25, %v10674_v55  ;;  %vm10831_vm8 = vcmp.ge.s32.totalorder %v2828_v20, 1  ;;  %vm10877_vm11 = vcmp.le.s32.totalorder %v2849_v14, 14 }
 0x3ef   : > { %v2263_v63 = vmul.f32 %v2262_v31, %v10678_v60  ;;  %v2269_v4 = vmul.f32 %v2262_v31, %v10696_v12  ;;  %v2264_v16 = vmul.f32 %v2262_v31, %v10681_v32  ;;  %v2265_v52 = vmul.f32 %v2262_v31, %v10684_v7  ;;  %v9985_v60 = vld [vmem:[%s13272_s5] sm:$0xff]  }
 0x3f0   : > { %v2266_v42 = vmul.f32 %v2262_v31, %v10687_v10  ;;  %v2267_v53 = vmul.f32 %v2262_v31, %v10690_v22  ;;  %v2268_v35 = vmul.f32 %v2262_v31, %v10693_v45  ;;  %v2270_v41 = vmul.f32 %v2262_v31, %v10699_v19  ;;  %v9987_v31 = vld [vmem:[%s13273_s6 + $0x38] sm:$0xff]  }
 0x3f1   : > { %v2278_v8 = vadd.f32 %v8180_v56, %v2263_v63  ;;  %v2284_v61 = vadd.f32 %v8180_v56, %v2269_v4  ;;  %v2279_v38 = vadd.f32 %v8180_v56, %v2264_v16  ;;  %v2280_v12 = vadd.f32 %v8180_v56, %v2265_v52 }
 0x3f2   : > { %v2281_v30 = vadd.f32 %v8180_v56, %v2266_v42  ;;  %v2282_v34 = vadd.f32 %v8180_v56, %v2267_v53  ;;  %v2283_v49 = vadd.f32 %v8180_v56, %v2268_v35  ;;  %v2285_v28 = vadd.f32 %v8180_v56, %v2270_v41  ;;  %v9988_v56 = vld [vmem:[%s13273_s6 + $0x40] sm:$0xff]  }
 0x3f3   : > { %v2286_v51 = vmax.f32 %v2278_v8, 0.0  ;;  %v2292_v39 = vmax.f32 %v2284_v61, 0.0  ;;  %v2287_v54 = vmax.f32 %v2279_v38, 0.0  ;;  %v2288_v46 = vmax.f32 %v2280_v12, 0.0 }
 0x3f4   : > { %v2289_v13 = vmax.f32 %v2281_v30, 0.0  ;;  %v2290_v58 = vmax.f32 %v2282_v34, 0.0  ;;  %v2291_v0 = vmax.f32 %v2283_v49, 0.0  ;;  %v2293_v21 = vmax.f32 %v2285_v28, 0.0 }
 0x3f5   : > { %v2296_v47 = vpack.c.bf16 %v2286_v51, %v2286_v51  ;;  %v2660_v48 = vpack.c.bf16 %v2292_v39, %v2292_v39  ;;  %v2355_v32 = vpack.c.bf16 %v2287_v54, %v2287_v54  ;;  %v2416_v37 = vpack.c.bf16 %v2288_v46, %v2288_v46  ;;  %v9989_v46 = vld [vmem:[%s13273_s6 + $0x48] sm:$0xff]  }
 0x3f6   : > { %v2477_v10 = vpack.c.bf16 %v2289_v13, %v2289_v13  ;;  %v2538_v22 = vpack.c.bf16 %v2290_v58, %v2290_v58  ;;  %v2599_v45 = vpack.c.bf16 %v2291_v0, %v2291_v0  ;;  %v2721_v19 = vpack.c.bf16 %v2293_v21, %v2293_v21 }
 0x3f7   : > { %v2308_v40 = vsel %vm2306_vm6, %v2296_v47, 0  ;;  %v2662_v50 = vsel %vm2306_vm6, %v2660_v48, 0  ;;  %v2357_v7 = vsel %vm2306_vm6, %v2355_v32, 0  ;;  %v2418_v11 = vsel %vm2306_vm6, %v2416_v37, 0 }
 0x3f8   : > { %8784 = vmatpush3.bf16.msra.mxu0 %v2308_v40  ;;  %8820 = vmatpush3.bf16.msra.mxu1 %v2662_v50  ;;  %v2479_v33 = vsel %vm2306_vm6, %v2477_v10, 0  ;;  %v2540_v43 = vsel %vm2306_vm6, %v2538_v22, 0  ;;  %v2601_v44 = vsel %vm2306_vm6, %v2599_v45, 0  ;;  %v2723_v36 = vsel %vm2306_vm6, %v2721_v19, 0 }
 0x3f9   : > { %8789 = vmatprep.subr.bf16.mxu0 %v13279_v1  ;;  %8831 = vmatprep.subr.bf16.mxu1 %v9986_v2  ;;  %v2821_v63 = vand.u32 15, %v10112_v6  ;;  %v2835_v4 = vand.u32 15, %v10121_v15  ;;  %v13430_v16 = vmov 0  ;;  %v10837_v38 = vadd.s32 72, %v10105_v3 }
 0x3fa   : > { %v13431_v16 = vsel %vm10831_vm8, 4294967295, %v13430_v16  ;;  %v10840_v51 = vadd.s32 88, %v10105_v3  ;;  %v10843_v48 = vadd.s32 104, %v10105_v3  ;;  %v10865_v10 = vadd.s32 120, %v10105_v3 }
 0x3fb   : > { %8786 = vmatmul.mubr.msk.bf16.vlgmr.msra.gmra.mrb[8].mxu0 %vm2302_vm7, %v9985_v60  ;;  %8822 = vmatmul.mubr.msk.bf16.vlgmr.msra.gmra.mrb[4].mxu1 %vm2302_vm7, %v9985_v60  ;;  %13432 = vst [vmem:[#allocation7_spill] sm:$0xff] %v13431_v16  ;;  %vm10856_vm9 = vcmp.le.s32.totalorder %v2821_v63, 14  ;;  %vm10860_vm10 = vcmp.le.s32.totalorder %v2835_v4, 14  ;;  %v10872_v22 = vadd.s32 136, %v10105_v3  ;;  %v10875_v49 = vadd.s32 152, %v10105_v3 }
 0x3fc   : > { %8790 = vmatpush3.bf16.msra.mxu0 %v2357_v7  ;;  %8791 = vmatprep.mubr.msk.bf16.mxu0 %vm13294_vm5, %v13279_v1  ;;  %v2863_v0 = vand.u32 15, %v10166_v29  ;;  %v2877_v41 = vand.u32 15, %v10837_v38  ;;  %v2891_v45 = vand.u32 15, %v10840_v51  ;;  %v10888_v28 = vadd.s32 64, %v10105_v3 }
 0x3fd   : > { %8795 = vmatprep.subr.bf16.mxu0 %v13279_v1  ;;  %8832 = vmatpush3.bf16.msra.mxu1 %v9986_v2  ;;  %v2905_v19 = vand.u32 15, %v10843_v48  ;;  %v2884_v2 = vand.u32 15, %v10848_v26  ;;  %v11000_v53 = vadd.s32 112, %v10105_v3  ;;  %v11052_v48 = vld [vmem:[%s13273_s6] sm:$0xff]   ;;  %v13464_v26 = vmov 0 }
 0x3fe   : > { %8833 = vmatprep.subr.bf16.mxu1 %v9987_v31  ;;  %vm10935_vm13 = vcmp.le.s32.totalorder %v2863_v0, 14  ;;  %vm10964_vm14 = vcmp.le.s32.totalorder %v2877_v41, 14  ;;  %vm11007_vm15 = vcmp.le.s32.totalorder %v2891_v45, 14  ;;  %13458 = vst [vmem:[#allocation17_spill] sm:$0xff] %v11052_v48 }
 0x3ff   : > { %vm11036_vm2 = vcmp.le.s32.totalorder %v2905_v19, 14  ;;  %vm11060_vm3 = vcmp.ge.s32.totalorder %v2884_v2, 1 }
 0x401   : > { %8834 = vmatpush3.bf16.msra.mxu1 %v9987_v31  ;;  %v10901_v31 = vadd.s32 184, %v10105_v3 }
 0x402   : > { %8835 = vmatprep.subr.bf16.mxu1 %v9988_v56 }
 0x403   : > { %8792 = vmatmul.mubr.msk.bf16.vlgmr.msra.gmra.mrb[12].mxu0 %vm2302_vm7, %v9985_v60 }
 0x404   : > { %8796 = vmatpush3.bf16.msra.mxu0 %v2418_v11  ;;  %8797 = vmatprep.mubr.msk.bf16.mxu0 %vm13294_vm5, %v13279_v1 }
 0x405   : > { %8801 = vmatprep.subr.bf16.mxu0 %v13279_v1  ;;  %8836 = vmatpush3.bf16.msra.mxu1 %v9988_v56 }
 0x406   : > { %8837 = vmatprep.subr.bf16.mxu1 %v9989_v46 }
 0x409   : > { %8838 = vmatpush3.bf16.msra.mxu1 %v9989_v46 }
 0x40b   : > { %8798 = vmatmul.mubr.msk.bf16.vlgmr.msra.gmra.mrb[16].mxu0 %vm2302_vm7, %v9985_v60 }
 0x40c   : > { %8802 = vmatpush3.bf16.msra.mxu0 %v2479_v33  ;;  %8803 = vmatprep.mubr.msk.bf16.mxu0 %vm13294_vm5, %v13279_v1  ;;  %v2856_v33 = vand.u32 15, %v10157_v27  ;;  %v9990_v27 = vld [vmem:[%s13273_s6 + $0x50] sm:$0xff]  }
 0x40d   : > { %8807 = vmatprep.subr.bf16.mxu0 %v13279_v1  ;;  %8839 = vmatprep.subr.bf16.mxu1 %v9990_v27 }
 0x40e   : > { %vm10906_vm12 = vcmp.ge.s32.totalorder %v2856_v33, 1  ;;  %8840 = vmatpush3.bf16.msra.mxu1 %v9990_v27 }
 0x413   : > { %8804 = vmatmul.mubr.msk.bf16.vlgmr.msra.gmra.mrb[20].mxu0 %vm2302_vm7, %v9985_v60 }
 0x414   : > { %8808 = vmatpush3.bf16.msra.mxu0 %v2540_v43  ;;  %8809 = vmatprep.mubr.msk.bf16.mxu0 %vm13294_vm5, %v13279_v1 }
 0x415   : > { %8813 = vmatprep.subr.bf16.mxu0 %v13279_v1 }
 0x41b   : > { %8810 = vmatmul.mubr.msk.bf16.vlgmr.msra.gmra.mrb[24].mxu0 %vm2302_vm7, %v9985_v60 }
 0x41c   : > { %8814 = vmatpush3.bf16.msra.mxu0 %v2601_v44  ;;  %8815 = vmatprep.mubr.msk.bf16.mxu0 %vm13294_vm5, %v13279_v1 }
 0x41d   : > { %8825 = vmatprep.subr.bf16.mxu0 %v13279_v1 }
 0x423   : > { %8816 = vmatmul.mubr.msk.bf16.vlgmr.msra.gmra.mrb[28].mxu0 %vm2302_vm7, %v9985_v60 }
 0x424   : > { %8826 = vmatpush3.bf16.msra.mxu0 %v2723_v36  ;;  %8827 = vmatprep.mubr.msk.bf16.mxu0 %vm13294_vm5, %v13279_v1  ;;  %v10894_v36 = vadd.s32 168, %v10105_v3 }
 0x425   : > { %9263 = vmatprep.subr.bf16.mxu0 %v13281_v57 }
 0x42b   : > { %8828 = vmatmul.mubr.msk.bf16.vlgmr.msra.gmra.mrb[32].mxu0 %vm2302_vm7, %v9985_v60 }
 0x42c   : > { %8971 = vmatprep.mubr.msk.f32.mxu0 %vm13294_vm5, %v13279_v1 }
 0x4ce   : > { %v2344_v5 = vpop.f32.mrb[8].mxu0  ;;  %v10816_v62 = vpop.f32.mrb[4].mxu1 }
 0x4cf   : > { %2351 = vst.msk [vmem:[#allocation3 + $0x18] sm:$0xff] %vm13300_vm1, %v2344_v5  ;;  %v8787_v59 = vpop.f32.mrb[9].mxu0  ;;  %v8823_v9 = vpop.f32.mrb[5].mxu1  ;;  %v2353_v8 = vmul.f32 0.53333336, %v2344_v5 }
 0x4d0   : > { %v2347_v17 = vpop.f32.mrb[10].mxu0  ;;  %v10819_v18 = vpop.f32.mrb[6].mxu1  ;;  %v2406_v39 = vmul.f32 0.06666667, %v2344_v5 }
 0x4d1   : > { %2352 = vst.msk [vmem:[#allocation3 + $0x20] sm:$0xff] %vm13300_vm1, %v2347_v17  ;;  %v8788_v23 = vpop.f32.mrb[11].mxu0  ;;  %v8824_v25 = vpop.f32.mrb[7].mxu1  ;;  %v2354_v50 = vmul.f32 0.53333336, %v2347_v17 }
 0x4d2   : > { %v2407_v42 = vmul.f32 0.06666667, %v2347_v17  ;;  %v10981_v41 = vmul.f32 0.6, %v10819_v18 }
 0x4d6   : > { %v2393_v61 = vpop.f32.mrb[12].mxu0  ;;  %v3388_v52 = vld [vmem:[#allocation3 + $0x18] sm:$0xff] }
 0x4d7   : > { %v2400_v54 = vmul.f32 0.46666667, %v2393_v61  ;;  %v2408_v6 = vmul.f32 0.93333334, %v2393_v61  ;;  %v8793_v15 = vpop.f32.mrb[13].mxu0  ;;  %v10845_v40 = vld [vmem:[#allocation3 + $0x17] sm:$0xff] }
 0x4d8   : > { %v3389_v47 = vld [vmem:[#allocation3 + $0x20] sm:$0xff]  ;;  %13433 = vst [vmem:[#allocation8_spill] sm:$0xff] %v10845_v40  ;;  %v2396_v12 = vpop.f32.mrb[14].mxu0  ;;  %v2414_v44 = vmul.f32 0.6, %v2393_v61  ;;  %v11275_v40 = vadd.s32 240, %v10105_v3 }
 0x4d9   : > { %v2402_v60 = vadd.f32 %v2400_v54, %v2353_v8  ;;  %v2410_v32 = vadd.f32 %v2408_v6, %v2406_v39  ;;  %v9571_v7 = vpack.i.bf16 %v3389_v47, %v3388_v52  ;;  %v2401_v37 = vmul.f32 0.46666667, %v2396_v12  ;;  %v8794_v11 = vpop.f32.mrb[15].mxu0 }
 0x4da   : > { %v2409_v30 = vmul.f32 0.93333334, %v2396_v12  ;;  %v2467_v5 = vmul.f32 0.13333334, %v2393_v61  ;;  %v2415_v56 = vmul.f32 0.6, %v2396_v12 }
 0x4db   : > { %2404 = vst.msk [vmem:[#allocation3 + $0x28] sm:$0xff] %vm13300_vm1, %v2402_v60  ;;  %2412 = vst.msk [vmem:[#allocation3 + $0x38] sm:$0xff] %vm13300_vm1, %v2410_v32  ;;  %9572 = vrot.lane.b32.xlu1 %v9571_v7, %s10020_s30  ;;  %v2403_v58 = vadd.f32 %v2401_v37, %v2354_v50  ;;  %v10904_v61 = vadd.s32 96, %v10105_v3  ;;  %v2468_v14 = vmul.f32 0.13333334, %v2396_v12  ;;  %v10917_v60 = vadd.s32 200, %v10105_v3 }
 0x4dc   : > { %v2411_v35 = vadd.f32 %v2409_v30, %v2407_v42  ;;  %v10913_v47 = vmul.f32 0.13333334, %v10816_v62  ;;  %v3420_v7 = vld [vmem:[#allocation3 + $0x19] sm:$0xff] }
 0x4dd   : > { %2405 = vst.msk [vmem:[#allocation3 + $0x30] sm:$0xff] %vm13300_vm1, %v2403_v58  ;;  %v9991_v37 = vld [vmem:[%s13273_s6 + $0x58] sm:$0xff]  }
 0x4de   : > { %2413 = vst.msk [vmem:[#allocation3 + $0x40] sm:$0xff] %vm13300_vm1, %v2411_v35  ;;  %v2454_v21 = vpop.f32.mrb[16].mxu0  ;;  %8841 = vmatprep.subr.bf16.mxu1 %v9991_v37 }
 0x4df   : > { %v2461_v59 = vmul.f32 0.4, %v2454_v21  ;;  %v2469_v9 = vmul.f32 0.8666667, %v2454_v21  ;;  %v8799_v17 = vpop.f32.mrb[17].mxu0  ;;  %8842 = vmatpush3.bf16.msra.mxu1 %v9991_v37 }
 0x4e0   : > { %v2457_v8 = vpop.f32.mrb[18].mxu0  ;;  %v2475_v30 = vmul.f32 0.6666667, %v2454_v21  ;;  %v2528_v11 = vmul.f32 0.2, %v2454_v21  ;;  %8875 = vmatprep.subr.bf16.mxu1 %v11052_v48 }
 0x4e1   : > { %v2463_v63 = vadd.f32 %v2461_v59, %v2414_v44  ;;  %v2471_v4 = vadd.f32 %v2469_v9, %v2467_v5  ;;  %v2462_v39 = vmul.f32 0.4, %v2457_v8  ;;  %v2470_v54 = vmul.f32 0.8666667, %v2457_v8  ;;  %v8800_v15 = vpop.f32.mrb[19].mxu0 }
 0x4e2   : > { %v3421_v52 = vld [vmem:[#allocation3 + $0x21] sm:$0xff]  ;;  %v2476_v27 = vmul.f32 0.6666667, %v2457_v8 }
 0x4e3   : > { %2465 = vst.msk [vmem:[#allocation3 + $0x48] sm:$0xff] %vm13300_vm1, %v2463_v63  ;;  %2473 = vst.msk [vmem:[#allocation3 + $0x58] sm:$0xff] %vm13300_vm1, %v2471_v4  ;;  %v2464_v32 = vadd.f32 %v2462_v39, %v2415_v56  ;;  %v2472_v12 = vadd.f32 %v2470_v54, %v2468_v14  ;;  %v3934_v46 = vsel %vm10856_vm9, %v3421_v52, 0.0  ;;  %v3517_v42 = vsel %vm10860_vm10, %v3421_v52, 0.0  ;;  %v3390_v58 = vld [vmem:[#allocation3 + $0x28] sm:$0xff]  ;;  %v3392_v54 = vld [vmem:[#allocation3 + $0x38] sm:$0xff] }
 0x4e4   : > { %v9576_v33 = vpack.i.bf16 %v3934_v46, %v3420_v7  ;;  %v3391_v35 = vld [vmem:[#allocation3 + $0x30] sm:$0xff]  ;;  %v10926_v44 = vpack.i.bf16 %v3517_v42, %v3420_v7  ;;  %v2529_v63 = vmul.f32 0.2, %v2457_v8  ;;  %v13443_v14 = vmov 0 }
 0x4e5   : > { %2466 = vst.msk [vmem:[#allocation3 + $0x50] sm:$0xff] %vm13300_vm1, %v2464_v32  ;;  %2474 = vst.msk [vmem:[#allocation3 + $0x60] sm:$0xff] %vm13300_vm1, %v2472_v12  ;;  %v10930_v59 = vpack.i.bf16 %v3391_v35, %v3390_v58  ;;  %v3393_v9 = vld [vmem:[#allocation3 + $0x40] sm:$0xff]  ;;  %v3422_v17 = vld [vmem:[#allocation3 + $0x29] sm:$0xff]  ;;  %v13444_v14 = vsel %vm10935_vm13, 4294967295, %v13443_v14 }
 0x4e6   : > { %v2515_v5 = vpop.f32.mrb[20].mxu0  ;;  %v3423_v56 = vld [vmem:[#allocation3 + $0x31] sm:$0xff]  ;;  %9577 = vrot.lane.b32.xlu1 %v9576_v33, %s10023_s20  ;;  %v10948_v7 = vpack.i.bf16 %v3393_v9, %v3392_v54  ;;  %v13448_v9 = vmov 0 }
 0x4e7   : > { %13442 = vst [vmem:[#allocation9_spill] sm:$0xff] %v10930_v59  ;;  %v2522_v21 = vmul.f32 0.33333334, %v2515_v5  ;;  %v2530_v4 = vmul.f32 0.8, %v2515_v5  ;;  %9582 = vrot.lane.b32.xlu0 %v10930_v59, %s10020_s30  ;;  %v8805_v39 = vpop.f32.mrb[21].mxu0 }
 0x4e8   : > { %v3936_v8 = vsel %vm10860_vm10, %v3423_v56, 0.0  ;;  %v3519_v52 = vsel %vm10877_vm11, %v3423_v56, 0.0  ;;  %v4814_v29 = vsel %vm10856_vm9, %v3423_v56, 0.0  ;;  %v2518_v12 = vpop.f32.mrb[22].mxu0  ;;  %13445 = vst [vmem:[#allocation10_spill] sm:$0xff] %v10948_v7  ;;  %v10954_v35 = vld [vmem:[#allocation3 + $0x37] sm:$0xff] }
 0x4e9   : > { %v2524_v0 = vadd.f32 %v2522_v21, %v2475_v30  ;;  %v2532_v32 = vadd.f32 %v2530_v4, %v2528_v11  ;;  %v10950_v46 = vpack.i.bf16 %v3519_v52, %v3422_v17  ;;  %v2523_v42 = vmul.f32 0.33333334, %v2518_v12  ;;  %13447 = vst [vmem:[#allocation12_spill] sm:$0xff] %v10954_v35  ;;  %v8806_v30 = vpop.f32.mrb[23].mxu0  ;;  %v10975_v39 = vld [vmem:[#allocation3 + $0x39] sm:$0xff] }
 0x4ea   : > { %v2531_v37 = vmul.f32 0.8, %v2518_v12  ;;  %v9591_v33 = vpack.i.bf16 %v3936_v8, %v3422_v17  ;;  %v10952_v58 = vpack.i.bf16 %v4814_v29, %v3422_v17  ;;  %9587 = vrot.lane.b32.xlu1 %v10948_v7, %s10020_s30  ;;  %v10960_v11 = vld [vmem:[#allocation3 + $0x41] sm:$0xff]  ;;  %v13449_v9 = vsel %vm10964_vm14, 4294967295, %v13448_v9 }
 0x4eb   : > { %2526 = vst.msk [vmem:[#allocation3 + $0x68] sm:$0xff] %vm13300_vm1, %v2524_v0  ;;  %2534 = vst.msk [vmem:[#allocation3 + $0x78] sm:$0xff] %vm13300_vm1, %v2532_v32  ;;  %v10969_v17 = vmul.f32 0.6, %v10816_v62  ;;  %v10972_v56 = vmul.f32 0.13333334, %v10819_v18  ;;  %v2525_v21 = vadd.f32 %v2523_v42, %v2476_v27 }
 0x4ec   : > { %13446 = vst [vmem:[#allocation11_spill] sm:$0xff] %v10952_v58  ;;  %v2533_v4 = vadd.f32 %v2531_v37, %v2529_v63  ;;  %9592 = vrot.lane.b32.xlu0 %v9591_v33, %s10023_s20  ;;  %v3938_v38 = vsel %vm10877_vm11, %v10960_v11, 0.0  ;;  %v2536_v54 = vmul.f32 0.73333335, %v2515_v5  ;;  %v3394_v52 = vld [vmem:[#allocation3 + $0x48] sm:$0xff]  ;;  %v3395_v29 = vld [vmem:[#allocation3 + $0x50] sm:$0xff] }
 0x4ed   : > { %v9596_v8 = vpack.i.bf16 %v3938_v38, %v10975_v39  ;;  %v4816_v27 = vsel %vm10860_vm10, %v10960_v11, 0.0  ;;  %v2589_v0 = vmul.f32 0.26666668, %v2515_v5  ;;  %2527 = vst.msk [vmem:[#allocation3 + $0x70] sm:$0xff] %vm13300_vm1, %v2525_v21  ;;  %v10992_v42 = vpack.i.bf16 %v3395_v29, %v3394_v52  ;;  %v3397_v37 = vld [vmem:[#allocation3 + $0x60] sm:$0xff]  ;;  %v10994_v33 = vld [vmem:[#allocation3 + $0x51] sm:$0xff] }
 0x4ee   : > { %2535 = vst.msk [vmem:[#allocation3 + $0x80] sm:$0xff] %vm13300_vm1, %v2533_v4  ;;  %v2576_v32 = vpop.f32.mrb[24].mxu0  ;;  %v10997_v30 = vpack.i.bf16 %v4816_v27, %v10975_v39  ;;  %v11003_v1 = vld [vmem:[#allocation3 + $0x49] sm:$0xff]  ;;  %v13452_v21 = vmov 0  ;;  %v11012_v4 = vmul.f32 0.0, %v10816_v62  ;;  %v3396_v27 = vld [vmem:[#allocation3 + $0x58] sm:$0xff] }
 0x4ef   : > { %13450 = vst [vmem:[#allocation13_spill] sm:$0xff] %v10992_v42  ;;  %9597 = vrot.lane.b32.xlu1 %v9596_v8, %s10023_s20  ;;  %v2583_v38 = vmul.f32 0.26666668, %v2576_v32  ;;  %v2591_v5 = vmul.f32 0.73333335, %v2576_v32  ;;  %v13453_v21 = vsel %vm11007_vm15, 4294967295, %v13452_v21  ;;  %v11022_v15 = vpack.i.bf16 %v3397_v37, %v3396_v27 }
 0x4f0   : > { %13451 = vst [vmem:[#allocation14_spill] sm:$0xff] %v10997_v30  ;;  %v2537_v52 = vmul.f32 0.73333335, %v2518_v12  ;;  %9602 = vrot.lane.b32.xlu0 %v10992_v42, %s10020_s30  ;;  %v8811_v29 = vpop.f32.mrb[25].mxu0  ;;  %v3940_v8 = vsel %vm10935_vm13, %v10994_v33, 0.0  ;;  %v4818_v51 = vsel %vm10877_vm11, %v10994_v33, 0.0 }
 0x4f1   : > { %v2590_v45 = vmul.f32 0.26666668, %v2518_v12  ;;  %v2585_v57 = vadd.f32 %v2583_v38, %v2536_v54  ;;  %v2593_v63 = vadd.f32 %v2591_v5, %v2589_v0  ;;  %v2579_v34 = vpop.f32.mrb[26].mxu0  ;;  %13454 = vst [vmem:[#allocation15_spill] sm:$0xff] %v11022_v15  ;;  %v9611_v20 = vpack.i.bf16 %v3940_v8, %v11003_v1 }
 0x4f2   : > { %v2584_v50 = vmul.f32 0.26666668, %v2579_v34  ;;  %v2592_v25 = vmul.f32 0.73333335, %v2579_v34  ;;  %v11026_v29 = vpack.i.bf16 %v4818_v51, %v11003_v1  ;;  %v2597_v23 = vmul.f32 0.8, %v2576_v32 }
 0x4f3   : > { %2587 = vst.msk [vmem:[#allocation3 + $0x88] sm:$0xff] %vm13300_vm1, %v2585_v57  ;;  %2595 = vst.msk [vmem:[#allocation3 + $0x98] sm:$0xff] %vm13300_vm1, %v2593_v63  ;;  %9607 = vrot.lane.b32.xlu1 %v11022_v15, %s10020_s30  ;;  %v8812_v43 = vpop.f32.mrb[27].mxu0  ;;  %v11032_v12 = vld [vmem:[#allocation3 + $0x61] sm:$0xff]  ;;  %v13456_v54 = vmov 0  ;;  %v11044_v63 = vld [vmem:[#allocation3 + $0x59] sm:$0xff] }
 0x4f4   : > { %13455 = vst [vmem:[#allocation16_spill] sm:$0xff] %v11026_v29  ;;  %v13457_v54 = vsel %vm11036_vm2, 4294967295, %v13456_v54  ;;  %v11041_v0 = vmul.f32 0.93333334, %v10816_v62  ;;  %v2650_v37 = vmul.f32 0.33333334, %v2576_v32  ;;  %v2586_v57 = vadd.f32 %v2584_v50, %v2537_v52  ;;  %9612 = vrot.lane.b32.xlu0 %v9611_v20, %s10023_s20 }
 0x4f5   : > { %v2594_v38 = vadd.f32 %v2592_v25, %v2590_v45  ;;  %v3942_v5 = vsel %vm10964_vm14, %v11032_v12, 0.0  ;;  %v2598_v19 = vmul.f32 0.8, %v2579_v34  ;;  %v3398_v8 = vld [vmem:[#allocation3 + $0x68] sm:$0xff]  ;;  %v3399_v32 = vld [vmem:[#allocation3 + $0x70] sm:$0xff]  ;;  %v3401_v50 = vld [vmem:[#allocation3 + $0x80] sm:$0xff] }
 0x4f6   : > { %v9616_v27 = vpack.i.bf16 %v3942_v5, %v11044_v63  ;;  %v4820_v20 = vsel %vm10935_vm13, %v11032_v12, 0.0  ;;  %v13459_v25 = vmov 0  ;;  %2588 = vst.msk [vmem:[#allocation3 + $0x90] sm:$0xff] %vm13300_vm1, %v2586_v57  ;;  %v2651_v52 = vmul.f32 0.33333334, %v2579_v34  ;;  %v2637_v51 = vpop.f32.mrb[28].mxu0 }
 0x4f7   : > { %v13460_v25 = vsel %vm11060_vm3, 4294967295, %v13459_v25  ;;  %2596 = vst.msk [vmem:[#allocation3 + $0xa0] sm:$0xff] %vm13300_vm1, %v2594_v38  ;;  %v11066_v45 = vpack.i.bf16 %v3399_v32, %v3398_v8  ;;  %v3400_v43 = vld [vmem:[#allocation3 + $0x78] sm:$0xff]  ;;  %v11068_v5 = vld [vmem:[#allocation3 + $0x69] sm:$0xff]  ;;  %v13463_v35 = vand.u32 15, %v10865_v10  ;;  %v11079_v2 = vpack.i.bf16 %v4820_v20, %v11044_v63  ;;  %v8817_v32 = vpop.f32.mrb[29].mxu0 }
 0x4f8   : > { %13461 = vst [vmem:[#allocation18_spill] sm:$0xff] %v13460_v25  ;;  %v11070_v55 = vld [vmem:[#allocation3 + $0x71] sm:$0xff]  ;;  %9617 = vrot.lane.b32.xlu1 %v9616_v27, %s10023_s20  ;;  %v2644_v34 = vmul.f32 0.2, %v2637_v51  ;;  %v2652_v57 = vmul.f32 0.6666667, %v2637_v51  ;;  %v11085_v10 = vpack.i.bf16 %v3401_v50, %v3400_v43 }
 0x4f9   : > { %13462 = vst [vmem:[#allocation19_spill] sm:$0xff] %v11066_v45  ;;  %vm11074_vm4 = vcmp.le.s32.totalorder %v13463_v35, 14  ;;  %13466 = vst [vmem:[#allocation20_spill] sm:$0xff] %v11079_v2  ;;  %v2658_v38 = vmul.f32 0.8666667, %v2637_v51  ;;  %9622 = vrot.lane.b32.xlu0 %v11066_v45, %s10020_s30  ;;  %v3944_v35 = vsel %vm11007_vm15, %v11070_v55, 0.0 }
 0x4fa   : > { %v13465_v26 = vsel %vm11074_vm4, 4294967295, %v13464_v26  ;;  %v2711_v8 = vmul.f32 0.4, %v2637_v51  ;;  %13467 = vst [vmem:[#allocation21_spill] sm:$0xff] %v11085_v10  ;;  %v4822_v20 = vsel %vm10964_vm14, %v11070_v55, 0.0  ;;  %v2646_v48 = vadd.f32 %v2644_v34, %v2597_v23  ;;  %v2640_v24 = vpop.f32.mrb[30].mxu0 }
 0x4fb   : > { %v2654_v27 = vadd.f32 %v2652_v57, %v2650_v37  ;;  %v2707_v29 = vadd.f32 %v10913_v47, %v2658_v38  ;;  %v9631_v51 = vpack.i.bf16 %v3944_v35, %v11068_v5  ;;  %v2645_v2 = vmul.f32 0.2, %v2640_v24  ;;  %v11107_v47 = vld [vmem:[#allocation3 + $0x81] sm:$0xff]  ;;  %v8818_v37 = vpop.f32.mrb[31].mxu0  ;;  %v11121_v38 = vld [vmem:[#allocation3 + $0x57] sm:$0xff] }
 0x4fc   : > { %v2653_v45 = vmul.f32 0.6666667, %v2640_v24  ;;  %v2659_v32 = vmul.f32 0.8666667, %v2640_v24  ;;  %v2715_v50 = vadd.f32 %v10969_v17, %v2711_v8  ;;  %v13468_v43 = vand.u32 15, %v10872_v22  ;;  %2648 = vst.msk [vmem:[#allocation3 + $0xa8] sm:$0xff] %vm13300_vm1, %v2646_v48  ;;  %9627 = vrot.lane.b32.xlu1 %v11085_v10, %s10020_s30 }
 0x4fd   : > { %v13469_v42 = vmov 0  ;;  %2656 = vst.msk [vmem:[#allocation3 + $0xb8] sm:$0xff] %vm13300_vm1, %v2654_v27  ;;  %v2712_v23 = vmul.f32 0.4, %v2640_v24  ;;  %2709 = vst.msk [vmem:[#allocation3 + $0xc8] sm:$0xff] %vm13300_vm1, %v2707_v29  ;;  %v11111_v22 = vpack.i.bf16 %v4822_v20, %v11068_v5  ;;  %v2647_v34 = vadd.f32 %v2645_v2, %v2598_v19  ;;  %9632 = vrot.lane.b32.xlu0 %v9631_v51, %s10023_s20  ;;  %v11115_v24 = vld [vmem:[#allocation3 + $0x79] sm:$0xff] }
 0x4fe   : > { %vm11098_vm6 = vcmp.le.s32.totalorder %v13468_v43, 14  ;;  %v2772_v17 = vmul.f32 0.46666667, %v10816_v62  ;;  %v2655_v57 = vadd.f32 %v2653_v45, %v2651_v52  ;;  %2717 = vst.msk [vmem:[#allocation3 + $0xd8] sm:$0xff] %vm13300_vm1, %v2715_v50  ;;  %v3946_v29 = vsel %vm11036_vm2, %v11107_v47, 0.0  ;;  %v3402_v8 = vld [vmem:[#allocation3 + $0x88] sm:$0xff] }
 0x4ff   : > { %v13470_v42 = vsel %vm11098_vm6, 4294967295, %v13469_v42  ;;  %13472 = vst [vmem:[#allocation23_spill] sm:$0xff] %v11111_v22  ;;  %v2708_v48 = vadd.f32 %v10972_v56, %v2659_v32  ;;  %v9636_v62 = vpack.i.bf16 %v3946_v29, %v11115_v24  ;;  %v3403_v35 = vld [vmem:[#allocation3 + $0x90] sm:$0xff]  ;;  %v2716_v19 = vadd.f32 %v10981_v41, %v2712_v23  ;;  %v3405_v52 = vld [vmem:[#allocation3 + $0xa0] sm:$0xff]  ;;  %2649 = vst.msk [vmem:[#allocation3 + $0xb0] sm:$0xff] %vm13300_vm1, %v2647_v34  ;;  %v2759_v20 = vpop.f32.mrb[32].mxu0 }
 0x500   : > { %13471 = vst [vmem:[#allocation22_spill] sm:$0xff] %v13470_v42  ;;  %v2720_v45 = vmul.f32 0.93333334, %v10819_v18  ;;  %v4824_v2 = vsel %vm11007_vm15, %v11107_v47, 0.0  ;;  %2657 = vst.msk [vmem:[#allocation3 + $0xc0] sm:$0xff] %vm13300_vm1, %v2655_v57  ;;  %v11131_v56 = vpack.i.bf16 %v3403_v35, %v3402_v8  ;;  %v3404_v27 = vld [vmem:[#allocation3 + $0x98] sm:$0xff]  ;;  %v2782_v34 = vadd.f32 %v11012_v4, %v2759_v20 }
 0x501   : > { %2710 = vst.msk [vmem:[#allocation3 + $0xd0] sm:$0xff] %vm13300_vm1, %v2708_v48  ;;  %v11134_v51 = vld [vmem:[#allocation3 + $0x89] sm:$0xff]  ;;  %v11136_v41 = vld [vmem:[#allocation3 + $0x91] sm:$0xff]  ;;  %v2781_v32 = vmul.f32 0.0, %v10819_v18  ;;  %v11140_v50 = vpack.i.bf16 %v4824_v2, %v11115_v24  ;;  %v2912_v43 = vand.u32 15, %v11000_v53  ;;  %9637 = vrot.lane.b32.xlu1 %v9636_v62, %s10023_s20  ;;  %2718 = vst.msk [vmem:[#allocation3 + $0xe0] sm:$0xff] %vm13300_vm1, %v2716_v19  ;;  %v11151_v48 = vpack.i.bf16 %v3405_v52, %v3404_v27 }
 0x502   : > { %13473 = vst [vmem:[#allocation24_spill] sm:$0xff] %v11131_v56  ;;  %13474 = vst [vmem:[#allocation25_spill] sm:$0xff] %v11134_v51  ;;  %v2766_v23 = vmul.f32 0.06666667, %v2759_v20  ;;  %v2774_v37 = vmul.f32 0.53333336, %v2759_v20  ;;  %9642 = vrot.lane.b32.xlu0 %v11131_v56, %s10020_s30 }
 0x503   : > { %13475 = vst [vmem:[#allocation26_spill] sm:$0xff] %v11140_v50  ;;  %v3948_v57 = vsel %vm11074_vm4, %v11136_v41, 0.0  ;;  %v8829_v29 = vpop.f32.mrb[33].mxu0  ;;  %13476 = vst [vmem:[#allocation27_spill] sm:$0xff] %v11151_v48  ;;  %v2773_v53 = vmul.f32 0.46666667, %v10819_v18 }
 0x504   : > { %v2762_v8 = vpop.f32.mrb[34].mxu0  ;;  %v4826_v62 = vsel %vm11036_vm2, %v11136_v41, 0.0  ;;  %v2768_v35 = vadd.f32 %v2766_v23, %v11041_v0  ;;  %v2776_v19 = vadd.f32 %v2774_v37, %v2772_v17  ;;  %2784 = vst.msk [vmem:[#allocation3 + $0x108] sm:$0xff] %vm13300_vm1, %v2782_v34  ;;  %v9651_v27 = vpack.i.bf16 %v3948_v57, %v11134_v51  ;;  %v11163_v29 = vld [vmem:[#allocation3 + $0xa1] sm:$0xff]  ;;  %v11172_v4 = vld [vmem:[#allocation3 + $0x77] sm:$0xff] }
 0x505   : > { %v2767_v2 = vmul.f32 0.06666667, %v2762_v8  ;;  %v2775_v20 = vmul.f32 0.53333336, %v2762_v8  ;;  %v8830_v52 = vpop.f32.mrb[35].mxu0  ;;  %v2783_v18 = vadd.f32 %v2781_v32, %v2762_v8  ;;  %v11166_v56 = vpack.i.bf16 %v4826_v62, %v11134_v51  ;;  %13481 = vst [vmem:[#allocation30_spill] sm:$0xff] %v11172_v4  ;;  %9647 = vrot.lane.b32.xlu1 %v11151_v48, %s10020_s30 }
 0x506   : > { %vm11168_vm7 = vcmp.ge.s32.totalorder %v2912_v43, 1  ;;  %v13478_v22 = vmov 0  ;;  %2770 = vst.msk [vmem:[#allocation3 + $0xe8] sm:$0xff] %vm13300_vm1, %v2768_v35  ;;  %2778 = vst.msk [vmem:[#allocation3 + $0xf8] sm:$0xff] %vm13300_vm1, %v2776_v19  ;;  %v11178_v0 = vld [vmem:[#allocation3 + $0x99] sm:$0xff]  ;;  %v3950_v17 = vsel %vm11098_vm6, %v11163_v29, 0.0  ;;  %9652 = vrot.lane.b32.xlu0 %v9651_v27, %s10023_s20 }
 0x507   : > { %13477 = vst [vmem:[#allocation28_spill] sm:$0xff] %v11166_v56  ;;  %v13479_v22 = vsel %vm11168_vm7, 4294967295, %v13478_v22  ;;  %13482 = vst [vmem:[#allocation31_spill] sm:$0xff] %v11178_v0  ;;  %v2769_v32 = vadd.f32 %v2767_v2, %v2720_v45  ;;  %v2777_v43 = vadd.f32 %v2775_v20, %v2773_v53  ;;  %v2805_v23 = vadd.s32 216, %v10105_v3  ;;  %v3406_v62 = vld [vmem:[#allocation3 + $0xa8] sm:$0xff]  ;;  %v3407_v35 = vld [vmem:[#allocation3 + $0xb0] sm:$0xff] }
 0x508   : > { %13480 = vst [vmem:[#allocation29_spill] sm:$0xff] %v13479_v22  ;;  %v9656_v37 = vpack.i.bf16 %v3950_v17, %v11178_v0  ;;  %2785 = vst.msk [vmem:[#allocation3 + $0x110] sm:$0xff] %vm13300_vm1, %v2783_v18  ;;  %v2807_v34 = vadd.s32 232, %v10105_v3  ;;  %v4828_v57 = vsel %vm11074_vm4, %v11163_v29, 0.0  ;;  %v2796_v8 = vadd.s32 144, %v10105_v3  ;;  %v3409_v52 = vld [vmem:[#allocation3 + $0xc0] sm:$0xff] }
 0x509   : > { %2771 = vst.msk [vmem:[#allocation3 + $0xf0] sm:$0xff] %vm13300_vm1, %v2769_v32  ;;  %2779 = vst.msk [vmem:[#allocation3 + $0x100] sm:$0xff] %vm13300_vm1, %v2777_v43  ;;  %v2989_v45 = vand.u32 15, %v10917_v60  ;;  %v11196_v53 = vpack.i.bf16 %v4828_v57, %v11178_v0  ;;  %v2800_v2 = vadd.s32 176, %v10105_v3  ;;  %v11202_v20 = vpack.i.bf16 %v3407_v35, %v3406_v62  ;;  %v11210_v17 = vld [vmem:[#allocation3 + $0xb1] sm:$0xff]  ;;  %v11215_v43 = vld [vmem:[#allocation3 + $0xa9] sm:$0xff] }
 0x50a   : > { %v13485_v27 = vand.u32 15, %v10875_v49  ;;  %v13486_v18 = vmov 0  ;;  %13488 = vst [vmem:[#allocation34_spill] sm:$0xff] %v11210_v17  ;;  %v2804_v32 = vadd.s32 208, %v10105_v3  ;;  %9657 = vrot.lane.b32.xlu1 %v9656_v37, %s10023_s20  ;;  %13489 = vst [vmem:[#allocation35_spill] sm:$0xff] %v11215_v43  ;;  %v13490_v49 = vand.u32 15, %v10894_v36 }
 0x50b   : > { %13483 = vst [vmem:[#allocation32_spill] sm:$0xff] %v11196_v53  ;;  %13484 = vst [vmem:[#allocation33_spill] sm:$0xff] %v11202_v20  ;;  %v13491_v62 = vmov 0  ;;  %v11226_v35 = vld [vmem:[#allocation3 + $0xc1] sm:$0xff]  ;;  %v13496_v19 = vmov 0  ;;  %9662 = vrot.lane.b32.xlu0 %v11202_v20, %s10020_s30  ;;  %v3408_v60 = vld [vmem:[#allocation3 + $0xb8] sm:$0xff] }
 0x50c   : > { %vm11206_vm10 = vcmp.le.s32.totalorder %v13485_v27, 14  ;;  %vm11222_vm11 = vcmp.le.s32.totalorder %v13490_v49, 14  ;;  %13494 = vst [vmem:[#allocation37_spill] sm:$0xff] %v11226_v35  ;;  %v13495_v27 = vand.u32 15, %v10901_v31  ;;  %v11237_v56 = vld [vmem:[#allocation3 + $0xb9] sm:$0xff]  ;;  %v3003_v36 = vand.u32 15, %v2805_v23 }
 0x50d   : > { %v13487_v18 = vsel %vm11206_vm10, 4294967295, %v13486_v18  ;;  %v3952_v57 = vsel %vm11206_vm10, %v11210_v17, 0.0  ;;  %v13492_v62 = vsel %vm11222_vm11, 4294967295, %v13491_v62  ;;  %13499 = vst [vmem:[#allocation39_spill] sm:$0xff] %v11237_v56  ;;  %v3017_v49 = vand.u32 15, %v2807_v34  ;;  %v3410_v15 = vld [vmem:[#allocation3 + $0xc8] sm:$0xff] }
 0x50e   : > { %13493 = vst [vmem:[#allocation36_spill] sm:$0xff] %v13492_v62  ;;  %vm11230_vm0 = vcmp.le.s32.totalorder %v13495_v27, 14  ;;  %v11240_v53 = vadd.s32 128, %v10105_v3  ;;  %v2940_v48 = vand.u32 15, %v2796_v8  ;;  %v11242_v50 = vpack.i.bf16 %v3409_v52, %v3408_v60  ;;  %v3411_v52 = vld [vmem:[#allocation3 + $0xd0] sm:$0xff]  ;;  %v11291_v58 = vld [vmem:[#allocation3 + $0xe1] sm:$0xff] }
 0x50f   : > { %v13497_v19 = vsel %vm11230_vm0, 4294967295, %v13496_v19  ;;  %vm11244_vm5 = vcmp.le.s32.totalorder %v2989_v45, 14  ;;  %v13501_v31 = vmov 0  ;;  %v11249_v27 = vadd.s32 160, %v10105_v3  ;;  %v11263_v60 = vld [vmem:[#allocation3 + $0xd1] sm:$0xff]  ;;  %13510 = vst [vmem:[#allocation44_spill] sm:$0xff] %v11291_v58 }
 0x510   : > { %13498 = vst [vmem:[#allocation38_spill] sm:$0xff] %v13497_v19  ;;  %13500 = vst [vmem:[#allocation40_spill] sm:$0xff] %v11242_v50  ;;  %v13502_v31 = vsel %vm11244_vm5, 4294967295, %v13501_v31  ;;  %v2968_v37 = vand.u32 15, %v2800_v2  ;;  %v11252_v20 = vadd.s32 192, %v10105_v3  ;;  %v9671_v23 = vpack.i.bf16 %v3952_v57, %v11215_v43  ;;  %9667 = vrot.lane.b32.xlu1 %v11242_v50, %s10020_s30  ;;  %v3412_v59 = vld [vmem:[#allocation3 + $0xd8] sm:$0xff] }
 0x511   : > { %13503 = vst [vmem:[#allocation41_spill] sm:$0xff] %v13502_v31  ;;  %v3954_v34 = vsel %vm11222_vm11, %v11226_v35, 0.0  ;;  %v4832_v8 = vsel %vm11206_vm10, %v11226_v35, 0.0  ;;  %v2996_v45 = vand.u32 15, %v2804_v32  ;;  %13504 = vst [vmem:[#allocation42_spill] sm:$0xff] %v11263_v60  ;;  %v4830_v57 = vsel %vm11098_vm6, %v11210_v17, 0.0 }
 0x512   : > { %v11266_v2 = vpack.i.bf16 %v4832_v8, %v11237_v56  ;;  %v11272_v10 = vadd.s32 224, %v10105_v3  ;;  %9672 = vrot.lane.b32.xlu0 %v9671_v23, %s10023_s20  ;;  %vm11278_vm1 = vcmp.le.s32.totalorder %v3003_v36, 14  ;;  %vm11282_vm8 = vcmp.le.s32.totalorder %v3017_v49, 14  ;;  %v11300_v49 = vld [vmem:[#allocation3 + $0x97] sm:$0xff]  ;;  %v11305_v7 = vld [vmem:[#allocation3 + $0xc9] sm:$0xff] }
 0x513   : > { %v11287_v8 = vadd.s32 248, %v10105_v3  ;;  %v9681_v16 = vpack.i.bf16 %v3954_v34, %v11237_v56  ;;  %v11294_v23 = vpack.i.bf16 %v4830_v57, %v11215_v43  ;;  %vm11296_vm6 = vcmp.ge.s32.totalorder %v2940_v48, 1  ;;  %13515 = vst [vmem:[#allocation47_spill] sm:$0xff] %v11300_v49  ;;  %13517 = vst [vmem:[#allocation49_spill] sm:$0xff] %v11305_v7  ;;  %v11334_v56 = vld [vmem:[#allocation3 + $0xf9] sm:$0xff]  ;;  %v11348_v35 = vld [vmem:[#allocation3 + $0x111] sm:$0xff] }
 0x514   : > { %13505 = vst [vmem:[#allocation43_spill] sm:$0xff] %v11266_v2  ;;  %v2926_v2 = vand.u32 15, %v11240_v53  ;;  %v13512_v36 = vmov 0  ;;  %v2954_v30 = vand.u32 15, %v11249_v27  ;;  %v11303_v3 = vpack.i.bf16 %v3411_v52, %v3410_v15  ;;  %v3413_v53 = vld [vmem:[#allocation3 + $0xe0] sm:$0xff]  ;;  %v11320_v27 = vld [vmem:[#allocation3 + $0xb7] sm:$0xff] }
 0x515   : > { %13511 = vst [vmem:[#allocation45_spill] sm:$0xff] %v11294_v23  ;;  %v13513_v36 = vsel %vm11296_vm6, 4294967295, %v13512_v36  ;;  %v3956_v34 = vsel %vm11230_vm0, %v11263_v60, 0.0  ;;  %vm11310_vm10 = vcmp.ge.s32.totalorder %v2968_v37, 1  ;;  %v13518_v57 = vmov 0  ;;  %9682 = vrot.lane.b32.xlu1 %v9681_v16, %s10023_s20  ;;  %v11316_v23 = vld [vmem:[#allocation3 + $0xf1] sm:$0xff] }
 0x516   : > { %13514 = vst [vmem:[#allocation46_spill] sm:$0xff] %v13513_v36  ;;  %13516 = vst [vmem:[#allocation48_spill] sm:$0xff] %v11303_v3  ;;  %v13519_v57 = vsel %vm11310_vm10, 4294967295, %v13518_v57  ;;  %v2982_v48 = vand.u32 15, %v11252_v20  ;;  %v11318_v15 = vld [vmem:[#allocation3 + $0x101] sm:$0xff]  ;;  %vm11322_vm2 = vcmp.ge.s32.totalorder %v2996_v45, 1  ;;  %9677 = vrot.lane.b32.xlu0 %v11303_v3, %s10020_s30  ;;  %v9691_v3 = vpack.i.bf16 %v3956_v34, %v11305_v7 }
 0x517   : > { %13520 = vst [vmem:[#allocation50_spill] sm:$0xff] %v13519_v57  ;;  %13521 = vst [vmem:[#allocation51_spill] sm:$0xff] %v11320_v27  ;;  %v13522_v52 = vmov 0  ;;  %v3010_v43 = vand.u32 15, %v11272_v10  ;;  %v3024_v37 = vand.u32 15, %v11275_v40  ;;  %v11330_v20 = vld [vmem:[#allocation3 + $0xd9] sm:$0xff]  ;;  %v11345_v10 = vpack.i.bf16 %v3413_v53, %v3412_v59 }
 0x518   : > { %v13523_v52 = vsel %vm11322_vm2, 4294967295, %v13522_v52  ;;  %13525 = vst [vmem:[#allocation53_spill] sm:$0xff] %v11330_v20  ;;  %v11332_v16 = vld [vmem:[#allocation3 + $0xe9] sm:$0xff]  ;;  %v4836_v45 = vsel %vm11230_vm0, %v11291_v58, 0.0  ;;  %v4834_v17 = vsel %vm11222_vm11, %v11263_v60, 0.0  ;;  %v11356_v0 = vld [vmem:[#allocation3 + $0xd7] sm:$0xff]  ;;  %vm13563_vm2 = vnez %v13453_v21 }
 0x519   : > { %13524 = vst [vmem:[#allocation52_spill] sm:$0xff] %v13523_v52  ;;  %13526 = vst [vmem:[#allocation54_spill] sm:$0xff] %v11345_v10  ;;  %v11351_v51 = vpack.i.bf16 %v4836_v45, %v11330_v20  ;;  %v11354_v19 = vpack.i.bf16 %v4834_v17, %v11305_v7  ;;  %v3958_v60 = vsel %vm11244_vm5, %v11291_v58, 0.0  ;;  %v11361_v62 = vld [vmem:[#allocation3 + $0x109] sm:$0xff]  ;;  %v4840_v59 = vsel %vm11278_vm1, %v11318_v15, 0.0  ;;  %9687 = vrot.lane.b32.xlu1 %v11345_v10, %s10020_s30  ;;  %v11392_v10 = vld [vmem:[#allocation3 + $0xf7] sm:$0xff] }
 0x51a   : > { %13529 = vst [vmem:[#allocation57_spill] sm:$0xff] %v11356_v0  ;;  %v4838_v53 = vsel %vm11244_vm5, %v11316_v23, 0.0  ;;  %v3415_v34 = vld [vmem:[#allocation3 + $0xf0] sm:$0xff]  ;;  %v13530_v45 = vand.u32 15, %v10888_v28  ;;  %v11387_v7 = vpack.i.bf16 %v4840_v59, %v11334_v56  ;;  %13539 = vst [vmem:[#allocation61_spill] sm:$0xff] %v11392_v10  ;;  %9692 = vrot.lane.b32.xlu0 %v9691_v3, %s10023_s20  ;;  %v3417_v28 = vld [vmem:[#allocation3 + $0x100] sm:$0xff]  ;;  %v9696_v59 = vpack.i.bf16 %v3958_v60, %v11330_v20 }
 0x51b   : > { %13527 = vst [vmem:[#allocation55_spill] sm:$0xff] %v11351_v51  ;;  %13528 = vst [vmem:[#allocation56_spill] sm:$0xff] %v11354_v19  ;;  %v13533_v19 = vand.u32 15, %v10904_v61  ;;  %v13534_v51 = vmov 0  ;;  %v11390_v17 = vpack.i.bf16 %v4838_v53, %v11332_v16  ;;  %vm11396_vm5 = vcmp.ge.s32.totalorder %v2926_v2, 1  ;;  %v3414_v53 = vld [vmem:[#allocation3 + $0xe8] sm:$0xff] }
 0x51c   : > { %vm11376_vm11 = vcmp.ge.s32.totalorder %v13530_v45, 1  ;;  %13537 = vst [vmem:[#allocation59_spill] sm:$0xff] %v11387_v7  ;;  %v3031_v45 = vand.u32 15, %v11287_v8  ;;  %v13540_v31 = vmov 0  ;;  %v4842_v61 = vsel %vm11282_vm8, %v11348_v35, 0.0  ;;  %v11409_v3 = vld [vmem:[#allocation3 + $0x87] sm:$0xff] }
 0x51d   : > { %vm11382_vm0 = vcmp.ge.s32.totalorder %v13533_v19, 1  ;;  %13538 = vst [vmem:[#allocation60_spill] sm:$0xff] %v11390_v17  ;;  %v13541_v31 = vsel %vm11396_vm5, 4294967295, %v13540_v31  ;;  %v11407_v17 = vld [vmem:[#allocation3 + $0x67] sm:$0xff]  ;;  %13543 = vst [vmem:[#allocation63_spill] sm:$0xff] %v11409_v3  ;;  %vm11411_vm4 = vcmp.ge.s32.totalorder %v2954_v30, 1  ;;  %v11416_v8 = vpack.i.bf16 %v4842_v61, %v11361_v62  ;;  %9697 = vrot.lane.b32.xlu1 %v9696_v59, %s10023_s20 }
 0x51e   : > { %v13535_v51 = vsel %vm11382_vm0, 4294967295, %v13534_v51  ;;  %13542 = vst [vmem:[#allocation62_spill] sm:$0xff] %v13541_v31  ;;  %v13544_v2 = vmov 0  ;;  %vm11418_vm14 = vcmp.ge.s32.totalorder %v3024_v37, 1  ;;  %v13547_v7 = vmov 0  ;;  %v3416_v19 = vld [vmem:[#allocation3 + $0xf8] sm:$0xff] }
 0x51f   : > { %13536 = vst [vmem:[#allocation58_spill] sm:$0xff] %v13535_v51  ;;  %v13545_v2 = vsel %vm11411_vm4, 4294967295, %v13544_v2  ;;  %v13548_v7 = vsel %vm11418_vm14, 4294967295, %v13547_v7  ;;  %v11422_v58 = vpack.i.bf16 %v3415_v34, %v3414_v53  ;;  %v11424_v60 = vld [vmem:[#allocation3 + $0xa7] sm:$0xff]  ;;  %vm11426_vm15 = vcmp.ge.s32.totalorder %v2982_v48, 1  ;;  %v3930_v0 = vld [vmem:[#allocation3 + $0x110] sm:$0xff] }
 0x520   : > { %13546 = vst [vmem:[#allocation64_spill] sm:$0xff] %v13545_v2  ;;  %13549 = vst [vmem:[#allocation65_spill] sm:$0xff] %v13548_v7  ;;  %v13551_v20 = vmov 0  ;;  %v11430_v30 = vld [vmem:[#allocation3 + $0xc7] sm:$0xff]  ;;  %vm11432_vm13 = vcmp.ge.s32.totalorder %v3010_v43, 1  ;;  %v13555_v42 = vmov 0  ;;  %v11440_v34 = vpack.i.bf16 %v3417_v28, %v3416_v19 }
 0x521   : > { %13550 = vst [vmem:[#allocation66_spill] sm:$0xff] %v11424_v60  ;;  %v13552_v20 = vsel %vm11426_vm15, 4294967295, %v13551_v20  ;;  %13554 = vst [vmem:[#allocation68_spill] sm:$0xff] %v11430_v30  ;;  %v13556_v42 = vsel %vm11432_vm13, 4294967295, %v13555_v42  ;;  %v3960_v48 = vsel %vm11278_vm1, %v11316_v23, 0.0  ;;  %v11445_v61 = vld [vmem:[#allocation3 + $0xe7] sm:$0xff]  ;;  %9702 = vrot.lane.b32.xlu0 %v11422_v58, %s10020_s30  ;;  %vm13562_vm13 = vnez %v13444_v14 }
 0x522   : > { %13553 = vst [vmem:[#allocation67_spill] sm:$0xff] %v13552_v20  ;;  %13557 = vst [vmem:[#allocation69_spill] sm:$0xff] %v13556_v42  ;;  %v11447_v53 = vld [vmem:[#allocation3 + $0x107] sm:$0xff]  ;;  %v9711_v7 = vpack.i.bf16 %v3960_v48, %v11332_v16  ;;  %v3962_v43 = vsel %vm11282_vm8, %v11318_v15, 0.0  ;;  %9707 = vrot.lane.b32.xlu1 %v11440_v34, %s10020_s30  ;;  %v3387_v59 = vld [vmem:[#allocation3 + $0x10] sm:$0xff]  ;;  %vm11494_vm14 = vcmp.le.s32.totalorder %v3031_v45, 14 }
 0x523   : > { %13558 = vst [vmem:[#allocation70_spill] sm:$0xff] %v11445_v61  ;;  %13559 = vst [vmem:[#allocation71_spill] sm:$0xff] %v11447_v53  ;;  %v3929_v19 = vld [vmem:[#allocation3 + $0x108] sm:$0xff]  ;;  %v9721_v52 = vpack.i.bf16 %v3962_v43, %v11334_v56  ;;  %v3964_v53 = vsel %vm11494_vm14, %v11348_v35, 0.0  ;;  %v3521_v43 = vsel %vm13562_vm13, %v10960_v11, 0.0  ;;  %v3525_v35 = vsel %vm13563_vm2, %v11032_v12, 0.0 }
 0x524   : > { %v3386_v48 = vld [vmem:[#allocation3 + $0x8] sm:$0xff]  ;;  %v11499_v37 = vpack.i.bf16 %v3930_v0, %v3929_v19  ;;  %v9726_v45 = vpack.i.bf16 %v3964_v53, %v11361_v62  ;;  %v9751_v62 = vpack.i.bf16 %v3521_v43, %v10975_v39  ;;  %v9761_v14 = vpack.i.bf16 %v3525_v35, %v11044_v63  ;;  %v13571_v12 = vld [vmem:[#allocation25_spill] sm:$0xff]  ;;  %v13580_v19 = vld [vmem:[#allocation44_spill] sm:$0xff] }
 0x525   : > { %9712 = vrot.lane.b32.xlu0 %v9711_v7, %s10023_s20  ;;  %v9731_v28 = vpack.i.bf16 %v3387_v59, %v3386_v48  ;;  %v3419_v7 = vld [vmem:[#allocation3 + $0x11] sm:$0xff]  ;;  %v3418_v42 = vld [vmem:[#allocation3 + $0x9] sm:$0xff]  ;;  %vm13565_vm13 = vnez %v13465_v26  ;;  %vm13566_vm2 = vnez %v13457_v54  ;;  %v13573_v26 = vld [vmem:[#allocation38_spill] sm:$0xff]  ;;  %v3541_v59 = vsel %vm11278_vm1, %v13580_v19, 0.0 }
 0x526   : > { %9722 = vrot.lane.b32.xlu1 %v9721_v52, %s10023_s20  ;;  %v3515_v0 = vsel %vm10856_vm9, %v3419_v7, 0.0  ;;  %vm13564_vm9 = vnez %v13449_v9  ;;  %v3529_v11 = vsel %vm13565_vm13, %v11107_v47, 0.0  ;;  %v3527_v39 = vsel %vm13566_vm2, %v11070_v55, 0.0  ;;  %v13570_v21 = vld [vmem:[#allocation31_spill] sm:$0xff]  ;;  %v13572_v63 = vld [vmem:[#allocation37_spill] sm:$0xff]  ;;  %v13575_v47 = vld [vmem:[#allocation34_spill] sm:$0xff] }
 0x527   : > { %v9736_v52 = vpack.i.bf16 %v3515_v0, %v3418_v42  ;;  %v3523_v13 = vsel %vm13564_vm9, %v10994_v33, 0.0  ;;  %v9771_v9 = vpack.i.bf16 %v3529_v11, %v11115_v24  ;;  %vm13567_vm9 = vnez %v13487_v18  ;;  %v13568_v42 = vld [vmem:[#allocation22_spill] sm:$0xff]  ;;  %v13576_v24 = vld [vmem:[#allocation36_spill] sm:$0xff]  ;;  %v13578_v18 = vld [vmem:[#allocation39_spill] sm:$0xff] }
 0x528   : > { %vm13569_vm13 = vnez %v13568_v42  ;;  %vm13574_vm2 = vnez %v13573_v26  ;;  %v13579_v53 = vld [vmem:[#allocation35_spill] sm:$0xff]  ;;  %v13581_v48 = vld [vmem:[#allocation42_spill] sm:$0xff]  ;;  %v13582_v7 = vld [vmem:[#allocation41_spill] sm:$0xff]  ;;  %v3545_v35 = vsel %vm11494_vm14, %v11318_v15, 0.0  ;;  %v3543_v32 = vsel %vm11282_vm8, %v11316_v23, 0.0 }
 0x529   : > { %9717 = vrot.lane.b32.xlu0 %v11499_v37, %s10020_s30  ;;  %v3531_v33 = vsel %vm13569_vm13, %v11136_v41, 0.0  ;;  %vm13583_vm13 = vnez %v13582_v7  ;;  %v13584_v0 = vld [vmem:[#allocation53_spill] sm:$0xff]  ;;  %v13588_v11 = vld [vmem:[#allocation14_spill] sm:$0xff]  ;;  %v13589_v50 = vld [vmem:[#allocation11_spill] sm:$0xff]  ;;  %vm13595_vm8 = vcmask 261120   ;;  %v13601_v26 = vmov 0 }
 0x52a   : > { %9732 = vrot.lane.b32.xlu1 %v9731_v28, %s10020_s30  ;;  %v9776_v54 = vpack.i.bf16 %v3531_v33, %v13571_v12  ;;  %v13585_v43 = vld [vmem:[#allocation49_spill] sm:$0xff]  ;;  %v13597_v33 = vld [vmem:[#allocation4_spill] sm:$0xff]  ;;  %vm13607_vm15 = vmmov %vm13595_vm8 }
 0x52b   : > { %v13587_v15 = vld [vmem:[#allocation9_spill] sm:$0xff]  ;;  %v13599_v12 = vld [vmem:[#allocation16_spill] sm:$0xff] }
 0x52c   : > { %v13596_v42 = vld [vmem:[#allocation13_spill] sm:$0xff] }
 0x52d   : > { %9727 = vrot.lane.b32.xlu0 %v9726_v45, %s10023_s20  ;;  %v3539_v45 = vsel %vm13583_vm13, %v13581_v48, 0.0  ;;  %vm13358_vm13 = vcmask 523264  }
 0x52e   : > { %9742 = vrot.lane.b32.xlu1 %v10926_v44, %s10023_s20  ;;  %v9756_v44 = vpack.i.bf16 %v3523_v13, %v11003_v1  ;;  %v3533_v1 = vsel %vm13567_vm9, %v11163_v29, 0.0  ;;  %vm13577_vm9 = vnez %v13576_v24  ;;  %v9816_v13 = vpack.i.bf16 %v3545_v35, %v11334_v56  ;;  %v13604_v24 = vld [vmem:[#allocation19_spill] sm:$0xff] }
 0x52f   : > { %v9781_v55 = vpack.i.bf16 %v3533_v1, %v13570_v21  ;;  %v3535_v29 = vsel %vm13577_vm9, %v13575_v47, 0.0  ;;  %v2814_v21 = vand.u32 15, %v13597_v33  ;;  %v13603_v47 = vld [vmem:[#allocation21_spill] sm:$0xff] }
 0x530   : > { %v9786_v28 = vpack.i.bf16 %v3535_v29, %v13579_v53 }
 0x531   : > { %9737 = vrot.lane.b32.xlu0 %v9736_v52, %s10023_s20  ;;  %v9801_v52 = vpack.i.bf16 %v3541_v59, %v13584_v0 }
 0x532   : > { %9752 = vrot.lane.b32.xlu1 %v9751_v62, %s10023_s20  ;;  %v9796_v62 = vpack.i.bf16 %v3539_v45, %v13585_v43  ;;  %v13608_v43 = vld [vmem:[#allocation26_spill] sm:$0xff] }
 0x535   : > { %9747 = vrot.lane.b32.xlu0 %v10950_v46, %s10023_s20  ;;  %v9766_v46 = vpack.i.bf16 %v3527_v39, %v11068_v5  ;;  %v3537_v5 = vsel %vm13574_vm2, %v13572_v63, 0.0  ;;  %v13591_v39 = vld [vmem:[#allocation7_spill] sm:$0xff]  ;;  %vm11607_vm2 = vcmp.ge.s32.totalorder %v2814_v21, 1 }
 0x536   : > { %9762 = vrot.lane.b32.xlu1 %v9761_v14, %s10023_s20  ;;  %v9791_v41 = vpack.i.bf16 %v3537_v5, %v13578_v18  ;;  %v9806_v14 = vpack.i.bf16 %v3543_v32, %v11332_v16  ;;  %v13590_v16 = vld [vmem:[#allocation15_spill] sm:$0xff]  ;;  %vm13592_vm1 = vnez %v13591_v39  ;;  %v13602_v26 = vsel %vm11607_vm2, 4294967295, %v13601_v26 }
 0x537   : > { %v3262_v18 = vld [vmem:[#allocation3 + $0x27] sm:$0xff] }
 0x539   : > { %9757 = vrot.lane.b32.xlu0 %v9756_v44, %s10023_s20  ;;  %v13586_v44 = vld [vmem:[#allocation10_spill] sm:$0xff] }
 0x53a   : > { %9772 = vrot.lane.b32.xlu1 %v9771_v9, %s10023_s20  ;;  %v13593_v9 = vld [vmem:[#allocation8_spill] sm:$0xff] }
 0x53b   : > { %v3897_v53 = vsel %vm11607_vm2, %v13593_v9, 0.0  ;;  %vm13610_vm2 = vmmov %vm13607_vm15 }
 0x53d   : > { %9767 = vrot.lane.b32.xlu0 %v9766_v46, %s10023_s20  ;;  %v13594_v46 = vsel %vm13592_vm1, %v13593_v9, 0.0 }
 0x53e   : > { %9782 = vrot.lane.b32.xlu1 %v9781_v55, %s10023_s20  ;;  %v13598_v55 = vld [vmem:[#allocation20_spill] sm:$0xff] }
 0x541   : > { %9777 = vrot.lane.b32.xlu0 %v9776_v54, %s10023_s20  ;;  %v13600_v54 = vld [vmem:[#allocation5_spill] sm:$0xff] }
 0x542   : > { %9792 = vrot.lane.b32.xlu1 %v9791_v41, %s10023_s20  ;;  %v2842_v63 = vand.u32 15, %v13600_v54 }
 0x544   : > { %vm11615_vm9 = vcmp.ge.s32.totalorder %v2842_v63, 1  ;;  %v13616_v63 = vld [vmem:[#allocation24_spill] sm:$0xff] }
 0x545   : > { %9787 = vrot.lane.b32.xlu0 %v9786_v28, %s10023_s20  ;;  %v3261_v28 = vld [vmem:[#allocation3 + $0x1f] sm:$0xff]  ;;  %v3358_v0 = vsel %vm11615_vm9, %v3262_v18, 0.0 }
 0x546   : > { %9802 = vrot.lane.b32.xlu1 %v9801_v52, %s10023_s20 }
 0x549   : > { %9797 = vrot.lane.b32.xlu0 %v9796_v62, %s10023_s20 }
 0x54a   : > { %9817 = vrot.lane.b32.xlu1 %v9816_v13, %s10023_s20  ;;  %v13609_v13 = vld [vmem:[#allocation23_spill] sm:$0xff] }
 0x54d   : > { %9807 = vrot.lane.b32.xlu0 %v9806_v14, %s10023_s20  ;;  %v9573_v23 = vpop.permute.xlu1 %9572 }
 0x54e   : > { %9822 = vrot.lane.b32.xlu1 %v13586_v44, %s10020_s30  ;;  %v9574_v56 = vunpack.i.l.bf16 %v9573_v23  ;;  %v9575_v5 = vunpack.i.h.bf16 %v9573_v23  ;;  %v3899_v23 = vsel %vm13592_vm1, %v3262_v18, 0.0  ;;  %vm13617_vm1 = vcmask 523264   ;;  %v3266_v18 = vld [vmem:[#allocation3 + $0x47] sm:$0xff] }
 0x550   : > { %v11597_v1 = vsel %vm13595_vm8, %v13594_v46, %v9574_v56  ;;  %v11623_v7 = vsel %vm13595_vm8, %v3261_v28, %v9575_v5  ;;  %v4101_v45 = vsel %vm13607_vm15, %v3897_v53, %v9574_v56  ;;  %vm13360_vm8 = vcmask 785408   ;;  %v3263_v56 = vld [vmem:[#allocation3 + $0x2f] sm:$0xff]  ;;  %vm13612_vm15 = vmmov %vm13610_vm2 }
 0x551   : > { %9812 = vrot.lane.b32.xlu0 %v13587_v15, %s10020_s30 }
 0x552   : > { %9832 = vrot.lane.b32.xlu1 %v13588_v11, %s10023_s20 }
 0x555   : > { %9827 = vrot.lane.b32.xlu0 %v13589_v50, %s10023_s20 }
 0x556   : > { %9842 = vrot.lane.b32.xlu1 %v13590_v16, %s10020_s30 }
 0x558   : > { %v9578_v41 = vpop.permute.xlu1 %9577 }
 0x559   : > { %9837 = vrot.lane.b32.xlu0 %v13596_v42, %s10020_s30  ;;  %v9580_v19 = vunpack.i.h.bf16 %v9578_v41  ;;  %v9579_v59 = vunpack.i.l.bf16 %v9578_v41  ;;  %v9583_v48 = vpop.permute.xlu0 %9582  ;;  %v13611_v42 = vld [vmem:[#allocation27_spill] sm:$0xff]  ;;  %v3265_v41 = vld [vmem:[#allocation3 + $0x3f] sm:$0xff] }
 0x55a   : > { %9852 = vrot.lane.b32.xlu1 %v13598_v55, %s10023_s20  ;;  %v9584_v52 = vunpack.i.l.bf16 %v9583_v48  ;;  %v9585_v32 = vunpack.i.h.bf16 %v9583_v48  ;;  %v13613_v55 = vld [vmem:[#allocation12_spill] sm:$0xff] }
 0x55b   : > { %v4134_v62 = vsel %vm13358_vm13, %v11623_v7, %v9580_v19  ;;  %v4133_v35 = vsel %vm13358_vm13, %v4101_v45, %v9579_v59  ;;  %vm13615_vm13 = vmmov %vm13610_vm2  ;;  %v3901_v53 = vsel %vm11615_vm9, %v13613_v55, 0.0  ;;  %v9993_v45 = vld [vmem:[%s13273_s6 + $0x8] sm:$0xff]  }
 0x55c   : > { %v4165_v14 = vpack.c.bf16 %v4134_v62, %v4133_v35  ;;  %v11636_v44 = vsel %vm13610_vm2, %v3358_v0, %v9584_v52  ;;  %v9588_v15 = vpop.permute.xlu1 %9587  ;;  %v11644_v33 = vsel %vm13612_vm15, %v3263_v56, %v9585_v32  ;;  %v4103_v21 = vsel %vm13610_vm2, %v3899_v23, %v9584_v52  ;;  %v13621_v62 = vld [vmem:[#allocation32_spill] sm:$0xff]  ;;  %v13626_v56 = vld [vmem:[#allocation17_spill] sm:$0xff] }
 0x55d   : > { %9847 = vrot.lane.b32.xlu0 %v13599_v12, %s10023_s20  ;;  %v9589_v11 = vunpack.i.l.bf16 %v9588_v15  ;;  %v9590_v16 = vunpack.i.h.bf16 %v9588_v15  ;;  %v13614_v12 = vsel %vm10906_vm12, %v13613_v55, 0.0  ;;  %v13624_v15 = vld [vmem:[#allocation28_spill] sm:$0xff] }
 0x55e   : > { %9862 = vrot.lane.b32.xlu1 %v13603_v47, %s10020_s30  ;;  %v9593_v50 = vpop.permute.xlu0 %9592  ;;  %8843 = vmatprep.mubr.msk.bf16.mxu1 %vm13360_vm8, %v4165_v14  ;;  %vm13618_vm8 = vmmov %vm13617_vm1 }
 0x55f   : > { %v9595_v9 = vunpack.i.h.bf16 %v9593_v50  ;;  %v9594_v46 = vunpack.i.l.bf16 %v9593_v50  ;;  %v11652_v54 = vsel %vm13615_vm13, %v13614_v12, %v9589_v11  ;;  %vm13619_vm13 = vmmov %vm13610_vm2 }
 0x560   : > { %v11666_v0 = vsel %vm13619_vm13, %v3265_v41, %v9590_v16  ;;  %vm13622_vm15 = vmmov %vm13618_vm8  ;;  %v13631_v41 = vsel %vm11060_vm3, %v11121_v38, 0.0 }
 0x561   : > { %9857 = vrot.lane.b32.xlu0 %v13604_v24, %s10020_s30  ;;  %v4135_v5 = vsel %vm13617_vm1, %v4103_v21, %v9594_v46  ;;  %v4136_v47 = vsel %vm13618_vm8, %v11644_v33, %v9595_v9  ;;  %v9598_v24 = vpop.permute.xlu1 %9597  ;;  %vm13620_vm1 = vmmov %vm13610_vm2  ;;  %vm13623_vm2 = vcmask 785408   ;;  %v9994_v46 = vld [vmem:[%s13273_s6 + $0x10] sm:$0xff]  }
 0x562   : > { %9872 = vrot.lane.b32.xlu1 %v13608_v43, %s10023_s20  ;;  %v4166_v28 = vpack.c.bf16 %v4136_v47, %v4135_v5  ;;  %v9600_v19 = vunpack.i.h.bf16 %v9598_v24  ;;  %v9599_v59 = vunpack.i.l.bf16 %v9598_v24  ;;  %v9603_v48 = vpop.permute.xlu0 %9602  ;;  %v4105_v52 = vsel %vm13620_vm1, %v3901_v53, %v9589_v11  ;;  %vm13625_vm13 = vmmov %vm13620_vm1  ;;  %v3267_v21 = vld [vmem:[#allocation3 + $0x4f] sm:$0xff]  ;;  %v13633_v53 = vld [vmem:[#allocation33_spill] sm:$0xff] }
 0x563   : > { %v9604_v43 = vunpack.i.l.bf16 %v9603_v48  ;;  %v9605_v14 = vunpack.i.h.bf16 %v9603_v48  ;;  %vm13627_vm1 = vmmov %vm13623_vm2  ;;  %v13628_v5 = vld [vmem:[#allocation40_spill] sm:$0xff]  ;;  %v11707_v48 = vld [vmem:[#allocation3 + $0x5f] sm:$0xff] }
 0x564   : > { %v4138_v35 = vsel %vm13618_vm8, %v11666_v0, %v9600_v19  ;;  %v4137_v32 = vsel %vm13622_vm15, %v4105_v52, %v9599_v59  ;;  %8844 = vmatmul.mubr.msk.bf16.vlgmr.msra.gmra.mrb[8].mxu1 %vm13623_vm2, %v4166_v28  ;;  %vm13629_vm8 = vmmov %vm13625_vm13  ;;  %v3905_v52 = vsel %vm11376_vm11, %v11121_v38, 0.0 }
 0x565   : > { %9867 = vrot.lane.b32.xlu0 %v13609_v13, %s10023_s20  ;;  %v3362_v13 = vsel %vm11376_vm11, %v3266_v18, 0.0  ;;  %v4167_v50 = vpack.c.bf16 %v4138_v35, %v4137_v32  ;;  %v9608_v23 = vpop.permute.xlu1 %9607  ;;  %8876 = vmatpush3.bf16.msra.mxu1 %v13626_v56  ;;  %v11692_v47 = vsel %vm13629_vm8, %v3267_v21, %v9605_v14  ;;  %vm13630_vm15 = vmmov %vm13629_vm8  ;;  %v13642_v21 = vld [vmem:[#allocation45_spill] sm:$0xff] }
 0x566   : > { %9882 = vrot.lane.b32.xlu1 %v13611_v42, %s10020_s30  ;;  %v11680_v11 = vsel %vm13625_vm13, %v3362_v13, %v9604_v43  ;;  %v9609_v16 = vunpack.i.l.bf16 %v9608_v23  ;;  %v9613_v9 = vpop.permute.xlu0 %9612  ;;  %8877 = vmatprep.subr.bf16.mxu1 %v9993_v45  ;;  %v3903_v42 = vsel %vm10906_vm12, %v3266_v18, 0.0  ;;  %v9610_v55 = vunpack.i.h.bf16 %v9608_v23  ;;  %vm13632_vm2 = vmmov %vm13629_vm8  ;;  %v9995_v13 = vld [vmem:[%s13273_s6 + $0x18] sm:$0xff]  }
 0x567   : > { %v9615_v12 = vunpack.i.h.bf16 %v9613_v9  ;;  %8847 = vmatprep.mubr.msk.bf16.mxu1 %vm13627_vm1, %v4167_v50  ;;  %v4107_v24 = vsel %vm13630_vm15, %v3903_v42, %v9604_v43  ;;  %vm13634_vm13 = vcmask 523264   ;;  %vm13636_vm8 = vmmov %vm13632_vm2  ;;  %v13638_v50 = vld [vmem:[#allocation43_spill] sm:$0xff] }
 0x568   : > { %v11700_v18 = vsel %vm13632_vm2, %v13631_v41, %v9609_v16  ;;  %vm13635_vm1 = vmmov %vm13634_vm13  ;;  %v11717_v14 = vsel %vm13636_vm8, %v11707_v48, %v9610_v55  ;;  %v3907_v41 = vsel %vm11060_vm3, %v11407_v17, 0.0 }
 0x569   : > { %9877 = vrot.lane.b32.xlu0 %v13616_v63, %s10020_s30  ;;  %v9614_v63 = vunpack.i.l.bf16 %v9613_v9  ;;  %v4140_v19 = vsel %vm13635_vm1, %v11692_v47, %v9615_v12  ;;  %8878 = vmatpush3.bf16.msra.mxu1 %v9993_v45  ;;  %vm13637_vm15 = vmmov %vm13632_vm2  ;;  %v3366_v9 = vsel %vm11382_vm0, %v11407_v17, 0.0 }
 0x56a   : > { %9892 = vrot.lane.b32.xlu1 %v13621_v62, %s10023_s20  ;;  %v9618_v59 = vpop.permute.xlu1 %9617  ;;  %8879 = vmatprep.subr.bf16.mxu1 %v9994_v46  ;;  %v4109_v45 = vsel %vm13637_vm15, %v3905_v52, %v9609_v16  ;;  %vm13639_vm2 = vmmov %vm13635_vm1 }
 0x56b   : > { %v4139_v28 = vsel %vm13634_vm13, %v4107_v24, %v9614_v63  ;;  %v9620_v62 = vunpack.i.h.bf16 %v9618_v59  ;;  %v9619_v35 = vunpack.i.l.bf16 %v9618_v59  ;;  %v9623_v32 = vpop.permute.xlu0 %9622  ;;  %vm13640_vm13 = vmmov %vm13635_vm1  ;;  %vm13641_vm1 = vcmask 785408   ;;  %v9996_v24 = vld [vmem:[%s13273_s6 + $0x20] sm:$0xff]  }
 0x56c   : > { %v4168_v43 = vpack.c.bf16 %v4140_v19, %v4139_v28  ;;  %v9625_v42 = vunpack.i.h.bf16 %v9623_v32  ;;  %vm13643_vm15 = vmmov %vm13641_vm1 }
 0x56d   : > { %9887 = vrot.lane.b32.xlu0 %v13624_v15, %s10023_s20  ;;  %v9624_v15 = vunpack.i.l.bf16 %v9623_v32  ;;  %v4142_v23 = vsel %vm13639_vm2, %v11717_v14, %v9620_v62  ;;  %v4141_v56 = vsel %vm13640_vm13, %v4109_v45, %v9619_v35  ;;  %8880 = vmatpush3.bf16.msra.mxu1 %v9994_v46  ;;  %v13644_v46 = vld [vmem:[#allocation54_spill] sm:$0xff]  ;;  %vm13645_vm2 = vmmov %vm13636_vm8  ;;  %v13647_v62 = vsel %vm11168_vm7, %v11172_v4, 0.0  ;;  %v13649_v32 = vld [vmem:[#allocation48_spill] sm:$0xff] }
 0x56e   : > { %9902 = vrot.lane.b32.xlu1 %v13628_v5, %s10020_s30  ;;  %8848 = vmatmul.mubr.msk.bf16.gmra.mrb[12].mxu1 %vm13641_vm1, %v4168_v43  ;;  %v4169_v16 = vpack.c.bf16 %v4142_v23, %v4141_v56  ;;  %v9628_v12 = vpop.permute.xlu1 %9627  ;;  %vm13646_vm13 = vmmov %vm13645_vm2  ;;  %v11762_v56 = vld [vmem:[#allocation3 + $0x7f] sm:$0xff] }
 0x56f   : > { %v11732_v55 = vsel %vm13636_vm8, %v3366_v9, %v9624_v15  ;;  %v9629_v63 = vunpack.i.l.bf16 %v9628_v12  ;;  %v9633_v5 = vpop.permute.xlu0 %9632  ;;  %8881 = vmatprep.subr.bf16.mxu1 %v9995_v13  ;;  %v9630_v28 = vunpack.i.h.bf16 %v9628_v12  ;;  %v4111_v43 = vsel %vm13646_vm13, %v3907_v41, %v9624_v15  ;;  %vm13648_vm1 = vmmov %vm13645_vm2  ;;  %v9997_v12 = vld [vmem:[%s13273_s6 + $0x28] sm:$0xff]  }
 0x570   : > { %v9635_v19 = vunpack.i.h.bf16 %v9633_v5  ;;  %v9634_v59 = vunpack.i.l.bf16 %v9633_v5  ;;  %8851 = vmatprep.mubr.msk.bf16.mxu1 %vm13643_vm15, %v4169_v16  ;;  %vm13650_vm8 = vcmask 523264   ;;  %v3909_v15 = vsel %vm11382_vm0, %v11172_v4, 0.0  ;;  %vm13653_vm13 = vmmov %vm13648_vm1 }
 0x571   : > { %9897 = vrot.lane.b32.xlu0 %v13633_v53, %s10020_s30  ;;  %v11740_v53 = vld [vmem:[#allocation3 + $0x6f] sm:$0xff]  ;;  %v11755_v35 = vsel %vm13648_vm1, %v13647_v62, %v9629_v63  ;;  %vm13651_vm15 = vmmov %vm13650_vm8  ;;  %8882 = vmatpush3.bf16.msra.mxu1 %v9995_v13  ;;  %v4113_v13 = vsel %vm13653_vm13, %v3909_v15, %v9629_v63  ;;  %v4779_v15 = vld [vmem:[#allocation3 + $0x118] sm:$0xff] }
 0x572   : > { %9912 = vrot.lane.b32.xlu1 %v13638_v50, %s10023_s20  ;;  %v11747_v52 = vsel %vm13645_vm2, %v11740_v53, %v9625_v42  ;;  %v4143_v45 = vsel %vm13650_vm8, %v4111_v43, %v9634_v59  ;;  %8883 = vmatprep.subr.bf16.mxu1 %v9996_v24  ;;  %vm13652_vm2 = vmmov %vm13648_vm1  ;;  %v3370_v43 = vsel %vm11396_vm5, %v11409_v3, 0.0 }
 0x573   : > { %v4144_v50 = vsel %vm13651_vm15, %v11747_v52, %v9635_v19  ;;  %v9638_v23 = vpop.permute.xlu1 %9637  ;;  %v11772_v5 = vsel %vm13652_vm2, %v11762_v56, %v9630_v28  ;;  %v13654_v19 = vld [vmem:[#allocation55_spill] sm:$0xff]  ;;  %vm13655_vm1 = vmmov %vm13650_vm8  ;;  %vm13657_vm15 = vcmask 785408   ;;  %v13658_v28 = vld [vmem:[#allocation56_spill] sm:$0xff] }
 0x574   : > { %v4170_v9 = vpack.c.bf16 %v4144_v50, %v4143_v45  ;;  %v9640_v42 = vunpack.i.h.bf16 %v9638_v23  ;;  %v9643_v16 = vpop.permute.xlu0 %9642  ;;  %vm13656_vm8 = vmmov %vm13655_vm1 }
 0x575   : > { %9907 = vrot.lane.b32.xlu0 %v13642_v21, %s10023_s20  ;;  %v9639_v21 = vunpack.i.l.bf16 %v9638_v23  ;;  %v9644_v41 = vunpack.i.l.bf16 %v9643_v16  ;;  %v9645_v62 = vunpack.i.h.bf16 %v9643_v16  ;;  %8884 = vmatpush3.bf16.msra.mxu1 %v9996_v24  ;;  %v11797_v16 = vld [vmem:[#allocation3 + $0x8f] sm:$0xff]  ;;  %vm13660_vm13 = vmmov %vm13657_vm15 }
 0x576   : > { %9922 = vrot.lane.b32.xlu1 %v13644_v46, %s10020_s30  ;;  %v4146_v59 = vsel %vm13655_vm1, %v11772_v5, %v9640_v42  ;;  %8852 = vmatmul.mubr.msk.bf16.gmra.mrb[16].mxu1 %vm13657_vm15, %v4170_v9  ;;  %v4780_v42 = vld [vmem:[#allocation3 + $0x120] sm:$0xff]  ;;  %v3911_v9 = vsel %vm11168_vm7, %v11409_v3, 0.0  ;;  %13659 = vst [vmem:[#allocation22_spill] sm:$0xff] %v11797_v16  ;;  %vm13661_vm1 = vmmov %vm13652_vm2 }
 0x577   : > { %v4145_v46 = vsel %vm13656_vm8, %v4113_v13, %v9639_v21  ;;  %v9648_v45 = vpop.permute.xlu1 %9647  ;;  %8885 = vmatprep.subr.bf16.mxu1 %v9997_v12  ;;  %v11792_v21 = vld [vmem:[%s13273_s6 + $0x60] sm:$0xff]   ;;  %v11804_v24 = vsel %vm13661_vm1, %v11797_v16, %v9645_v62  ;;  %vm13662_vm8 = vmmov %vm13661_vm1  ;;  %v9961_v62 = vpack.i.bf16 %v4780_v42, %v4779_v15 }
 0x578   : > { %v4171_v63 = vpack.c.bf16 %v4146_v59, %v4145_v46  ;;  %v9649_v50 = vunpack.i.l.bf16 %v9648_v45  ;;  %v9653_v23 = vpop.permute.xlu0 %9652  ;;  %v9650_v13 = vunpack.i.h.bf16 %v9648_v45  ;;  %v4115_v46 = vsel %vm13662_vm8, %v3911_v9, %v9644_v41  ;;  %vm13664_vm15 = vmmov %vm13661_vm1 }
 0x579   : > { %9917 = vrot.lane.b32.xlu0 %v13649_v32, %s10020_s30  ;;  %v11787_v32 = vsel %vm13652_vm2, %v3370_v43, %v9644_v41  ;;  %v9654_v59 = vunpack.i.l.bf16 %v9653_v23  ;;  %v13663_v43 = vsel %vm11296_vm6, %v11300_v49, 0.0  ;;  %vm13665_vm2 = vcmask 523264   ;;  %8886 = vmatpush3.bf16.msra.mxu1 %v9997_v12  ;;  %v11819_v41 = vld [vmem:[#allocation3 + $0x9f] sm:$0xff]  ;;  %vm13668_vm8 = vmmov %vm13661_vm1 }
 0x57a   : > { %9932 = vrot.lane.b32.xlu1 %v13654_v19, %s10023_s20  ;;  %v9655_v19 = vunpack.i.h.bf16 %v9653_v23  ;;  %8855 = vmatprep.mubr.msk.bf16.mxu1 %vm13660_vm13, %v4171_v63  ;;  %vm13666_vm13 = vmmov %vm13665_vm2  ;;  %v4812_v23 = vld [vmem:[#allocation3 + $0x121] sm:$0xff]  ;;  %13667 = vst [vmem:[#allocation31_spill] sm:$0xff] %v11819_v41  ;;  %v3913_v9 = vsel %vm11396_vm5, %v11300_v49, 0.0  ;;  %v3374_v12 = vsel %vm11411_vm4, %v11424_v60, 0.0 }
 0x57b   : > { %v4147_v63 = vsel %vm13665_vm2, %v4115_v46, %v9654_v59  ;;  %8919 = vmatprep.subr.bf16.mxu1 %v11792_v21  ;;  %v4117_v15 = vsel %vm13668_vm8, %v3913_v9, %v9649_v50 }
 0x57c   : > { %v9658_v45 = vpop.permute.xlu1 %9657 }
 0x57d   : > { %9927 = vrot.lane.b32.xlu0 %v13658_v28, %s10023_s20  ;;  %v11812_v28 = vsel %vm13664_vm15, %v13663_v43, %v9649_v50  ;;  %v9660_v22 = vunpack.i.h.bf16 %v9658_v45  ;;  %v9659_v3 = vunpack.i.l.bf16 %v9658_v45  ;;  %v9663_v51 = vpop.permute.xlu0 %9662  ;;  %vm13670_vm15 = vmmov %vm13665_vm2  ;;  %v4811_v50 = vld [vmem:[#allocation3 + $0x119] sm:$0xff] }
 0x57e   : > { %9942 = vrot.lane.b32.xlu1 %v11440_v34, %s10020_s30  ;;  %v4148_v34 = vsel %vm13666_vm13, %v11804_v24, %v9655_v19  ;;  %v9664_v42 = vunpack.i.l.bf16 %v9663_v51  ;;  %v13669_v19 = vld [vmem:[#allocation59_spill] sm:$0xff]  ;;  %vm13671_vm13 = vcmask 785408  }
 0x57f   : > { %v4172_v43 = vpack.c.bf16 %v4148_v34, %v4147_v63  ;;  %v4149_v46 = vsel %vm13665_vm2, %v4117_v15, %v9659_v3  ;;  %v9665_v63 = vunpack.i.h.bf16 %v9663_v51  ;;  %v4844_v34 = vsel %vm11494_vm14, %v4812_v23, 0.0  ;;  %v11849_v15 = vld [vmem:[#allocation3 + $0xaf] sm:$0xff]  ;;  %vm13674_vm8 = vmmov %vm13671_vm13 }
 0x580   : > { %v11844_v9 = vsel %vm13661_vm1, %v3374_v12, %v9664_v42  ;;  %13673 = vst [vmem:[#allocation25_spill] sm:$0xff] %v11849_v15  ;;  %v9971_v10 = vpack.i.bf16 %v4844_v34, %v4811_v50  ;;  %vm13675_vm14 = vmmov %vm13661_vm1 }
 0x581   : > { %9937 = vrot.lane.b32.xlu0 %v11422_v58, %s10020_s30  ;;  %v11827_v58 = vsel %vm13661_vm1, %v11819_v41, %v9650_v13  ;;  %8856 = vmatmul.mubr.msk.bf16.gmra.mrb[20].mxu1 %vm13671_vm13, %v4172_v43  ;;  %v13672_v13 = vld [vmem:[#allocation60_spill] sm:$0xff]  ;;  %v11855_v23 = vsel %vm13675_vm14, %v11849_v15, %v9665_v63  ;;  %vm13678_vm2 = vmmov %vm13661_vm1  ;;  %vm13679_vm13 = vcmask 523264   ;;  %v11870_v63 = vld [vmem:[#allocation3 + $0xbf] sm:$0xff] }
 0x582   : > { %9957 = vrot.lane.b32.xlu1 %v13669_v19, %s10023_s20  ;;  %v4150_v59 = vsel %vm13670_vm15, %v11827_v58, %v9660_v22  ;;  %v9668_v19 = vpop.permute.xlu1 %9667  ;;  %v3915_v22 = vsel %vm11296_vm6, %v11424_v60, 0.0  ;;  %vm13676_vm15 = vmmov %vm13661_vm1  ;;  %13681 = vst [vmem:[#allocation37_spill] sm:$0xff] %v11870_v63 }
 0x583   : > { %v4173_v45 = vpack.c.bf16 %v4150_v59, %v4149_v46  ;;  %v9669_v3 = vunpack.i.l.bf16 %v9668_v19  ;;  %v9670_v43 = vunpack.i.h.bf16 %v9668_v19  ;;  %v4119_v12 = vsel %vm13676_vm15, %v3915_v22, %v9664_v42  ;;  %vm13680_vm1 = vmmov %vm13679_vm13 }
 0x584   : > { %v9673_v51 = vpop.permute.xlu0 %9672  ;;  %v13677_v59 = vsel %vm11310_vm10, %v11320_v27, 0.0  ;;  %v3917_v42 = vsel %vm11411_vm4, %v11320_v27, 0.0  ;;  %vm13683_vm14 = vmmov %vm13678_vm2 }
 0x585   : > { %9947 = vrot.lane.b32.xlu0 %v13672_v13, %s10023_s20  ;;  %v9675_v31 = vunpack.i.h.bf16 %v9673_v51  ;;  %v9674_v13 = vunpack.i.l.bf16 %v9673_v51  ;;  %8859 = vmatprep.mubr.msk.bf16.mxu1 %vm13674_vm8, %v4173_v45  ;;  %v11863_v46 = vsel %vm13678_vm2, %v13677_v59, %v9669_v3  ;;  %vm13682_vm8 = vmmov %vm13678_vm2 }
 0x586   : > { %9962 = vrot.lane.b32.xlu1 %v9961_v62, %s10020_s30  ;;  %v11877_v59 = vsel %vm13682_vm8, %v11870_v63, %v9670_v43  ;;  %vm13684_vm15 = vmmov %vm13680_vm1  ;;  %v13703_v63 = vld [vmem:[#allocation69_spill] sm:$0xff] }
 0x587   : > { %v4151_v45 = vsel %vm13679_vm13, %v4119_v12, %v9674_v13  ;;  %v4152_v62 = vsel %vm13680_vm1, %v11855_v23, %v9675_v31  ;;  %v9683_v50 = vpop.permute.xlu1 %9682  ;;  %vm13685_vm2 = vmmov %vm13680_vm1  ;;  %vm13686_vm13 = vnez %v13552_v20  ;;  %vm13687_vm1 = vcmask 785408  }
 0x588   : > { %v4174_v34 = vpack.c.bf16 %v4152_v62, %v4151_v45  ;;  %v9685_v19 = vunpack.i.h.bf16 %v9683_v50  ;;  %v9684_v22 = vunpack.i.l.bf16 %v9683_v50  ;;  %v9678_v51 = vpop.permute.xlu0 %9677  ;;  %v3378_v45 = vsel %vm13686_vm13, %v11430_v30, 0.0 }
 0x589   : > { %9952 = vrot.lane.b32.xlu0 %v11499_v37, %s10020_s30  ;;  %v4121_v37 = vsel %vm13683_vm14, %v3917_v42, %v9669_v3  ;;  %v9679_v13 = vunpack.i.l.bf16 %v9678_v51  ;;  %v9680_v62 = vunpack.i.h.bf16 %v9678_v51  ;;  %vm13689_vm14 = vmmov %vm13687_vm1 }
 0x58a   : > { %9972 = vrot.lane.b32.xlu1 %v9971_v10, %s10023_s20  ;;  %v4154_v31 = vsel %vm13684_vm15, %v11877_v59, %v9685_v19  ;;  %v4153_v12 = vsel %vm13685_vm2, %v4121_v37, %v9684_v22  ;;  %8860 = vmatmul.mubr.msk.bf16.gmra.mrb[24].mxu1 %vm13687_vm1, %v4174_v34  ;;  %v3919_v19 = vsel %vm11310_vm10, %v11430_v30, 0.0  ;;  %v11896_v22 = vld [vmem:[#allocation3 + $0xcf] sm:$0xff]  ;;  %vm13690_vm15 = vmmov %vm13682_vm8  ;;  %vm13697_vm10 = vcmask 523264  }
 0x58b   : > { %v4175_v43 = vpack.c.bf16 %v4154_v31, %v4153_v12  ;;  %v11891_v3 = vsel %vm13682_vm8, %v3378_v45, %v9679_v13  ;;  %v9688_v10 = vpop.permute.xlu1 %9687  ;;  %13688 = vst [vmem:[#allocation38_spill] sm:$0xff] %v11896_v22  ;;  %vm13691_vm2 = vmmov %vm13682_vm8  ;;  %v13692_v31 = vld [vmem:[#allocation52_spill] sm:$0xff]  ;;  %v13694_v12 = vld [vmem:[#allocation57_spill] sm:$0xff] }
 0x58c   : > { %v9689_v50 = vunpack.i.l.bf16 %v9688_v10  ;;  %v9693_v42 = vpop.permute.xlu0 %9692  ;;  %v9690_v37 = vunpack.i.h.bf16 %v9688_v10  ;;  %v4123_v34 = vsel %vm13691_vm2, %v3919_v19, %v9679_v13  ;;  %vm13693_vm1 = vnez %v13692_v31  ;;  %vm13696_vm8 = vmmov %vm13691_vm2 }
 0x58d   : > { %9967 = vrot.lane.b32.xlu0 %v11416_v8, %s10023_s20  ;;  %v9695_v51 = vunpack.i.h.bf16 %v9693_v42  ;;  %v9694_v2 = vunpack.i.l.bf16 %v9693_v42  ;;  %8863 = vmatprep.mubr.msk.bf16.mxu1 %vm13689_vm14, %v4175_v43  ;;  %v11901_v8 = vsel %vm13690_vm15, %v11896_v22, %v9680_v62  ;;  %v13695_v45 = vsel %vm13693_vm1, %v13694_v12, 0.0  ;;  %vm13698_vm4 = vmmov %vm13697_vm10  ;;  %v11914_v43 = vld [vmem:[#allocation3 + $0xdf] sm:$0xff] }
 0x58e   : > { %v11909_v57 = vsel %vm13696_vm8, %v13695_v45, %v9689_v50  ;;  %13699 = vst [vmem:[#allocation34_spill] sm:$0xff] %v11914_v43  ;;  %v3921_v62 = vsel %vm13686_vm13, %v13694_v12, 0.0  ;;  %vm13700_vm14 = vmmov %vm13691_vm2  ;;  %vm13705_vm8 = vcmask 785408  }
 0x58f   : > { %v4155_v30 = vsel %vm13697_vm10, %v4123_v34, %v9694_v2  ;;  %v4156_v10 = vsel %vm13698_vm4, %v11901_v8, %v9695_v51  ;;  %v9698_v42 = vpop.permute.xlu1 %9697  ;;  %v11921_v45 = vsel %vm13700_vm14, %v11914_v43, %v9690_v37  ;;  %vm13701_vm15 = vmmov %vm13691_vm2  ;;  %vm13704_vm2 = vnez %v13703_v63  ;;  %v3258_v63 = vld [vmem:[#allocation3 + $0x7] sm:$0xff] }
 0x590   : > { %v4176_v13 = vpack.c.bf16 %v4156_v10, %v4155_v30  ;;  %v9700_v19 = vunpack.i.h.bf16 %v9698_v42  ;;  %v9699_v22 = vunpack.i.l.bf16 %v9698_v42  ;;  %v4125_v2 = vsel %vm13701_vm15, %v3921_v62, %v9689_v50  ;;  %vm13702_vm10 = vmmov %vm13698_vm4  ;;  %v11934_v62 = vld [vmem:[#allocation3 + $0xef] sm:$0xff] }
 0x591   : > { %v3382_v20 = vsel %vm13704_vm2, %v11445_v61, 0.0  ;;  %vm13706_vm13 = vmmov %vm13700_vm14  ;;  %13707 = vst [vmem:[#allocation36_spill] sm:$0xff] %v11934_v62 }
 0x592   : > { %v4157_v51 = vsel %vm13702_vm10, %v4125_v2, %v9699_v22  ;;  %v4158_v36 = vsel %vm13698_vm4, %v11921_v45, %v9700_v19  ;;  %8864 = vmatmul.mubr.msk.bf16.gmra.mrb[28].mxu1 %vm13705_vm8, %v4176_v13  ;;  %v3923_v22 = vsel %vm13693_vm1, %v11445_v61, 0.0  ;;  %vm13708_vm14 = vmmov %vm13705_vm8  ;;  %v13712_v13 = vld [vmem:[#allocation61_spill] sm:$0xff]  ;;  %vm13715_vm8 = vcmask 523264  }
 0x593   : > { %v9703_v27 = vpop.permute.xlu0 %9702  ;;  %v4177_v10 = vpack.c.bf16 %v4158_v36, %v4157_v51  ;;  %vm13709_vm15 = vmmov %vm13706_vm13 }
 0x594   : > { %v9704_v34 = vunpack.i.l.bf16 %v9703_v27  ;;  %v9705_v30 = vunpack.i.h.bf16 %v9703_v27  ;;  %v9708_v37 = vpop.permute.xlu1 %9707  ;;  %vm13714_vm4 = vmmov %vm13706_vm13 }
 0x595   : > { %v9709_v12 = vunpack.i.l.bf16 %v9708_v37  ;;  %v9710_v19 = vunpack.i.h.bf16 %v9708_v37  ;;  %8867 = vmatprep.mubr.msk.bf16.mxu1 %vm13708_vm14, %v4177_v10  ;;  %vm13716_vm1 = vmmov %vm13715_vm8  ;;  %v11955_v10 = vld [vmem:[#allocation3 + $0xff] sm:$0xff] }
 0x596   : > { %v11932_v42 = vsel %vm13706_vm13, %v3382_v20, %v9704_v34  ;;  %v11942_v36 = vsel %vm13709_vm15, %v11934_v62, %v9705_v30  ;;  %v4127_v27 = vsel %vm13706_vm13, %v3923_v22, %v9704_v34  ;;  %v13710_v20 = vld [vmem:[#allocation65_spill] sm:$0xff]  ;;  %13717 = vst [vmem:[#allocation39_spill] sm:$0xff] %v11955_v10  ;;  %v3925_v30 = vsel %vm13704_vm2, %v13712_v13, 0.0  ;;  %vm13718_vm14 = vmmov %vm13714_vm4 }
 0x597   : > { %v9713_v50 = vpop.permute.xlu0 %9712  ;;  %vm13711_vm10 = vnez %v13710_v20  ;;  %vm13719_vm15 = vmmov %vm13714_vm4 }
 0x598   : > { %v9715_v2 = vunpack.i.h.bf16 %v9713_v50  ;;  %v9714_v43 = vunpack.i.l.bf16 %v9713_v50  ;;  %v13713_v51 = vsel %vm13711_vm10, %v13712_v13, 0.0  ;;  %v9723_v50 = vpop.permute.xlu1 %9722  ;;  %vm13720_vm13 = vmmov %vm13716_vm1 }
 0x599   : > { %v11950_v60 = vsel %vm13714_vm4, %v13713_v51, %v9709_v12  ;;  %v9725_v22 = vunpack.i.h.bf16 %v9723_v50  ;;  %v9724_v61 = vunpack.i.l.bf16 %v9723_v50  ;;  %v11962_v51 = vsel %vm13718_vm14, %v11955_v10, %v9710_v19  ;;  %v3259_v50 = vld [vmem:[#allocation3 + $0xf] sm:$0xff] }
 0x59a   : > { %v4159_v31 = vsel %vm13715_vm8, %v4127_v27, %v9714_v43  ;;  %v4160_v37 = vsel %vm13716_vm1, %v11942_v36, %v9715_v2  ;;  %v4129_v43 = vsel %vm13719_vm15, %v3925_v30, %v9709_v12  ;;  %vm13721_vm4 = vcmask 785408   ;;  %v11969_v19 = vld [vmem:[#allocation3 + $0x10f] sm:$0xff] }
 0x59b   : > { %v4178_v34 = vpack.c.bf16 %v4160_v37, %v4159_v31  ;;  %v9718_v62 = vpop.permute.xlu0 %9717  ;;  %v4161_v27 = vsel %vm13720_vm13, %v4129_v43, %v9724_v61  ;;  %v4162_v2 = vsel %vm13716_vm1, %v11962_v51, %v9725_v22  ;;  %v13722_v10 = vld [vmem:[#allocation71_spill] sm:$0xff]  ;;  %vm13723_vm8 = vnez %v13602_v26  ;;  %vm13724_vm14 = vmmov %vm13721_vm4 }
 0x59c   : > { %v9720_v15 = vunpack.i.h.bf16 %v9718_v62  ;;  %v9719_v49 = vunpack.i.l.bf16 %v9718_v62  ;;  %v4179_v31 = vpack.c.bf16 %v4162_v2, %v4161_v27  ;;  %v9733_v37 = vpop.permute.xlu1 %9732  ;;  %v3927_v61 = vsel %vm13711_vm10, %v13722_v10, 0.0  ;;  %vm13725_vm13 = vmmov %vm13719_vm15  ;;  %v4689_v26 = vld [vmem:[#allocation3 + $0x47] sm:$0xff] }
 0x59d   : > { %8868 = vmatmul.mubr.msk.bf16.gmra.mrb[32].mxu1 %vm13721_vm4, %v4178_v34  ;;  %v9735_v13 = vunpack.i.h.bf16 %v9733_v37  ;;  %v9734_v41 = vunpack.i.l.bf16 %v9733_v37  ;;  %v3354_v12 = vsel %vm13723_vm8, %v3258_v63, 0.0  ;;  %vm13726_vm1 = vmmov %vm13725_vm13  ;;  %vm13727_vm4 = vcmask 523264  }
 0x59e   : > { %8871 = vmatprep.mubr.msk.bf16.mxu1 %vm13724_vm14, %v4179_v31  ;;  %v4132_v34 = vsel %vm13719_vm15, %v11969_v19, %v9720_v15  ;;  %v4131_v22 = vsel %vm13725_vm13, %v3927_v61, %v9719_v49  ;;  %vm13728_vm2 = vmmov %vm13727_vm4  ;;  %vm13732_vm13 = vcmask 785408  }
 0x59f   : > { %v9728_v16 = vpop.permute.xlu0 %9727  ;;  %v3803_v43 = vsel %vm13726_vm1, %v3259_v50, %v9735_v13  ;;  %vm13729_vm10 = vmmov %vm13726_vm1 }
 0x5a0   : > { %v9730_v30 = vunpack.i.h.bf16 %v9728_v16  ;;  %v9729_v62 = vunpack.i.l.bf16 %v9728_v16  ;;  %v9743_v37 = vpop.permute.xlu1 %9742  ;;  %v3802_v20 = vsel %vm13729_vm10, %v3354_v12, %v9734_v41  ;;  %vm13730_vm14 = vmmov %vm13728_vm2 }
 0x5a1   : > { %v9745_v63 = vunpack.i.h.bf16 %v9743_v37  ;;  %v9744_v4 = vunpack.i.l.bf16 %v9743_v37  ;;  %vm13731_vm15 = vmmov %vm13728_vm2 }
 0x5a2   : > { %v4163_v27 = vsel %vm13727_vm4, %v4131_v22, %v9729_v62  ;;  %v4164_v2 = vsel %vm13728_vm2, %v4132_v34, %v9730_v30  ;;  %vm13733_vm1 = vmmov %vm13728_vm2 }
 0x5a3   : > { %v4180_v10 = vpack.c.bf16 %v4164_v2, %v4163_v27  ;;  %v9738_v16 = vpop.permute.xlu0 %9737  ;;  %v3838_v15 = vsel %vm13730_vm14, %v11623_v7, %v9745_v63  ;;  %v3837_v49 = vsel %vm13731_vm15, %v11597_v1, %v9744_v4  ;;  %vm13734_vm2 = vmmov %vm13733_vm1 }
 0x5a4   : > { %v9740_v25 = vunpack.i.h.bf16 %v9738_v16  ;;  %v9739_v31 = vunpack.i.l.bf16 %v9738_v16  ;;  %v3868_v13 = vpack.c.bf16 %v3838_v15, %v3837_v49  ;;  %v9753_v41 = vpop.permute.xlu1 %9752  ;;  %vm13735_vm10 = vmmov %vm13733_vm1 }
 0x5a5   : > { %8872 = vmatmul.mubr.msk.bf16.gmra.mrb[36].mxu1 %vm13732_vm13, %v4180_v10  ;;  %v9755_v30 = vunpack.i.h.bf16 %v9753_v41  ;;  %v9754_v62 = vunpack.i.l.bf16 %v9753_v41  ;;  %vm13736_vm4 = vmmov %vm13733_vm1 }
 0x5a6   : > { %v3836_v50 = vsel %vm13733_vm1, %v3803_v43, %v9740_v25  ;;  %v3835_v61 = vsel %vm13734_vm2, %v3802_v20, %v9739_v31  ;;  %vm13737_vm14 = vmmov %vm13732_vm13 }
 0x5a7   : > { %v3867_v12 = vpack.c.bf16 %v3836_v50, %v3835_v61  ;;  %v9748_v34 = vpop.permute.xlu0 %9747  ;;  %v3842_v7 = vsel %vm13735_vm10, %v11666_v0, %v9755_v30  ;;  %v3841_v4 = vsel %vm13736_vm4, %v11652_v54, %v9754_v62  ;;  %vm13738_vm15 = vmmov %vm13733_vm1  ;;  %v9999_v0 = vld [vmem:[%s13273_s6 + $0x68] sm:$0xff]  }
 0x5a8   : > { %v9750_v22 = vunpack.i.h.bf16 %v9748_v34  ;;  %v9749_v27 = vunpack.i.l.bf16 %v9748_v34  ;;  %v3870_v1 = vpack.c.bf16 %v3842_v7, %v3841_v4  ;;  %vm13739_vm13 = vmmov %vm13733_vm1  ;;  %v9763_v10 = vpop.permute.xlu1 %9762 }
 0x5a9   : > { %8887 = vmatprep.mubr.msk.bf16.mxu1 %vm13737_vm14, %v3867_v12  ;;  %v9765_v2 = vunpack.i.h.bf16 %v9763_v10  ;;  %v9764_v37 = vunpack.i.l.bf16 %v9763_v10  ;;  %vm13740_vm2 = vmmov %vm13733_vm1 }
 0x5aa   : > { %v3840_v25 = vsel %vm13738_vm15, %v11644_v33, %v9750_v22  ;;  %v3839_v20 = vsel %vm13739_vm13, %v11636_v44, %v9749_v27  ;;  %vm13741_vm10 = vmmov %vm13737_vm14 }
 0x5ab   : > { %v3869_v43 = vpack.c.bf16 %v3840_v25, %v3839_v20  ;;  %v9758_v63 = vpop.permute.xlu0 %9757  ;;  %v12005_v31 = vsel %vm13733_vm1, %v11717_v14, %v9765_v2  ;;  %v12009_v33 = vsel %vm13740_vm2, %v11700_v18, %v9764_v37  ;;  %vm13742_vm4 = vmmov %vm13733_vm1 }
 0x5ac   : > { %v9760_v16 = vunpack.i.h.bf16 %v9758_v63  ;;  %v9759_v54 = vunpack.i.l.bf16 %v9758_v63  ;;  %v3872_v44 = vpack.c.bf16 %v12005_v31, %v12009_v33  ;;  %vm13743_vm14 = vmmov %vm13733_vm1  ;;  %v9773_v50 = vpop.permute.xlu1 %9772 }
 0x5ad   : > { %8888 = vmatmul.mubr.msk.bf16.vlgmr.msra.gmra.mrb[8].mxu1 %vm13741_vm10, %v3868_v13  ;;  %vm13744_vm15 = vmmov %vm13741_vm10  ;;  %v9775_v61 = vunpack.i.h.bf16 %v9773_v50  ;;  %v9774_v18 = vunpack.i.l.bf16 %v9773_v50  ;;  %v10000_v13 = vld [vmem:[%s13273_s6 + $0x70] sm:$0xff]  }
 0x5ae   : > { %v3844_v15 = vsel %vm13742_vm4, %v11692_v47, %v9760_v16  ;;  %v3843_v49 = vsel %vm13743_vm14, %v11680_v11, %v9759_v54  ;;  %8891 = vmatprep.mubr.msk.bf16.mxu1 %vm13744_vm15, %v3869_v43  ;;  %8920 = vmatpush3.bf16.msra.mxu1 %v11792_v21  ;;  %vm13745_vm13 = vmmov %vm13733_vm1 }
 0x5af   : > { %v3871_v14 = vpack.c.bf16 %v3844_v15, %v3843_v49  ;;  %v9768_v41 = vpop.permute.xlu0 %9767  ;;  %8921 = vmatprep.subr.bf16.mxu1 %v9999_v0  ;;  %v12025_v47 = vsel %vm13745_vm13, %v11772_v5, %v9775_v61  ;;  %v12029_v11 = vsel %vm13733_vm1, %v11755_v35, %v9774_v18  ;;  %vm13746_vm2 = vmmov %vm13733_vm1  ;;  %v10001_v35 = vld [vmem:[%s13273_s6 + $0x78] sm:$0xff]  }
 0x5b0   : > { %v9770_v12 = vunpack.i.h.bf16 %v9768_v41  ;;  %v9769_v30 = vunpack.i.l.bf16 %v9768_v41  ;;  %v3874_v21 = vpack.c.bf16 %v12025_v47, %v12029_v11  ;;  %vm13747_vm10 = vmmov %vm13733_vm1  ;;  %v9783_v22 = vpop.permute.xlu1 %9782 }
 0x5b1   : > { %v9785_v7 = vunpack.i.h.bf16 %v9783_v22  ;;  %v9784_v4 = vunpack.i.l.bf16 %v9783_v22  ;;  %vm13748_vm4 = vmmov %vm13733_vm1 }
 0x5b2   : > { %v3848_v62 = vsel %vm13746_vm2, %v11747_v52, %v9770_v12  ;;  %v3847_v34 = vsel %vm13747_vm10, %v11732_v55, %v9769_v30  ;;  %8922 = vmatpush3.bf16.msra.mxu1 %v9999_v0  ;;  %vm13749_vm14 = vmmov %vm13733_vm1 }
 0x5b3   : > { %v3873_v27 = vpack.c.bf16 %v3848_v62, %v3847_v34  ;;  %v9778_v5 = vpop.permute.xlu0 %9777  ;;  %8923 = vmatprep.subr.bf16.mxu1 %v10000_v13  ;;  %v12042_v10 = vsel %vm13748_vm4, %v11827_v58, %v9785_v7  ;;  %v12046_v55 = vsel %vm13749_vm14, %v11812_v28, %v9784_v4  ;;  %vm13750_vm13 = vmmov %vm13733_vm1 }
 0x5b4   : > { %v9780_v25 = vunpack.i.h.bf16 %v9778_v5  ;;  %v9779_v20 = vunpack.i.l.bf16 %v9778_v5  ;;  %v3876_v52 = vpack.c.bf16 %v12042_v10, %v12046_v55  ;;  %v9793_v37 = vpop.permute.xlu1 %9792  ;;  %vm13751_vm2 = vmmov %vm13744_vm15 }
 0x5b5   : > { %8892 = vmatmul.mubr.msk.bf16.gmra.mrb[12].mxu1 %vm13744_vm15, %v3870_v1  ;;  %v9795_v63 = vunpack.i.h.bf16 %v9793_v37  ;;  %v9794_v0 = vunpack.i.l.bf16 %v9793_v37  ;;  %v10002_v1 = vld [vmem:[%s13273_s6 + $0x80] sm:$0xff]   ;;  %vm13752_vm10 = vmmov %vm13733_vm1 }
 0x5b6   : > { %v3852_v43 = vsel %vm13750_vm13, %v11804_v24, %v9780_v25  ;;  %v3851_v2 = vsel %vm13733_vm1, %v11787_v32, %v9779_v20  ;;  %8895 = vmatprep.mubr.msk.bf16.mxu1 %vm13751_vm2, %v3871_v14  ;;  %8924 = vmatpush3.bf16.msra.mxu1 %v10000_v13  ;;  %vm13753_vm4 = vmmov %vm13733_vm1 }
 0x5b7   : > { %v3875_v58 = vpack.c.bf16 %v3852_v43, %v3851_v2  ;;  %v9788_v28 = vpop.permute.xlu0 %9787  ;;  %8925 = vmatprep.subr.bf16.mxu1 %v10001_v35  ;;  %v3858_v24 = vsel %vm13752_vm10, %v11877_v59, %v9795_v63  ;;  %v3857_v32 = vsel %vm13753_vm4, %v11863_v46, %v9794_v0  ;;  %vm13754_vm14 = vmmov %vm13733_vm1  ;;  %v10003_v59 = vld [vmem:[%s13273_s6 + $0x88] sm:$0xff]  }
 0x5b8   : > { %v9790_v16 = vunpack.i.h.bf16 %v9788_v28  ;;  %v9789_v54 = vunpack.i.l.bf16 %v9788_v28  ;;  %v3878_v15 = vpack.c.bf16 %v3858_v24, %v3857_v32  ;;  %vm13755_vm15 = vmmov %vm13733_vm1  ;;  %v9803_v14 = vpop.permute.xlu1 %9802  ;;  %v4686_v28 = vld [vmem:[#allocation3 + $0x2f] sm:$0xff] }
 0x5b9   : > { %v9805_v18 = vunpack.i.h.bf16 %v9803_v14  ;;  %v9804_v41 = vunpack.i.l.bf16 %v9803_v14  ;;  %vm13756_vm13 = vmmov %vm13733_vm1 }
 0x5ba   : > { %v3856_v49 = vsel %vm13754_vm14, %v11855_v23, %v9790_v16  ;;  %v3855_v50 = vsel %vm13755_vm15, %v11844_v9, %v9789_v54  ;;  %8926 = vmatpush3.bf16.msra.mxu1 %v10001_v35  ;;  %vm13757_vm10 = vmmov %vm13733_vm1 }
 0x5bb   : > { %v3877_v61 = vpack.c.bf16 %v3856_v49, %v3855_v50  ;;  %v9798_v13 = vpop.permute.xlu0 %9797  ;;  %8927 = vmatprep.subr.bf16.mxu1 %v10002_v1  ;;  %v3861_v30 = vsel %vm13756_vm13, %v11909_v57, %v9804_v41  ;;  %v3862_v23 = vsel %vm13733_vm1, %v11921_v45, %v9805_v18  ;;  %vm13758_vm4 = vmmov %vm13733_vm1  ;;  %v4687_v49 = vld [vmem:[#allocation3 + $0x37] sm:$0xff] }
 0x5bc   : > { %v9800_v12 = vunpack.i.h.bf16 %v9798_v13  ;;  %v9799_v46 = vunpack.i.l.bf16 %v9798_v13  ;;  %v3880_v9 = vpack.c.bf16 %v3862_v23, %v3861_v30  ;;  %v9818_v22 = vpop.permute.xlu1 %9817  ;;  %vm13759_vm14 = vmmov %vm13751_vm2  ;;  %v4688_v23 = vld [vmem:[#allocation3 + $0x3f] sm:$0xff] }
 0x5bd   : > { %8896 = vmatmul.mubr.msk.bf16.gmra.mrb[16].mxu1 %vm13751_vm2, %v3872_v44  ;;  %v9820_v7 = vunpack.i.h.bf16 %v9818_v22  ;;  %v9819_v4 = vunpack.i.l.bf16 %v9818_v22  ;;  %vm13760_vm15 = vmmov %vm13733_vm1  ;;  %v4690_v22 = vld [vmem:[#allocation3 + $0x4f] sm:$0xff] }
 0x5be   : > { %v3859_v62 = vsel %vm13757_vm10, %v11891_v3, %v9799_v46  ;;  %v3860_v34 = vsel %vm13758_vm4, %v11901_v8, %v9800_v12  ;;  %8899 = vmatprep.mubr.msk.bf16.mxu1 %vm13759_vm14, %v3873_v27  ;;  %8928 = vmatpush3.bf16.msra.mxu1 %v10002_v1  ;;  %vm13761_vm13 = vmmov %vm13733_vm1 }
 0x5bf   : > { %v3879_v57 = vpack.c.bf16 %v3860_v34, %v3859_v62  ;;  %v9808_v45 = vpop.permute.xlu0 %9807  ;;  %8929 = vmatprep.subr.bf16.mxu1 %v10003_v59  ;;  %v3865_v33 = vsel %vm13760_vm15, %v11950_v60, %v9819_v4  ;;  %v3866_v3 = vsel %vm13761_vm13, %v11962_v51, %v9820_v7  ;;  %vm13762_vm2 = vmmov %vm13733_vm1 }
 0x5c0   : > { %v9810_v5 = vunpack.i.h.bf16 %v9808_v45  ;;  %v9809_v31 = vunpack.i.l.bf16 %v9808_v45  ;;  %v3882_v44 = vpack.c.bf16 %v3866_v3, %v3865_v33  ;;  %v9823_v35 = vpop.permute.xlu1 %9822  ;;  %vm13763_vm10 = vmmov %vm13759_vm14 }
 0x5c1   : > { %vm13764_vm4 = vmmov %vm13763_vm10  ;;  %v9825_v50 = vunpack.i.h.bf16 %v9823_v35  ;;  %v9824_v14 = vunpack.i.l.bf16 %v9823_v35 }
 0x5c2   : > { %v3863_v8 = vsel %vm13733_vm1, %v11932_v42, %v9809_v31  ;;  %v3864_v27 = vsel %vm13762_vm2, %v11942_v36, %v9810_v5  ;;  %8930 = vmatpush3.bf16.msra.mxu1 %v10003_v59  ;;  %vm13765_vm14 = vmmov %vm13764_vm4 }
 0x5c3   : > { %v3881_v25 = vpack.c.bf16 %v3864_v27, %v3863_v8  ;;  %v9813_v20 = vpop.permute.xlu0 %9812  ;;  %vm13766_vm15 = vmmov %vm13764_vm4 }
 0x5c4   : > { %v9833_v60 = vpop.permute.xlu1 %9832  ;;  %vm13767_vm13 = vmmov %vm13764_vm4  ;;  %v9815_v2 = vunpack.i.h.bf16 %v9813_v20  ;;  %v9814_v37 = vunpack.i.l.bf16 %v9813_v20 }
 0x5c5   : > { %8900 = vmatmul.mubr.msk.bf16.gmra.mrb[20].mxu1 %vm13763_vm10, %v3874_v21  ;;  %vm13768_vm1 = vmmov %vm13764_vm4  ;;  %v4685_v21 = vld [vmem:[#allocation3 + $0x27] sm:$0xff]  ;;  %v9834_v41 = vunpack.i.l.bf16 %v9833_v60 }
 0x5c6   : > { %8903 = vmatprep.mubr.msk.bf16.mxu1 %vm13764_vm4, %v3875_v58  ;;  %vm13769_vm2 = vmmov %vm13768_vm1  ;;  %v4717_v1 = vsel %vm13723_vm8, %v4685_v21, 0.0  ;;  %vm13771_vm4 = vcmask 261120  }
 0x5c7   : > { %v9828_v51 = vpop.permute.xlu0 %9827  ;;  %vm13770_vm10 = vmmov %vm13768_vm1  ;;  %v5102_v16 = vsel %vm13771_vm4, %v4686_v28, %v9815_v2 }
 0x5c8   : > { %v12096_v10 = vpop.permute.xlu1 %9842  ;;  %v9829_v63 = vunpack.i.l.bf16 %v9828_v51  ;;  %vm13775_vm8 = vmmov %vm13768_vm1 }
 0x5c9   : > { %v9845_v29 = vunpack.i.h.bf16 %v12096_v10  ;;  %v9844_v8 = vunpack.i.l.bf16 %v12096_v10 }
 0x5cb   : > { %v9838_v55 = vpop.permute.xlu0 %9837  ;;  %v5108_v10 = vsel %vm13771_vm4, %v11707_v48, %v9845_v29  ;;  %v13812_v29 = vld [vmem:[#allocation31_spill] sm:$0xff] }
 0x5cc   : > { %v12100_v36 = vpop.permute.xlu1 %9852  ;;  %v9840_v59 = vunpack.i.h.bf16 %v9838_v55  ;;  %v9839_v12 = vunpack.i.l.bf16 %v9838_v55 }
 0x5cd   : > { %8904 = vmatmul.mubr.msk.bf16.gmra.mrb[24].mxu1 %vm13765_vm14, %v3876_v52  ;;  %v9830_v52 = vunpack.i.h.bf16 %v9828_v51  ;;  %vm13772_vm14 = vmmov %vm13771_vm4  ;;  %v9855_v27 = vunpack.i.h.bf16 %v12100_v36  ;;  %v9854_v35 = vunpack.i.l.bf16 %v12100_v36  ;;  %v13786_v36 = vsel %vm10906_vm12, %v11121_v38, 0.0 }
 0x5ce   : > { %8907 = vmatprep.mubr.msk.bf16.mxu1 %vm13766_vm15, %v3877_v61  ;;  %v5101_v54 = vsel %vm13772_vm14, %v4717_v1, %v9814_v37  ;;  %vm13773_vm15 = vcmask 523264   ;;  %v9835_v61 = vunpack.i.h.bf16 %v9833_v60 }
 0x5cf   : > { %v9848_v42 = vpop.permute.xlu0 %9847  ;;  %v5133_v24 = vsel %vm13773_vm15, %v5101_v54, %v9829_v63 }
 0x5d0   : > { %v12106_v47 = vpop.permute.xlu1 %9862  ;;  %v9850_v46 = vunpack.i.h.bf16 %v9848_v42  ;;  %v9849_v30 = vunpack.i.l.bf16 %v9848_v42 }
 0x5d1   : > { %v9865_v28 = vunpack.i.h.bf16 %v12106_v47  ;;  %v9864_v1 = vunpack.i.l.bf16 %v12106_v47 }
 0x5d3   : > { %v12102_v43 = vpop.permute.xlu0 %9857 }
 0x5d4   : > { %v12112_v0 = vpop.permute.xlu1 %9872  ;;  %v9860_v20 = vunpack.i.h.bf16 %v12102_v43  ;;  %v9859_v60 = vunpack.i.l.bf16 %v12102_v43 }
 0x5d5   : > { %8908 = vmatmul.mubr.msk.bf16.gmra.mrb[28].mxu1 %vm13767_vm13, %v3878_v15  ;;  %vm13774_vm13 = vmmov %vm13773_vm15  ;;  %v9874_v54 = vunpack.i.l.bf16 %v12112_v0 }
 0x5d6   : > { %8911 = vmatprep.mubr.msk.bf16.mxu1 %vm13768_vm1, %v3879_v57  ;;  %v5134_v32 = vsel %vm13774_vm13, %v5102_v16, %v9830_v52  ;;  %vm13776_vm1 = vnez %v13591_v39  ;;  %v4721_v57 = vsel %vm11615_vm9, %v4689_v26, 0.0  ;;  %vm13778_vm14 = vmmov %vm13774_vm13  ;;  %vm13784_vm9 = vcmask 785408   ;;  %v13802_v26 = vld [vmem:[#allocation22_spill] sm:$0xff] }
 0x5d7   : > { %v12108_v11 = vpop.permute.xlu0 %9867  ;;  %v5165_v13 = vpack.c.bf16 %v5134_v32, %v5133_v24  ;;  %vm13779_vm15 = vmmov %vm13774_vm13  ;;  %v13791_v52 = vsel %vm11376_vm11, %v11407_v17, 0.0  ;;  %v9875_v16 = vunpack.i.h.bf16 %v12112_v0  ;;  %v13797_v0 = vld [vmem:[#allocation30_spill] sm:$0xff] }
 0x5d8   : > { %v12124_v18 = vpop.permute.xlu1 %9882  ;;  %vm13780_vm13 = vmmov %vm13771_vm4  ;;  %v9870_v51 = vunpack.i.h.bf16 %v12108_v11  ;;  %v9869_v55 = vunpack.i.l.bf16 %v12108_v11 }
 0x5d9   : > { %v5106_v45 = vsel %vm13780_vm13, %v4690_v22, %v9840_v59  ;;  %vm13794_vm11 = vmmov %vm13784_vm9  ;;  %v9884_v22 = vunpack.i.l.bf16 %v12124_v18 }
 0x5db   : > { %v12110_v58 = vpop.permute.xlu0 %9877 }
 0x5dc   : > { %v12142_v3 = vpop.permute.xlu1 %9892  ;;  %v9880_v40 = vunpack.i.h.bf16 %v12110_v58  ;;  %v9879_v17 = vunpack.i.l.bf16 %v12110_v58 }
 0x5dd   : > { %8912 = vmatmul.mubr.msk.bf16.gmra.mrb[32].mxu1 %vm13769_vm2, %v3880_v9  ;;  %v4719_v9 = vsel %vm13776_vm1, %v4687_v49, 0.0  ;;  %vm13782_vm1 = vmmov %vm13778_vm14 }
 0x5de   : > { %8915 = vmatprep.mubr.msk.bf16.mxu1 %vm13770_vm10, %v3881_v25  ;;  %vm13777_vm10 = vmmov %vm13771_vm4  ;;  %v5103_v34 = vsel %vm13771_vm4, %v4719_v9, %v9824_v14 }
 0x5df   : > { %v12122_v15 = vpop.permute.xlu0 %9887  ;;  %v5104_v62 = vsel %vm13777_vm10, %v4688_v23, %v9825_v50  ;;  %v5135_v7 = vsel %vm13778_vm14, %v5103_v34, %v9834_v41  ;;  %vm13785_vm10 = vmmov %vm13784_vm9  ;;  %v9885_v34 = vunpack.i.h.bf16 %v12124_v18 }
 0x5e0   : > { %v5136_v4 = vsel %vm13779_vm15, %v5104_v62, %v9835_v61  ;;  %vm13787_vm14 = vmmov %vm13771_vm4  ;;  %v12161_v2 = vpop.permute.xlu1 %9902  ;;  %v9890_v32 = vunpack.i.h.bf16 %v12122_v15  ;;  %v9889_v49 = vunpack.i.l.bf16 %v12122_v15  ;;  %v13798_v61 = vsel %vm11060_vm3, %v13797_v0, 0.0  ;;  %v13836_v0 = vld [vmem:[#allocation38_spill] sm:$0xff] }
 0x5e1   : > { %v5107_v21 = vsel %vm13787_vm14, %v13786_v36, %v9844_v8  ;;  %vm13788_vm15 = vmmov %vm13782_vm1 }
 0x5e2   : > { %v5139_v43 = vsel %vm13788_vm15, %v5107_v21, %v9854_v35  ;;  %vm13789_vm13 = vmmov %vm13782_vm1 }
 0x5e3   : > { %v12138_v39 = vpop.permute.xlu0 %9897  ;;  %v5140_v11 = vsel %vm13789_vm13, %v5108_v10, %v9855_v27  ;;  %v13815_v27 = vld [vmem:[#allocation47_spill] sm:$0xff] }
 0x5e4   : > { %v5168_v63 = vpack.c.bf16 %v5140_v11, %v5139_v43  ;;  %v9913_v50 = vpop.permute.xlu1 %9912  ;;  %v13816_v35 = vsel %vm11168_vm7, %v13815_v27, 0.0  ;;  %v13856_v27 = vld [vmem:[#allocation36_spill] sm:$0xff] }
 0x5e5   : > { %8916 = vmatmul.mubr.msk.bf16.gmra.mrb[36].mxu1 %vm13775_vm8, %v3882_v44  ;;  %vm13781_vm8 = vmmov %vm13771_vm4  ;;  %v5166_v44 = vpack.c.bf16 %v5136_v4, %v5135_v7  ;;  %v9894_v4 = vunpack.i.l.bf16 %v12142_v3 }
 0x5e6   : > { %8931 = vmatprep.mubr.msk.bf16.mxu1 %vm13769_vm2, %v5165_v13  ;;  %v5105_v5 = vsel %vm13781_vm8, %v4721_v57, %v9839_v12  ;;  %vm13783_vm2 = vmmov %vm13782_vm1  ;;  %v13805_v12 = vld [vmem:[#allocation63_spill] sm:$0xff]  ;;  %v9895_v57 = vunpack.i.h.bf16 %v12142_v3 }
 0x5e7   : > { %v5137_v31 = vsel %vm13782_vm1, %v5105_v5, %v9849_v30  ;;  %v5138_v33 = vsel %vm13783_vm2, %v5106_v45, %v9850_v46  ;;  %v9908_v42 = vpop.permute.xlu0 %9907  ;;  %vm13790_vm8 = vmmov %vm13771_vm4  ;;  %v13806_v46 = vsel %vm11382_vm0, %v13805_v12, 0.0  ;;  %v9900_v5 = vunpack.i.h.bf16 %v12138_v39 }
 0x5e8   : > { %v5167_v25 = vpack.c.bf16 %v5138_v33, %v5137_v31  ;;  %v5110_v37 = vsel %vm13790_vm8, %v11740_v53, %v9860_v20  ;;  %vm13792_vm1 = vmmov %vm13771_vm4  ;;  %v9923_v7 = vpop.permute.xlu1 %9922  ;;  %v9899_v31 = vunpack.i.l.bf16 %v12138_v39  ;;  %v9910_v33 = vunpack.i.h.bf16 %v9908_v42  ;;  %v13820_v39 = vld [vmem:[#allocation25_spill] sm:$0xff] }
 0x5e9   : > { %v5109_v48 = vsel %vm13792_vm1, %v13791_v52, %v9859_v60  ;;  %vm13793_vm12 = vmmov %vm13783_vm2  ;;  %v9905_v52 = vunpack.i.h.bf16 %v12161_v2 }
 0x5ea   : > { %v5141_v6 = vsel %vm13783_vm2, %v5109_v48, %v9869_v55  ;;  %v5142_v38 = vsel %vm13793_vm12, %v5110_v37, %v9870_v51  ;;  %vm13799_vm4 = vmmov %vm13792_vm1  ;;  %v13822_v55 = vld [vmem:[#allocation66_spill] sm:$0xff]  ;;  %v9904_v48 = vunpack.i.l.bf16 %v12161_v2 }
 0x5eb   : > { %v5169_v53 = vpack.c.bf16 %v5142_v38, %v5141_v6  ;;  %v9918_v24 = vpop.permute.xlu0 %9917  ;;  %v5111_v41 = vsel %vm13799_vm4, %v13798_v61, %v9864_v1  ;;  %vm13800_vm14 = vmmov %vm13783_vm2  ;;  %v5118_v60 = vsel %vm13799_vm4, %v13820_v39, %v9900_v5  ;;  %v9915_v6 = vunpack.i.h.bf16 %v9913_v50  ;;  %v13847_v5 = vld [vmem:[#allocation34_spill] sm:$0xff] }
 0x5ec   : > { %v5143_v58 = vsel %vm13800_vm14, %v5111_v41, %v9874_v54  ;;  %vm13801_vm15 = vmmov %vm13783_vm2  ;;  %v9933_v11 = vpop.permute.xlu1 %9932  ;;  %v9914_v38 = vunpack.i.l.bf16 %v9913_v50  ;;  %v9919_v1 = vunpack.i.l.bf16 %v9918_v24  ;;  %v13838_v41 = vld [vmem:[#allocation64_spill] sm:$0xff] }
 0x5ed   : > { %8932 = vmatmul.mubr.msk.bf16.vlgmr.msra.gmra.mrb[8].mxu1 %vm13784_vm9, %v5166_v44  ;;  %vm13803_vm13 = vmmov %vm13792_vm1  ;;  %v9909_v44 = vunpack.i.l.bf16 %v9908_v42  ;;  %v13823_v42 = vsel %vm11396_vm5, %v13822_v55, 0.0 }
 0x5ee   : > { %8935 = vmatprep.mubr.msk.bf16.mxu1 %vm13785_vm10, %v5167_v25  ;;  %vm13795_vm10 = vmmov %vm13792_vm1  ;;  %v5114_v15 = vsel %vm13803_vm13, %v13802_v26, %v9880_v40  ;;  %v13829_v40 = vld [vmem:[#allocation37_spill] sm:$0xff] }
 0x5ef   : > { %v5112_v47 = vsel %vm13795_vm10, %v11762_v56, %v9865_v28  ;;  %vm13807_vm8 = vmmov %vm13792_vm1  ;;  %v9928_v9 = vpop.permute.xlu0 %9927  ;;  %v9920_v28 = vunpack.i.h.bf16 %v9918_v24 }
 0x5f0   : > { %v5144_v13 = vsel %vm13801_vm15, %v5112_v47, %v9875_v16  ;;  %v5113_v30 = vsel %vm13807_vm8, %v13806_v46, %v9879_v17  ;;  %vm13808_vm1 = vmmov %vm13783_vm2  ;;  %v9930_v16 = vunpack.i.h.bf16 %v9928_v9  ;;  %v9929_v54 = vunpack.i.l.bf16 %v9928_v9  ;;  %v9943_v50 = vpop.permute.xlu1 %9942 }
 0x5f1   : > { %v5145_v56 = vsel %vm13808_vm1, %v5113_v30, %v9889_v49  ;;  %vm13809_vm2 = vmmov %vm13808_vm1  ;;  %v5170_v62 = vpack.c.bf16 %v5144_v13, %v5143_v58  ;;  %v13832_v49 = vld [vmem:[#allocation51_spill] sm:$0xff]  ;;  %v13840_v58 = vld [vmem:[#allocation68_spill] sm:$0xff]  ;;  %v9925_v46 = vunpack.i.h.bf16 %v9923_v7  ;;  %v9924_v30 = vunpack.i.l.bf16 %v9923_v7 }
 0x5f2   : > { %v5146_v23 = vsel %vm13809_vm2, %v5114_v15, %v9890_v32  ;;  %vm13810_vm0 = vmmov %vm13784_vm9  ;;  %v13833_v47 = vsel %vm11296_vm6, %v13832_v49, 0.0  ;;  %v13876_v49 = vld [vmem:[#allocation69_spill] sm:$0xff] }
 0x5f3   : > { %v5171_v45 = vpack.c.bf16 %v5146_v23, %v5145_v56  ;;  %vm13811_vm3 = vmmov %vm13810_vm0  ;;  %v9938_v36 = vpop.permute.xlu0 %9937  ;;  %v9935_v56 = vunpack.i.h.bf16 %v9933_v11  ;;  %v9934_v23 = vunpack.i.l.bf16 %v9933_v11 }
 0x5f4   : > { %vm13813_vm12 = vmmov %vm13799_vm4 }
 0x5f5   : > { %8936 = vmatmul.mubr.msk.bf16.gmra.mrb[12].mxu1 %vm13794_vm11, %v5168_v63  ;;  %v5116_v8 = vsel %vm13813_vm12, %v13812_v29, %v9885_v34  ;;  %vm13817_vm11 = vmmov %vm13799_vm4  ;;  %vm13839_vm12 = vnez %v13838_v41  ;;  %v9939_v34 = vunpack.i.l.bf16 %v9938_v36  ;;  %v4716_v41 = vld [vmem:[#allocation3 + $0x11f] sm:$0xff] }
 0x5f6   : > { %8939 = vmatprep.mubr.msk.bf16.mxu1 %vm13784_vm9, %v5169_v53  ;;  %v5115_v3 = vsel %vm13817_vm11, %v13816_v35, %v9884_v22  ;;  %vm13818_vm9 = vmmov %vm13808_vm1  ;;  %v13841_v13 = vsel %vm13839_vm12, %v13840_v58, 0.0 }
 0x5f7   : > { %v5147_v25 = vsel %vm13818_vm9, %v5115_v3, %v9894_v4  ;;  %vm13819_vm10 = vmmov %vm13808_vm1  ;;  %v9948_v53 = vpop.permute.xlu0 %9947  ;;  %v13858_v3 = vld [vmem:[#allocation67_spill] sm:$0xff] }
 0x5f8   : > { %v5148_v20 = vsel %vm13819_vm10, %v5116_v8, %v9895_v57  ;;  %vm13824_vm14 = vmmov %vm13799_vm4  ;;  %v9958_v57 = vpop.permute.xlu1 %9957  ;;  %v9950_v4 = vunpack.i.h.bf16 %v9948_v53 }
 0x5f9   : > { %v5117_v10 = vsel %vm13824_vm14, %v13823_v42, %v9899_v31  ;;  %vm13825_vm15 = vmmov %vm13808_vm1  ;;  %v5172_v37 = vpack.c.bf16 %v5148_v20, %v5147_v25  ;;  %v13860_v25 = vld [vmem:[#allocation70_spill] sm:$0xff]  ;;  %v9959_v11 = vunpack.i.l.bf16 %v9958_v57 }
 0x5fa   : > { %v5149_v21 = vsel %vm13825_vm15, %v5117_v10, %v9909_v44  ;;  %vm13826_vm13 = vmmov %vm13808_vm1  ;;  %v13851_v44 = vld [vmem:[#allocation57_spill] sm:$0xff]  ;;  %v9945_v10 = vunpack.i.h.bf16 %v9943_v50 }
 0x5fb   : > { %v5150_v43 = vsel %vm13826_vm13, %v5118_v60, %v9910_v33  ;;  %vm13827_vm5 = vmmov %vm13810_vm0  ;;  %v9953_v22 = vpop.permute.xlu0 %9952  ;;  %v13849_v33 = vld [vmem:[#allocation50_spill] sm:$0xff] }
 0x5fc   : > { %v5173_v63 = vpack.c.bf16 %v5150_v43, %v5149_v21  ;;  %vm13828_vm7 = vmmov %vm13810_vm0  ;;  %vm13850_vm15 = vnez %v13849_v33  ;;  %v9960_v21 = vunpack.i.h.bf16 %v9958_v57  ;;  %v9963_v43 = vpop.permute.xlu1 %9962  ;;  %v5542_v57 = vld [vmem:[%s13274_s7 + $0x10] sm:$0xff] }
 0x5fd   : > { %8940 = vmatmul.mubr.msk.bf16.gmra.mrb[16].mxu1 %vm13810_vm0, %v5170_v62  ;;  %vm13830_vm8 = vmmov %vm13799_vm4  ;;  %v9940_v62 = vunpack.i.h.bf16 %v9938_v36  ;;  %v13852_v7 = vsel %vm13850_vm15, %v13851_v44, 0.0  ;;  %v9944_v36 = vunpack.i.l.bf16 %v9943_v50 }
 0x5fe   : > { %8943 = vmatprep.mubr.msk.bf16.mxu1 %vm13811_vm3, %v5171_v45  ;;  %v5120_v17 = vsel %vm13830_vm8, %v13829_v40, %v9905_v52  ;;  %vm13834_vm1 = vmmov %vm13799_vm4  ;;  %v9949_v45 = vunpack.i.l.bf16 %v9948_v53  ;;  %v9955_v52 = vunpack.i.h.bf16 %v9953_v22 }
 0x5ff   : > { %v5119_v2 = vsel %vm13834_vm1, %v13833_v47, %v9904_v48  ;;  %vm13835_vm0 = vmmov %vm13809_vm2  ;;  %v9968_v55 = vpop.permute.xlu0 %9967  ;;  %v9954_v48 = vunpack.i.l.bf16 %v9953_v22  ;;  %v13878_v47 = vld [vmem:[#allocation71_spill] sm:$0xff] }
 0x600   : > { %v5151_v14 = vsel %vm13809_vm2, %v5119_v2, %v9914_v38  ;;  %v5152_v24 = vsel %vm13835_vm0, %v5120_v17, %v9915_v6  ;;  %vm13837_vm3 = vmmov %vm13834_vm1  ;;  %v9970_v6 = vunpack.i.h.bf16 %v9968_v55  ;;  %v9969_v38 = vunpack.i.l.bf16 %v9968_v55  ;;  %v5541_v22 = vld [vmem:[%s13274_s7 + $0x8] sm:$0xff] }
 0x601   : > { %v5122_v61 = vsel %vm13837_vm3, %v13836_v0, %v9920_v28  ;;  %vm13842_vm11 = vmmov %vm13834_vm1  ;;  %v5174_v12 = vpack.c.bf16 %v5152_v24, %v5151_v14  ;;  %v9965_v14 = vunpack.i.h.bf16 %v9963_v43  ;;  %v9973_v24 = vpop.permute.xlu1 %9972 }
 0x602   : > { %v5121_v26 = vsel %vm13842_vm11, %v13841_v13, %v9919_v1  ;;  %vm13843_vm9 = vmmov %vm13835_vm0  ;;  %v13868_v1 = vld [vmem:[#allocation52_spill] sm:$0xff] }
 0x603   : > { %v5153_v15 = vsel %vm13843_vm9, %v5121_v26, %v9929_v54  ;;  %vm13844_vm10 = vmmov %vm13835_vm0  ;;  %v4715_v13 = vld [vmem:[#allocation3 + $0x117] sm:$0xff]  ;;  %v9964_v26 = vunpack.i.l.bf16 %v9963_v43 }
 0x604   : > { %v5154_v59 = vsel %vm13844_vm10, %v5122_v61, %v9930_v16  ;;  %vm13845_vm6 = vmmov %vm13827_vm5  ;;  %vm13869_vm10 = vnez %v13868_v1  ;;  %v13870_v16 = vld [vmem:[#allocation61_spill] sm:$0xff] }
 0x605   : > { %8944 = vmatmul.mubr.msk.bf16.gmra.mrb[20].mxu1 %vm13827_vm5, %v5172_v37  ;;  %v5175_v9 = vpack.c.bf16 %v5154_v59, %v5153_v15  ;;  %vm13846_vm4 = vmmov %vm13827_vm5  ;;  %v13871_v54 = vsel %vm13869_vm10, %v13870_v16, 0.0  ;;  %v9975_v15 = vunpack.i.h.bf16 %v9973_v24  ;;  %v9974_v59 = vunpack.i.l.bf16 %v9973_v24 }
 0x606   : > { %8947 = vmatprep.mubr.msk.bf16.mxu1 %vm13828_vm7, %v5173_v63  ;;  %vm13848_vm14 = vmmov %vm13834_vm1  ;;  %v13866_v63 = vld [vmem:[#allocation39_spill] sm:$0xff] }
 0x607   : > { %v5124_v31 = vsel %vm13848_vm14, %v13847_v5, %v9925_v46  ;;  %vm13853_vm13 = vmmov %vm13834_vm1  ;;  %v13885_v46 = vld [vmem:[#allocation65_spill] sm:$0xff] }
 0x608   : > { %v5123_v29 = vsel %vm13853_vm13, %v13852_v7, %v9924_v30  ;;  %vm13854_vm5 = vmmov %vm13835_vm0  ;;  %vm13877_vm13 = vnez %v13876_v49  ;;  %v5543_v5 = vld [vmem:[%s13274_s7 + $0x18] sm:$0xff] }
 0x609   : > { %v5155_v8 = vsel %vm13854_vm5, %v5123_v29, %v9934_v23  ;;  %vm13855_vm7 = vmmov %vm13835_vm0  ;;  %v13879_v2 = vsel %vm13877_vm13, %v13878_v47, 0.0  ;;  %v5557_v33 = vand.u32 4294901760, %v5543_v5  ;;  %v13892_v29 = vmov 0.0|0.0  }
 0x60a   : > { %v5156_v18 = vsel %vm13855_vm7, %v5124_v31, %v9935_v56  ;;  %vm13857_vm8 = vmmov %vm13834_vm1  ;;  %vm13859_vm1 = vnez %v13858_v3  ;;  %v5554_v31 = vand.u32 4294901760, %v5542_v57 }
 0x60b   : > { %v5126_v35 = vsel %vm13857_vm8, %v13856_v27, %v9940_v62  ;;  %v13861_v20 = vsel %vm13859_vm1, %v13860_v25, 0.0  ;;  %vm13862_vm2 = vmmov %vm13837_vm3  ;;  %v5176_v42 = vpack.c.bf16 %v5156_v18, %v5155_v8  ;;  %v5649_v25 = vsub.f32 %v5543_v5, %v5557_v33 }
 0x60c   : > { %v5125_v39 = vsel %vm13862_vm2, %v13861_v20, %v9939_v34  ;;  %vm13863_vm3 = vmmov %vm13835_vm0  ;;  %v5540_v34 = vld [vmem:[%s13274_s7] sm:$0xff]  ;;  %v12314_v7 = vpack.c.bf16 %v5557_v33, %v5554_v31  ;;  %v5642_v3 = vsub.f32 %v5542_v57, %v5554_v31 }
 0x60d   : > { %8948 = vmatmul.mubr.msk.bf16.gmra.mrb[24].mxu1 %vm13845_vm6, %v5174_v12  ;;  %v5157_v60 = vsel %vm13835_vm0, %v5125_v39, %v9949_v45  ;;  %v5158_v51 = vsel %vm13863_vm3, %v5126_v35, %v9950_v4  ;;  %vm13864_vm12 = vmmov %vm13846_vm4  ;;  %v5548_v4 = vand.u32 4294901760, %v5540_v34  ;;  %v5551_v45 = vand.u32 4294901760, %v5541_v22 }
 0x60e   : > { %8951 = vmatprep.mubr.msk.bf16.mxu1 %vm13846_vm4, %v5175_v9  ;;  %v5177_v37 = vpack.c.bf16 %v5158_v51, %v5157_v60  ;;  %vm13865_vm11 = vmmov %vm13846_vm4  ;;  %v5643_v60 = vand.u32 4294901760, %v5642_v3  ;;  %v5650_v51 = vand.u32 4294901760, %v5649_v25 }
 0x60f   : > { %vm13867_vm9 = vmmov %vm13862_vm2  ;;  %v12311_v44 = vpack.c.bf16 %v5551_v45, %v5548_v4  ;;  %v5628_v8 = vsub.f32 %v5540_v34, %v5548_v4  ;;  %v5635_v18 = vsub.f32 %v5541_v22, %v5551_v45 }
 0x610   : > { %v5128_v28 = vsel %vm13867_vm9, %v13866_v63, %v9945_v10  ;;  %vm13872_vm6 = vmmov %vm13862_vm2  ;;  %v5644_v10 = vsub.f32 %v5642_v3, %v5643_v60 }
 0x611   : > { %v5127_v53 = vsel %vm13872_vm6, %v13871_v54, %v9944_v36  ;;  %vm13873_vm4 = vmmov %vm13835_vm0  ;;  %9265 = vmatpush3.bf16.msra.mxu0 %v12311_v44  ;;  %v5629_v27 = vand.u32 4294901760, %v5628_v8  ;;  %v5636_v35 = vand.u32 4294901760, %v5635_v18  ;;  %v5651_v36 = vsub.f32 %v5649_v25, %v5650_v51 }
 0x612   : > { %v5159_v40 = vsel %vm13873_vm4, %v5127_v53, %v9959_v11  ;;  %vm13874_vm14 = vmmov %vm13835_vm0  ;;  %9266 = vmatprep.subr.bf16.mxu0 %v13892_v29  ;;  %v5645_v43 = vand.u32 4294901760, %v5644_v10 }
 0x613   : > { %v5160_v17 = vsel %vm13874_vm14, %v5128_v28, %v9960_v21  ;;  %vm13875_vm15 = vmmov %vm13862_vm2  ;;  %v5630_v20 = vsub.f32 %v5628_v8, %v5629_v27  ;;  %v5637_v39 = vsub.f32 %v5635_v18, %v5636_v35  ;;  %v5652_v11 = vand.u32 4294901760, %v5651_v36 }
 0x614   : > { %v5130_v32 = vsel %vm13875_vm15, %v11969_v19, %v9955_v52  ;;  %vm13880_vm5 = vmmov %vm13862_vm2  ;;  %v5178_v58 = vpack.c.bf16 %v5160_v17, %v5159_v40 }
 0x615   : > { %8952 = vmatmul.mubr.msk.bf16.gmra.mrb[28].mxu1 %vm13864_vm12, %v5176_v42  ;;  %v5129_v50 = vsel %vm13880_vm5, %v13879_v2, %v9954_v48  ;;  %vm13881_vm7 = vmmov %vm13835_vm0  ;;  %9268 = vmatpush3.bf16.msra.mxu0 %v12314_v7  ;;  %v5631_v55 = vand.u32 4294901760, %v5630_v20  ;;  %v5638_v42 = vand.u32 4294901760, %v5637_v39  ;;  %v12323_v52 = vpack.c.bf16 %v5652_v11, %v5645_v43 }
 0x616   : > { %8955 = vmatprep.mubr.msk.bf16.mxu1 %vm13865_vm11, %v5177_v37  ;;  %v5161_v0 = vsel %vm13881_vm7, %v5129_v50, %v9969_v38  ;;  %vm13882_vm8 = vmmov %vm13835_vm0  ;;  %vm13886_vm0 = vnez %v13885_v46  ;;  %9269 = vmatprep.subr.bf16.mxu0 %v13892_v29  ;;  %v12321_v37 = vpack.c.bf16 %v5635_v18, %v5628_v8  ;;  %v12325_v48 = vpack.c.bf16 %v5649_v25, %v5642_v3 }
 0x617   : > { %v5162_v61 = vsel %vm13882_vm8, %v5130_v32, %v9970_v6  ;;  %vm13883_vm1 = vmmov %vm13862_vm2  ;;  %v4747_v30 = vsel %vm13886_vm0, %v4715_v13, 0.0  ;;  %v12319_v21 = vpack.c.bf16 %v5638_v42, %v5631_v55  ;;  %v12327_v6 = vpack.c.bf16 %v5636_v35, %v5629_v27 }
 0x618   : > { %v5179_v12 = vpack.c.bf16 %v5162_v61, %v5161_v0  ;;  %v5132_v19 = vsel %vm13883_vm1, %v4716_v41, %v9965_v14  ;;  %vm13884_vm2 = vmmov %vm13865_vm11  ;;  %v12329_v38 = vpack.c.bf16 %v5650_v51, %v5643_v60 }
 0x619   : > { %vm13887_vm3 = vmmov %vm13884_vm2 }
 0x61a   : > { %vm13888_vm12 = vmmov %vm13883_vm1 }
 0x61b   : > { %v5131_v56 = vsel %vm13888_vm12, %v4747_v30, %v9964_v26  ;;  %vm13889_vm11 = vmmov %vm13873_vm4 }
 0x61c   : > { %v5163_v23 = vsel %vm13889_vm11, %v5131_v56, %v9974_v59  ;;  %vm13890_vm9 = vmmov %vm13873_vm4 }
 0x61d   : > { %8956 = vmatmul.mubr.msk.bf16.gmra.mrb[32].mxu1 %vm13884_vm2, %v5178_v58  ;;  %v5164_v9 = vsel %vm13890_vm9, %v5132_v19, %v9975_v15  ;;  %vm13891_vm10 = vmmov %vm13884_vm2 }
 0x61e   : > { %8959 = vmatprep.mubr.msk.bf16.mxu1 %vm13887_vm3, %v5179_v12  ;;  %v5180_v62 = vpack.c.bf16 %v5164_v9, %v5163_v23  ;;  %vm13893_vm6 = vmmov %vm13883_vm1 }
 0x61f   : > { %vm13894_vm4 = vmmov %vm13883_vm1 }
 0x620   : > { %vm13895_vm14 = vmmov %vm13883_vm1 }
 0x621   : > { %vm13896_vm15 = vmmov %vm13883_vm1 }
 0x622   : > { %vm13897_vm13 = vmmov %vm13883_vm1 }
 0x623   : > { %vm13898_vm5 = vmmov %vm13883_vm1 }
 0x624   : > { %vm13899_vm7 = vmmov %vm13883_vm1 }
 0x625   : > { %8960 = vmatmul.mubr.msk.bf16.gmra.mrb[36].mxu1 %vm13891_vm10, %v5180_v62  ;;  %vm13900_vm8 = vmmov %vm13883_vm1 }
 0x626   : > { %vm13901_vm2 = vmmov %vm13883_vm1 }
 0x627   : > { %vm13902_vm0 = vmmov %vm13883_vm1 }
 0x628   : > { %vm13903_vm3 = vmmov %vm13902_vm0 }
 0x629   : > { %vm13904_vm12 = vmmov %vm13902_vm0 }
 0x62a   : > { %vm13905_vm11 = vmmov %vm13902_vm0 }
 0x62b   : > { %vm13906_vm9 = vmmov %vm13902_vm0 }
 0x62c   : > { %vm13907_vm10 = vmmov %vm13902_vm0 }
 0x6c0   : > { %v12331_v63 = vpop.f32.mrb[8].mxu1 }
 0x6c1   : > { %v12333_v28 = vpop.f32.mrb[9].mxu1  ;;  %v5474_v17 = vsel %vm13895_vm14, %v12331_v63, 0.0  ;;  %vm13910_vm14 = vmmov %vm13902_vm0 }
 0x6c2   : > { %v12335_v1 = vpop.f32.mrb[10].mxu1  ;;  %v5471_v54 = vsel %vm13893_vm6, %v12333_v28, 0.0  ;;  %vm13908_vm6 = vmmov %vm13902_vm0 }
 0x6c3   : > { %v12337_v16 = vpop.f32.mrb[11].mxu1  ;;  %v5476_v49 = vsel %vm13896_vm15, %v12335_v1, 0.0  ;;  %vm13911_vm15 = vmmov %vm13902_vm0 }
 0x6c4   : > { %v5472_v53 = vsel %vm13894_vm4, %v12337_v16, 0.0  ;;  %vm13909_vm4 = vmmov %vm13902_vm0 }
 0x6c5   : > { %v5473_v40 = vadd.f32 %v5472_v53, %v5471_v54 }
 0x6c7   : > { %v5475_v32 = vadd.f32 %v5474_v17, %v5473_v40 }
 0x6c8   : > { %v12347_v47 = vpop.f32.mrb[12].mxu1 }
 0x6c9   : > { %v12349_v2 = vpop.f32.mrb[13].mxu1  ;;  %v5477_v50 = vadd.f32 %v5476_v49, %v5475_v32  ;;  %v5482_v13 = vsel %vm13899_vm7, %v12347_v47, 0.0  ;;  %vm13914_vm7 = vmmov %vm13902_vm0 }
 0x6ca   : > { %v5478_v14 = vsel %vm13897_vm13, %v12349_v2, 0.0  ;;  %v12353_v24 = vpop.f32.mrb[14].mxu1  ;;  %vm13912_vm13 = vmmov %vm13902_vm0 }
 0x6cb   : > { %v5479_v0 = vadd.f32 %v5478_v14, %v5477_v50  ;;  %v12355_v61 = vpop.f32.mrb[15].mxu1  ;;  %v5484_v15 = vsel %vm13900_vm8, %v12353_v24, 0.0  ;;  %vm13915_vm8 = vmmov %vm13902_vm0 }
 0x6cc   : > { %v5480_v41 = vsel %vm13898_vm5, %v12355_v61, 0.0  ;;  %vm13913_vm5 = vmmov %vm13902_vm0 }
 0x6cd   : > { %v5481_v58 = vadd.f32 %v5480_v41, %v5479_v0 }
 0x6cf   : > { %v5483_v26 = vadd.f32 %v5482_v13, %v5481_v58 }
 0x6d0   : > { %v12363_v59 = vpop.f32.mrb[16].mxu1 }
 0x6d1   : > { %v12365_v12 = vpop.f32.mrb[17].mxu1  ;;  %v5485_v19 = vadd.f32 %v5484_v15, %v5483_v26  ;;  %v5490_v34 = vsel %vm13902_vm0, %v12363_v59, 0.0 }
 0x6d2   : > { %v5486_v46 = vsel %vm13883_vm1, %v12365_v12, 0.0  ;;  %v12369_v30 = vpop.f32.mrb[18].mxu1  ;;  %vm13916_vm1 = vmmov %vm13902_vm0 }
 0x6d3   : > { %v5487_v56 = vadd.f32 %v5486_v46, %v5485_v19  ;;  %v12371_v23 = vpop.f32.mrb[19].mxu1  ;;  %v5492_v57 = vsel %vm13903_vm3, %v12369_v30, 0.0  ;;  %vm13918_vm3 = vmmov %vm13902_vm0 }
 0x6d4   : > { %v5488_v9 = vsel %vm13901_vm2, %v12371_v23, 0.0  ;;  %vm13917_vm2 = vmmov %vm13902_vm0 }
 0x6d5   : > { %v5489_v62 = vadd.f32 %v5488_v9, %v5487_v56 }
 0x6d7   : > { %v5491_v22 = vadd.f32 %v5490_v34, %v5489_v62 }
 0x6d8   : > { %v12379_v4 = vpop.f32.mrb[20].mxu1 }
 0x6d9   : > { %v12381_v45 = vpop.f32.mrb[21].mxu1  ;;  %v5493_v5 = vadd.f32 %v5492_v57, %v5491_v22  ;;  %v5498_v3 = vsel %vm13906_vm9, %v12379_v4, 0.0  ;;  %vm13921_vm9 = vmmov %vm13902_vm0 }
 0x6da   : > { %v5494_v31 = vsel %vm13904_vm12, %v12381_v45, 0.0  ;;  %v12385_v33 = vpop.f32.mrb[22].mxu1  ;;  %vm13919_vm12 = vmmov %vm13902_vm0 }
 0x6db   : > { %v5495_v8 = vadd.f32 %v5494_v31, %v5493_v5  ;;  %v12387_v18 = vpop.f32.mrb[23].mxu1  ;;  %v5500_v20 = vsel %vm13907_vm10, %v12385_v33, 0.0  ;;  %vm13922_vm10 = vmmov %vm13902_vm0 }
 0x6dc   : > { %v5496_v27 = vsel %vm13905_vm11, %v12387_v18, 0.0  ;;  %vm13920_vm11 = vmmov %vm13902_vm0 }
 0x6dd   : > { %v5497_v35 = vadd.f32 %v5496_v27, %v5495_v8 }
 0x6df   : > { %v5499_v25 = vadd.f32 %v5498_v3, %v5497_v35 }
 0x6e0   : > { %v12395_v39 = vpop.f32.mrb[24].mxu1 }
 0x6e1   : > { %v12397_v60 = vpop.f32.mrb[25].mxu1  ;;  %v5501_v51 = vadd.f32 %v5500_v20, %v5499_v25  ;;  %v5506_v54 = vsel %vm13910_vm14, %v12395_v39, 0.0  ;;  %vm13927_vm14 = vmmov %vm13902_vm0 }
 0x6e2   : > { %v5502_v55 = vsel %vm13908_vm6, %v12397_v60, 0.0  ;;  %v12401_v42 = vpop.f32.mrb[26].mxu1  ;;  %vm13923_vm6 = vmmov %vm13902_vm0 }
 0x6e3   : > { %v5503_v10 = vadd.f32 %v5502_v55, %v5501_v51  ;;  %v12403_v36 = vpop.f32.mrb[27].mxu1  ;;  %v5508_v40 = vsel %vm13911_vm15, %v12401_v42, 0.0  ;;  %vm13928_vm15 = vmmov %vm13902_vm0 }
 0x6e4   : > { %v5504_v43 = vsel %vm13909_vm4, %v12403_v36, 0.0  ;;  %vm13925_vm4 = vmmov 0  }
 0x6e5   : > { %v5505_v11 = vadd.f32 %v5504_v43, %v5503_v10 }
 0x6e7   : > { %v5507_v53 = vadd.f32 %v5506_v54, %v5505_v11 }
 0x6e8   : > { %v12411_v17 = vpop.f32.mrb[28].mxu1 }
 0x6e9   : > { %v12413_v32 = vpop.f32.mrb[29].mxu1  ;;  %v5509_v49 = vadd.f32 %v5508_v40, %v5507_v53  ;;  %v5514_v26 = vsel %vm13914_vm7, %v12411_v17, 0.0  ;;  %vm13931_vm7 = vmmov %vm13902_vm0 }
 0x6ea   : > { %v5510_v50 = vsel %vm13912_vm13, %v12413_v32, 0.0  ;;  %v12417_v14 = vpop.f32.mrb[30].mxu1  ;;  %vm13929_vm13 = vmmov %vm13902_vm0 }
 0x6eb   : > { %v5511_v0 = vadd.f32 %v5510_v50, %v5509_v49  ;;  %v12419_v41 = vpop.f32.mrb[31].mxu1  ;;  %v5516_v19 = vsel %vm13915_vm8, %v12417_v14, 0.0  ;;  %vm13932_vm8 = vmmov %vm13902_vm0 }
 0x6ec   : > { %v5512_v58 = vsel %vm13913_vm5, %v12419_v41, 0.0  ;;  %vm13930_vm5 = vmmov %vm13902_vm0 }
 0x6ed   : > { %v5513_v13 = vadd.f32 %v5512_v58, %v5511_v0 }
 0x6ef   : > { %v5515_v15 = vadd.f32 %v5514_v26, %v5513_v13 }
 0x6f0   : > { %v12427_v46 = vpop.f32.mrb[32].mxu1 }
 0x6f1   : > { %v12429_v56 = vpop.f32.mrb[33].mxu1  ;;  %v5517_v9 = vadd.f32 %v5516_v19, %v5515_v15  ;;  %v5522_v8 = vsel %vm13902_vm0, %v12427_v46, 0.0 }
 0x6f2   : > { %v5518_v62 = vsel %vm13916_vm1, %v12429_v56, 0.0  ;;  %v12433_v34 = vpop.f32.mrb[34].mxu1  ;;  %vm13933_vm1 = vmmov %vm13902_vm0 }
 0x6f3   : > { %v5519_v22 = vadd.f32 %v5518_v62, %v5517_v9  ;;  %v12435_v57 = vpop.f32.mrb[35].mxu1  ;;  %v5524_v35 = vsel %vm13918_vm3, %v12433_v34, 0.0  ;;  %vm13935_vm3 = vmmov %vm13902_vm0 }
 0x6f4   : > { %v5520_v5 = vsel %vm13917_vm2, %v12435_v57, 0.0  ;;  %vm13934_vm2 = vmmov %vm13902_vm0 }
 0x6f5   : > { %v5521_v31 = vadd.f32 %v5520_v5, %v5519_v22 }
 0x6f7   : > { %v5523_v27 = vadd.f32 %v5522_v8, %v5521_v31 }
 0x6f8   : > { %v12443_v3 = vpop.f32.mrb[36].mxu1 }
 0x6f9   : > { %v12445_v25 = vpop.f32.mrb[37].mxu1  ;;  %v5525_v20 = vadd.f32 %v5524_v35, %v5523_v27  ;;  %v5530_v53 = vsel %vm13921_vm9, %v12443_v3, 0.0  ;;  %v13924_v27 = vmov 0.0   ;;  %vm13938_vm9 = vmmov %vm13902_vm0 }
 0x6fa   : > { %v5526_v51 = vsel %vm13919_vm12, %v12445_v25, 0.0  ;;  %v12449_v55 = vpop.f32.mrb[38].mxu1  ;;  %vm13936_vm12 = vmmov %vm13902_vm0 }
 0x6fb   : > { %v5527_v10 = vadd.f32 %v5526_v51, %v5525_v20  ;;  %v12451_v43 = vpop.f32.mrb[39].mxu1  ;;  %v5532_v49 = vsel %vm13922_vm10, %v12449_v55, 0.0  ;;  %v13926_v20 = vld [vmem:[#allocation6_spill] sm:$0xff]  ;;  %vm13939_vm10 = vmmov %vm13902_vm0 }
 0x6fc   : > { %v5528_v11 = vsel %vm13920_vm11, %v12451_v43, 0.0  ;;  %vm13937_vm11 = vmmov %vm13902_vm0 }
 0x6fd   : > { %v5529_v54 = vadd.f32 %v5528_v11, %v5527_v10 }
 0x6ff   : > { %v5531_v40 = vadd.f32 %v5530_v53, %v5529_v54 }
 0x701   : > { %v5533_v50 = vadd.f32 %v5532_v49, %v5531_v40 }
 0x703   : > { %v5534_v0 = vrot.slane %v5533_v50, 4 }
 0x705   : > { %v5535_v58 = vadd.f32 %v5534_v0, %v5533_v50 }
 0x707   : > { %v5536_v13 = vrot.slane %v5535_v58, 2 }
 0x709   : > { %v5537_v26 = vadd.f32 %v5536_v13, %v5535_v58 }
 0x70b   : > { %v5538_v15 = vrot.slane %v5537_v26, 1 }
 0x70d   : > { %v5539_v19 = vadd.f32 %v5538_v15, %v5537_v26 }
 0x70f   : > { %v5545_v9 = vsel %vm13923_vm6, %v5539_v19, 0  ;;  %vm13940_vm6 = vmmov %vm13902_vm0 }
 0x710   : > { %v5616_v62 = vand.u32 4294901760, %v5545_v9 }
 0x712   : > { %v5617_v22 = vsub.f32 %v5545_v9, %v5616_v62 }
 0x714   : > { %v5618_v5 = vand.u32 4294901760, %v5617_v22 }
 0x716   : > { %v5619_v31 = vsub.f32 %v5617_v22, %v5618_v5 }
 0x718   : > { %v5620_v8 = vand.u32 4294901760, %v5619_v31 }
 0x71a   : > { %8972 = vmatmul.mubr.f32.vlgmr.msra.gmra.mrb[36].mxu0 %v5620_v8 }
 0x71b   : > { %9271 = vmatpush3.bf16.msra.mxu0 %v12319_v21  ;;  %8982 = vmatprep.mubr.msk.f32.mxu0 %vm13925_vm4, %v13924_v27 }
 0x71c   : > { %9272 = vmatprep.subr.bf16.mxu0 %v13892_v29 }
 0x71f   : > { %9274 = vmatpush3.bf16.msra.mxu0 %v12323_v52 }
 0x720   : > { %9275 = vmatprep.subr.bf16.mxu0 %v13892_v29 }
 0x722   : > { %8983 = vmatmul.mubr.f32.vlgmr.msra.gmra.mrb[36].mxu0 %v5616_v62 }
 0x723   : > { %9277 = vmatpush3.bf16.msra.mxu0 %v12321_v37  ;;  %8993 = vmatprep.mubr.msk.f32.mxu0 %vm13925_vm4, %v13924_v27 }
 0x724   : > { %9278 = vmatprep.subr.bf16.mxu0 %v13892_v29 }
 0x727   : > { %9280 = vmatpush3.bf16.msra.mxu0 %v12325_v48 }
 0x728   : > { %9281 = vmatprep.subr.bf16.mxu0 %v13892_v29 }
 0x72a   : > { %8994 = vmatmul.mubr.f32.vlgmr.msra.gmra.mrb[36].mxu0 %v5617_v22 }
 0x72b   : > { %9283 = vmatpush3.bf16.msra.mxu0 %v12311_v44  ;;  %9004 = vmatprep.mubr.msk.f32.mxu0 %vm13925_vm4, %v13924_v27 }
 0x72c   : > { %9284 = vmatprep.subr.bf16.mxu0 %v13892_v29 }
 0x72f   : > { %9286 = vmatpush3.bf16.msra.mxu0 %v12314_v7 }
 0x730   : > { %9287 = vmatprep.subr.bf16.mxu0 %v13892_v29 }
 0x732   : > { %9005 = vmatmul.mubr.f32.vlgmr.msra.gmra.mrb[36].mxu0 %v5618_v5 }
 0x733   : > { %9289 = vmatpush3.bf16.msra.mxu0 %v12327_v6  ;;  %9015 = vmatprep.mubr.msk.f32.mxu0 %vm13925_vm4, %v13924_v27 }
 0x734   : > { %9290 = vmatprep.subr.bf16.mxu0 %v13892_v29 }
 0x737   : > { %9292 = vmatpush3.bf16.msra.mxu0 %v12329_v38 }
 0x738   : > { %9293 = vmatprep.subr.bf16.mxu0 %v13892_v29 }
 0x73a   : > { %9016 = vmatmul.mubr.f32.vlgmr.msra.gmra.mrb[36].mxu0 %v5616_v62 }
 0x73b   : > { %9295 = vmatpush3.bf16.msra.mxu0 %v12311_v44  ;;  %9026 = vmatprep.mubr.msk.f32.mxu0 %vm13925_vm4, %v13924_v27 }
 0x73c   : > { %9296 = vmatprep.subr.bf16.mxu0 %v13892_v29 }
 0x73f   : > { %9298 = vmatpush3.bf16.msra.mxu0 %v12314_v7 }
 0x740   : > { %9299 = vmatprep.subr.bf16.mxu0 %v13892_v29 }
 0x742   : > { %9027 = vmatmul.mubr.f32.vlgmr.msra.gmra.mrb[36].mxu0 %v5616_v62 }
 0x743   : > { %9301 = vmatpush3.bf16.msra.mxu0 %v12311_v44  ;;  %9037 = vmatprep.mubr.msk.f32.mxu0 %vm13925_vm4, %v13924_v27 }
 0x744   : > { %9302 = vmatprep.subr.bf16.mxu0 %v13892_v29 }
 0x747   : > { %9304 = vmatpush3.bf16.msra.mxu0 %v12314_v7 }
 0x748   : > { %9305 = vmatprep.subr.bf16.mxu0 %v13892_v29 }
 0x815   : > { %v6028_v35 = vpop.f32.mrb[36].mxu0 }
 0x816   : > { %v6035_v51 = vrot.slane %v6028_v35, %v13926_v20  ;;  %v9028_v10 = vpop.f32.mrb[37].mxu0 }
 0x818   : > { %v12498_v11 = vsub.f32 %v12333_v28, %v6035_v51  ;;  %v12501_v54 = vsub.f32 %v12337_v16, %v6035_v51  ;;  %v12504_v53 = vsub.f32 %v12331_v63, %v6035_v51  ;;  %v12507_v40 = vsub.f32 %v12335_v1, %v6035_v51 }
 0x819   : > { %v12510_v49 = vsub.f32 %v12349_v2, %v6035_v51  ;;  %v12513_v50 = vsub.f32 %v12355_v61, %v6035_v51  ;;  %v12516_v0 = vsub.f32 %v12347_v47, %v6035_v51  ;;  %v12519_v28 = vsub.f32 %v12353_v24, %v6035_v51 }
 0x81a   : > { %v12522_v16 = vsub.f32 %v12365_v12, %v6035_v51  ;;  %v12525_v63 = vsub.f32 %v12371_v23, %v6035_v51  ;;  %v12528_v1 = vsub.f32 %v12363_v59, %v6035_v51  ;;  %v12531_v2 = vsub.f32 %v12369_v30, %v6035_v51 }
 0x81b   : > { %v12534_v61 = vsub.f32 %v12381_v45, %v6035_v51  ;;  %v12537_v47 = vsub.f32 %v12387_v18, %v6035_v51  ;;  %v12540_v24 = vsub.f32 %v12379_v4, %v6035_v51  ;;  %v12543_v12 = vsub.f32 %v12385_v33, %v6035_v51 }
 0x81c   : > { %v12546_v23 = vsub.f32 %v12397_v60, %v6035_v51  ;;  %v12549_v59 = vsub.f32 %v12403_v36, %v6035_v51  ;;  %v12552_v30 = vsub.f32 %v12395_v39, %v6035_v51  ;;  %v12555_v45 = vsub.f32 %v12401_v42, %v6035_v51 }
 0x81d   : > { %v12558_v18 = vsub.f32 %v12413_v32, %v6035_v51  ;;  %v12561_v4 = vsub.f32 %v12419_v41, %v6035_v51  ;;  %v12564_v33 = vsub.f32 %v12411_v17, %v6035_v51  ;;  %v12567_v60 = vsub.f32 %v12417_v14, %v6035_v51 }
 0x81e   : > { %v12570_v36 = vsub.f32 %v12429_v56, %v6035_v51  ;;  %v12573_v39 = vsub.f32 %v12435_v57, %v6035_v51  ;;  %v12576_v42 = vsub.f32 %v12427_v46, %v6035_v51  ;;  %v12579_v32 = vsub.f32 %v12433_v34, %v6035_v51 }
 0x81f   : > { %v12582_v41 = vsub.f32 %v12445_v25, %v6035_v51  ;;  %v12585_v17 = vsub.f32 %v12451_v43, %v6035_v51  ;;  %v12588_v14 = vsub.f32 %v12443_v3, %v6035_v51  ;;  %v12591_v56 = vsub.f32 %v12449_v55, %v6035_v51 }
 0x820   : > { %v6068_v57 = vmul.f32 %v12498_v11, %v12498_v11  ;;  %v6069_v46 = vmul.f32 %v12501_v54, %v12501_v54  ;;  %v6070_v34 = vmul.f32 %v12504_v53, %v12504_v53  ;;  %v6071_v25 = vmul.f32 %v12507_v40, %v12507_v40 }
 0x821   : > { %v6072_v55 = vmul.f32 %v12510_v49, %v12510_v49  ;;  %v6073_v15 = vmul.f32 %v12513_v50, %v12513_v50  ;;  %v6074_v62 = vmul.f32 %v12516_v0, %v12516_v0  ;;  %v6075_v31 = vmul.f32 %v12519_v28, %v12519_v28 }
 0x822   : > { %v6100_v43 = vsel %vm13927_vm14, %v6068_v57, 0.0  ;;  %v6101_v3 = vsel %vm13928_vm15, %v6069_v46, 0.0  ;;  %v6103_v13 = vsel %vm13929_vm13, %v6070_v34, 0.0  ;;  %v6105_v19 = vsel %vm13930_vm5, %v6071_v25, 0.0  ;;  %vm13941_vm14 = vmmov %vm13902_vm0 }
 0x823   : > { %v6102_v58 = vadd.f32 %v6101_v3, %v6100_v43  ;;  %v6107_v22 = vsel %vm13931_vm7, %v6072_v55, 0.0  ;;  %v6109_v8 = vsel %vm13932_vm8, %v6073_v15, 0.0  ;;  %v6076_v51 = vmul.f32 %v12522_v16, %v12522_v16  ;;  %vm13942_vm15 = vmmov %vm13902_vm0 }
 0x824   : > { %v6111_v10 = vsel %vm13933_vm1, %v6074_v62, 0.0  ;;  %v6077_v46 = vmul.f32 %v12525_v63, %v12525_v63  ;;  %v6113_v34 = vsel %vm13934_vm2, %v6075_v31, 0.0  ;;  %v6078_v43 = vmul.f32 %v12528_v1, %v12528_v1  ;;  %vm13943_vm13 = vmmov %vm13902_vm0 }
 0x825   : > { %v6104_v26 = vadd.f32 %v6103_v13, %v6102_v58  ;;  %v6115_v3 = vsel %vm13902_vm0, %v6076_v51, 0.0  ;;  %v6079_v55 = vmul.f32 %v12531_v2, %v12531_v2  ;;  %v6080_v15 = vmul.f32 %v12534_v61, %v12534_v61  ;;  %vm13944_vm5 = vmmov %vm13902_vm0 }
 0x826   : > { %v6117_v13 = vsel %vm13935_vm3, %v6077_v46, 0.0  ;;  %v6081_v62 = vmul.f32 %v12537_v47, %v12537_v47  ;;  %v6082_v31 = vmul.f32 %v12540_v24, %v12540_v24  ;;  %v6083_v51 = vmul.f32 %v12543_v12, %v12543_v12  ;;  %vm13945_vm7 = vmmov %vm13902_vm0 }
 0x827   : > { %v6106_v9 = vadd.f32 %v6105_v19, %v6104_v26  ;;  %v6119_v19 = vsel %vm13936_vm12, %v6078_v43, 0.0  ;;  %v6084_v46 = vmul.f32 %v12546_v23, %v12546_v23  ;;  %v6085_v43 = vmul.f32 %v12549_v59, %v12549_v59  ;;  %vm13946_vm8 = vmmov %vm13902_vm0 }
 0x828   : > { %vm13947_vm1 = vmmov %vm13902_vm0 }
 0x829   : > { %v6108_v5 = vadd.f32 %v6107_v22, %v6106_v9  ;;  %v6121_v22 = vsel %vm13937_vm11, %v6079_v55, 0.0  ;;  %v6086_v55 = vmul.f32 %v12552_v30, %v12552_v30  ;;  %vm13948_vm2 = vmmov %vm13902_vm0 }
 0x82a   : > { %vm13949_vm3 = vmmov %vm13902_vm0 }
 0x82b   : > { %v6110_v35 = vadd.f32 %v6109_v8, %v6108_v5  ;;  %v6123_v8 = vsel %vm13938_vm9, %v6080_v15, 0.0  ;;  %v6087_v15 = vmul.f32 %v12555_v45, %v12555_v45  ;;  %vm13950_vm12 = vmmov %vm13902_vm0 }
 0x82c   : > { %vm13951_vm11 = vmmov %vm13902_vm0 }
 0x82d   : > { %v6112_v57 = vadd.f32 %v6111_v10, %v6110_v35  ;;  %v6125_v10 = vsel %vm13939_vm10, %v6081_v62, 0.0  ;;  %v6088_v62 = vmul.f32 %v12558_v18, %v12558_v18  ;;  %vm13952_vm9 = vmmov %vm13902_vm0 }
 0x82e   : > { %vm13953_vm10 = vmmov %vm13902_vm0 }
 0x82f   : > { %v6114_v25 = vadd.f32 %v6113_v34, %v6112_v57  ;;  %v6127_v34 = vsel %vm13940_vm6, %v6082_v31, 0.0  ;;  %v6089_v31 = vmul.f32 %v12561_v4, %v12561_v4  ;;  %vm13954_vm6 = vmmov %vm13902_vm0 }
 0x831   : > { %v6116_v58 = vadd.f32 %v6115_v3, %v6114_v25  ;;  %v6129_v3 = vsel %vm13941_vm14, %v6083_v51, 0.0  ;;  %v6090_v51 = vmul.f32 %v12564_v33, %v12564_v33  ;;  %vm13955_vm14 = vmmov %vm13902_vm0 }
 0x833   : > { %v6118_v26 = vadd.f32 %v6117_v13, %v6116_v58  ;;  %v6131_v13 = vsel %vm13942_vm15, %v6084_v46, 0.0  ;;  %v6091_v46 = vmul.f32 %v12567_v60, %v12567_v60  ;;  %vm13956_vm15 = vmmov %vm13902_vm0 }
 0x835   : > { %v6120_v9 = vadd.f32 %v6119_v19, %v6118_v26  ;;  %v6133_v19 = vsel %vm13943_vm13, %v6085_v43, 0.0  ;;  %v6092_v43 = vmul.f32 %v12570_v36, %v12570_v36  ;;  %vm13957_vm13 = vmmov %vm13902_vm0 }
 0x837   : > { %v6122_v5 = vadd.f32 %v6121_v22, %v6120_v9  ;;  %v6135_v22 = vsel %vm13944_vm5, %v6086_v55, 0.0  ;;  %v6093_v55 = vmul.f32 %v12573_v39, %v12573_v39  ;;  %vm13958_vm5 = vcmask 130048  }
 0x839   : > { %v6124_v35 = vadd.f32 %v6123_v8, %v6122_v5  ;;  %v6137_v8 = vsel %vm13945_vm7, %v6087_v15, 0.0  ;;  %v6094_v15 = vmul.f32 %v12576_v42, %v12576_v42  ;;  %vm13959_vm7 = vmmov %vm13958_vm5 }
 0x83b   : > { %v6126_v57 = vadd.f32 %v6125_v10, %v6124_v35  ;;  %v6139_v10 = vsel %vm13946_vm8, %v6088_v62, 0.0  ;;  %v6095_v62 = vmul.f32 %v12579_v32, %v12579_v32 }
 0x83d   : > { %v6128_v25 = vadd.f32 %v6127_v34, %v6126_v57  ;;  %v6141_v34 = vsel %vm13947_vm1, %v6089_v31, 0.0  ;;  %v6096_v31 = vmul.f32 %v12582_v41, %v12582_v41 }
 0x83f   : > { %v6130_v58 = vadd.f32 %v6129_v3, %v6128_v25  ;;  %v6143_v3 = vsel %vm13948_vm2, %v6090_v51, 0.0  ;;  %v6097_v51 = vmul.f32 %v12585_v17, %v12585_v17 }
 0x841   : > { %v6132_v26 = vadd.f32 %v6131_v13, %v6130_v58  ;;  %v6145_v13 = vsel %vm13902_vm0, %v6091_v46, 0.0  ;;  %v6098_v46 = vmul.f32 %v12588_v14, %v12588_v14 }
 0x843   : > { %v6134_v9 = vadd.f32 %v6133_v19, %v6132_v26  ;;  %v6147_v19 = vsel %vm13949_vm3, %v6092_v43, 0.0  ;;  %v6099_v43 = vmul.f32 %v12591_v56, %v12591_v56 }
 0x845   : > { %v6136_v5 = vadd.f32 %v6135_v22, %v6134_v9  ;;  %v6149_v22 = vsel %vm13950_vm12, %v6093_v55, 0.0  ;;  %v6159_v55 = vsel %vm13955_vm14, %v6098_v46, 0.0 }
 0x847   : > { %v6138_v35 = vadd.f32 %v6137_v8, %v6136_v5  ;;  %v6151_v8 = vsel %vm13951_vm11, %v6094_v15, 0.0 }
 0x849   : > { %v6140_v57 = vadd.f32 %v6139_v10, %v6138_v35  ;;  %v6153_v10 = vsel %vm13952_vm9, %v6095_v62, 0.0 }
 0x84b   : > { %v6142_v25 = vadd.f32 %v6141_v34, %v6140_v57  ;;  %v6155_v34 = vsel %vm13953_vm10, %v6096_v31, 0.0 }
 0x84d   : > { %v6144_v58 = vadd.f32 %v6143_v3, %v6142_v25  ;;  %v6157_v3 = vsel %vm13954_vm6, %v6097_v51, 0.0 }
 0x84f   : > { %v6146_v26 = vadd.f32 %v6145_v13, %v6144_v58 }
 0x851   : > { %v6148_v9 = vadd.f32 %v6147_v19, %v6146_v26  ;;  %v6161_v26 = vsel %vm13956_vm15, %v6099_v43, 0.0  ;;  %v12745_v43 = vld [vmem:[%s13276_s9] ss:$0 sm:$0xff] }
 0x853   : > { %v6150_v5 = vadd.f32 %v6149_v22, %v6148_v9 }
 0x855   : > { %v6152_v35 = vadd.f32 %v6151_v8, %v6150_v5 }
 0x857   : > { %v6154_v57 = vadd.f32 %v6153_v10, %v6152_v35 }
 0x859   : > { %v6156_v25 = vadd.f32 %v6155_v34, %v6154_v57 }
 0x85b   : > { %v6158_v58 = vadd.f32 %v6157_v3, %v6156_v25 }
 0x85d   : > { %v6160_v13 = vadd.f32 %v6159_v55, %v6158_v58 }
 0x85f   : > { %v6162_v15 = vadd.f32 %v6161_v26, %v6160_v13 }
 0x861   : > { %v6163_v19 = vrot.slane %v6162_v15, 4 }
 0x863   : > { %v6164_v9 = vadd.f32 %v6163_v19, %v6162_v15 }
 0x865   : > { %v6165_v62 = vrot.slane %v6164_v9, 2 }
 0x867   : > { %v6166_v22 = vadd.f32 %v6165_v62, %v6164_v9 }
 0x869   : > { %v6167_v5 = vrot.slane %v6166_v22, 1 }
 0x86b   : > { %v6168_v8 = vadd.f32 %v6167_v5, %v6166_v22 }
 0x86d   : > { %v6170_v31 = vsel %vm13957_vm13, %v6168_v8, 0 }
 0x86e   : > { %v6241_v35 = vand.u32 4294901760, %v6170_v31 }
 0x870   : > { %v6242_v10 = vsub.f32 %v6170_v31, %v6241_v35 }
 0x872   : > { %v6243_v57 = vand.u32 4294901760, %v6242_v10 }
 0x874   : > { %v6244_v34 = vsub.f32 %v6242_v10, %v6243_v57 }
 0x876   : > { %v6245_v51 = vand.u32 4294901760, %v6244_v34 }
 0x878   : > { %9038 = vmatmul.mubr.f32.vlgmr.msra.gmra.mrb[38].mxu0 %v6245_v51 }
 0x879   : > { %9307 = vmatpush3.bf16.msra.mxu0 %v12319_v21  ;;  %9048 = vmatprep.mubr.msk.f32.mxu0 %vm13925_vm4, %v13924_v27  ;;  %v12722_v21 = vld [vmem:[%s13277_s10] sm:$0xff]  }
 0x87a   : > { %9308 = vmatprep.subr.bf16.mxu0 %v13892_v29  ;;  %9181 = vmatprep.mubr.msk.bf16.mxu1 %vm13959_vm7, %v12722_v21 }
 0x87d   : > { %9310 = vmatpush3.bf16.msra.mxu0 %v12323_v52 }
 0x87e   : > { %9311 = vmatprep.subr.bf16.mxu0 %v13892_v29 }
 0x880   : > { %9049 = vmatmul.mubr.f32.vlgmr.msra.gmra.mrb[38].mxu0 %v6241_v35 }
 0x881   : > { %9313 = vmatpush3.bf16.msra.mxu0 %v12321_v37  ;;  %9059 = vmatprep.mubr.msk.f32.mxu0 %vm13925_vm4, %v13924_v27 }
 0x882   : > { %9314 = vmatprep.subr.bf16.mxu0 %v13892_v29 }
 0x885   : > { %9316 = vmatpush3.bf16.msra.mxu0 %v12325_v48 }
 0x886   : > { %9317 = vmatprep.subr.bf16.mxu0 %v13892_v29 }
 0x888   : > { %9060 = vmatmul.mubr.f32.vlgmr.msra.gmra.mrb[38].mxu0 %v6242_v10 }
 0x889   : > { %9319 = vmatpush3.bf16.msra.mxu0 %v12311_v44  ;;  %9070 = vmatprep.mubr.msk.f32.mxu0 %vm13925_vm4, %v13924_v27 }
 0x88a   : > { %9320 = vmatprep.subr.bf16.mxu0 %v13892_v29 }
 0x88d   : > { %9322 = vmatpush3.bf16.msra.mxu0 %v12314_v7 }
 0x88e   : > { %9323 = vmatprep.subr.bf16.mxu0 %v13892_v29 }
 0x890   : > { %9071 = vmatmul.mubr.f32.vlgmr.msra.gmra.mrb[38].mxu0 %v6243_v57 }
 0x891   : > { %9325 = vmatpush3.bf16.msra.mxu0 %v12327_v6  ;;  %9081 = vmatprep.mubr.msk.f32.mxu0 %vm13925_vm4, %v13924_v27 }
 0x892   : > { %9326 = vmatprep.subr.bf16.mxu0 %v13892_v29 }
 0x895   : > { %9328 = vmatpush3.bf16.msra.mxu0 %v12329_v38 }
 0x896   : > { %9329 = vmatprep.subr.bf16.mxu0 %v13892_v29 }
 0x898   : > { %9082 = vmatmul.mubr.f32.vlgmr.msra.gmra.mrb[38].mxu0 %v6241_v35 }
 0x899   : > { %9331 = vmatpush3.bf16.msra.mxu0 %v12311_v44  ;;  %9092 = vmatprep.mubr.msk.f32.mxu0 %vm13925_vm4, %v13924_v27  ;;  %vm13960_vm4 = vmmov %vm13958_vm5 }
 0x89a   : > { %9332 = vmatprep.subr.bf16.mxu0 %v13892_v29  ;;  %vm13961_vm8 = vmmov %vm13960_vm4 }
 0x89b   : > { %vm13962_vm1 = vmmov %vm13960_vm4 }
 0x89c   : > { %vm13963_vm2 = vmmov %vm13962_vm1 }
 0x89d   : > { %9334 = vmatpush3.bf16.msra.mxu0 %v12314_v7  ;;  %v6658_v7 = vld [vmem:[%s13275_s8] sm:$0x1]  ;;  %vm13964_vm0 = vmmov %vm13962_vm1 }
 0x89e   : > { %vm13965_vm3 = vmmov %vm13964_vm0 }
 0x89f   : > { %vm13966_vm12 = vmmov %vm13964_vm0 }
 0x8a0   : > { %9093 = vmatmul.mubr.f32.vlgmr.msra.gmra.mrb[38].mxu0 %v6241_v35  ;;  %vm13967_vm11 = vmmov %vm13964_vm0 }
 0x8a1   : > { %9097 = vmatprep.mubr.msk.bf16.mxu0 %vm13958_vm5, %v12722_v21  ;;  %vm13968_vm9 = vmmov %vm13964_vm0 }
 0x8a2   : > { %vm13969_vm10 = vmmov %vm13964_vm0 }
 0x8a3   : > { %vm13970_vm6 = vmmov %vm13964_vm0 }
 0x8a4   : > { %vm13971_vm14 = vmmov %vm13964_vm0 }
 0x8a5   : > { %vm13972_vm15 = vmmov %vm13964_vm0 }
 0x8a6   : > { %vm13973_vm13 = vmmov %vm13964_vm0 }
 0x8a7   : > { %vm13974_vm5 = vmmov %vm13964_vm0 }
 0x8a8   : > { %vm13975_vm7 = vmmov %vm13964_vm0 }
 0x973   : > { %v6653_v44 = vpop.f32.mrb[38].mxu0 }
 0x974   : > { %v9336_v37 = vadd.f32 1e-05, %v6653_v44  ;;  %v9094_v52 = vpop.f32.mrb[39].mxu0 }
 0x976   : > { %10008 = vrsqrt.f32 %v9336_v37 }
 0x980   : > { %v10009_v48 = vpop.eup %10008 }
 0x981   : > { %v6659_v29 = vmul.f32 %v10009_v48, %v6658_v7 }
 0x983   : > { %v12732_v6 = vrot.slane %v6659_v29, %v13926_v20 }
 0x985   : > { %v6664_v38 = vmul.f32 %v12732_v6, %v12498_v11  ;;  %v6665_v27 = vmul.f32 %v12732_v6, %v12501_v54  ;;  %v6666_v46 = vmul.f32 %v12732_v6, %v12504_v53  ;;  %v6667_v25 = vmul.f32 %v12732_v6, %v12507_v40 }
 0x986   : > { %v6668_v20 = vmul.f32 %v12732_v6, %v12510_v49  ;;  %v6669_v11 = vmul.f32 %v12732_v6, %v12513_v50  ;;  %v6684_v54 = vmul.f32 %v12732_v6, %v12558_v18  ;;  %v6685_v53 = vmul.f32 %v12732_v6, %v12561_v4 }
 0x987   : > { %v6686_v40 = vmul.f32 %v12732_v6, %v12564_v33  ;;  %v6687_v3 = vmul.f32 %v12732_v6, %v12567_v60  ;;  %v6688_v58 = vmul.f32 %v12732_v6, %v12570_v36  ;;  %v6689_v49 = vmul.f32 %v12732_v6, %v12573_v39 }
 0x988   : > { %v6690_v50 = vmul.f32 %v12732_v6, %v12576_v42  ;;  %v6691_v18 = vmul.f32 %v12732_v6, %v12579_v32  ;;  %v6692_v4 = vmul.f32 %v12732_v6, %v12582_v41  ;;  %v6693_v33 = vmul.f32 %v12732_v6, %v12585_v17 }
 0x989   : > { %v6694_v60 = vmul.f32 %v12732_v6, %v12588_v14  ;;  %v6695_v36 = vmul.f32 %v12732_v6, %v12591_v56  ;;  %v6703_v39 = vadd.f32 %v12745_v43, %v6664_v38  ;;  %v6704_v55 = vadd.f32 %v12745_v43, %v6665_v27  ;;  %v12800_v38 = vld [vmem:[%s13277_s10 + $0x8] sm:$0xff]  }
 0x98a   : > { %v6705_v42 = vadd.f32 %v12745_v43, %v6666_v46  ;;  %v6706_v32 = vadd.f32 %v12745_v43, %v6667_v25  ;;  %v6707_v13 = vadd.f32 %v12745_v43, %v6668_v20  ;;  %v6708_v41 = vadd.f32 %v12745_v43, %v6669_v11 }
 0x98b   : > { %v6723_v17 = vadd.f32 %v12745_v43, %v6684_v54  ;;  %v6724_v26 = vadd.f32 %v12745_v43, %v6685_v53  ;;  %v6725_v14 = vadd.f32 %v12745_v43, %v6686_v40  ;;  %v6726_v56 = vadd.f32 %v12745_v43, %v6687_v3 }
 0x98c   : > { %v6727_v15 = vadd.f32 %v12745_v43, %v6688_v58  ;;  %v6728_v19 = vadd.f32 %v12745_v43, %v6689_v49  ;;  %v6729_v9 = vadd.f32 %v12745_v43, %v6690_v50  ;;  %v6730_v62 = vadd.f32 %v12745_v43, %v6691_v18 }
 0x98d   : > { %v6731_v22 = vadd.f32 %v12745_v43, %v6692_v4  ;;  %v6732_v5 = vadd.f32 %v12745_v43, %v6693_v33  ;;  %v6733_v8 = vadd.f32 %v12745_v43, %v6694_v60  ;;  %v6734_v31 = vadd.f32 %v12745_v43, %v6695_v36 }
 0x98e   : > { %v6735_v35 = vmax.f32 %v6703_v39, 0.0  ;;  %v6736_v10 = vmax.f32 %v6704_v55, 0.0  ;;  %v6737_v57 = vmax.f32 %v6705_v42, 0.0  ;;  %v6738_v34 = vmax.f32 %v6706_v32, 0.0 }
 0x98f   : > { %v6763_v51 = vmax.f32 %v6731_v22, 0.0  ;;  %v6764_v44 = vmax.f32 %v6732_v5, 0.0  ;;  %v6670_v52 = vmul.f32 %v12732_v6, %v12516_v0  ;;  %v6671_v48 = vmul.f32 %v12732_v6, %v12519_v28 }
 0x990   : > { %v6771_v37 = vpack.c.bf16 %v6736_v10, %v6735_v35  ;;  %v6845_v29 = vpack.c.bf16 %v6738_v34, %v6737_v57  ;;  %v6739_v27 = vmax.f32 %v6707_v13, 0.0  ;;  %v6740_v46 = vmax.f32 %v6708_v41, 0.0 }
 0x991   : > { %v7911_v7 = vpack.c.bf16 %v6764_v44, %v6763_v51  ;;  %v6709_v25 = vadd.f32 %v12745_v43, %v6670_v52  ;;  %v6710_v0 = vadd.f32 %v12745_v43, %v6671_v48  ;;  %v6755_v20 = vmax.f32 %v6723_v17, 0.0 }
 0x992   : > { %9095 = vmatprep.subr.bf16.mxu0 %v6771_v37  ;;  %v6927_v28 = vpack.c.bf16 %v6740_v46, %v6739_v27  ;;  %v6756_v11 = vmax.f32 %v6724_v26, 0.0  ;;  %v6757_v54 = vmax.f32 %v6725_v14, 0.0  ;;  %v6758_v53 = vmax.f32 %v6726_v56, 0.0 }
 0x993   : > { %9179 = vmatprep.subr.bf16.mxu1 %v7911_v7  ;;  %9096 = vmatpush3.bf16.msra.mxu0 %v6771_v37  ;;  %v6759_v40 = vmax.f32 %v6727_v15, 0.0  ;;  %v6760_v3 = vmax.f32 %v6728_v19, 0.0  ;;  %v6761_v58 = vmax.f32 %v6729_v9, 0.0  ;;  %v6762_v18 = vmax.f32 %v6730_v62, 0.0 }
 0x994   : > { %9180 = vmatpush3.bf16.msra.mxu1 %v7911_v7  ;;  %9101 = vmatprep.subr.bf16.mxu0 %v6845_v29  ;;  %v12808_v49 = vpack.c.bf16 %v6756_v11, %v6755_v20  ;;  %v12810_v50 = vpack.c.bf16 %v6758_v53, %v6757_v54  ;;  %v6765_v4 = vmax.f32 %v6733_v8, 0.0  ;;  %v6672_v33 = vmul.f32 %v12732_v6, %v12522_v16 }
 0x995   : > { %v12816_v60 = vpack.c.bf16 %v6760_v3, %v6759_v40  ;;  %v6766_v36 = vmax.f32 %v6734_v31, 0.0  ;;  %v6673_v39 = vmul.f32 %v12732_v6, %v12525_v63  ;;  %v6741_v55 = vmax.f32 %v6709_v25, 0.0 }
 0x996   : > { %9098 = vmatmul.mubr.msk.bf16.vlgmr.msra.gmra.mrb[40].mxu0 %vm13960_vm4, %v12800_v38  ;;  %v6742_v42 = vmax.f32 %v6710_v0, 0.0  ;;  %v12820_v32 = vpack.c.bf16 %v6762_v18, %v6761_v58  ;;  %v6711_v41 = vadd.f32 %v12745_v43, %v6672_v33  ;;  %v6674_v63 = vmul.f32 %v12732_v6, %v12528_v1  ;;  %vm13976_vm4 = vmmov %vm13964_vm0 }
 0x997   : > { %9102 = vmatpush3.bf16.msra.mxu0 %v6845_v29  ;;  %9103 = vmatprep.mubr.msk.bf16.mxu0 %vm13961_vm8, %v12722_v21  ;;  %v12822_v13 = vpack.c.bf16 %v6766_v36, %v6765_v4  ;;  %v6712_v17 = vadd.f32 %v12745_v43, %v6673_v39  ;;  %v6675_v26 = vmul.f32 %v12732_v6, %v12531_v2  ;;  %vm13977_vm8 = vmmov %vm13964_vm0 }
 0x998   : > { %9107 = vmatprep.subr.bf16.mxu0 %v6927_v28  ;;  %9182 = vmatmul.mubr.msk.bf16.vlgmr.msra.gmra.mrb[40].mxu1 %vm13962_vm1, %v12800_v38  ;;  %v7009_v16 = vpack.c.bf16 %v6742_v42, %v6741_v55  ;;  %v6743_v14 = vmax.f32 %v6711_v41, 0.0  ;;  %v6713_v15 = vadd.f32 %v12745_v43, %v6674_v63  ;;  %v6676_v1 = vmul.f32 %v12732_v6, %v12534_v61  ;;  %vm13978_vm1 = vmmov %vm13964_vm0 }
 0x999   : > { %v6744_v56 = vmax.f32 %v6712_v17, 0.0  ;;  %v6714_v19 = vadd.f32 %v12745_v43, %v6675_v26  ;;  %v6677_v2 = vmul.f32 %v12732_v6, %v12537_v47  ;;  %v6678_v61 = vmul.f32 %v12732_v6, %v12540_v24 }
 0x99a   : > { %v6745_v62 = vmax.f32 %v6713_v15, 0.0  ;;  %v6715_v5 = vadd.f32 %v12745_v43, %v6676_v1  ;;  %v6679_v47 = vmul.f32 %v12732_v6, %v12543_v12  ;;  %v6680_v24 = vmul.f32 %v12732_v6, %v12546_v23 }
 0x99b   : > { %v7091_v9 = vpack.c.bf16 %v6744_v56, %v6743_v14  ;;  %v6746_v22 = vmax.f32 %v6714_v19, 0.0  ;;  %v6716_v8 = vadd.f32 %v12745_v43, %v6677_v2  ;;  %v6717_v57 = vadd.f32 %v12745_v43, %v6678_v61 }
 0x99c   : > { %v6747_v35 = vmax.f32 %v6715_v5, 0.0  ;;  %v6718_v34 = vadd.f32 %v12745_v43, %v6679_v47  ;;  %v6681_v12 = vmul.f32 %v12732_v6, %v12549_v59  ;;  %v6719_v52 = vadd.f32 %v12745_v43, %v6680_v24 }
 0x99d   : > { %v7173_v31 = vpack.c.bf16 %v6746_v22, %v6745_v62  ;;  %v6748_v10 = vmax.f32 %v6716_v8, 0.0  ;;  %v6749_v44 = vmax.f32 %v6717_v57, 0.0  ;;  %v6682_v23 = vmul.f32 %v12732_v6, %v12552_v30 }
 0x99e   : > { %9104 = vmatmul.mubr.msk.bf16.vlgmr.msra.gmra.mrb[44].mxu0 %vm13963_vm2, %v12800_v38  ;;  %v6750_v37 = vmax.f32 %v6718_v34, 0.0  ;;  %v6720_v48 = vadd.f32 %v12745_v43, %v6681_v12  ;;  %v6683_v59 = vmul.f32 %v12732_v6, %v12555_v45  ;;  %v6751_v29 = vmax.f32 %v6719_v52, 0.0  ;;  %vm13979_vm2 = vmmov %vm13964_vm0 }
 0x99f   : > { %9108 = vmatpush3.bf16.msra.mxu0 %v6927_v28  ;;  %9109 = vmatprep.mubr.msk.bf16.mxu0 %vm13964_vm0, %v12722_v21  ;;  %v7255_v51 = vpack.c.bf16 %v6748_v10, %v6747_v35  ;;  %v6721_v46 = vadd.f32 %v12745_v43, %v6682_v23 }
 0x9a0   : > { %9113 = vmatprep.subr.bf16.mxu0 %v7009_v16  ;;  %v7337_v7 = vpack.c.bf16 %v6750_v37, %v6749_v44  ;;  %v6752_v27 = vmax.f32 %v6720_v48, 0.0  ;;  %v6722_v25 = vadd.f32 %v12745_v43, %v6683_v59 }
 0x9a1   : > { %v6753_v20 = vmax.f32 %v6721_v46, 0.0 }
 0x9a2   : > { %v7419_v0 = vpack.c.bf16 %v6752_v27, %v6751_v29  ;;  %v6754_v30 = vmax.f32 %v6722_v25, 0.0 }
 0x9a4   : > { %v7501_v45 = vpack.c.bf16 %v6754_v30, %v6753_v20 }
 0x9a6   : > { %9110 = vmatmul.mubr.msk.bf16.vlgmr.msra.gmra.mrb[48].mxu0 %vm13965_vm3, %v12800_v38  ;;  %vm13980_vm3 = vmmov %vm13964_vm0 }
 0x9a7   : > { %9114 = vmatpush3.bf16.msra.mxu0 %v7009_v16  ;;  %9115 = vmatprep.mubr.msk.bf16.mxu0 %vm13966_vm12, %v12722_v21  ;;  %vm13981_vm12 = vmmov %vm13964_vm0 }
 0x9a8   : > { %9119 = vmatprep.subr.bf16.mxu0 %v7091_v9 }
 0x9ae   : > { %9116 = vmatmul.mubr.msk.bf16.vlgmr.msra.gmra.mrb[52].mxu0 %vm13967_vm11, %v12800_v38  ;;  %vm13982_vm11 = vmmov %vm13964_vm0 }
 0x9af   : > { %9120 = vmatpush3.bf16.msra.mxu0 %v7091_v9  ;;  %9121 = vmatprep.mubr.msk.bf16.mxu0 %vm13968_vm9, %v12722_v21  ;;  %vm13983_vm9 = vmmov %vm13964_vm0 }
 0x9b0   : > { %9125 = vmatprep.subr.bf16.mxu0 %v7173_v31 }
 0x9b6   : > { %9122 = vmatmul.mubr.msk.bf16.vlgmr.msra.gmra.mrb[56].mxu0 %vm13969_vm10, %v12800_v38  ;;  %vm13984_vm10 = vmmov %vm13964_vm0 }
 0x9b7   : > { %9126 = vmatpush3.bf16.msra.mxu0 %v7173_v31  ;;  %9127 = vmatprep.mubr.msk.bf16.mxu0 %vm13970_vm6, %v12722_v21  ;;  %vm13985_vm6 = vmmov %vm13964_vm0 }
 0x9b8   : > { %9131 = vmatprep.subr.bf16.mxu0 %v7255_v51 }
 0x9be   : > { %9128 = vmatmul.mubr.msk.bf16.vlgmr.msra.gmra.mrb[60].mxu0 %vm13971_vm14, %v12800_v38  ;;  %vm13986_vm14 = vmmov %vm13964_vm0 }
 0x9bf   : > { %9132 = vmatpush3.bf16.msra.mxu0 %v7255_v51  ;;  %9133 = vmatprep.mubr.msk.bf16.mxu0 %vm13972_vm15, %v12722_v21  ;;  %vm13987_vm15 = vmmov %vm13964_vm0 }
 0x9c0   : > { %9137 = vmatprep.subr.bf16.mxu0 %v7337_v7 }
 0x9c6   : > { %9134 = vmatmul.mubr.msk.bf16.vlgmr.msra.gmra.mrb[64].mxu0 %vm13973_vm13, %v12800_v38  ;;  %vm13988_vm13 = vmmov %vm13964_vm0 }
 0x9c7   : > { %9138 = vmatpush3.bf16.msra.mxu0 %v7337_v7  ;;  %9139 = vmatprep.mubr.msk.bf16.mxu0 %vm13974_vm5, %v12722_v21  ;;  %vm13989_vm5 = vcmask 261120  }
 0x9c8   : > { %9143 = vmatprep.subr.bf16.mxu0 %v7419_v0 }
 0x9ce   : > { %9140 = vmatmul.mubr.msk.bf16.vlgmr.msra.gmra.mrb[68].mxu0 %vm13975_vm7, %v12800_v38  ;;  %vm13990_vm7 = vmmov %vm13989_vm5 }
 0x9cf   : > { %9144 = vmatpush3.bf16.msra.mxu0 %v7419_v0  ;;  %9145 = vmatprep.mubr.msk.bf16.mxu0 %vm13976_vm4, %v12722_v21  ;;  %vm13991_vm4 = vmmov %vm13989_vm5 }
 0x9d0   : > { %9149 = vmatprep.subr.bf16.mxu0 %v7501_v45 }
 0x9d6   : > { %9146 = vmatmul.mubr.msk.bf16.vlgmr.msra.gmra.mrb[72].mxu0 %vm13977_vm8, %v12800_v38  ;;  %vm13992_vm8 = vmmov %vm13991_vm4 }
 0x9d7   : > { %9150 = vmatpush3.bf16.msra.mxu0 %v7501_v45  ;;  %9151 = vmatprep.mubr.msk.bf16.mxu0 %vm13978_vm1, %v12722_v21  ;;  %vm13993_vm1 = vmmov %vm13991_vm4 }
 0x9d8   : > { %9155 = vmatprep.subr.bf16.mxu0 %v12808_v49 }
 0x9de   : > { %9152 = vmatmul.mubr.msk.bf16.vlgmr.msra.gmra.mrb[76].mxu0 %vm13979_vm2, %v12800_v38  ;;  %vm13994_vm2 = vmmov %vm13993_vm1 }
 0x9df   : > { %9156 = vmatpush3.bf16.msra.mxu0 %v12808_v49  ;;  %9157 = vmatprep.mubr.msk.bf16.mxu0 %vm13964_vm0, %v12722_v21  ;;  %vm13995_vm0 = vmmov %vm13993_vm1 }
 0x9e0   : > { %9161 = vmatprep.subr.bf16.mxu0 %v12810_v50 }
 0x9e6   : > { %9158 = vmatmul.mubr.msk.bf16.vlgmr.msra.gmra.mrb[80].mxu0 %vm13980_vm3, %v12800_v38  ;;  %vm13996_vm3 = vmmov %vm13995_vm0 }
 0x9e7   : > { %9162 = vmatpush3.bf16.msra.mxu0 %v12810_v50  ;;  %9163 = vmatprep.mubr.msk.bf16.mxu0 %vm13981_vm12, %v12722_v21  ;;  %vm13997_vm12 = vmmov %vm13995_vm0 }
 0x9e8   : > { %9167 = vmatprep.subr.bf16.mxu0 %v12816_v60 }
 0x9ee   : > { %9164 = vmatmul.mubr.msk.bf16.vlgmr.msra.gmra.mrb[84].mxu0 %vm13982_vm11, %v12800_v38  ;;  %vm13998_vm11 = vmmov %vm13995_vm0 }
 0x9ef   : > { %9168 = vmatpush3.bf16.msra.mxu0 %v12816_v60  ;;  %9169 = vmatprep.mubr.msk.bf16.mxu0 %vm13983_vm9, %v12722_v21  ;;  %vm13999_vm9 = vmmov %vm13995_vm0 }
 0x9f0   : > { %9173 = vmatprep.subr.bf16.mxu0 %v12820_v32 }
 0x9f6   : > { %9170 = vmatmul.mubr.msk.bf16.vlgmr.msra.gmra.mrb[88].mxu0 %vm13984_vm10, %v12800_v38  ;;  %vm14000_vm10 = vmmov %vm13995_vm0 }
 0x9f7   : > { %9174 = vmatpush3.bf16.msra.mxu0 %v12820_v32  ;;  %9175 = vmatprep.mubr.msk.bf16.mxu0 %vm13985_vm6, %v12722_v21  ;;  %vm14001_vm6 = vmmov %vm13995_vm0 }
 0x9f8   : > { %9185 = vmatprep.subr.bf16.mxu0 %v12822_v13 }
 0x9fe   : > { %9176 = vmatmul.mubr.msk.bf16.vlgmr.msra.gmra.mrb[92].mxu0 %vm13986_vm14, %v12800_v38  ;;  %vm14002_vm14 = vmmov %vm13995_vm0 }
 0x9ff   : > { %9186 = vmatpush3.bf16.msra.mxu0 %v12822_v13  ;;  %9187 = vmatprep.mubr.msk.bf16.mxu0 %vm13987_vm15, %v12722_v21  ;;  %vm14003_vm15 = vmmov %vm13995_vm0 }
 0xa06   : > { %9188 = vmatmul.mubr.msk.bf16.vlgmr.msra.gmra.mrb[96].mxu0 %vm13988_vm13, %v12800_v38  ;;  %vm14004_vm13 = vmmov %vm13995_vm0 }
 0xa69   : > { %v9099_v6 = vpop.f32.mrb[40].mxu0 }
 0xa6a   : > { %6839 = vst.msk [vmem:[%s12924_s12 + $0x10] sm:$0xff] %vm13989_vm5, %v9099_v6  ;;  %v6822_v43 = vpop.f32.mrb[41].mxu0  ;;  %v6843_v40 = vmul.f32 0.516129, %v9099_v6  ;;  %vm14005_vm5 = vmmov %vm13995_vm0 }
 0xa6b   : > { %6837 = vst.msk [vmem:[%s12924_s12] sm:$0xff] %vm13990_vm7, %v6822_v43  ;;  %v9100_v21 = vpop.f32.mrb[42].mxu0  ;;  %v12930_v28 = vpop.f32.mrb[40].mxu1  ;;  %v6909_v58 = vmul.f32 0.032258064, %v9099_v6  ;;  %vm14006_vm7 = vmmov %vm13995_vm0 }
 0xa6c   : > { %6840 = vst.msk [vmem:[%s12924_s12 + $0x18] sm:$0xff] %vm13991_vm4, %v9100_v21  ;;  %v6825_v38 = vpop.f32.mrb[43].mxu0  ;;  %v12934_v11 = vpop.f32.mrb[41].mxu1  ;;  %v6841_v18 = vmul.f32 0.516129, %v6822_v43  ;;  %vm14007_vm4 = vmmov %vm13995_vm0 }
 0xa6d   : > { %6838 = vst.msk [vmem:[%s12924_s12 + $0x8] sm:$0xff] %vm13992_vm8, %v6825_v38  ;;  %v12938_v54 = vpop.f32.mrb[42].mxu1  ;;  %v6907_v4 = vmul.f32 0.032258064, %v6822_v43  ;;  %v6910_v13 = vmul.f32 0.032258064, %v9100_v21  ;;  %vm14008_vm8 = vmmov %vm13995_vm0 }
 0xa6e   : > { %v12940_v53 = vpop.f32.mrb[43].mxu1  ;;  %v6844_v32 = vmul.f32 0.516129, %v9100_v21  ;;  %v6842_v17 = vmul.f32 0.516129, %v6825_v38 }
 0xa6f   : > { %v6908_v56 = vmul.f32 0.032258064, %v6825_v38 }
 0xa71   : > { %v9105_v3 = vpop.f32.mrb[44].mxu0 }
 0xa72   : > { %v6897_v49 = vmul.f32 0.48387095, %v9105_v3  ;;  %v6913_v50 = vmul.f32 0.9677419, %v9105_v3  ;;  %v6880_v33 = vpop.f32.mrb[45].mxu0 }
 0xa73   : > { %v6895_v39 = vmul.f32 0.48387095, %v6880_v33  ;;  %v6911_v55 = vmul.f32 0.9677419, %v6880_v33  ;;  %v9106_v42 = vpop.f32.mrb[46].mxu0 }
 0xa74   : > { %v6901_v60 = vadd.f32 %v6897_v49, %v6843_v40  ;;  %v6917_v36 = vadd.f32 %v6913_v50, %v6909_v58  ;;  %v6898_v41 = vmul.f32 0.48387095, %v9106_v42  ;;  %v6914_v26 = vmul.f32 0.9677419, %v9106_v42  ;;  %v6883_v14 = vpop.f32.mrb[47].mxu0 }
 0xa75   : > { %v6899_v16 = vadd.f32 %v6895_v39, %v6841_v18  ;;  %v6915_v63 = vadd.f32 %v6911_v55, %v6907_v4  ;;  %v6896_v19 = vmul.f32 0.48387095, %v6883_v14  ;;  %v6912_v9 = vmul.f32 0.9677419, %v6883_v14 }
 0xa76   : > { %6905 = vst.msk [vmem:[%s12924_s12 + $0x30] sm:$0xff] %vm13993_vm1, %v6901_v60  ;;  %v6902_v15 = vadd.f32 %v6898_v41, %v6844_v32  ;;  %v6918_v1 = vadd.f32 %v6914_v26, %v6910_v13  ;;  %v6925_v2 = vmul.f32 0.5483871, %v9105_v3  ;;  %v6991_v8 = vmul.f32 0.06451613, %v9105_v3  ;;  %vm14009_vm1 = vmmov %vm13995_vm0 }
 0xa77   : > { %6921 = vst.msk [vmem:[%s12924_s12 + $0x50] sm:$0xff] %vm13994_vm2, %v6917_v36  ;;  %v6900_v62 = vadd.f32 %v6896_v19, %v6842_v17  ;;  %v6916_v22 = vadd.f32 %v6912_v9, %v6908_v56  ;;  %v6923_v47 = vmul.f32 0.5483871, %v6880_v33  ;;  %v6989_v35 = vmul.f32 0.06451613, %v6880_v33  ;;  %vm14010_vm2 = vmmov %vm13995_vm0 }
 0xa78   : > { %6903 = vst.msk [vmem:[%s12924_s12 + $0x20] sm:$0xff] %vm13995_vm0, %v6899_v16  ;;  %v6926_v44 = vmul.f32 0.5483871, %v9106_v42  ;;  %v6992_v37 = vmul.f32 0.06451613, %v9106_v42 }
 0xa79   : > { %6919 = vst.msk [vmem:[%s12924_s12 + $0x40] sm:$0xff] %vm13996_vm3, %v6915_v63  ;;  %v9111_v5 = vpop.f32.mrb[48].mxu0  ;;  %v6924_v48 = vmul.f32 0.5483871, %v6883_v14  ;;  %vm14011_vm3 = vmmov %vm13995_vm0 }
 0xa7a   : > { %6906 = vst.msk [vmem:[%s12924_s12 + $0x38] sm:$0xff] %vm13997_vm12, %v6902_v15  ;;  %v6979_v31 = vmul.f32 0.4516129, %v9111_v5  ;;  %v6995_v61 = vmul.f32 0.9354839, %v9111_v5  ;;  %vm14012_vm12 = vmmov %vm13995_vm0 }
 0xa7b   : > { %6922 = vst.msk [vmem:[%s12924_s12 + $0x58] sm:$0xff] %vm13998_vm11, %v6918_v1  ;;  %v6962_v10 = vpop.f32.mrb[49].mxu0  ;;  %v6990_v27 = vmul.f32 0.06451613, %v6883_v14  ;;  %vm14013_vm11 = vmmov %vm13995_vm0 }
 0xa7c   : > { %6904 = vst.msk [vmem:[%s12924_s12 + $0x28] sm:$0xff] %vm13999_vm9, %v6900_v62  ;;  %v6983_v57 = vadd.f32 %v6979_v31, %v6925_v2  ;;  %v6999_v34 = vadd.f32 %v6995_v61, %v6991_v8  ;;  %v6977_v51 = vmul.f32 0.4516129, %v6962_v10  ;;  %v6993_v24 = vmul.f32 0.9354839, %v6962_v10  ;;  %vm14014_vm9 = vmmov %vm13995_vm0 }
 0xa7d   : > { %6920 = vst.msk [vmem:[%s12924_s12 + $0x48] sm:$0xff] %vm14000_vm10, %v6916_v22  ;;  %v9112_v12 = vpop.f32.mrb[50].mxu0  ;;  %v7007_v30 = vmul.f32 0.58064514, %v9111_v5  ;;  %v7005_v3 = vmul.f32 0.58064514, %v6962_v10  ;;  %vm14015_vm10 = vmmov %vm13995_vm0 }
 0xa7e   : > { %v6980_v52 = vmul.f32 0.4516129, %v9112_v12  ;;  %6987 = vst.msk [vmem:[%s12924_s12 + $0x70] sm:$0xff] %vm14001_vm6, %v6983_v57  ;;  %v6981_v7 = vadd.f32 %v6977_v51, %v6923_v47  ;;  %v6997_v23 = vadd.f32 %v6993_v24, %v6989_v35  ;;  %v6996_v59 = vmul.f32 0.9354839, %v9112_v12  ;;  %vm14016_vm6 = vmmov %vm13995_vm0 }
 0xa7f   : > { %7003 = vst.msk [vmem:[%s12924_s12 + $0x90] sm:$0xff] %vm14002_vm14, %v6999_v34  ;;  %v6965_v29 = vpop.f32.mrb[51].mxu0  ;;  %v7073_v21 = vmul.f32 0.09677419, %v9111_v5  ;;  %v7071_v58 = vmul.f32 0.09677419, %v6962_v10  ;;  %vm14017_vm14 = vmmov %vm13995_vm0 }
 0xa80   : > { %v6984_v46 = vadd.f32 %v6980_v52, %v6926_v44  ;;  %v6978_v25 = vmul.f32 0.4516129, %v6965_v29  ;;  %v6994_v0 = vmul.f32 0.9354839, %v6965_v29  ;;  %6985 = vst.msk [vmem:[%s12924_s12 + $0x60] sm:$0xff] %vm14003_vm15, %v6981_v7  ;;  %v7000_v20 = vadd.f32 %v6996_v59, %v6992_v37  ;;  %vm14018_vm15 = vmmov %vm13995_vm0 }
 0xa81   : > { %7001 = vst.msk [vmem:[%s12924_s12 + $0x80] sm:$0xff] %vm14004_vm13, %v6997_v23  ;;  %v9117_v43 = vpop.f32.mrb[52].mxu0  ;;  %v7008_v36 = vmul.f32 0.58064514, %v9112_v12  ;;  %v7006_v42 = vmul.f32 0.58064514, %v6965_v29  ;;  %vm14019_vm13 = vmmov %vm13995_vm0 }
 0xa82   : > { %6988 = vst.msk [vmem:[%s12924_s12 + $0x78] sm:$0xff] %vm14005_vm5, %v6984_v46  ;;  %v6982_v45 = vadd.f32 %v6978_v25, %v6924_v48  ;;  %v6998_v6 = vadd.f32 %v6994_v0, %v6990_v27  ;;  %v7061_v38 = vmul.f32 0.41935483, %v9117_v43  ;;  %v7077_v40 = vmul.f32 0.9032258, %v9117_v43  ;;  %vm14020_vm5 = vmmov %vm13995_vm0 }
 0xa83   : > { %7004 = vst.msk [vmem:[%s12924_s12 + $0x98] sm:$0xff] %vm14006_vm7, %v7000_v20  ;;  %v7044_v49 = vpop.f32.mrb[53].mxu0  ;;  %v7074_v39 = vmul.f32 0.09677419, %v9112_v12  ;;  %v7072_v16 = vmul.f32 0.09677419, %v6965_v29  ;;  %vm14021_vm7 = vmmov %vm13995_vm0 }
 0xa84   : > { %6986 = vst.msk [vmem:[%s12924_s12 + $0x68] sm:$0xff] %vm14007_vm4, %v6982_v45  ;;  %v7065_v50 = vadd.f32 %v7061_v38, %v7007_v30  ;;  %v7081_v18 = vadd.f32 %v7077_v40, %v7073_v21  ;;  %v7059_v4 = vmul.f32 0.41935483, %v7044_v49  ;;  %v7075_v33 = vmul.f32 0.9032258, %v7044_v49  ;;  %vm14022_vm4 = vmmov %vm13995_vm0 }
 0xa85   : > { %7002 = vst.msk [vmem:[%s12924_s12 + $0x88] sm:$0xff] %vm14008_vm8, %v6998_v6  ;;  %v9118_v60 = vpop.f32.mrb[54].mxu0  ;;  %v7089_v15 = vmul.f32 0.61290324, %v9117_v43  ;;  %v7087_v5 = vmul.f32 0.61290324, %v7044_v49  ;;  %vm14023_vm8 = vmmov %vm13995_vm0 }
 0xa86   : > { %v7062_v55 = vmul.f32 0.41935483, %v9118_v60  ;;  %7069 = vst.msk [vmem:[%s12924_s12 + $0xb0] sm:$0xff] %vm14009_vm1, %v7065_v50  ;;  %v7063_v32 = vadd.f32 %v7059_v4, %v7005_v3  ;;  %v7079_v13 = vadd.f32 %v7075_v33, %v7071_v58  ;;  %v7078_v41 = vmul.f32 0.9032258, %v9118_v60  ;;  %vm14024_vm1 = vmmov %vm13995_vm0 }
 0xa87   : > { %7085 = vst.msk [vmem:[%s12924_s12 + $0xd0] sm:$0xff] %vm14010_vm2, %v7081_v18  ;;  %v7047_v17 = vpop.f32.mrb[55].mxu0  ;;  %v7155_v2 = vmul.f32 0.12903225, %v9117_v43  ;;  %v7153_v8 = vmul.f32 0.12903225, %v7044_v49  ;;  %vm14025_vm2 = vmmov %vm13995_vm0 }
 0xa88   : > { %v7066_v63 = vadd.f32 %v7062_v55, %v7008_v36  ;;  %v7060_v26 = vmul.f32 0.41935483, %v7047_v17  ;;  %v7076_v14 = vmul.f32 0.9032258, %v7047_v17  ;;  %7067 = vst.msk [vmem:[%s12924_s12 + $0xa0] sm:$0xff] %vm13995_vm0, %v7063_v32  ;;  %v7082_v56 = vadd.f32 %v7078_v41, %v7074_v39 }
 0xa89   : > { %7083 = vst.msk [vmem:[%s12924_s12 + $0xc0] sm:$0xff] %vm14011_vm3, %v7079_v13  ;;  %v9123_v1 = vpop.f32.mrb[56].mxu0  ;;  %v7090_v34 = vmul.f32 0.61290324, %v9118_v60  ;;  %v7088_v12 = vmul.f32 0.61290324, %v7047_v17  ;;  %vm14026_vm3 = vmmov %vm13995_vm0 }
 0xa8a   : > { %7070 = vst.msk [vmem:[%s12924_s12 + $0xb8] sm:$0xff] %vm14012_vm12, %v7066_v63  ;;  %v7064_v19 = vadd.f32 %v7060_v26, %v7006_v42  ;;  %v7080_v9 = vadd.f32 %v7076_v14, %v7072_v16  ;;  %v7143_v62 = vmul.f32 0.38709676, %v9123_v1  ;;  %v7159_v22 = vmul.f32 0.87096775, %v9123_v1  ;;  %vm14027_vm12 = vmmov %vm13995_vm0 }
 0xa8b   : > { %7086 = vst.msk [vmem:[%s12924_s12 + $0xd8] sm:$0xff] %vm14013_vm11, %v7082_v56  ;;  %v7126_v31 = vpop.f32.mrb[57].mxu0  ;;  %v7156_v51 = vmul.f32 0.12903225, %v9118_v60  ;;  %v7154_v7 = vmul.f32 0.12903225, %v7047_v17  ;;  %vm14028_vm11 = vmmov %vm13995_vm0 }
 0xa8c   : > { %7068 = vst.msk [vmem:[%s12924_s12 + $0xa8] sm:$0xff] %vm14014_vm9, %v7064_v19  ;;  %v7147_v61 = vadd.f32 %v7143_v62, %v7089_v15  ;;  %v7163_v47 = vadd.f32 %v7159_v22, %v7155_v2  ;;  %v7141_v35 = vmul.f32 0.38709676, %v7126_v31  ;;  %v7157_v10 = vmul.f32 0.87096775, %v7126_v31  ;;  %vm14029_vm9 = vmmov %vm13995_vm0 }
 0xa8d   : > { %7084 = vst.msk [vmem:[%s12924_s12 + $0xc8] sm:$0xff] %vm14015_vm10, %v7080_v9  ;;  %v9124_v57 = vpop.f32.mrb[58].mxu0  ;;  %v7171_v46 = vmul.f32 0.6451613, %v9123_v1  ;;  %v7169_v43 = vmul.f32 0.6451613, %v7126_v31  ;;  %vm14030_vm10 = vmmov %vm13995_vm0 }
 0xa8e   : > { %v7144_v24 = vmul.f32 0.38709676, %v9124_v57  ;;  %7151 = vst.msk [vmem:[%s12924_s12 + $0xf0] sm:$0xff] %vm14016_vm6, %v7147_v61  ;;  %v7145_v44 = vadd.f32 %v7141_v35, %v7087_v5  ;;  %v7161_v37 = vadd.f32 %v7157_v10, %v7153_v8  ;;  %v7160_v52 = vmul.f32 0.87096775, %v9124_v57  ;;  %vm14031_vm6 = vmmov %vm13995_vm0 }
 0xa8f   : > { %7167 = vst.msk [vmem:[%s12924_s12 + $0x110] sm:$0xff] %vm14017_vm14, %v7163_v47  ;;  %v7129_v48 = vpop.f32.mrb[59].mxu0  ;;  %v7237_v30 = vmul.f32 0.16129032, %v9123_v1  ;;  %v7235_v21 = vmul.f32 0.16129032, %v7126_v31  ;;  %vm14032_vm14 = vmmov %vm13995_vm0 }
 0xa90   : > { %v7148_v23 = vadd.f32 %v7144_v24, %v7090_v34  ;;  %v7142_v59 = vmul.f32 0.38709676, %v7129_v48  ;;  %v7158_v29 = vmul.f32 0.87096775, %v7129_v48  ;;  %7149 = vst.msk [vmem:[%s12924_s12 + $0xe0] sm:$0xff] %vm14018_vm15, %v7145_v44  ;;  %v7164_v27 = vadd.f32 %v7160_v52, %v7156_v51  ;;  %vm14033_vm15 = vmmov %vm13995_vm0 }
 0xa91   : > { %7165 = vst.msk [vmem:[%s12924_s12 + $0x100] sm:$0xff] %vm14019_vm13, %v7161_v37  ;;  %v9129_v20 = vpop.f32.mrb[60].mxu0  ;;  %v7172_v18 = vmul.f32 0.6451613, %v9124_v57  ;;  %v7170_v60 = vmul.f32 0.6451613, %v7129_v48  ;;  %vm14034_vm13 = vmmov %vm13995_vm0 }
 0xa92   : > { %7152 = vst.msk [vmem:[%s12924_s12 + $0xf8] sm:$0xff] %vm14020_vm5, %v7148_v23  ;;  %v7146_v25 = vadd.f32 %v7142_v59, %v7088_v12  ;;  %v7162_v0 = vadd.f32 %v7158_v29, %v7154_v7  ;;  %v7225_v45 = vmul.f32 0.3548387, %v9129_v20  ;;  %v7241_v6 = vmul.f32 0.83870965, %v9129_v20  ;;  %vm14035_vm5 = vmmov %vm13995_vm0 }
 0xa93   : > { %7168 = vst.msk [vmem:[%s12924_s12 + $0x118] sm:$0xff] %vm14021_vm7, %v7164_v27  ;;  %v7208_v38 = vpop.f32.mrb[61].mxu0  ;;  %v7238_v4 = vmul.f32 0.16129032, %v9124_v57  ;;  %v7236_v32 = vmul.f32 0.16129032, %v7129_v48  ;;  %vm14036_vm7 = vmmov %vm13995_vm0 }
 0xa94   : > { %7150 = vst.msk [vmem:[%s12924_s12 + $0xe8] sm:$0xff] %vm14022_vm4, %v7146_v25  ;;  %v7229_v40 = vadd.f32 %v7225_v45, %v7171_v46  ;;  %v7245_v3 = vadd.f32 %v7241_v6, %v7237_v30  ;;  %v7223_v58 = vmul.f32 0.3548387, %v7208_v38  ;;  %v7239_v49 = vmul.f32 0.83870965, %v7208_v38  ;;  %vm14037_vm4 = vmmov %vm13995_vm0 }
 0xa95   : > { %7166 = vst.msk [vmem:[%s12924_s12 + $0x108] sm:$0xff] %vm14023_vm8, %v7162_v0  ;;  %v9130_v50 = vpop.f32.mrb[62].mxu0  ;;  %v7253_v63 = vmul.f32 0.67741936, %v9129_v20  ;;  %v7251_v1 = vmul.f32 0.67741936, %v7208_v38  ;;  %vm14038_vm8 = vmmov %vm13995_vm0 }
 0xa96   : > { %v7226_v33 = vmul.f32 0.3548387, %v9130_v50  ;;  %7233 = vst.msk [vmem:[%s12924_s12 + $0x130] sm:$0xff] %vm14024_vm1, %v7229_v40  ;;  %v7227_v36 = vadd.f32 %v7223_v58, %v7169_v43  ;;  %v7243_v39 = vadd.f32 %v7239_v49, %v7235_v21  ;;  %v7242_v55 = vmul.f32 0.83870965, %v9130_v50  ;;  %vm14039_vm1 = vmmov %vm13995_vm0 }
 0xa97   : > { %7249 = vst.msk [vmem:[%s12924_s12 + $0x150] sm:$0xff] %vm14025_vm2, %v7245_v3  ;;  %v7211_v42 = vpop.f32.mrb[63].mxu0  ;;  %v7319_v15 = vmul.f32 0.19354838, %v9129_v20  ;;  %v7317_v2 = vmul.f32 0.19354838, %v7208_v38  ;;  %vm14040_vm2 = vmmov %vm13995_vm0 }
 0xa98   : > { %v7230_v13 = vadd.f32 %v7226_v33, %v7172_v18  ;;  %v7224_v41 = vmul.f32 0.3548387, %v7211_v42  ;;  %v7240_v17 = vmul.f32 0.83870965, %v7211_v42  ;;  %7231 = vst.msk [vmem:[%s12924_s12 + $0x120] sm:$0xff] %vm13995_vm0, %v7227_v36  ;;  %v7246_v16 = vadd.f32 %v7242_v55, %v7238_v4 }
 0xa99   : > { %7247 = vst.msk [vmem:[%s12924_s12 + $0x140] sm:$0xff] %vm14026_vm3, %v7243_v39  ;;  %v9135_v56 = vpop.f32.mrb[64].mxu0  ;;  %v7254_v47 = vmul.f32 0.67741936, %v9130_v50  ;;  %v7252_v57 = vmul.f32 0.67741936, %v7211_v42  ;;  %vm14041_vm3 = vmmov %vm13995_vm0 }
 0xa9a   : > { %7234 = vst.msk [vmem:[%s12924_s12 + $0x138] sm:$0xff] %vm14027_vm12, %v7230_v13  ;;  %v7228_v26 = vadd.f32 %v7224_v41, %v7170_v60  ;;  %v7244_v14 = vadd.f32 %v7240_v17, %v7236_v32  ;;  %v7307_v19 = vmul.f32 0.32258064, %v9135_v56  ;;  %v7323_v9 = vmul.f32 0.8064516, %v9135_v56  ;;  %vm14042_vm12 = vmmov %vm13995_vm0 }
 0xa9b   : > { %7250 = vst.msk [vmem:[%s12924_s12 + $0x158] sm:$0xff] %vm14028_vm11, %v7246_v16  ;;  %v7290_v62 = vpop.f32.mrb[65].mxu0  ;;  %v7320_v35 = vmul.f32 0.19354838, %v9130_v50  ;;  %v7318_v44 = vmul.f32 0.19354838, %v7211_v42  ;;  %vm14043_vm11 = vmmov %vm13995_vm0 }
 0xa9c   : > { %7232 = vst.msk [vmem:[%s12924_s12 + $0x128] sm:$0xff] %vm14029_vm9, %v7228_v26  ;;  %v7311_v22 = vadd.f32 %v7307_v19, %v7253_v63  ;;  %v7327_v5 = vadd.f32 %v7323_v9, %v7319_v15  ;;  %v7305_v8 = vmul.f32 0.32258064, %v7290_v62  ;;  %v7321_v31 = vmul.f32 0.8064516, %v7290_v62  ;;  %vm14044_vm9 = vmmov %vm13995_vm0 }
 0xa9d   : > { %7248 = vst.msk [vmem:[%s12924_s12 + $0x148] sm:$0xff] %vm14030_vm10, %v7244_v14  ;;  %v9136_v61 = vpop.f32.mrb[66].mxu0  ;;  %v7335_v23 = vmul.f32 0.7096774, %v9135_v56  ;;  %v7333_v20 = vmul.f32 0.7096774, %v7290_v62  ;;  %vm14045_vm10 = vmmov %vm13995_vm0 }
 0xa9e   : > { %v7308_v10 = vmul.f32 0.32258064, %v9136_v61  ;;  %7315 = vst.msk [vmem:[%s12924_s12 + $0x170] sm:$0xff] %vm14031_vm6, %v7311_v22  ;;  %v7309_v34 = vadd.f32 %v7305_v8, %v7251_v1  ;;  %v7325_v51 = vadd.f32 %v7321_v31, %v7317_v2  ;;  %v7324_v24 = vmul.f32 0.8064516, %v9136_v61  ;;  %vm14046_vm6 = vmmov %vm13995_vm0 }
 0xa9f   : > { %7331 = vst.msk [vmem:[%s12924_s12 + $0x190] sm:$0xff] %vm14032_vm14, %v7327_v5  ;;  %v7293_v12 = vpop.f32.mrb[67].mxu0  ;;  %v7401_v46 = vmul.f32 0.22580644, %v9135_v56  ;;  %v7399_v30 = vmul.f32 0.22580644, %v7290_v62  ;;  %vm14047_vm14 = vmmov %vm13995_vm0 }
 0xaa0   : > { %v7312_v37 = vadd.f32 %v7308_v10, %v7254_v47  ;;  %v7306_v52 = vmul.f32 0.32258064, %v7293_v12  ;;  %v7322_v48 = vmul.f32 0.8064516, %v7293_v12  ;;  %7313 = vst.msk [vmem:[%s12924_s12 + $0x160] sm:$0xff] %vm14033_vm15, %v7309_v34  ;;  %v7328_v7 = vadd.f32 %v7324_v24, %v7320_v35  ;;  %vm14048_vm15 = vmmov %vm13995_vm0 }
 0xaa1   : > { %7329 = vst.msk [vmem:[%s12924_s12 + $0x180] sm:$0xff] %vm14034_vm13, %v7325_v51  ;;  %v9141_v27 = vpop.f32.mrb[68].mxu0  ;;  %v7336_v3 = vmul.f32 0.7096774, %v9136_v61  ;;  %v7334_v50 = vmul.f32 0.7096774, %v7293_v12  ;;  %vm14049_vm13 = vmmov %vm13995_vm0 }
 0xaa2   : > { %7316 = vst.msk [vmem:[%s12924_s12 + $0x178] sm:$0xff] %vm14035_vm5, %v7312_v37  ;;  %v7310_v59 = vadd.f32 %v7306_v52, %v7252_v57  ;;  %v7326_v29 = vadd.f32 %v7322_v48, %v7318_v44  ;;  %v7389_v25 = vmul.f32 0.29032257, %v9141_v27  ;;  %v7405_v0 = vmul.f32 0.7741935, %v9141_v27  ;;  %vm14050_vm5 = vmmov %vm13995_vm0 }
 0xaa3   : > { %7332 = vst.msk [vmem:[%s12924_s12 + $0x198] sm:$0xff] %vm14036_vm7, %v7328_v7  ;;  %v7372_v45 = vpop.f32.mrb[69].mxu0  ;;  %v7402_v58 = vmul.f32 0.22580644, %v9136_v61  ;;  %v7400_v36 = vmul.f32 0.22580644, %v7293_v12  ;;  %vm14051_vm7 = vmmov %vm13995_vm0 }
 0xaa4   : > { %7314 = vst.msk [vmem:[%s12924_s12 + $0x168] sm:$0xff] %vm14037_vm4, %v7310_v59  ;;  %v7393_v6 = vadd.f32 %v7389_v25, %v7335_v23  ;;  %v7409_v43 = vadd.f32 %v7405_v0, %v7401_v46  ;;  %v7387_v21 = vmul.f32 0.29032257, %v7372_v45  ;;  %v7403_v38 = vmul.f32 0.7741935, %v7372_v45  ;;  %vm14052_vm4 = vmmov %vm13995_vm0 }
 0xaa5   : > { %7330 = vst.msk [vmem:[%s12924_s12 + $0x188] sm:$0xff] %vm14038_vm8, %v7326_v29  ;;  %v9142_v40 = vpop.f32.mrb[70].mxu0  ;;  %v7417_v13 = vmul.f32 0.7419355, %v9141_v27  ;;  %v7415_v56 = vmul.f32 0.7419355, %v7372_v45  ;;  %vm14053_vm8 = vmmov %vm13995_vm0 }
 0xaa6   : > { %v7390_v49 = vmul.f32 0.29032257, %v9142_v40  ;;  %7397 = vst.msk [vmem:[%s12924_s12 + $0x1b0] sm:$0xff] %vm14039_vm1, %v7393_v6  ;;  %v7391_v18 = vadd.f32 %v7387_v21, %v7333_v20  ;;  %v7407_v4 = vadd.f32 %v7403_v38, %v7399_v30  ;;  %v7406_v33 = vmul.f32 0.7741935, %v9142_v40  ;;  %vm14054_vm1 = vmmov %vm13995_vm0 }
 0xaa7   : > { %7413 = vst.msk [vmem:[%s12924_s12 + $0x1d0] sm:$0xff] %vm14040_vm2, %v7409_v43  ;;  %v7375_v60 = vpop.f32.mrb[71].mxu0  ;;  %v7483_v63 = vmul.f32 0.2580645, %v9141_v27  ;;  %v7481_v15 = vmul.f32 0.2580645, %v7372_v45  ;;  %vm14055_vm2 = vmmov %vm13995_vm0 }
 0xaa8   : > { %v7394_v39 = vadd.f32 %v7390_v49, %v7336_v3  ;;  %v7388_v55 = vmul.f32 0.29032257, %v7375_v60  ;;  %v7404_v42 = vmul.f32 0.7741935, %v7375_v60  ;;  %7395 = vst.msk [vmem:[%s12924_s12 + $0x1a0] sm:$0xff] %vm13995_vm0, %v7391_v18  ;;  %v7410_v32 = vadd.f32 %v7406_v33, %v7402_v58 }
 0xaa9   : > { %7411 = vst.msk [vmem:[%s12924_s12 + $0x1c0] sm:$0xff] %vm14041_vm3, %v7407_v4  ;;  %v9147_v16 = vpop.f32.mrb[72].mxu0  ;;  %v7418_v5 = vmul.f32 0.7419355, %v9142_v40  ;;  %v7416_v61 = vmul.f32 0.7419355, %v7375_v60  ;;  %vm14056_vm3 = vmmov %vm13995_vm0 }
 0xaaa   : > { %7398 = vst.msk [vmem:[%s12924_s12 + $0x1b8] sm:$0xff] %vm14042_vm12, %v7394_v39  ;;  %v7392_v41 = vadd.f32 %v7388_v55, %v7334_v50  ;;  %v7408_v17 = vadd.f32 %v7404_v42, %v7400_v36  ;;  %v7471_v26 = vmul.f32 0.2580645, %v9147_v16  ;;  %v7487_v14 = vmul.f32 0.7419355, %v9147_v16  ;;  %vm14057_vm12 = vmmov %vm13995_vm0 }
 0xaab   : > { %7414 = vst.msk [vmem:[%s12924_s12 + $0x1d8] sm:$0xff] %vm14043_vm11, %v7410_v32  ;;  %v7454_v19 = vpop.f32.mrb[73].mxu0  ;;  %v7484_v8 = vmul.f32 0.2580645, %v9142_v40  ;;  %v7482_v34 = vmul.f32 0.2580645, %v7375_v60  ;;  %vm14058_vm11 = vmmov %vm13995_vm0 }
 0xaac   : > { %7396 = vst.msk [vmem:[%s12924_s12 + $0x1a8] sm:$0xff] %vm14044_vm9, %v7392_v41  ;;  %v7475_v9 = vadd.f32 %v7471_v26, %v7417_v13  ;;  %v7491_v1 = vadd.f32 %v7487_v14, %v7483_v63  ;;  %v7469_v2 = vmul.f32 0.2580645, %v7454_v19  ;;  %v7485_v62 = vmul.f32 0.7419355, %v7454_v19  ;;  %vm14059_vm9 = vmmov %vm13995_vm0 }
 0xaad   : > { %7412 = vst.msk [vmem:[%s12924_s12 + $0x1c8] sm:$0xff] %vm14045_vm10, %v7408_v17  ;;  %v9148_v22 = vpop.f32.mrb[74].mxu0  ;;  %v13063_v37 = vmul.f32 0.06451613, %v12930_v28  ;;  %v13069_v48 = vmul.f32 0.06451613, %v12934_v11  ;;  %vm14060_vm10 = vmmov %vm13995_vm0 }
 0xaae   : > { %v7472_v31 = vmul.f32 0.2580645, %v9148_v22  ;;  %7479 = vst.msk [vmem:[%s12924_s12 + $0x1f0] sm:$0xff] %vm14046_vm6, %v7475_v9  ;;  %v7473_v47 = vadd.f32 %v7469_v2, %v7415_v56  ;;  %v7489_v35 = vadd.f32 %v7485_v62, %v7481_v15  ;;  %v7488_v10 = vmul.f32 0.7419355, %v9148_v22  ;;  %vm14061_vm6 = vmmov %vm13995_vm0 }
 0xaaf   : > { %7495 = vst.msk [vmem:[%s12924_s12 + $0x210] sm:$0xff] %vm14047_vm14, %v7491_v1  ;;  %v7457_v57 = vpop.f32.mrb[75].mxu0  ;;  %v13066_v52 = vmul.f32 0.5483871, %v12930_v28  ;;  %v13074_v27 = vmul.f32 0.5483871, %v12934_v11  ;;  %vm14062_vm14 = vmmov %vm13995_vm0 }
 0xab0   : > { %v7476_v51 = vadd.f32 %v7472_v31, %v7418_v5  ;;  %v7470_v24 = vmul.f32 0.2580645, %v7457_v57  ;;  %v7486_v12 = vmul.f32 0.7419355, %v7457_v57  ;;  %7477 = vst.msk [vmem:[%s12924_s12 + $0x1e0] sm:$0xff] %vm14048_vm15, %v7473_v47  ;;  %v7492_v44 = vadd.f32 %v7488_v10, %v7484_v8  ;;  %vm14063_vm15 = vmmov %vm13995_vm0 }
 0xab1   : > { %7493 = vst.msk [vmem:[%s12924_s12 + $0x200] sm:$0xff] %vm14049_vm13, %v7489_v35  ;;  %v7499_v7 = vmul.f32 0.7741935, %v9147_v16  ;;  %v9153_v29 = vpop.f32.mrb[76].mxu0  ;;  %v7497_v20 = vmul.f32 0.7741935, %v7454_v19  ;;  %vm14064_vm13 = vmmov %vm13995_vm0 }
 0xab2   : > { %7480 = vst.msk [vmem:[%s12924_s12 + $0x1f8] sm:$0xff] %vm14050_vm5, %v7476_v51  ;;  %v7474_v23 = vadd.f32 %v7470_v24, %v7416_v61  ;;  %v7490_v59 = vadd.f32 %v7486_v12, %v7482_v34  ;;  %v7565_v46 = vmul.f32 0.29032257, %v9147_v16  ;;  %v7553_v25 = vmul.f32 0.22580644, %v9153_v29  ;;  %vm14065_vm5 = vmmov %vm13995_vm0 }
 0xab3   : > { %7496 = vst.msk [vmem:[%s12924_s12 + $0x218] sm:$0xff] %vm14051_vm7, %v7492_v44  ;;  %v7569_v0 = vmul.f32 0.7096774, %v9153_v29  ;;  %v7563_v30 = vmul.f32 0.29032257, %v7454_v19  ;;  %vm14066_vm7 = vmmov %vm13995_vm0 }
 0xab4   : > { %7478 = vst.msk [vmem:[%s12924_s12 + $0x1e8] sm:$0xff] %vm14052_vm4, %v7474_v23  ;;  %v7536_v45 = vpop.f32.mrb[77].mxu0  ;;  %v7557_v6 = vadd.f32 %v7553_v25, %v7499_v7  ;;  %v7500_v3 = vmul.f32 0.7741935, %v9148_v22  ;;  %v7498_v50 = vmul.f32 0.7741935, %v7457_v57  ;;  %vm14067_vm4 = vmmov %vm13995_vm0 }
 0xab5   : > { %7494 = vst.msk [vmem:[%s12924_s12 + $0x208] sm:$0xff] %vm14053_vm8, %v7490_v59  ;;  %v7573_v43 = vadd.f32 %v7569_v0, %v7565_v46  ;;  %v7551_v21 = vmul.f32 0.22580644, %v7536_v45  ;;  %v7567_v38 = vmul.f32 0.7096774, %v7536_v45  ;;  %vm14068_vm8 = vmmov %vm13995_vm0 }
 0xab6   : > { %v9154_v40 = vpop.f32.mrb[78].mxu0  ;;  %v7566_v58 = vmul.f32 0.29032257, %v9148_v22  ;;  %7561 = vst.msk [vmem:[%s12924_s12 + $0x230] sm:$0xff] %vm14054_vm1, %v7557_v6  ;;  %v7564_v36 = vmul.f32 0.29032257, %v7457_v57  ;;  %vm14069_vm1 = vmmov %vm13995_vm0 }
 0xab7   : > { %v7554_v49 = vmul.f32 0.22580644, %v9154_v40  ;;  %7577 = vst.msk [vmem:[%s12924_s12 + $0x250] sm:$0xff] %vm14055_vm2, %v7573_v43  ;;  %v7555_v18 = vadd.f32 %v7551_v21, %v7497_v20  ;;  %v7571_v4 = vadd.f32 %v7567_v38, %v7563_v30  ;;  %v7570_v33 = vmul.f32 0.7096774, %v9154_v40  ;;  %vm14070_vm2 = vmmov %vm13995_vm0 }
 0xab8   : > { %v7539_v60 = vpop.f32.mrb[79].mxu0  ;;  %v13091_v13 = vmul.f32 0.06451613, %v12938_v54  ;;  %v13094_v41 = vmul.f32 0.9677419, %v12930_v28  ;;  %v13111_v22 = vmul.f32 0.0, %v12930_v28 }
 0xab9   : > { %v7558_v39 = vadd.f32 %v7554_v49, %v7500_v3  ;;  %v7552_v55 = vmul.f32 0.22580644, %v7539_v60  ;;  %v7568_v42 = vmul.f32 0.7096774, %v7539_v60  ;;  %7559 = vst.msk [vmem:[%s12924_s12 + $0x220] sm:$0xff] %vm13995_vm0, %v7555_v18  ;;  %v7574_v32 = vadd.f32 %v7570_v33, %v7566_v58 }
 0xaba   : > { %7575 = vst.msk [vmem:[%s12924_s12 + $0x240] sm:$0xff] %vm14056_vm3, %v7571_v4  ;;  %v13097_v17 = vmul.f32 0.48387095, %v12930_v28  ;;  %v7581_v16 = vmul.f32 0.8064516, %v9153_v29  ;;  %vm14071_vm3 = vmmov %vm13995_vm0 }
 0xabb   : > { %7562 = vst.msk [vmem:[%s12924_s12 + $0x238] sm:$0xff] %vm14057_vm12, %v7558_v39  ;;  %v7556_v63 = vadd.f32 %v7552_v55, %v7498_v50  ;;  %v7572_v26 = vadd.f32 %v7568_v42, %v7564_v36  ;;  %v9159_v14 = vpop.f32.mrb[80].mxu0  ;;  %v13102_v56 = vmul.f32 0.5483871, %v12938_v54  ;;  %v13125_v25 = vmul.f32 0.5483871, %v12940_v53  ;;  %vm14072_vm12 = vmmov %vm13995_vm0 }
 0xabc   : > { %v7647_v15 = vmul.f32 0.32258064, %v9153_v29  ;;  %7578 = vst.msk [vmem:[%s12924_s12 + $0x258] sm:$0xff] %vm14058_vm11, %v7574_v32  ;;  %v7635_v19 = vmul.f32 0.19354838, %v9159_v14  ;;  %v13142_v50 = vmul.f32 0.0, %v12934_v11  ;;  %vm14073_vm11 = vmmov %vm13995_vm0 }
 0xabd   : > { %v7651_v9 = vmul.f32 0.67741936, %v9159_v14  ;;  %v7579_v1 = vmul.f32 0.8064516, %v7536_v45  ;;  %v7645_v2 = vmul.f32 0.32258064, %v7536_v45 }
 0xabe   : > { %7560 = vst.msk [vmem:[%s12924_s12 + $0x228] sm:$0xff] %vm14059_vm9, %v7556_v63  ;;  %v7618_v62 = vpop.f32.mrb[81].mxu0  ;;  %v7639_v5 = vadd.f32 %v7635_v19, %v7581_v16  ;;  %v7582_v35 = vmul.f32 0.8064516, %v9154_v40  ;;  %v7580_v34 = vmul.f32 0.8064516, %v7539_v60  ;;  %vm14074_vm9 = vmmov %vm13995_vm0 }
 0xabf   : > { %7576 = vst.msk [vmem:[%s12924_s12 + $0x248] sm:$0xff] %vm14060_vm10, %v7572_v26  ;;  %v7655_v8 = vadd.f32 %v7651_v9, %v7647_v15  ;;  %v7633_v31 = vmul.f32 0.19354838, %v7618_v62  ;;  %v7649_v61 = vmul.f32 0.67741936, %v7618_v62  ;;  %vm14075_vm10 = vmmov %vm13995_vm0 }
 0xac0   : > { %v9160_v47 = vpop.f32.mrb[82].mxu0  ;;  %v7648_v10 = vmul.f32 0.32258064, %v9154_v40  ;;  %7643 = vst.msk [vmem:[%s12924_s12 + $0x270] sm:$0xff] %vm14061_vm6, %v7639_v5  ;;  %v7646_v44 = vmul.f32 0.32258064, %v7539_v60  ;;  %vm14076_vm6 = vmmov %vm13995_vm0 }
 0xac1   : > { %v7636_v57 = vmul.f32 0.19354838, %v9160_v47  ;;  %7659 = vst.msk [vmem:[%s12924_s12 + $0x290] sm:$0xff] %vm14062_vm14, %v7655_v8  ;;  %v7637_v51 = vadd.f32 %v7633_v31, %v7579_v1  ;;  %v7653_v24 = vadd.f32 %v7649_v61, %v7645_v2  ;;  %v7652_v28 = vmul.f32 0.67741936, %v9160_v47  ;;  %vm14077_vm14 = vmmov %vm13995_vm0 }
 0xac2   : > { %v7621_v12 = vpop.f32.mrb[83].mxu0  ;;  %v13122_v46 = vmul.f32 0.06451613, %v12940_v53  ;;  %v13128_v0 = vmul.f32 0.9677419, %v12934_v11 }
 0xac3   : > { %v7640_v7 = vadd.f32 %v7636_v57, %v7582_v35  ;;  %v7634_v23 = vmul.f32 0.19354838, %v7621_v12  ;;  %v7650_v59 = vmul.f32 0.67741936, %v7621_v12  ;;  %7641 = vst.msk [vmem:[%s12924_s12 + $0x260] sm:$0xff] %vm14063_vm15, %v7637_v51  ;;  %v7656_v29 = vadd.f32 %v7652_v28, %v7648_v10  ;;  %vm14078_vm15 = vmmov %vm13995_vm0 }
 0xac4   : > { %7657 = vst.msk [vmem:[%s12924_s12 + $0x280] sm:$0xff] %vm14064_vm13, %v7653_v24  ;;  %v7663_v20 = vmul.f32 0.83870965, %v9159_v14  ;;  %v9165_v6 = vpop.f32.mrb[84].mxu0  ;;  %v7661_v3 = vmul.f32 0.83870965, %v7618_v62  ;;  %vm14079_vm13 = vmmov %vm13995_vm0 }
 0xac5   : > { %7644 = vst.msk [vmem:[%s12924_s12 + $0x278] sm:$0xff] %vm14065_vm5, %v7640_v7  ;;  %v7638_v30 = vadd.f32 %v7634_v23, %v7580_v34  ;;  %v7654_v45 = vadd.f32 %v7650_v59, %v7646_v44  ;;  %v13133_v43 = vmul.f32 0.48387095, %v12934_v11  ;;  %v7729_v21 = vmul.f32 0.3548387, %v9159_v14  ;;  %vm14080_vm5 = vmmov %vm13995_vm0 }
 0xac6   : > { %7660 = vst.msk [vmem:[%s12924_s12 + $0x298] sm:$0xff] %vm14066_vm7, %v7656_v29  ;;  %v7717_v38 = vmul.f32 0.16129032, %v9165_v6  ;;  %v7733_v40 = vmul.f32 0.6451613, %v9165_v6  ;;  %vm14081_vm7 = vmmov %vm13995_vm0 }
 0xac7   : > { %v7727_v58 = vmul.f32 0.3548387, %v7618_v62  ;;  %7642 = vst.msk [vmem:[%s12924_s12 + $0x268] sm:$0xff] %vm14067_vm4, %v7638_v30  ;;  %v7700_v49 = vpop.f32.mrb[85].mxu0  ;;  %v7730_v55 = vmul.f32 0.3548387, %v9160_v47  ;;  %vm14082_vm4 = vmmov %vm13995_vm0 }
 0xac8   : > { %7658 = vst.msk [vmem:[%s12924_s12 + $0x288] sm:$0xff] %vm14068_vm8, %v7654_v45  ;;  %v7721_v18 = vadd.f32 %v7717_v38, %v7663_v20  ;;  %v7737_v4 = vadd.f32 %v7733_v40, %v7729_v21  ;;  %v7715_v33 = vmul.f32 0.16129032, %v7700_v49  ;;  %v7731_v60 = vmul.f32 0.6451613, %v7700_v49  ;;  %vm14083_vm8 = vmmov %vm13995_vm0 }
 0xac9   : > { %v9166_v36 = vpop.f32.mrb[86].mxu0  ;;  %v7664_v39 = vmul.f32 0.83870965, %v9160_v47  ;;  %v7662_v32 = vmul.f32 0.83870965, %v7621_v12 }
 0xaca   : > { %v7718_v42 = vmul.f32 0.16129032, %v9166_v36  ;;  %7725 = vst.msk [vmem:[%s12924_s12 + $0x2b0] sm:$0xff] %vm14069_vm1, %v7721_v18  ;;  %v7719_v16 = vadd.f32 %v7715_v33, %v7661_v3  ;;  %v7735_v63 = vadd.f32 %v7731_v60, %v7727_v58  ;;  %v7734_v11 = vmul.f32 0.6451613, %v9166_v36  ;;  %vm14084_vm1 = vmmov %vm13995_vm0 }
 0xacb   : > { %7741 = vst.msk [vmem:[%s12924_s12 + $0x2d0] sm:$0xff] %vm14070_vm2, %v7737_v4  ;;  %v7703_v26 = vpop.f32.mrb[87].mxu0  ;;  %v7728_v14 = vmul.f32 0.3548387, %v7621_v12  ;;  %v13167_v12 = vmul.f32 0.0, %v12938_v54  ;;  %vm14085_vm2 = vmmov %vm13995_vm0 }
 0xacc   : > { %v7722_v15 = vadd.f32 %v7718_v42, %v7664_v39  ;;  %v7716_v19 = vmul.f32 0.16129032, %v7703_v26  ;;  %v7732_v9 = vmul.f32 0.6451613, %v7703_v26  ;;  %v7745_v1 = vmul.f32 0.87096775, %v9165_v6 }
 0xacd   : > { %7723 = vst.msk [vmem:[%s12924_s12 + $0x2a0] sm:$0xff] %vm13995_vm0, %v7719_v16  ;;  %v7738_v2 = vadd.f32 %v7734_v11, %v7730_v55  ;;  %v13153_v62 = vmul.f32 0.9677419, %v12938_v54  ;;  %v13156_v5 = vmul.f32 0.48387095, %v12938_v54 }
 0xace   : > { %7739 = vst.msk [vmem:[%s12924_s12 + $0x2c0] sm:$0xff] %vm14071_vm3, %v7735_v63  ;;  %v7811_v8 = vmul.f32 0.38709676, %v9165_v6  ;;  %v7743_v31 = vmul.f32 0.87096775, %v7700_v49  ;;  %v7720_v61 = vadd.f32 %v7716_v19, %v7662_v32  ;;  %v7736_v47 = vadd.f32 %v7732_v9, %v7728_v14  ;;  %vm14086_vm3 = vmmov %vm13995_vm0 }
 0xacf   : > { %7726 = vst.msk [vmem:[%s12924_s12 + $0x2b8] sm:$0xff] %vm14072_vm12, %v7722_v15  ;;  %v9171_v35 = vpop.f32.mrb[88].mxu0  ;;  %v7809_v10 = vmul.f32 0.38709676, %v7700_v49  ;;  %v7812_v24 = vmul.f32 0.38709676, %v9166_v36  ;;  %vm14087_vm12 = vmmov %vm13995_vm0 }
 0xad0   : > { %7742 = vst.msk [vmem:[%s12924_s12 + $0x2d8] sm:$0xff] %vm14073_vm11, %v7738_v2  ;;  %v7799_v57 = vmul.f32 0.12903225, %v9171_v35  ;;  %v7815_v34 = vmul.f32 0.61290324, %v9171_v35  ;;  %v13186_v9 = vmul.f32 0.0, %v12940_v53  ;;  %vm14088_vm11 = vmmov %vm13995_vm0 }
 0xad1   : > { %v7746_v51 = vmul.f32 0.87096775, %v9166_v36  ;;  %7724 = vst.msk [vmem:[%s12924_s12 + $0x2a8] sm:$0xff] %vm14074_vm9, %v7720_v61  ;;  %v7782_v28 = vpop.f32.mrb[89].mxu0  ;;  %v7744_v20 = vmul.f32 0.87096775, %v7703_v26  ;;  %vm14089_vm9 = vmmov %vm13995_vm0 }
 0xad2   : > { %7740 = vst.msk [vmem:[%s12924_s12 + $0x2c8] sm:$0xff] %vm14075_vm10, %v7736_v47  ;;  %v7803_v44 = vadd.f32 %v7799_v57, %v7745_v1  ;;  %v7819_v7 = vadd.f32 %v7815_v34, %v7811_v8  ;;  %v7797_v23 = vmul.f32 0.12903225, %v7782_v28  ;;  %v7813_v59 = vmul.f32 0.61290324, %v7782_v28  ;;  %vm14090_vm10 = vmmov %vm13995_vm0 }
 0xad3   : > { %v9172_v29 = vpop.f32.mrb[90].mxu0  ;;  %v7810_v30 = vmul.f32 0.38709676, %v7703_v26  ;;  %v7827_v6 = vmul.f32 0.9032258, %v9171_v35 }
 0xad4   : > { %v7800_v45 = vmul.f32 0.12903225, %v9172_v29  ;;  %7807 = vst.msk [vmem:[%s12924_s12 + $0x2f0] sm:$0xff] %vm14076_vm6, %v7803_v44  ;;  %v7801_v21 = vadd.f32 %v7797_v23, %v7743_v31  ;;  %v7817_v38 = vadd.f32 %v7813_v59, %v7809_v10  ;;  %v7816_v54 = vmul.f32 0.61290324, %v9172_v29  ;;  %vm14091_vm6 = vmmov %vm13995_vm0 }
 0xad5   : > { %7823 = vst.msk [vmem:[%s12924_s12 + $0x310] sm:$0xff] %vm14077_vm14, %v7819_v7  ;;  %v7785_v40 = vpop.f32.mrb[91].mxu0  ;;  %v7893_v3 = vmul.f32 0.41935483, %v9171_v35  ;;  %v7891_v33 = vmul.f32 0.41935483, %v7782_v28  ;;  %vm14092_vm14 = vmmov %vm13995_vm0 }
 0xad6   : > { %v7804_v58 = vadd.f32 %v7800_v45, %v7746_v51  ;;  %v7798_v49 = vmul.f32 0.12903225, %v7785_v40  ;;  %v7814_v18 = vmul.f32 0.61290324, %v7785_v40  ;;  %7805 = vst.msk [vmem:[%s12924_s12 + $0x2e0] sm:$0xff] %vm14078_vm15, %v7801_v21  ;;  %v7820_v60 = vadd.f32 %v7816_v54, %v7812_v24  ;;  %vm14093_vm15 = vmmov %vm13995_vm0 }
 0xad7   : > { %7821 = vst.msk [vmem:[%s12924_s12 + $0x300] sm:$0xff] %vm14079_vm13, %v7817_v38  ;;  %v7825_v4 = vmul.f32 0.9032258, %v7782_v28  ;;  %v7828_v36 = vmul.f32 0.9032258, %v9172_v29  ;;  %v9177_v16 = vpop.f32.mrb[92].mxu0  ;;  %vm14094_vm13 = vmmov %vm13995_vm0 }
 0xad8   : > { %7808 = vst.msk [vmem:[%s12924_s12 + $0x2f8] sm:$0xff] %vm14080_vm5, %v7804_v58  ;;  %v7894_v39 = vmul.f32 0.41935483, %v9172_v29  ;;  %v7802_v55 = vadd.f32 %v7798_v49, %v7744_v20  ;;  %v7818_v42 = vadd.f32 %v7814_v18, %v7810_v30  ;;  %v7826_v32 = vmul.f32 0.9032258, %v7785_v40  ;;  %vm14095_vm5 = vmmov %vm13995_vm0 }
 0xad9   : > { %7824 = vst.msk [vmem:[%s12924_s12 + $0x318] sm:$0xff] %vm14081_vm7, %v7820_v60  ;;  %v7881_v63 = vmul.f32 0.09677419, %v9177_v16  ;;  %v7897_v11 = vmul.f32 0.58064514, %v9177_v16  ;;  %vm14096_vm7 = vmmov %vm13995_vm0 }
 0xada   : > { %v7909_v26 = vmul.f32 0.9354839, %v9177_v16  ;;  %7806 = vst.msk [vmem:[%s12924_s12 + $0x2e8] sm:$0xff] %vm14082_vm4, %v7802_v55  ;;  %v7892_v14 = vmul.f32 0.41935483, %v7785_v40  ;;  %vm14097_vm4 = vmmov %vm13995_vm0 }
 0xadb   : > { %7822 = vst.msk [vmem:[%s12924_s12 + $0x308] sm:$0xff] %vm14083_vm8, %v7818_v42  ;;  %v7975_v15 = vmul.f32 0.4516129, %v9177_v16  ;;  %v7864_v19 = vpop.f32.mrb[93].mxu0  ;;  %v7885_v1 = vadd.f32 %v7881_v63, %v7827_v6  ;;  %v7901_v2 = vadd.f32 %v7897_v11, %v7893_v3  ;;  %vm14098_vm8 = vmmov %vm13995_vm0 }
 0xadc   : > { %v7879_v8 = vmul.f32 0.09677419, %v7864_v19  ;;  %v7895_v31 = vmul.f32 0.58064514, %v7864_v19  ;;  %v9178_v61 = vpop.f32.mrb[94].mxu0  ;;  %v7967_v57 = vadd.f32 %v13063_v37, %v7909_v26 }
 0xadd   : > { %v7907_v47 = vmul.f32 0.9354839, %v7864_v19  ;;  %v7973_v35 = vmul.f32 0.4516129, %v7864_v19  ;;  %v7882_v10 = vmul.f32 0.09677419, %v9178_v61  ;;  %v7983_v45 = vadd.f32 %v13066_v52, %v7975_v15 }
 0xade   : > { %7889 = vst.msk [vmem:[%s12924_s12 + $0x330] sm:$0xff] %vm14084_vm1, %v7885_v1  ;;  %v7883_v34 = vadd.f32 %v7879_v8, %v7825_v4  ;;  %v7899_v51 = vadd.f32 %v7895_v31, %v7891_v33  ;;  %v7898_v24 = vmul.f32 0.58064514, %v9178_v61  ;;  %v7910_v28 = vmul.f32 0.9354839, %v9178_v61  ;;  %vm14099_vm1 = vmmov %vm13995_vm0 }
 0xadf   : > { %7905 = vst.msk [vmem:[%s12924_s12 + $0x350] sm:$0xff] %vm14085_vm2, %v7901_v2  ;;  %v7867_v44 = vpop.f32.mrb[95].mxu0  ;;  %v7886_v7 = vadd.f32 %v7882_v10, %v7828_v36  ;;  %v7976_v23 = vmul.f32 0.4516129, %v9178_v61  ;;  %v7965_v38 = vadd.f32 %v13069_v48, %v7907_v47  ;;  %v7981_v54 = vadd.f32 %v13074_v27, %v7973_v35  ;;  %vm14100_vm2 = vmmov %vm13995_vm0 }
 0xae0   : > { %v7880_v59 = vmul.f32 0.09677419, %v7867_v44  ;;  %v7896_v29 = vmul.f32 0.58064514, %v7867_v44  ;;  %7971 = vst.msk [vmem:[%s12924_s12 + $0x370] sm:$0xff] %vm13995_vm0, %v7967_v57  ;;  %v7902_v37 = vadd.f32 %v7898_v24, %v7894_v39  ;;  %v7968_v52 = vadd.f32 %v13091_v13, %v7910_v28 }
 0xae1   : > { %7887 = vst.msk [vmem:[%s12924_s12 + $0x320] sm:$0xff] %vm14086_vm3, %v7883_v34  ;;  %v7908_v20 = vmul.f32 0.9354839, %v7867_v44  ;;  %v7974_v30 = vmul.f32 0.4516129, %v7867_v44  ;;  %v7984_v3 = vadd.f32 %v13102_v56, %v7976_v23  ;;  %vm14101_vm3 = vmmov %vm13995_vm0 }
 0xae2   : > { %7903 = vst.msk [vmem:[%s12924_s12 + $0x340] sm:$0xff] %vm14087_vm12, %v7899_v51  ;;  %v7884_v6 = vadd.f32 %v7880_v59, %v7826_v32  ;;  %v7900_v21 = vadd.f32 %v7896_v29, %v7892_v14  ;;  %v9189_v40 = vpop.f32.mrb[96].mxu0  ;;  %v7990_v33 = vmul.f32 0.9677419, %v12940_v53  ;;  %vm14102_vm12 = vmmov %vm13995_vm0 }
 0xae3   : > { %7890 = vst.msk [vmem:[%s12924_s12 + $0x338] sm:$0xff] %vm14088_vm11, %v7886_v7  ;;  %v7966_v58 = vadd.f32 %v13122_v46, %v7908_v20  ;;  %v7982_v49 = vadd.f32 %v13125_v25, %v7974_v30  ;;  %v8028_v48 = vpop.f32.mrb[97].mxu0  ;;  %v8045_v27 = vmul.f32 0.032258064, %v9189_v40  ;;  %v8077_v13 = vadd.f32 %v9189_v40, %v13111_v22  ;;  %vm14103_vm11 = vmmov %vm13995_vm0 }
 0xae4   : > { %7906 = vst.msk [vmem:[%s12924_s12 + $0x358] sm:$0xff] %vm14089_vm9, %v7902_v37  ;;  %v8061_v18 = vmul.f32 0.516129, %v9189_v40  ;;  %v8043_v4 = vmul.f32 0.032258064, %v8028_v48  ;;  %v8075_v46 = vadd.f32 %v13142_v50, %v8028_v48  ;;  %vm14104_vm9 = vmmov %vm13995_vm0 }
 0xae5   : > { %7987 = vst.msk [vmem:[%s12924_s12 + $0x390] sm:$0xff] %vm14090_vm10, %v7983_v45  ;;  %v8059_v56 = vmul.f32 0.516129, %v8028_v48  ;;  %v9190_v25 = vpop.f32.mrb[98].mxu0  ;;  %v8049_v22 = vadd.f32 %v8045_v27, %v13094_v41  ;;  %vm14105_vm10 = vmmov %vm13995_vm0 }
 0xae6   : > { %7888 = vst.msk [vmem:[%s12924_s12 + $0x328] sm:$0xff] %vm14091_vm6, %v7884_v6  ;;  %v8065_v60 = vadd.f32 %v8061_v18, %v13097_v17  ;;  %v8047_v36 = vadd.f32 %v8043_v4, %v13128_v0  ;;  %v8046_v39 = vmul.f32 0.032258064, %v9190_v25  ;;  %v8031_v55 = vpop.f32.mrb[99].mxu0  ;;  %v8078_v32 = vadd.f32 %v9190_v25, %v13167_v12  ;;  %vm14106_vm6 = vmmov %vm13995_vm0 }
 0xae7   : > { %7904 = vst.msk [vmem:[%s12924_s12 + $0x348] sm:$0xff] %vm14092_vm14, %v7900_v21  ;;  %v8063_v42 = vadd.f32 %v8059_v56, %v13133_v43  ;;  %v8062_v50 = vmul.f32 0.516129, %v9190_v25  ;;  %v8044_v41 = vmul.f32 0.032258064, %v8031_v55  ;;  %v8076_v16 = vadd.f32 %v13186_v9, %v8031_v55  ;;  %vm14107_vm14 = vmmov %vm13995_vm0 }
 0xae8   : > { %7969 = vst.msk [vmem:[%s12924_s12 + $0x360] sm:$0xff] %vm14093_vm15, %v7965_v38  ;;  %v8050_v17 = vadd.f32 %v8046_v39, %v13153_v62  ;;  %v8056_v0 = vmul.f32 0.48387095, %v12940_v53  ;;  %v8060_v43 = vmul.f32 0.516129, %v8031_v55  ;;  %vm14108_vm15 = vmmov %vm13995_vm0 }
 0xae9   : > { %7985 = vst.msk [vmem:[%s12924_s12 + $0x380] sm:$0xff] %vm14094_vm13, %v7981_v54  ;;  %v8066_v12 = vadd.f32 %v8062_v50, %v13156_v5  ;;  %v8048_v63 = vadd.f32 %v8044_v41, %v7990_v33  ;;  %vm14109_vm13 = vmmov %vm13995_vm0 }
 0xaea   : > { %7972 = vst.msk [vmem:[%s12924_s12 + $0x378] sm:$0xff] %vm14095_vm5, %v7968_v52  ;;  %v8064_v11 = vadd.f32 %v8060_v43, %v8056_v0 }
 0xaeb   : > { %7988 = vst.msk [vmem:[%s12924_s12 + $0x398] sm:$0xff] %vm14096_vm7, %v7984_v3 }
 0xaec   : > { %7970 = vst.msk [vmem:[%s12924_s12 + $0x368] sm:$0xff] %vm14097_vm4, %v7966_v58 }
 0xaed   : > { %7986 = vst.msk [vmem:[%s12924_s12 + $0x388] sm:$0xff] %vm14098_vm8, %v7982_v49 }
 0xaee   : > { %8081 = vst.msk [vmem:[%s12924_s12 + $0x3f0] sm:$0xff] %vm14099_vm1, %v8077_v13 }
 0xaef   : > { %8079 = vst.msk [vmem:[%s12924_s12 + $0x3e0] sm:$0xff] %vm14100_vm2, %v8075_v46 }
 0xaf0   : > { %8053 = vst.msk [vmem:[%s12924_s12 + $0x3b0] sm:$0xff] %vm13995_vm0, %v8049_v22 }
 0xaf1   : > { %8069 = vst.msk [vmem:[%s12924_s12 + $0x3d0] sm:$0xff] %vm14101_vm3, %v8065_v60 }
 0xaf2   : > { %8051 = vst.msk [vmem:[%s12924_s12 + $0x3a0] sm:$0xff] %vm14102_vm12, %v8047_v36 }
 0xaf3   : > { %8067 = vst.msk [vmem:[%s12924_s12 + $0x3c0] sm:$0xff] %vm14103_vm11, %v8063_v42 }
 0xaf4   : > { %8082 = vst.msk [vmem:[%s12924_s12 + $0x3f8] sm:$0xff] %vm14104_vm9, %v8078_v32 }
 0xaf5   : > { %8054 = vst.msk [vmem:[%s12924_s12 + $0x3b8] sm:$0xff] %vm14105_vm10, %v8050_v17 }
 0xaf6   : > { %8080 = vst.msk [vmem:[%s12924_s12 + $0x3e8] sm:$0xff] %vm14106_vm6, %v8076_v16 }
 0xaf7   : > { %8070 = vst.msk [vmem:[%s12924_s12 + $0x3d8] sm:$0xff] %vm14107_vm14, %v8066_v12 }
 0xaf8   : > { %8052 = vst.msk [vmem:[%s12924_s12 + $0x3a8] sm:$0xff] %vm14108_vm15, %v8048_v63 }
 0xaf9   : > { %8068 = vst.msk [vmem:[%s12924_s12 + $0x3c8] sm:$0xff] %vm14109_vm13, %v8064_v11 }
 0xafa PF: > { %s21_s17 = sadd.s32 1, %s10016_s17  }
 0xafb   : > { %p18_p4 = scmp.ge.s32.totalorder %s21_s17, 4  }
 0xafd   :  { %20 = sbr.rel (!%p18_p4) target bundleno = 1 (0x1), region = 98 }

</bundles_post_ra>
